<compile_context>
chip_gen: v6e
topology: v6e:2x2x1
jax: 0.10.0
libtpu: 0.0.40
codegen_flags: <defaults>
</compile_context>

<pallas_src>
import functools

import numpy as np
import jax
import jax.numpy as jnp
from jax import lax
from jax.experimental import pallas as pl
from jax.experimental.pallas import tpu as pltpu

_EPS_GN = 1e-5     # PyTorch GroupNorm default eps
_EPS_SIG = 1e-5    # deformable-DETR inverse_sigmoid eps


# ----------------------------------------------------------------------------
# In-kernel GroupNorm(C//2, C) + ReLU helpers.
# Groups are 2 adjacent channels; stats over (2 channels x rows); affine is
# identity (xavier init only touches >1-D params, so gamma=1 / beta=0).
# `pair` is a constant (C, C) 0/1 matrix with pair[i, j] = 1 iff i//2 == j//2.
# ----------------------------------------------------------------------------
def _gn_relu_one(h, pair, inv_n):
    """Single-sample GroupNorm + ReLU on (rows, C)."""
    s = jnp.sum(h, axis=0, keepdims=True)
    s2 = jnp.sum(h * h, axis=0, keepdims=True)
    st = jnp.concatenate([s, s2], axis=0)                       # (2, C): 1 pair-matmul
    g = jnp.dot(st, pair, preferred_element_type=jnp.float32) * inv_n
    gm = g[0:1, :]
    gm2 = g[1:2, :]
    var = jnp.maximum(gm2 - gm * gm, 0.0)                       # clamp f32 cancellation
    y = (h - gm) * lax.rsqrt(var + _EPS_GN)
    return jnp.maximum(y, 0.0)


def _gn_relu_seg(h, pair, seg, inv_n):
    """Per-segment GroupNorm + ReLU for S contiguous row segments of length L.

    h: (S*L, C), seg: (S, S*L) 0/1 selector.  Segment sums go through the MXU
    (seg @ h) and stats are broadcast back with seg^T @ stats, so the batched
    MLP never reshapes or re-slices the (S*L, C) activation.
    """
    S = seg.shape[0]
    s = jnp.dot(seg, h, preferred_element_type=jnp.float32)         # (S, C)
    s2 = jnp.dot(seg, h * h, preferred_element_type=jnp.float32)    # (S, C)
    st = jnp.concatenate([s, s2], axis=0)                           # (2S, C)
    g = jnp.dot(st, pair, preferred_element_type=jnp.float32) * inv_n
    gm = g[:S]
    gm2 = g[S:]
    var = jnp.maximum(gm2 - gm * gm, 0.0)
    rstd = lax.rsqrt(var + _EPS_GN)
    # Broadcast (S, C) stats back to (S*L, C):  seg^T @ stats (K=S matmuls).
    mfull = lax.dot_general(seg, gm * rstd, (((0,), (0,)), ((), ())),
                            preferred_element_type=jnp.float32)
    rfull = lax.dot_general(seg, rstd, (((0,), (0,)), ((), ())),
                            preferred_element_type=jnp.float32)
    return jnp.maximum(h * rfull - mfull, 0.0)


# ----------------------------------------------------------------------------
# The single fused kernel: per batch element b it computes
#   tmp        = flow MLP(hs[l, b])     for all nl layers (batched)
#   flow       = tmp + inverse_sigmoid(reference_l)
#   mbd        = blockdiag_lvl(corr^T corr),  corr = prop_n MLP @ prop_hs MLP^T
#   corr_flow  = mbd @ flow   (all layers stacked along lanes)
#   V          = (init_ref - sigmoid(.)) * (i_h, i_w)   for flow & corr_flow
#   out        = V^T @ Kt      -- Kt folds per-level align_corners bilinear
#                                 upsample and the 1/num_levels mean
# ----------------------------------------------------------------------------
def raft_head_kernel(hs_ref, phs_ref, refs_ref, irt_ref, kt_ref,
                     pair_d_ref, pair_2d_ref, seg_ref, lvl_mask_ref, scale_ref,
                     fw1, fb1, fw2, fb2, fw3, fb3,
                     pw1, pb1, pw2, pb2, pw3, pb3,
                     o_ref, *, nl, L, D):
    f32 = jnp.float32
    inv2l = 1.0 / (2.0 * L)
    pair_d = pair_d_ref[...]
    seg = seg_ref[...]

    # ---- flow MLP, batched over all nl decoder layers (segments of L rows) --
    x = hs_ref[0].astype(f32)                                    # (nl*L, D)
    h = _gn_relu_seg(jnp.dot(x, fw1[...], preferred_element_type=f32) + fb1[...],
                     pair_d, seg, inv2l)
    h = _gn_relu_seg(jnp.dot(h, fw2[...], preferred_element_type=f32) + fb2[...],
                     pair_d, seg, inv2l)
    tmp = jnp.dot(h, fw3[...], preferred_element_type=f32) + fb3[...]   # (nl*L, 2)

    # ---- flow = tmp + inverse_sigmoid(per-layer reference), all layers ------
    r = jnp.clip(refs_ref[0].astype(f32), 0.0, 1.0)
    inv_sig = jnp.log(jnp.maximum(r, _EPS_SIG) / jnp.maximum(1.0 - r, _EPS_SIG))
    flow_all = tmp + inv_sig                                     # (nl*L, 2)

    # Stack layers along lanes: column 2*l + c = (layer l, channel c).
    flow_stack = jnp.concatenate(
        [flow_all[l * L:(l + 1) * L, :] for l in range(nl)], axis=1)    # (L, 2*nl)

    # ---- packed prop_hs / prop_n MLPs + layer-invariant correlation Gram ----
    xc = jnp.concatenate([x[:L, :], phs_ref[0].astype(f32)], axis=1)    # (L, 2D)
    pair_2d = pair_2d_ref[...]
    hp = _gn_relu_one(jnp.dot(xc, pw1[...], preferred_element_type=f32) + pb1[...],
                      pair_2d, inv2l)
    hp = _gn_relu_one(jnp.dot(hp, pw2[...], preferred_element_type=f32) + pb2[...],
                      pair_2d, inv2l)
    php = jnp.dot(hp, pw3[...], preferred_element_type=f32) + pb3[...]  # (L, 2D)
    ph = php[:, :D]      # prop_hs_embed(hs[0]),     channels-last (L, D)
    pn = php[:, D:]      # prop_n_embed(prop_hs[0]), channels-last (L, D)

    # corr = prop_n_embed @ prop_hs_embed over ALL L rows; same-level block of
    # corr^T corr equals the per-level corr_lvl^T corr_lvl of the reference.
    corr = lax.dot_general(pn, ph, (((1,), (1,)), ((), ())),
                           preferred_element_type=f32)           # (L, L)
    mbd = lax.dot_general(corr, corr, (((0,), (0,)), ((), ())),
                          preferred_element_type=f32) * lvl_mask_ref[...]

    # corr_flow for all layers in one matmul (N = 2*nl instead of 2).
    cflow_stack = jnp.dot(mbd, flow_stack, preferred_element_type=f32)  # (L, 2*nl)

    # ---- init_ref - sigmoid(.), per-channel (i_h, i_w) scaling --------------
    irt = irt_ref[0].astype(f32)                                 # (L, 2*nl)
    sc = scale_ref[...]                                          # (1, 2*nl)
    v_flow = (irt - jax.nn.sigmoid(flow_stack)) * sc
    v_corr = (irt - jax.nn.sigmoid(cflow_stack)) * sc
    v = jnp.concatenate([v_flow, v_corr], axis=1)                # (L, 4*nl)

    # ---- fused bilinear upsample (align_corners=True) + level mean ----------
    out = lax.dot_general(v, kt_ref[...], (((0,), (0,)), ((), ())),
                          preferred_element_type=f32)            # (4*nl, i_h*i_w)
    o_ref[0] = out.astype(o_ref.dtype)


def run_raft_heads(hs_pb, phs0, refs_pb, ir_tiled, kt, pair_d, pair_2d, seg,
                   lvl_mask, scale_cols, flow_args, prop_args, *, nl, L, D, HW):
    bs = hs_pb.shape[0]

    def const_spec(a):
        return pl.BlockSpec(a.shape, lambda b: (0, 0))           # all consts are 2-D

    consts = ((kt, pair_d, pair_2d, seg, lvl_mask, scale_cols)
              + tuple(flow_args) + tuple(prop_args))

    in_specs = ([
        pl.BlockSpec((1, nl * L, D), lambda b: (b, 0, 0)),       # hs, all layers of b
        pl.BlockSpec((1, L, D), lambda b: (b, 0, 0)),            # prop_hs[0][b]
        pl.BlockSpec((1, nl * L, 2), lambda b: (b, 0, 0)),       # per-layer references
        pl.BlockSpec((1, L, 2 * nl), lambda b: (b, 0, 0)),       # init_reference tiled
    ] + [const_spec(a) for a in consts])

    kernel = functools.partial(raft_head_kernel, nl=nl, L=L, D=D)
    return pl.pallas_call(
        kernel,
        out_shape=jax.ShapeDtypeStruct((bs, 4 * nl, HW), jnp.float32),
        grid=(bs,),
        in_specs=in_specs,
        out_specs=pl.BlockSpec((1, 4 * nl, HW), lambda b: (b, 0, 0)),
        compiler_params=pltpu.CompilerParams(dimension_semantics=("parallel",)),
    )(hs_pb, phs0, refs_pb, ir_tiled, *consts)


# ----------------------------------------------------------------------------
# Host-side (trace-time) constants — hoisted out of all loops and kernels.
# ----------------------------------------------------------------------------
def _pair_matrix(C):
    idx = np.arange(C)
    return (idx[:, None] // 2 == idx[None, :] // 2).astype(np.float32)


def _level_mask(level_shapes):
    lvl_id = np.concatenate([np.full(h * w, i, np.int32)
                             for i, (h, w) in enumerate(level_shapes)])
    return (lvl_id[:, None] == lvl_id[None, :]).astype(np.float32)


def _segment_matrix(n_seg, seg_len):
    r = np.arange(n_seg * seg_len)
    return (r[None, :] // seg_len == np.arange(n_seg)[:, None]).astype(np.float32)


def _interp_matrix(out_size, in_size):
    """align_corners=True bilinear interpolation matrix (out_size, in_size)."""
    A = np.zeros((out_size, in_size), np.float32)
    if in_size == 1:
        A[:, 0] = 1.0
        return A
    if out_size == 1:
        pos = np.zeros((1,), np.float64)
    else:
        pos = np.arange(out_size, dtype=np.float64) * (in_size - 1) / (out_size - 1)
    lo = np.clip(np.floor(pos).astype(np.int64), 0, in_size - 2)
    frac = (pos - lo).astype(np.float32)
    A[np.arange(out_size), lo] = 1.0 - frac
    A[np.arange(out_size), lo + 1] += frac
    return A


def _upsample_kronecker(level_shapes, i_h, i_w):
    """(L, i_h*i_w): per-level A_h (x) A_w, transposed, scaled by 1/#levels."""
    blocks = []
    for (h, w) in level_shapes:
        a_h = _interp_matrix(i_h, h)                             # (i_h, h)
        a_w = _interp_matrix(i_w, w)                             # (i_w, w)
        k = np.einsum('yr,xs->yxrs', a_h, a_w).reshape(i_h * i_w, h * w)
        blocks.append(k.T)                                       # (h*w, i_h*i_w)
    kt = np.concatenate(blocks, axis=0) / float(len(level_shapes))
    return kt.astype(np.float32)


# ----------------------------------------------------------------------------
# RAFT forward (post-transformer flow-head part)
# ----------------------------------------------------------------------------
def raft_flow_heads(hs, init_reference, inter_references, prop_hs,
                    level_shapes, image_hw, params):
    """
    hs:               (num_dec_layers, bs, L, D)
    init_reference:   (bs, L, 2)   in (0, 1)
    inter_references: (num_dec_layers, bs, L, 2) in (0, 1)
    prop_hs:          (1, bs, L, D)
    Returns a list of num_dec_layers tensors of shape (bs, 2, i_h, i_w, 2)
    (stack of (flow, corr_flow) along the last axis, averaged over levels),
    matching the PyTorch forward with test_mode=False.
    """
    nl, bs, L, D = hs.shape
    i_h, i_w = image_hw
    HW = i_h * i_w
    assert L == sum(h * w for h, w in level_shapes)

    # Trace-time constants (hoisted out of all loops and the kernel).
    pair_d = jnp.asarray(_pair_matrix(D))                            # (D, D)
    pair_2d = jnp.asarray(_pair_matrix(2 * D))                       # (2D, 2D)
    lvl_mask = jnp.asarray(_level_mask(level_shapes))                # (L, L)
    kt = jnp.asarray(_upsample_kronecker(level_shapes, i_h, i_w))    # (L, HW)
    seg = jnp.asarray(_segment_matrix(nl, L))                        # (nl, nl*L)
    scale_cols = jnp.asarray(np.tile(np.array([[i_h, i_w]], np.float32), (1, nl)))

    # Layout plumbing (cheap XLA transposes/reshapes on HBM).
    hs_pb = jnp.transpose(hs, (1, 0, 2, 3)).reshape(bs, nl * L, D)
    refs = jnp.concatenate([init_reference[None], inter_references[:nl - 1]], axis=0)
    refs_pb = jnp.transpose(refs, (1, 0, 2, 3)).reshape(bs, nl * L, 2)
    ir_tiled = jnp.tile(init_reference, (1, 1, nl))                  # (bs, L, 2*nl)
    phs0 = prop_hs[0]                                                # (bs, L, D)

    # Pack the two prop MLPs into one block-diagonal (2D, 2D) MLP (fills the
    # 128-lane vreg / MXU contraction width; GN groups never cross the halves).
    p_hs, p_n = params["prop_hs"], params["prop_n"]

    def bd(a, b):
        z1 = jnp.zeros((a.shape[0], b.shape[1]), a.dtype)
        z2 = jnp.zeros((b.shape[0], a.shape[1]), b.dtype)
        return jnp.concatenate([jnp.concatenate([a, z1], axis=1),
                                jnp.concatenate([z2, b], axis=1)], axis=0)

    prop_args = (bd(p_hs["w1"], p_n["w1"]),
                 jnp.concatenate([p_hs["b1"], p_n["b1"]], axis=1),
                 bd(p_hs["w2"], p_n["w2"]),
                 jnp.concatenate([p_hs["b2"], p_n["b2"]], axis=1),
                 bd(p_hs["w3"], p_n["w3"]),
                 jnp.concatenate([p_hs["b3"], p_n["b3"]], axis=1))

    p_flow = params["flow"]
    flow_args = (p_flow["w1"], p_flow["b1"], p_flow["w2"], p_flow["b2"],
                 p_flow["w3"], p_flow["b3"])

    packed = run_raft_heads(hs_pb, phs0, refs_pb, ir_tiled, kt, pair_d, pair_2d,
                            seg, lvl_mask, scale_cols, flow_args, prop_args,
                            nl=nl, L=L, D=D, HW=HW)                  # (bs, 4*nl, HW)

    # Rows are ordered [flow (layer, chan) x 2*nl | corr_flow (layer, chan) x 2*nl].
    out = packed.reshape(bs, 2, nl, 2, i_h, i_w)                     # (b, t, l, c, y, x)
    out = jnp.transpose(out, (2, 0, 3, 4, 5, 1))                     # (l, b, c, y, x, t)
    return [out[l] for l in range(nl)]


# ----------------------------------------------------------------------------
# Deterministic parameter init (shapes from MLP(d_model, d_model, out, 3))
# ----------------------------------------------------------------------------
def xavier_uniform(key, shape):
    fan_in, fan_out = shape
    bound = float(np.sqrt(6.0 / (fan_in + fan_out)))
    return jax.random.uniform(key, shape, jnp.float32, -bound, bound)


def make_mlp_params(key, cin, chid, cout):
    k1, k2, k3 = jax.random.split(key, 3)
    return dict(
        w1=xavier_uniform(k1, (cin, chid)), b1=jnp.zeros((1, chid), jnp.float32),
        w2=xavier_uniform(k2, (chid, chid)), b2=jnp.zeros((1, chid), jnp.float32),
        w3=xavier_uniform(k3, (chid, cout)), b3=jnp.zeros((1, cout), jnp.float32),
    )


if __name__ == "__main__":
    key = jax.random.PRNGKey(0)
    bs = 2
    d_model = 64
    num_dec_layers = 6
    image_hw = (64, 64)                       # args.image_size (small)
    # feature levels at strides 8, 16, 32 -> (8,8), (4,4), (2,2)
    level_shapes = tuple((image_hw[0] // 2 ** i, image_hw[1] // 2 ** i)
                         for i in range(3, 6))
    L = sum(h * w for h, w in level_shapes)   # 84

    keys = jax.random.split(key, 8)

    # TODO(synk): BasicEncoder (fnet), input_proj, pos-embeddings and the
    # DeformableTransformer were not provided in the reference source; their
    # outputs are synthesized here with the shapes the forward pass requires.
    hs = 0.1 * jax.random.normal(keys[0], (num_dec_layers, bs, L, d_model), jnp.float32)
    prop_hs = 0.1 * jax.random.normal(keys[1], (1, bs, L, d_model), jnp.float32)
    init_reference = jax.random.uniform(keys[2], (bs, L, 2), jnp.float32, 0.05, 0.95)
    inter_references = jax.random.uniform(keys[3], (num_dec_layers, bs, L, 2),
                                          jnp.float32, 0.05, 0.95)

    params = dict(
        flow=make_mlp_params(keys[4], d_model, d_model, 2),        # flow_embed
        prop_hs=make_mlp_params(keys[5], d_model, d_model, d_model),
        prop_n=make_mlp_params(keys[6], d_model, d_model, d_model),
    )

    fwd = jax.jit(raft_flow_heads, static_argnums=(4, 5))
    preds = fwd(hs, init_reference, inter_references, prop_hs,
                level_shapes, image_hw, params)
    preds = jax.block_until_ready(preds)

    assert len(preds) == num_dec_layers
    assert preds[0].shape == (bs, 2, image_hw[0], image_hw[1], 2)
    assert all(bool(jnp.all(jnp.isfinite(p))) for p in preds)
    print("KERNEL_OK")
</pallas_src>

<mosaic_0001>
module attributes {stable_mosaic.version = 11 : i64} {
  func.func @raft_head_kernel(%arg0: i32, %arg1: memref<1x504x64xf32, #tpu.memory_space<vmem>>, %arg2: memref<1x84x64xf32, #tpu.memory_space<vmem>>, %arg3: memref<1x504x2xf32, #tpu.memory_space<vmem>>, %arg4: memref<1x84x12xf32, #tpu.memory_space<vmem>>, %arg5: memref<84x4096xf32, #tpu.memory_space<vmem>>, %arg6: memref<64x64xf32, #tpu.memory_space<vmem>>, %arg7: memref<128x128xf32, #tpu.memory_space<vmem>>, %arg8: memref<6x504xf32, #tpu.memory_space<vmem>>, %arg9: memref<84x84xf32, #tpu.memory_space<vmem>>, %arg10: memref<1x12xf32, #tpu.memory_space<vmem>>, %arg11: memref<64x64xf32, #tpu.memory_space<vmem>>, %arg12: memref<1x64xf32, #tpu.memory_space<vmem>>, %arg13: memref<64x64xf32, #tpu.memory_space<vmem>>, %arg14: memref<1x64xf32, #tpu.memory_space<vmem>>, %arg15: memref<64x2xf32, #tpu.memory_space<vmem>>, %arg16: memref<1x2xf32, #tpu.memory_space<vmem>>, %arg17: memref<128x128xf32, #tpu.memory_space<vmem>>, %arg18: memref<1x128xf32, #tpu.memory_space<vmem>>, %arg19: memref<128x128xf32, #tpu.memory_space<vmem>>, %arg20: memref<1x128xf32, #tpu.memory_space<vmem>>, %arg21: memref<128x128xf32, #tpu.memory_space<vmem>>, %arg22: memref<1x128xf32, #tpu.memory_space<vmem>>, %arg23: memref<1x24x4096xf32, #tpu.memory_space<vmem>>) attributes {dimension_semantics = [#tpu.dimension_semantics<parallel>], iteration_bounds = array<i64: 2>, scalar_prefetch = 0 : i64, scratch_operands = 0 : i64, tpu.core_type = #tpu.core_type<tc>, window_params = [{transform_indices = @transform_0, window_bounds = array<i64: 1, 504, 64>}, {transform_indices = @transform_1, window_bounds = array<i64: 1, 84, 64>}, {transform_indices = @transform_2, window_bounds = array<i64: 1, 504, 2>}, {transform_indices = @transform_3, window_bounds = array<i64: 1, 84, 12>}, {pipeline_mode = #tpu.pipeline_mode<synchronous>, transform_indices = @transform_4, window_bounds = array<i64: 84, 4096>}, {pipeline_mode = #tpu.pipeline_mode<synchronous>, transform_indices = @transform_5, window_bounds = array<i64: 64, 64>}, {pipeline_mode = #tpu.pipeline_mode<synchronous>, transform_indices = @transform_6, window_bounds = array<i64: 128, 128>}, {pipeline_mode = #tpu.pipeline_mode<synchronous>, transform_indices = @transform_7, window_bounds = array<i64: 6, 504>}, {pipeline_mode = #tpu.pipeline_mode<synchronous>, transform_indices = @transform_8, window_bounds = array<i64: 84, 84>}, {pipeline_mode = #tpu.pipeline_mode<synchronous>, transform_indices = @transform_9, window_bounds = array<i64: 1, 12>}, {pipeline_mode = #tpu.pipeline_mode<synchronous>, transform_indices = @transform_10, window_bounds = array<i64: 64, 64>}, {pipeline_mode = #tpu.pipeline_mode<synchronous>, transform_indices = @transform_11, window_bounds = array<i64: 1, 64>}, {pipeline_mode = #tpu.pipeline_mode<synchronous>, transform_indices = @transform_12, window_bounds = array<i64: 64, 64>}, {pipeline_mode = #tpu.pipeline_mode<synchronous>, transform_indices = @transform_13, window_bounds = array<i64: 1, 64>}, {pipeline_mode = #tpu.pipeline_mode<synchronous>, transform_indices = @transform_14, window_bounds = array<i64: 64, 2>}, {pipeline_mode = #tpu.pipeline_mode<synchronous>, transform_indices = @transform_15, window_bounds = array<i64: 1, 2>}, {pipeline_mode = #tpu.pipeline_mode<synchronous>, transform_indices = @transform_16, window_bounds = array<i64: 128, 128>}, {pipeline_mode = #tpu.pipeline_mode<synchronous>, transform_indices = @transform_17, window_bounds = array<i64: 1, 128>}, {pipeline_mode = #tpu.pipeline_mode<synchronous>, transform_indices = @transform_18, window_bounds = array<i64: 128, 128>}, {pipeline_mode = #tpu.pipeline_mode<synchronous>, transform_indices = @transform_19, window_bounds = array<i64: 1, 128>}, {pipeline_mode = #tpu.pipeline_mode<synchronous>, transform_indices = @transform_20, window_bounds = array<i64: 128, 128>}, {pipeline_mode = #tpu.pipeline_mode<synchronous>, transform_indices = @transform_21, window_bounds = array<i64: 1, 128>}, {transform_indices = @transform_22, window_bounds = array<i64: 1, 24, 4096>}]} {
    %c0 = arith.constant 0 : index
    %c0_0 = arith.constant 0 : index
    %0 = vector.load %arg6[%c0, %c0_0] : memref<64x64xf32, #tpu.memory_space<vmem>>, vector<64x64xf32>
    %c0_1 = arith.constant 0 : index
    %c0_2 = arith.constant 0 : index
    %1 = vector.load %arg8[%c0_1, %c0_2] : memref<6x504xf32, #tpu.memory_space<vmem>>, vector<6x504xf32>
    %c0_3 = arith.constant 0 : index
    %c0_4 = arith.constant 0 : index
    %c0_5 = arith.constant 0 : index
    %2 = vector.load %arg1[%c0_3, %c0_4, %c0_5] : memref<1x504x64xf32, #tpu.memory_space<vmem>>, vector<1x504x64xf32>
    %3 = vector.shape_cast %2 : vector<1x504x64xf32> to vector<504x64xf32>
    %c0_6 = arith.constant 0 : index
    %c0_7 = arith.constant 0 : index
    %4 = vector.load %arg11[%c0_6, %c0_7] : memref<64x64xf32, #tpu.memory_space<vmem>>, vector<64x64xf32>
    %cst = arith.constant dense<0.000000e+00> : vector<504x64xf32>
    %5 = tpu.matmul %3, %4, %cst {dimension_numbers = #tpu.dot_dimension_numbers<[1], [0], [0], [1], [0, 0, 1, 1], [], []>} : vector<504x64xf32>, vector<64x64xf32>, vector<504x64xf32> -> vector<504x64xf32>
    %c0_8 = arith.constant 0 : index
    %c0_9 = arith.constant 0 : index
    %6 = vector.load %arg12[%c0_8, %c0_9] : memref<1x64xf32, #tpu.memory_space<vmem>>, vector<1x64xf32>
    %7 = vector.broadcast %6 : vector<1x64xf32> to vector<504x64xf32>
    %8 = arith.addf %5, %7 : vector<504x64xf32>
    %cst_10 = arith.constant dense<0.000000e+00> : vector<6x64xf32>
    %9 = tpu.matmul %1, %8, %cst_10 {dimension_numbers = #tpu.dot_dimension_numbers<[1], [0], [0], [1], [0, 0, 1, 1], [], []>} : vector<6x504xf32>, vector<504x64xf32>, vector<6x64xf32> -> vector<6x64xf32>
    %10 = arith.mulf %8, %8 : vector<504x64xf32>
    %cst_11 = arith.constant dense<0.000000e+00> : vector<6x64xf32>
    %11 = tpu.matmul %1, %10, %cst_11 {dimension_numbers = #tpu.dot_dimension_numbers<[1], [0], [0], [1], [0, 0, 1, 1], [], []>} : vector<6x504xf32>, vector<504x64xf32>, vector<6x64xf32> -> vector<6x64xf32>
    %12 = tpu.concatenate %9, %11 in 0 : vector<6x64xf32>, vector<6x64xf32> -> vector<12x64xf32>
    %cst_12 = arith.constant dense<0.000000e+00> : vector<12x64xf32>
    %13 = tpu.matmul %12, %0, %cst_12 {dimension_numbers = #tpu.dot_dimension_numbers<[1], [0], [0], [1], [0, 0, 1, 1], [], []>} : vector<12x64xf32>, vector<64x64xf32>, vector<12x64xf32> -> vector<12x64xf32>
    %cst_13 = arith.constant 0.00595238106 : f32
    %14 = vector.broadcast %cst_13 : f32 to vector<12x64xf32>
    %15 = arith.mulf %13, %14 : vector<12x64xf32>
    %16 = vector.extract_strided_slice %15 {offsets = [0, 0], sizes = [6, 64], strides = [1, 1]} : vector<12x64xf32> to vector<6x64xf32>
    %17 = vector.extract_strided_slice %15 {offsets = [6, 0], sizes = [6, 64], strides = [1, 1]} : vector<12x64xf32> to vector<6x64xf32>
    %18 = arith.mulf %16, %16 : vector<6x64xf32>
    %19 = arith.subf %17, %18 : vector<6x64xf32>
    %cst_14 = arith.constant 0.000000e+00 : f32
    %20 = vector.broadcast %cst_14 : f32 to vector<6x64xf32>
    %21 = arith.maximumf %19, %20 : vector<6x64xf32>
    %cst_15 = arith.constant 9.99999974E-6 : f32
    %22 = vector.broadcast %cst_15 : f32 to vector<6x64xf32>
    %23 = arith.addf %21, %22 : vector<6x64xf32>
    %24 = math.rsqrt %23 : vector<6x64xf32>
    %25 = arith.mulf %16, %24 : vector<6x64xf32>
    %cst_16 = arith.constant dense<0.000000e+00> : vector<504x64xf32>
    %26 = tpu.matmul %1, %25, %cst_16 {dimension_numbers = #tpu.dot_dimension_numbers<[0], [0], [1], [1], [0, 1, 1, 1], [], []>} : vector<6x504xf32>, vector<6x64xf32>, vector<504x64xf32> -> vector<504x64xf32>
    %cst_17 = arith.constant dense<0.000000e+00> : vector<504x64xf32>
    %27 = tpu.matmul %1, %24, %cst_17 {dimension_numbers = #tpu.dot_dimension_numbers<[0], [0], [1], [1], [0, 1, 1, 1], [], []>} : vector<6x504xf32>, vector<6x64xf32>, vector<504x64xf32> -> vector<504x64xf32>
    %28 = arith.mulf %8, %27 : vector<504x64xf32>
    %29 = arith.subf %28, %26 : vector<504x64xf32>
    %cst_18 = arith.constant 0.000000e+00 : f32
    %30 = vector.broadcast %cst_18 : f32 to vector<504x64xf32>
    %31 = arith.maximumf %29, %30 : vector<504x64xf32>
    %c0_19 = arith.constant 0 : index
    %c0_20 = arith.constant 0 : index
    %32 = vector.load %arg13[%c0_19, %c0_20] : memref<64x64xf32, #tpu.memory_space<vmem>>, vector<64x64xf32>
    %cst_21 = arith.constant dense<0.000000e+00> : vector<504x64xf32>
    %33 = tpu.matmul %31, %32, %cst_21 {dimension_numbers = #tpu.dot_dimension_numbers<[1], [0], [0], [1], [0, 0, 1, 1], [], []>} : vector<504x64xf32>, vector<64x64xf32>, vector<504x64xf32> -> vector<504x64xf32>
    %c0_22 = arith.constant 0 : index
    %c0_23 = arith.constant 0 : index
    %34 = vector.load %arg14[%c0_22, %c0_23] : memref<1x64xf32, #tpu.memory_space<vmem>>, vector<1x64xf32>
    %35 = vector.broadcast %34 : vector<1x64xf32> to vector<504x64xf32>
    %36 = arith.addf %33, %35 : vector<504x64xf32>
    %cst_24 = arith.constant dense<0.000000e+00> : vector<6x64xf32>
    %37 = tpu.matmul %1, %36, %cst_24 {dimension_numbers = #tpu.dot_dimension_numbers<[1], [0], [0], [1], [0, 0, 1, 1], [], []>} : vector<6x504xf32>, vector<504x64xf32>, vector<6x64xf32> -> vector<6x64xf32>
    %38 = arith.mulf %36, %36 : vector<504x64xf32>
    %cst_25 = arith.constant dense<0.000000e+00> : vector<6x64xf32>
    %39 = tpu.matmul %1, %38, %cst_25 {dimension_numbers = #tpu.dot_dimension_numbers<[1], [0], [0], [1], [0, 0, 1, 1], [], []>} : vector<6x504xf32>, vector<504x64xf32>, vector<6x64xf32> -> vector<6x64xf32>
    %40 = tpu.concatenate %37, %39 in 0 : vector<6x64xf32>, vector<6x64xf32> -> vector<12x64xf32>
    %cst_26 = arith.constant dense<0.000000e+00> : vector<12x64xf32>
    %41 = tpu.matmul %40, %0, %cst_26 {dimension_numbers = #tpu.dot_dimension_numbers<[1], [0], [0], [1], [0, 0, 1, 1], [], []>} : vector<12x64xf32>, vector<64x64xf32>, vector<12x64xf32> -> vector<12x64xf32>
    %cst_27 = arith.constant 0.00595238106 : f32
    %42 = vector.broadcast %cst_27 : f32 to vector<12x64xf32>
    %43 = arith.mulf %41, %42 : vector<12x64xf32>
    %44 = vector.extract_strided_slice %43 {offsets = [0, 0], sizes = [6, 64], strides = [1, 1]} : vector<12x64xf32> to vector<6x64xf32>
    %45 = vector.extract_strided_slice %43 {offsets = [6, 0], sizes = [6, 64], strides = [1, 1]} : vector<12x64xf32> to vector<6x64xf32>
    %46 = arith.mulf %44, %44 : vector<6x64xf32>
    %47 = arith.subf %45, %46 : vector<6x64xf32>
    %cst_28 = arith.constant 0.000000e+00 : f32
    %48 = vector.broadcast %cst_28 : f32 to vector<6x64xf32>
    %49 = arith.maximumf %47, %48 : vector<6x64xf32>
    %cst_29 = arith.constant 9.99999974E-6 : f32
    %50 = vector.broadcast %cst_29 : f32 to vector<6x64xf32>
    %51 = arith.addf %49, %50 : vector<6x64xf32>
    %52 = math.rsqrt %51 : vector<6x64xf32>
    %53 = arith.mulf %44, %52 : vector<6x64xf32>
    %cst_30 = arith.constant dense<0.000000e+00> : vector<504x64xf32>
    %54 = tpu.matmul %1, %53, %cst_30 {dimension_numbers = #tpu.dot_dimension_numbers<[0], [0], [1], [1], [0, 1, 1, 1], [], []>} : vector<6x504xf32>, vector<6x64xf32>, vector<504x64xf32> -> vector<504x64xf32>
    %cst_31 = arith.constant dense<0.000000e+00> : vector<504x64xf32>
    %55 = tpu.matmul %1, %52, %cst_31 {dimension_numbers = #tpu.dot_dimension_numbers<[0], [0], [1], [1], [0, 1, 1, 1], [], []>} : vector<6x504xf32>, vector<6x64xf32>, vector<504x64xf32> -> vector<504x64xf32>
    %56 = arith.mulf %36, %55 : vector<504x64xf32>
    %57 = arith.subf %56, %54 : vector<504x64xf32>
    %cst_32 = arith.constant 0.000000e+00 : f32
    %58 = vector.broadcast %cst_32 : f32 to vector<504x64xf32>
    %59 = arith.maximumf %57, %58 : vector<504x64xf32>
    %c0_33 = arith.constant 0 : index
    %c0_34 = arith.constant 0 : index
    %60 = vector.load %arg15[%c0_33, %c0_34] : memref<64x2xf32, #tpu.memory_space<vmem>>, vector<64x2xf32>
    %cst_35 = arith.constant dense<0.000000e+00> : vector<504x2xf32>
    %61 = tpu.matmul %59, %60, %cst_35 {dimension_numbers = #tpu.dot_dimension_numbers<[1], [0], [0], [1], [0, 0, 1, 1], [], []>} : vector<504x64xf32>, vector<64x2xf32>, vector<504x2xf32> -> vector<504x2xf32>
    %c0_36 = arith.constant 0 : index
    %c0_37 = arith.constant 0 : index
    %62 = vector.load %arg16[%c0_36, %c0_37] : memref<1x2xf32, #tpu.memory_space<vmem>>, vector<1x2xf32>
    %63 = vector.broadcast %62 : vector<1x2xf32> to vector<504x2xf32>
    %64 = arith.addf %61, %63 : vector<504x2xf32>
    %c0_38 = arith.constant 0 : index
    %c0_39 = arith.constant 0 : index
    %c0_40 = arith.constant 0 : index
    %65 = vector.load %arg3[%c0_38, %c0_39, %c0_40] : memref<1x504x2xf32, #tpu.memory_space<vmem>>, vector<1x504x2xf32>
    %66 = vector.shape_cast %65 : vector<1x504x2xf32> to vector<504x2xf32>
    %cst_41 = arith.constant 0.000000e+00 : f32
    %cst_42 = arith.constant 1.000000e+00 : f32
    %67 = vector.broadcast %cst_41 : f32 to vector<504x2xf32>
    %68 = arith.maximumf %67, %66 : vector<504x2xf32>
    %69 = vector.broadcast %cst_42 : f32 to vector<504x2xf32>
    %70 = arith.minimumf %69, %68 : vector<504x2xf32>
    %cst_43 = arith.constant 9.99999974E-6 : f32
    %71 = vector.broadcast %cst_43 : f32 to vector<504x2xf32>
    %72 = arith.maximumf %70, %71 : vector<504x2xf32>
    %cst_44 = arith.constant 1.000000e+00 : f32
    %73 = vector.broadcast %cst_44 : f32 to vector<504x2xf32>
    %74 = arith.subf %73, %70 : vector<504x2xf32>
    %cst_45 = arith.constant 9.99999974E-6 : f32
    %75 = vector.broadcast %cst_45 : f32 to vector<504x2xf32>
    %76 = arith.maximumf %74, %75 : vector<504x2xf32>
    %77 = arith.divf %72, %76 : vector<504x2xf32>
    %78 = math.log %77 : vector<504x2xf32>
    %79 = arith.addf %64, %78 : vector<504x2xf32>
    %80 = vector.extract_strided_slice %79 {offsets = [0, 0], sizes = [84, 2], strides = [1, 1]} : vector<504x2xf32> to vector<84x2xf32>
    %81 = vector.extract_strided_slice %79 {offsets = [84, 0], sizes = [84, 2], strides = [1, 1]} : vector<504x2xf32> to vector<84x2xf32>
    %82 = vector.extract_strided_slice %79 {offsets = [168, 0], sizes = [84, 2], strides = [1, 1]} : vector<504x2xf32> to vector<84x2xf32>
    %83 = vector.extract_strided_slice %79 {offsets = [252, 0], sizes = [84, 2], strides = [1, 1]} : vector<504x2xf32> to vector<84x2xf32>
    %84 = vector.extract_strided_slice %79 {offsets = [336, 0], sizes = [84, 2], strides = [1, 1]} : vector<504x2xf32> to vector<84x2xf32>
    %85 = vector.extract_strided_slice %79 {offsets = [420, 0], sizes = [84, 2], strides = [1, 1]} : vector<504x2xf32> to vector<84x2xf32>
    %86 = tpu.concatenate %80, %81, %82, %83, %84, %85 in 1 : vector<84x2xf32>, vector<84x2xf32>, vector<84x2xf32>, vector<84x2xf32>, vector<84x2xf32>, vector<84x2xf32> -> vector<84x12xf32>
    %87 = vector.extract_strided_slice %3 {offsets = [0, 0], sizes = [84, 64], strides = [1, 1]} : vector<504x64xf32> to vector<84x64xf32>
    %c0_46 = arith.constant 0 : index
    %c0_47 = arith.constant 0 : index
    %c0_48 = arith.constant 0 : index
    %88 = vector.load %arg2[%c0_46, %c0_47, %c0_48] : memref<1x84x64xf32, #tpu.memory_space<vmem>>, vector<1x84x64xf32>
    %89 = vector.shape_cast %88 : vector<1x84x64xf32> to vector<84x64xf32>
    %90 = tpu.concatenate %87, %89 in 1 : vector<84x64xf32>, vector<84x64xf32> -> vector<84x128xf32>
    %c0_49 = arith.constant 0 : index
    %c0_50 = arith.constant 0 : index
    %91 = vector.load %arg7[%c0_49, %c0_50] : memref<128x128xf32, #tpu.memory_space<vmem>>, vector<128x128xf32>
    %c0_51 = arith.constant 0 : index
    %c0_52 = arith.constant 0 : index
    %92 = vector.load %arg17[%c0_51, %c0_52] : memref<128x128xf32, #tpu.memory_space<vmem>>, vector<128x128xf32>
    %cst_53 = arith.constant dense<0.000000e+00> : vector<84x128xf32>
    %93 = tpu.matmul %90, %92, %cst_53 {dimension_numbers = #tpu.dot_dimension_numbers<[1], [0], [0], [1], [0, 0, 1, 1], [], []>} : vector<84x128xf32>, vector<128x128xf32>, vector<84x128xf32> -> vector<84x128xf32>
    %c0_54 = arith.constant 0 : index
    %c0_55 = arith.constant 0 : index
    %94 = vector.load %arg18[%c0_54, %c0_55] : memref<1x128xf32, #tpu.memory_space<vmem>>, vector<1x128xf32>
    %95 = vector.broadcast %94 : vector<1x128xf32> to vector<84x128xf32>
    %96 = arith.addf %93, %95 : vector<84x128xf32>
    %cst_56 = arith.constant dense<0.000000e+00> : vector<128xf32>
    %97 = vector.multi_reduction <add>, %96, %cst_56 [0] : vector<84x128xf32> to vector<128xf32>
    %98 = vector.shape_cast %97 : vector<128xf32> to vector<1x128xf32>
    %99 = arith.mulf %96, %96 : vector<84x128xf32>
    %cst_57 = arith.constant dense<0.000000e+00> : vector<128xf32>
    %100 = vector.multi_reduction <add>, %99, %cst_57 [0] : vector<84x128xf32> to vector<128xf32>
    %101 = vector.shape_cast %100 : vector<128xf32> to vector<1x128xf32>
    %102 = tpu.concatenate %98, %101 in 0 : vector<1x128xf32>, vector<1x128xf32> -> vector<2x128xf32>
    %cst_58 = arith.constant dense<0.000000e+00> : vector<2x128xf32>
    %103 = tpu.matmul %102, %91, %cst_58 {dimension_numbers = #tpu.dot_dimension_numbers<[1], [0], [0], [1], [0, 0, 1, 1], [], []>} : vector<2x128xf32>, vector<128x128xf32>, vector<2x128xf32> -> vector<2x128xf32>
    %cst_59 = arith.constant 0.00595238106 : f32
    %104 = vector.broadcast %cst_59 : f32 to vector<2x128xf32>
    %105 = arith.mulf %103, %104 : vector<2x128xf32>
    %106 = vector.extract_strided_slice %105 {offsets = [0, 0], sizes = [1, 128], strides = [1, 1]} : vector<2x128xf32> to vector<1x128xf32>
    %107 = vector.extract_strided_slice %105 {offsets = [1, 0], sizes = [1, 128], strides = [1, 1]} : vector<2x128xf32> to vector<1x128xf32>
    %108 = arith.mulf %106, %106 : vector<1x128xf32>
    %109 = arith.subf %107, %108 : vector<1x128xf32>
    %cst_60 = arith.constant 0.000000e+00 : f32
    %110 = vector.broadcast %cst_60 : f32 to vector<1x128xf32>
    %111 = arith.maximumf %109, %110 : vector<1x128xf32>
    %112 = vector.broadcast %106 : vector<1x128xf32> to vector<84x128xf32>
    %113 = arith.subf %96, %112 : vector<84x128xf32>
    %cst_61 = arith.constant 9.99999974E-6 : f32
    %114 = vector.broadcast %cst_61 : f32 to vector<1x128xf32>
    %115 = arith.addf %111, %114 : vector<1x128xf32>
    %116 = math.rsqrt %115 : vector<1x128xf32>
    %117 = vector.broadcast %116 : vector<1x128xf32> to vector<84x128xf32>
    %118 = arith.mulf %113, %117 : vector<84x128xf32>
    %cst_62 = arith.constant 0.000000e+00 : f32
    %119 = vector.broadcast %cst_62 : f32 to vector<84x128xf32>
    %120 = arith.maximumf %118, %119 : vector<84x128xf32>
    %c0_63 = arith.constant 0 : index
    %c0_64 = arith.constant 0 : index
    %121 = vector.load %arg19[%c0_63, %c0_64] : memref<128x128xf32, #tpu.memory_space<vmem>>, vector<128x128xf32>
    %cst_65 = arith.constant dense<0.000000e+00> : vector<84x128xf32>
    %122 = tpu.matmul %120, %121, %cst_65 {dimension_numbers = #tpu.dot_dimension_numbers<[1], [0], [0], [1], [0, 0, 1, 1], [], []>} : vector<84x128xf32>, vector<128x128xf32>, vector<84x128xf32> -> vector<84x128xf32>
    %c0_66 = arith.constant 0 : index
    %c0_67 = arith.constant 0 : index
    %123 = vector.load %arg20[%c0_66, %c0_67] : memref<1x128xf32, #tpu.memory_space<vmem>>, vector<1x128xf32>
    %124 = vector.broadcast %123 : vector<1x128xf32> to vector<84x128xf32>
    %125 = arith.addf %122, %124 : vector<84x128xf32>
    %cst_68 = arith.constant dense<0.000000e+00> : vector<128xf32>
    %126 = vector.multi_reduction <add>, %125, %cst_68 [0] : vector<84x128xf32> to vector<128xf32>
    %127 = vector.shape_cast %126 : vector<128xf32> to vector<1x128xf32>
    %128 = arith.mulf %125, %125 : vector<84x128xf32>
    %cst_69 = arith.constant dense<0.000000e+00> : vector<128xf32>
    %129 = vector.multi_reduction <add>, %128, %cst_69 [0] : vector<84x128xf32> to vector<128xf32>
    %130 = vector.shape_cast %129 : vector<128xf32> to vector<1x128xf32>
    %131 = tpu.concatenate %127, %130 in 0 : vector<1x128xf32>, vector<1x128xf32> -> vector<2x128xf32>
    %cst_70 = arith.constant dense<0.000000e+00> : vector<2x128xf32>
    %132 = tpu.matmul %131, %91, %cst_70 {dimension_numbers = #tpu.dot_dimension_numbers<[1], [0], [0], [1], [0, 0, 1, 1], [], []>} : vector<2x128xf32>, vector<128x128xf32>, vector<2x128xf32> -> vector<2x128xf32>
    %cst_71 = arith.constant 0.00595238106 : f32
    %133 = vector.broadcast %cst_71 : f32 to vector<2x128xf32>
    %134 = arith.mulf %132, %133 : vector<2x128xf32>
    %135 = vector.extract_strided_slice %134 {offsets = [0, 0], sizes = [1, 128], strides = [1, 1]} : vector<2x128xf32> to vector<1x128xf32>
    %136 = vector.extract_strided_slice %134 {offsets = [1, 0], sizes = [1, 128], strides = [1, 1]} : vector<2x128xf32> to vector<1x128xf32>
    %137 = arith.mulf %135, %135 : vector<1x128xf32>
    %138 = arith.subf %136, %137 : vector<1x128xf32>
    %cst_72 = arith.constant 0.000000e+00 : f32
    %139 = vector.broadcast %cst_72 : f32 to vector<1x128xf32>
    %140 = arith.maximumf %138, %139 : vector<1x128xf32>
    %141 = vector.broadcast %135 : vector<1x128xf32> to vector<84x128xf32>
    %142 = arith.subf %125, %141 : vector<84x128xf32>
    %cst_73 = arith.constant 9.99999974E-6 : f32
    %143 = vector.broadcast %cst_73 : f32 to vector<1x128xf32>
    %144 = arith.addf %140, %143 : vector<1x128xf32>
    %145 = math.rsqrt %144 : vector<1x128xf32>
    %146 = vector.broadcast %145 : vector<1x128xf32> to vector<84x128xf32>
    %147 = arith.mulf %142, %146 : vector<84x128xf32>
    %cst_74 = arith.constant 0.000000e+00 : f32
    %148 = vector.broadcast %cst_74 : f32 to vector<84x128xf32>
    %149 = arith.maximumf %147, %148 : vector<84x128xf32>
    %c0_75 = arith.constant 0 : index
    %c0_76 = arith.constant 0 : index
    %150 = vector.load %arg21[%c0_75, %c0_76] : memref<128x128xf32, #tpu.memory_space<vmem>>, vector<128x128xf32>
    %cst_77 = arith.constant dense<0.000000e+00> : vector<84x128xf32>
    %151 = tpu.matmul %149, %150, %cst_77 {dimension_numbers = #tpu.dot_dimension_numbers<[1], [0], [0], [1], [0, 0, 1, 1], [], []>} : vector<84x128xf32>, vector<128x128xf32>, vector<84x128xf32> -> vector<84x128xf32>
    %c0_78 = arith.constant 0 : index
    %c0_79 = arith.constant 0 : index
    %152 = vector.load %arg22[%c0_78, %c0_79] : memref<1x128xf32, #tpu.memory_space<vmem>>, vector<1x128xf32>
    %153 = vector.broadcast %152 : vector<1x128xf32> to vector<84x128xf32>
    %154 = arith.addf %151, %153 : vector<84x128xf32>
    %155 = vector.extract_strided_slice %154 {offsets = [0, 0], sizes = [84, 64], strides = [1, 1]} : vector<84x128xf32> to vector<84x64xf32>
    %156 = vector.extract_strided_slice %154 {offsets = [0, 64], sizes = [84, 64], strides = [1, 1]} : vector<84x128xf32> to vector<84x64xf32>
    %cst_80 = arith.constant dense<0.000000e+00> : vector<84x84xf32>
    %157 = tpu.matmul %156, %155, %cst_80 {dimension_numbers = #tpu.dot_dimension_numbers<[1], [1], [0], [0], [0, 0, 1, 0], [], []>} : vector<84x64xf32>, vector<84x64xf32>, vector<84x84xf32> -> vector<84x84xf32>
    %cst_81 = arith.constant dense<0.000000e+00> : vector<84x84xf32>
    %158 = tpu.matmul %157, %157, %cst_81 {dimension_numbers = #tpu.dot_dimension_numbers<[0], [0], [1], [1], [0, 1, 1, 1], [], []>} : vector<84x84xf32>, vector<84x84xf32>, vector<84x84xf32> -> vector<84x84xf32>
    %c0_82 = arith.constant 0 : index
    %c0_83 = arith.constant 0 : index
    %159 = vector.load %arg9[%c0_82, %c0_83] : memref<84x84xf32, #tpu.memory_space<vmem>>, vector<84x84xf32>
    %160 = arith.mulf %158, %159 : vector<84x84xf32>
    %cst_84 = arith.constant dense<0.000000e+00> : vector<84x12xf32>
    %161 = tpu.matmul %160, %86, %cst_84 {dimension_numbers = #tpu.dot_dimension_numbers<[1], [0], [0], [1], [0, 0, 1, 1], [], []>} : vector<84x84xf32>, vector<84x12xf32>, vector<84x12xf32> -> vector<84x12xf32>
    %c0_85 = arith.constant 0 : index
    %c0_86 = arith.constant 0 : index
    %c0_87 = arith.constant 0 : index
    %162 = vector.load %arg4[%c0_85, %c0_86, %c0_87] : memref<1x84x12xf32, #tpu.memory_space<vmem>>, vector<1x84x12xf32>
    %163 = vector.shape_cast %162 : vector<1x84x12xf32> to vector<84x12xf32>
    %c0_88 = arith.constant 0 : index
    %c0_89 = arith.constant 0 : index
    %164 = vector.load %arg10[%c0_88, %c0_89] : memref<1x12xf32, #tpu.memory_space<vmem>>, vector<1x12xf32>
    %165 = arith.negf %86 : vector<84x12xf32>
    %166 = math.exp %165 : vector<84x12xf32>
    %cst_90 = arith.constant 1.000000e+00 : f32
    %167 = vector.broadcast %cst_90 : f32 to vector<84x12xf32>
    %168 = arith.addf %167, %166 : vector<84x12xf32>
    %169 = arith.divf %167, %168 : vector<84x12xf32>
    %170 = arith.subf %163, %169 : vector<84x12xf32>
    %171 = vector.broadcast %164 : vector<1x12xf32> to vector<84x12xf32>
    %172 = arith.mulf %170, %171 : vector<84x12xf32>
    %173 = arith.negf %161 : vector<84x12xf32>
    %174 = math.exp %173 : vector<84x12xf32>
    %cst_91 = arith.constant 1.000000e+00 : f32
    %175 = vector.broadcast %cst_91 : f32 to vector<84x12xf32>
    %176 = arith.addf %175, %174 : vector<84x12xf32>
    %177 = arith.divf %175, %176 : vector<84x12xf32>
    %178 = arith.subf %163, %177 : vector<84x12xf32>
    %179 = vector.broadcast %164 : vector<1x12xf32> to vector<84x12xf32>
    %180 = arith.mulf %178, %179 : vector<84x12xf32>
    %181 = tpu.concatenate %172, %180 in 1 : vector<84x12xf32>, vector<84x12xf32> -> vector<84x24xf32>
    %c0_92 = arith.constant 0 : index
    %c0_93 = arith.constant 0 : index
    %182 = vector.load %arg5[%c0_92, %c0_93] : memref<84x4096xf32, #tpu.memory_space<vmem>>, vector<84x4096xf32>
    %cst_94 = arith.constant dense<0.000000e+00> : vector<24x4096xf32>
    %183 = tpu.matmul %181, %182, %cst_94 {dimension_numbers = #tpu.dot_dimension_numbers<[0], [0], [1], [1], [0, 1, 1, 1], [], []>} : vector<84x24xf32>, vector<84x4096xf32>, vector<24x4096xf32> -> vector<24x4096xf32>
    %c0_95 = arith.constant 0 : index
    %c0_96 = arith.constant 0 : index
    %c0_97 = arith.constant 0 : index
    %184 = vector.load %arg23[%c0_95, %c0_96, %c0_97] : memref<1x24x4096xf32, #tpu.memory_space<vmem>>, vector<1x24x4096xf32>
    %185 = vector.shape_cast %184 : vector<1x24x4096xf32> to vector<24x4096xf32>
    %186 = vector.shape_cast %183 : vector<24x4096xf32> to vector<1x24x4096xf32>
    tpu.vector_store %arg23[%c0_95, %c0_96, %c0_97], %186 {strides = array<i32>} : memref<1x24x4096xf32, #tpu.memory_space<vmem>>, vector<1x24x4096xf32>,
    return
  }
  func.func @transform_0(%arg0: i32) -> (i32, i32, i32) {
    %c0_i32 = arith.constant 0 : i32
    %c0_i32_0 = arith.constant 0 : i32
    %c0_i32_1 = arith.constant 0 : i32
    return %arg0, %c0_i32, %c0_i32_0 : i32, i32, i32
  }
  func.func @transform_1(%arg0: i32) -> (i32, i32, i32) {
    %c0_i32 = arith.constant 0 : i32
    %c0_i32_0 = arith.constant 0 : i32
    %c0_i32_1 = arith.constant 0 : i32
    return %arg0, %c0_i32, %c0_i32_0 : i32, i32, i32
  }
  func.func @transform_2(%arg0: i32) -> (i32, i32, i32) {
    %c0_i32 = arith.constant 0 : i32
    %c0_i32_0 = arith.constant 0 : i32
    %c0_i32_1 = arith.constant 0 : i32
    return %arg0, %c0_i32, %c0_i32_0 : i32, i32, i32
  }
  func.func @transform_3(%arg0: i32) -> (i32, i32, i32) {
    %c0_i32 = arith.constant 0 : i32
    %c0_i32_0 = arith.constant 0 : i32
    %c0_i32_1 = arith.constant 0 : i32
    return %arg0, %c0_i32, %c0_i32_0 : i32, i32, i32
  }
  func.func @transform_4(%arg0: i32) -> (i32, i32) {
    %c0_i32 = arith.constant 0 : i32
    %c0_i32_0 = arith.constant 0 : i32
    %c0_i32_1 = arith.constant 0 : i32
    return %c0_i32, %c0_i32_0 : i32, i32
  }
  func.func @transform_5(%arg0: i32) -> (i32, i32) {
    %c0_i32 = arith.constant 0 : i32
    %c0_i32_0 = arith.constant 0 : i32
    %c0_i32_1 = arith.constant 0 : i32
    return %c0_i32, %c0_i32_0 : i32, i32
  }
  func.func @transform_6(%arg0: i32) -> (i32, i32) {
    %c0_i32 = arith.constant 0 : i32
    %c0_i32_0 = arith.constant 0 : i32
    %c0_i32_1 = arith.constant 0 : i32
    return %c0_i32, %c0_i32_0 : i32, i32
  }
  func.func @transform_7(%arg0: i32) -> (i32, i32) {
    %c0_i32 = arith.constant 0 : i32
    %c0_i32_0 = arith.constant 0 : i32
    %c0_i32_1 = arith.constant 0 : i32
    return %c0_i32, %c0_i32_0 : i32, i32
  }
  func.func @transform_8(%arg0: i32) -> (i32, i32) {
    %c0_i32 = arith.constant 0 : i32
    %c0_i32_0 = arith.constant 0 : i32
    %c0_i32_1 = arith.constant 0 : i32
    return %c0_i32, %c0_i32_0 : i32, i32
  }
  func.func @transform_9(%arg0: i32) -> (i32, i32) {
    %c0_i32 = arith.constant 0 : i32
    %c0_i32_0 = arith.constant 0 : i32
    %c0_i32_1 = arith.constant 0 : i32
    return %c0_i32, %c0_i32_0 : i32, i32
  }
  func.func @transform_10(%arg0: i32) -> (i32, i32) {
    %c0_i32 = arith.constant 0 : i32
    %c0_i32_0 = arith.constant 0 : i32
    %c0_i32_1 = arith.constant 0 : i32
    return %c0_i32, %c0_i32_0 : i32, i32
  }
  func.func @transform_11(%arg0: i32) -> (i32, i32) {
    %c0_i32 = arith.constant 0 : i32
    %c0_i32_0 = arith.constant 0 : i32
    %c0_i32_1 = arith.constant 0 : i32
    return %c0_i32, %c0_i32_0 : i32, i32
  }
  func.func @transform_12(%arg0: i32) -> (i32, i32) {
    %c0_i32 = arith.constant 0 : i32
    %c0_i32_0 = arith.constant 0 : i32
    %c0_i32_1 = arith.constant 0 : i32
    return %c0_i32, %c0_i32_0 : i32, i32
  }
  func.func @transform_13(%arg0: i32) -> (i32, i32) {
    %c0_i32 = arith.constant 0 : i32
    %c0_i32_0 = arith.constant 0 : i32
    %c0_i32_1 = arith.constant 0 : i32
    return %c0_i32, %c0_i32_0 : i32, i32
  }
  func.func @transform_14(%arg0: i32) -> (i32, i32) {
    %c0_i32 = arith.constant 0 : i32
    %c0_i32_0 = arith.constant 0 : i32
    %c0_i32_1 = arith.constant 0 : i32
    return %c0_i32, %c0_i32_0 : i32, i32
  }
  func.func @transform_15(%arg0: i32) -> (i32, i32) {
    %c0_i32 = arith.constant 0 : i32
    %c0_i32_0 = arith.constant 0 : i32
    %c0_i32_1 = arith.constant 0 : i32
    return %c0_i32, %c0_i32_0 : i32, i32
  }
  func.func @transform_16(%arg0: i32) -> (i32, i32) {
    %c0_i32 = arith.constant 0 : i32
    %c0_i32_0 = arith.constant 0 : i32
    %c0_i32_1 = arith.constant 0 : i32
    return %c0_i32, %c0_i32_0 : i32, i32
  }
  func.func @transform_17(%arg0: i32) -> (i32, i32) {
    %c0_i32 = arith.constant 0 : i32
    %c0_i32_0 = arith.constant 0 : i32
    %c0_i32_1 = arith.constant 0 : i32
    return %c0_i32, %c0_i32_0 : i32, i32
  }
  func.func @transform_18(%arg0: i32) -> (i32, i32) {
    %c0_i32 = arith.constant 0 : i32
    %c0_i32_0 = arith.constant 0 : i32
    %c0_i32_1 = arith.constant 0 : i32
    return %c0_i32, %c0_i32_0 : i32, i32
  }
  func.func @transform_19(%arg0: i32) -> (i32, i32) {
    %c0_i32 = arith.constant 0 : i32
    %c0_i32_0 = arith.constant 0 : i32
    %c0_i32_1 = arith.constant 0 : i32
    return %c0_i32, %c0_i32_0 : i32, i32
  }
  func.func @transform_20(%arg0: i32) -> (i32, i32) {
    %c0_i32 = arith.constant 0 : i32
    %c0_i32_0 = arith.constant 0 : i32
    %c0_i32_1 = arith.constant 0 : i32
    return %c0_i32, %c0_i32_0 : i32, i32
  }
  func.func @transform_21(%arg0: i32) -> (i32, i32) {
    %c0_i32 = arith.constant 0 : i32
    %c0_i32_0 = arith.constant 0 : i32
    %c0_i32_1 = arith.constant 0 : i32
    return %c0_i32, %c0_i32_0 : i32, i32
  }
  func.func @transform_22(%arg0: i32) -> (i32, i32, i32) {
    %c0_i32 = arith.constant 0 : i32
    %c0_i32_0 = arith.constant 0 : i32
    %c0_i32_1 = arith.constant 0 : i32
    return %arg0, %c0_i32, %c0_i32_0 : i32, i32, i32
  }
}

</mosaic_0001>

<bundles_post_ra>
// kernel: raft_flow_heads.1
= control target key start
LH: loop header
LB: loop body
LE: loop exit
PB: predicated region body
PF: predicated region fallthrough
CT: control target
= control target key end

     0   :  { %s21325_s0 = inlined_call_operand.vmem [shape: f32[2,504,64], index: 0, kind: input, shape index: {}]   ;;  %s21326_s1 = inlined_call_operand.vmem [shape: f32[2,84,64], index: 1, kind: input, shape index: {}]   ;;  %s21327_s2 = inlined_call_operand.vmem [shape: f32[2,504,2], index: 2, kind: input, shape index: {}]   ;;  %s21328_s3 = inlined_call_operand.vmem [shape: f32[2,84,12], index: 3, kind: input, shape index: {}]   ;;  %s21329_s4 = inlined_call_operand.vmem [shape: f32[84,4096], index: 4, kind: input, shape index: {}]   ;;  %s21330_s5 = inlined_call_operand.vmem [shape: f32[64,64], index: 5, kind: input, shape index: {}]   ;;  %s21331_s6 = inlined_call_operand.vmem [shape: f32[128,128], index: 6, kind: input, shape index: {}]   ;;  %s21332_s7 = inlined_call_operand.vmem [shape: f32[6,504], index: 7, kind: input, shape index: {}]   ;;  %s21333_s8 = inlined_call_operand.vmem [shape: f32[84,84], index: 8, kind: input, shape index: {}]   ;;  %s21334_s9 = inlined_call_operand.vmem [shape: f32[1,12], index: 9, kind: input, shape index: {}]   ;;  %s21335_s10 = inlined_call_operand.vmem [shape: f32[64,64], index: 10, kind: input, shape index: {}]   ;;  %s21336_s11 = inlined_call_operand.vmem [shape: f32[1,64], index: 11, kind: input, shape index: {}]   ;;  %s21337_s12 = inlined_call_operand.vmem [shape: f32[64,64], index: 12, kind: input, shape index: {}]   ;;  %s21338_s13 = inlined_call_operand.vmem [shape: f32[1,64], index: 13, kind: input, shape index: {}]   ;;  %s21339_s14 = inlined_call_operand.vmem [shape: f32[64,2], index: 14, kind: input, shape index: {}]   ;;  %s21340_s15 = inlined_call_operand.vmem [shape: f32[1,2], index: 15, kind: input, shape index: {}]   ;;  %s21341_s16 = inlined_call_operand.vmem [shape: f32[128,128], index: 16, kind: input, shape index: {}]   ;;  %s21342_s17 = inlined_call_operand.vmem [shape: f32[1,128], index: 17, kind: input, shape index: {}]   ;;  %s21343_s18 = inlined_call_operand.vmem [shape: f32[128,128], index: 18, kind: input, shape index: {}]   ;;  %s21344_s19 = inlined_call_operand.vmem [shape: f32[1,128], index: 19, kind: input, shape index: {}]   ;;  %s21345_s20 = inlined_call_operand.vmem [shape: f32[128,128], index: 20, kind: input, shape index: {}]   ;;  %s21346_s21 = inlined_call_operand.vmem [shape: f32[1,128], index: 21, kind: input, shape index: {}]   ;;  %s21347_s22 = inlined_call_operand.vmem [shape: f32[2,24,4096], index: 22, kind: output, shape index: {}]  }
   0x1   :  { %21592 = sst [smem:[#allocation104_spill]] %s21325_s0 }
   0x2   :  { %21593 = sst [smem:[#allocation105_spill]] %s21326_s1 }
   0x3   :  { %21594 = sst [smem:[#allocation106_spill]] %s21327_s2 }
   0x4   :  { %21595 = sst [smem:[#allocation107_spill]] %s21328_s3  ;;  %s14220_s3 = smov 0  }
   0x5   :  { %21596 = sst [smem:[#allocation108_spill]] %s21329_s4 }
   0x6   :  { %21597 = sst [smem:[#allocation109_spill]] %s21330_s5 }
   0x7   :  { %21598 = sst [smem:[#allocation110_spill]] %s21331_s6 }
   0x8 LB: > { %s10396_s28 = sadd.s32 4294967295, %s14094_s3   ;;  %p10400_p0 = scmp.ge.s32.totalorder %s14094_s3, 1  ;;  %s14094_s3 = sphi %s14220_s3, %s32_s3  }
   0x9   : > { %p642_p1 = scmp.lt.s32.totalorder %s14094_s3, 3 }
   0xb   : > { %p643_p2 = pnand %p10400_p0, %p642_p1 }
   0xd   : > { %646 = sbr.rel (%p643_p2) target bundleno = 5173 (0x1435), region = 108 }
  0x12   : > { %v826_v0 = vld [vmem:[%s21335_s10 + $0x38] sm:$0xff]  ;;  %p719_p3 = scmp.lt.s32.totalorder %s10396_s28, 1  ;;  %v21390_v1 = vmov 0.0   ;;  %v825_v2 = vld [vmem:[%s21335_s10 + $0x30] sm:$0xff]  ;;  %vm14097_vm0 = vmmov 0   ;;  %v824_v3 = vld [vmem:[%s21335_s10 + $0x28] sm:$0xff] }
  0x13   : > { %11826 = vmatprep.subr.mxu0 %v21390_v1  ;;  %11842 = vmatprep.mubr.msk.f32.mxu0 %vm14097_vm0, %v21390_v1  ;;  %v823_v4 = vld [vmem:[%s21335_s10 + $0x20] sm:$0xff]  ;;  %v822_v5 = vld [vmem:[%s21335_s10 + $0x18] sm:$0xff]  ;;  %v821_v6 = vld [vmem:[%s21335_s10 + $0x10] sm:$0xff]  ;;  %s21599_s23 = sld [smem:[#allocation104_spill]]  ;;  %vm834_vm1 = vcmask 523264   ;;  %vm1404_vm2 = vcmask 982016  }
  0x14   : > { %11827 = vmatpush3.msra.mxu0 %v826_v0  ;;  %s21994_s28 = smov (!%p719_p3, %s10396_s28), 1  ;;  %v820_v7 = vld [vmem:[%s21335_s10 + $0x8] sm:$0xff]  ;;  %v819_v8 = vld [vmem:[%s21335_s10] sm:$0xff]  ;;  %s21650_s25 = sld [smem:[#allocation109_spill]]  ;;  %vm1754_vm3 = vcmask 1045504   ;;  %vm1852_vm4 = vcmask 1041408  }
  0x15   : > { %11828 = vmatprep.subr.mxu0 %v21390_v1  ;;  %s13673_s26 = smul.u32 504, %s21994_s28  ;;  %vm1986_vm5 = vcmask 48128   ;;  %s21804_s27 = sld [smem:[#allocation105_spill]]  ;;  %vm6404_vm6 = vcmask 1043456   ;;  %vm7004_vm7 = vcmask 1040384   ;;  %vm6675_vm8 = vcmask 15360  }
  0x16   : > { %11829 = vmatpush3.msra.mxu0 %v825_v2  ;;  %s13674_s24 = smul.u32 88, %s21994_s28  ;;  %s14098_s30 = smov 64   ;;  %vm6687_vm9 = vcmask 31744   ;;  %vm6710_vm10 = vcmask 64512   ;;  %vm6722_vm11 = vcmask 80896   ;;  %vm7807_vm12 = vcmask 687104  }
  0x17   : > { %11830 = vmatprep.subr.mxu0 %v21390_v1  ;;  %s21868_s0 = sld [smem:[#allocation110_spill]]  ;;  %s14099_s2 = smov 2   ;;  %vm8380_vm13 = vcmask 97280  }
  0x18   : > { %11831 = vmatpush3.msra.mxu0 %v824_v3  ;;  %s21992_s6 = smov 12  }
  0x19   : > { %11832 = vmatprep.subr.mxu0 %v21390_v1  ;;  %s14265_s1 = scalar_lea.vmem %s21599_s23, %s13673_s26  ;;  %s21889_s23 = sld [smem:[#allocation106_spill]] }
  0x1a   : > { %11833 = vmatpush3.msra.mxu0 %v823_v4  ;;  %v756_v9 = vld [vmem:[%s14265_s1] sm:$0xff]  ;;  %v757_v10 = vld [vmem:[%s14265_s1 + $0x8] sm:$0xff]  ;;  %v758_v11 = vld [vmem:[%s14265_s1 + $0x10] sm:$0xff] }
  0x1b   : > { %11834 = vmatprep.subr.mxu0 %v21390_v1  ;;  %v759_v12 = vld [vmem:[%s14265_s1 + $0x18] sm:$0xff]  ;;  %v760_v13 = vld [vmem:[%s14265_s1 + $0x20] sm:$0xff]  ;;  %v761_v14 = vld [vmem:[%s14265_s1 + $0x28] sm:$0xff]  ;;  %s17049_s29 = scalar_lea.vmem %s21804_s27, %s13674_s24  ;;  %s14101_s27 = smov 6  }
  0x1c   : > { %11835 = vmatpush3.msra.mxu0 %v822_v5  ;;  %v762_v15 = vld [vmem:[%s14265_s1 + $0x30] sm:$0xff]  ;;  %v763_v16 = vld [vmem:[%s14265_s1 + $0x38] sm:$0xff]  ;;  %v764_v17 = vld [vmem:[%s14265_s1 + $0x40] sm:$0xff] }
  0x1d   : > { %11836 = vmatprep.subr.mxu0 %v21390_v1  ;;  %v765_v18 = vld [vmem:[%s14265_s1 + $0x48] sm:$0xff]  ;;  %v766_v19 = vld [vmem:[%s14265_s1 + $0x50] sm:$0xff]  ;;  %v767_v20 = vld [vmem:[%s14265_s1 + $0x58] sm:$0xff] }
  0x1e   : > { %11837 = vmatpush3.msra.mxu0 %v821_v6  ;;  %v768_v21 = vld [vmem:[%s14265_s1 + $0x60] sm:$0xff]  ;;  %v769_v22 = vld [vmem:[%s14265_s1 + $0x68] sm:$0xff]  ;;  %v770_v23 = vld [vmem:[%s14265_s1 + $0x70] sm:$0xff] }
  0x1f   : > { %11838 = vmatprep.subr.mxu0 %v21390_v1  ;;  %v771_v24 = vld [vmem:[%s14265_s1 + $0x78] sm:$0xff]  ;;  %v772_v25 = vld [vmem:[%s14265_s1 + $0x80] sm:$0xff]  ;;  %v773_v26 = vld [vmem:[%s14265_s1 + $0x88] sm:$0xff]  ;;  %s18272_s5 = scalar_lea.vmem %s21889_s23, %s13673_s26  ;;  %s14103_s23 = smov 10  }
  0x20   : > { %11839 = vmatpush3.msra.mxu0 %v820_v7  ;;  %v774_v27 = vld [vmem:[%s14265_s1 + $0x90] sm:$0xff]  ;;  %v775_v28 = vld [vmem:[%s14265_s1 + $0x98] sm:$0xff]  ;;  %v776_v29 = vld [vmem:[%s14265_s1 + $0xa0] sm:$0xff] }
  0x21   : > { %11840 = vmatprep.subr.mxu0 %v21390_v1  ;;  %v777_v30 = vld [vmem:[%s14265_s1 + $0xa8] sm:$0xff]  ;;  %v778_v31 = vld [vmem:[%s14265_s1 + $0xb0] sm:$0xff]  ;;  %v779_v32 = vld [vmem:[%s14265_s1 + $0xb8] sm:$0xff] }
  0x22   : > { %11841 = vmatpush3.msra.mxu0 %v819_v8  ;;  %v780_v33 = vld [vmem:[%s14265_s1 + $0xc0] sm:$0xff]  ;;  %v781_v34 = vld [vmem:[%s14265_s1 + $0xc8] sm:$0xff]  ;;  %v782_v35 = vld [vmem:[%s14265_s1 + $0xd0] sm:$0xff] }
  0x23   : > { %11843 = vmatmul.mubr.msk.f32.vlgmr.msra.gmra.mxu0 %vm834_vm1, %v756_v9  ;;  %12241 = vmatprep.subr.mxu0 %v21390_v1  ;;  %v783_v36 = vld [vmem:[%s14265_s1 + $0xd8] sm:$0xff]  ;;  %v784_v37 = vld [vmem:[%s14265_s1 + $0xe0] sm:$0xff]  ;;  %v785_v38 = vld [vmem:[%s14265_s1 + $0xe8] sm:$0xff] }
  0x24   : > { %11845 = vmatprep.mubr.msk.f32.mxu0 %vm14097_vm0, %v21390_v1  ;;  %v786_v39 = vld [vmem:[%s14265_s1 + $0xf0] sm:$0xff]  ;;  %v787_v40 = vld [vmem:[%s14265_s1 + $0xf8] sm:$0xff]  ;;  %v788_v41 = vld [vmem:[%s14265_s1 + $0x100] sm:$0xff] }
  0x25   : > { %v789_v42 = vld [vmem:[%s14265_s1 + $0x108] sm:$0xff]  ;;  %v790_v43 = vld [vmem:[%s14265_s1 + $0x110] sm:$0xff]  ;;  %v791_v44 = vld [vmem:[%s14265_s1 + $0x118] sm:$0xff] }
  0x26   : > { %v792_v45 = vld [vmem:[%s14265_s1 + $0x120] sm:$0xff]  ;;  %v793_v46 = vld [vmem:[%s14265_s1 + $0x128] sm:$0xff]  ;;  %v794_v47 = vld [vmem:[%s14265_s1 + $0x130] sm:$0xff] }
  0x27   : > { %11846 = vmatmul.mubr.msk.f32.gmra.mxu0 %vm834_vm1, %v757_v10  ;;  %v795_v48 = vld [vmem:[%s14265_s1 + $0x138] sm:$0xff]  ;;  %v796_v49 = vld [vmem:[%s14265_s1 + $0x140] sm:$0xff]  ;;  %v797_v50 = vld [vmem:[%s14265_s1 + $0x148] sm:$0xff] }
  0x28   : > { %11848 = vmatprep.mubr.msk.f32.mxu0 %vm14097_vm0, %v21390_v1  ;;  %v798_v51 = vld [vmem:[%s14265_s1 + $0x150] sm:$0xff]  ;;  %v799_v52 = vld [vmem:[%s14265_s1 + $0x158] sm:$0xff]  ;;  %v800_v53 = vld [vmem:[%s14265_s1 + $0x160] sm:$0xff] }
  0x29   : > { %v801_v54 = vld [vmem:[%s14265_s1 + $0x168] sm:$0xff]  ;;  %v802_v55 = vld [vmem:[%s14265_s1 + $0x170] sm:$0xff]  ;;  %v803_v56 = vld [vmem:[%s14265_s1 + $0x178] sm:$0xff] }
  0x2a   : > { %v804_v57 = vld [vmem:[%s14265_s1 + $0x180] sm:$0xff]  ;;  %v805_v59 = vld [vmem:[%s14265_s1 + $0x188] sm:$0xff]  ;;  %v806_v62 = vld [vmem:[%s14265_s1 + $0x190] sm:$0xff] }
  0x2b   : > { %11849 = vmatmul.mubr.msk.f32.gmra.mxu0 %vm834_vm1, %v758_v11  ;;  %v807_v2 = vld [vmem:[%s14265_s1 + $0x198] sm:$0xff]  ;;  %v808_v5 = vld [vmem:[%s14265_s1 + $0x1a0] sm:$0xff]  ;;  %v809_v8 = vld [vmem:[%s14265_s1 + $0x1a8] sm:$0xff] }
  0x2c   : > { %11851 = vmatprep.mubr.msk.f32.mxu0 %vm14097_vm0, %v21390_v1  ;;  %v810_v11 = vld [vmem:[%s14265_s1 + $0x1b0] sm:$0xff] }
  0x2f   : > { %11852 = vmatmul.mubr.msk.f32.gmra.mxu0 %vm834_vm1, %v759_v12 }
  0x30   : > { %11854 = vmatprep.mubr.msk.f32.mxu0 %vm14097_vm0, %v21390_v1 }
  0x33   : > { %11855 = vmatmul.mubr.msk.f32.gmra.mxu0 %vm834_vm1, %v760_v13 }
  0x34   : > { %11857 = vmatprep.mubr.msk.f32.mxu0 %vm14097_vm0, %v21390_v1 }
  0x37   : > { %11858 = vmatmul.mubr.msk.f32.gmra.mxu0 %vm834_vm1, %v761_v14  ;;  %v811_v14 = vld [vmem:[%s14265_s1 + $0x1b8] sm:$0xff] }
  0x38   : > { %11860 = vmatprep.mubr.msk.f32.mxu0 %vm14097_vm0, %v21390_v1 }
  0x3b   : > { %11861 = vmatmul.mubr.msk.f32.gmra.mxu0 %vm834_vm1, %v762_v15 }
  0x3c   : > { %11863 = vmatprep.mubr.msk.f32.mxu0 %vm14097_vm0, %v21390_v1 }
  0x3f   : > { %11864 = vmatmul.mubr.msk.f32.gmra.mxu0 %vm834_vm1, %v763_v16 }
  0x40   : > { %11866 = vmatprep.mubr.msk.f32.mxu0 %vm14097_vm0, %v21390_v1 }
  0x43   : > { %11867 = vmatmul.mubr.msk.f32.gmra.mxu0 %vm834_vm1, %v764_v17  ;;  %v812_v17 = vld [vmem:[%s14265_s1 + $0x1c0] sm:$0xff] }
  0x44   : > { %11869 = vmatprep.mubr.msk.f32.mxu0 %vm14097_vm0, %v21390_v1 }
  0x47   : > { %11870 = vmatmul.mubr.msk.f32.gmra.mxu0 %vm834_vm1, %v765_v18 }
  0x48   : > { %11872 = vmatprep.mubr.msk.f32.mxu0 %vm14097_vm0, %v21390_v1 }
  0x4b   : > { %11873 = vmatmul.mubr.msk.f32.gmra.mxu0 %vm834_vm1, %v766_v19 }
  0x4c   : > { %11875 = vmatprep.mubr.msk.f32.mxu0 %vm14097_vm0, %v21390_v1 }
  0x4f   : > { %11876 = vmatmul.mubr.msk.f32.gmra.mxu0 %vm834_vm1, %v767_v20  ;;  %v813_v20 = vld [vmem:[%s14265_s1 + $0x1c8] sm:$0xff] }
  0x50   : > { %11878 = vmatprep.mubr.msk.f32.mxu0 %vm14097_vm0, %v21390_v1 }
  0x53   : > { %11879 = vmatmul.mubr.msk.f32.gmra.mxu0 %vm834_vm1, %v768_v21 }
  0x54   : > { %11881 = vmatprep.mubr.msk.f32.mxu0 %vm14097_vm0, %v21390_v1 }
  0x57   : > { %11882 = vmatmul.mubr.msk.f32.gmra.mxu0 %vm834_vm1, %v769_v22 }
  0x58   : > { %11884 = vmatprep.mubr.msk.f32.mxu0 %vm14097_vm0, %v21390_v1 }
  0x5b   : > { %11885 = vmatmul.mubr.msk.f32.gmra.mxu0 %vm834_vm1, %v770_v23  ;;  %v814_v23 = vld [vmem:[%s14265_s1 + $0x1d0] sm:$0xff] }
  0x5c   : > { %11887 = vmatprep.mubr.msk.f32.mxu0 %vm14097_vm0, %v21390_v1 }
  0x5f   : > { %11888 = vmatmul.mubr.msk.f32.gmra.mxu0 %vm834_vm1, %v771_v24 }
  0x60   : > { %11890 = vmatprep.mubr.msk.f32.mxu0 %vm14097_vm0, %v21390_v1 }
  0x63   : > { %11891 = vmatmul.mubr.msk.f32.gmra.mxu0 %vm834_vm1, %v772_v25 }
  0x64   : > { %11893 = vmatprep.mubr.msk.f32.mxu0 %vm14097_vm0, %v21390_v1 }
  0x67   : > { %11894 = vmatmul.mubr.msk.f32.gmra.mxu0 %vm834_vm1, %v773_v26  ;;  %v815_v26 = vld [vmem:[%s14265_s1 + $0x1d8] sm:$0xff] }
  0x68   : > { %11896 = vmatprep.mubr.msk.f32.mxu0 %vm14097_vm0, %v21390_v1 }
  0x6b   : > { %11897 = vmatmul.mubr.msk.f32.gmra.mxu0 %vm834_vm1, %v774_v27 }
  0x6c   : > { %11899 = vmatprep.mubr.msk.f32.mxu0 %vm14097_vm0, %v21390_v1 }
  0x6f   : > { %11900 = vmatmul.mubr.msk.f32.gmra.mxu0 %vm834_vm1, %v775_v28 }
  0x70   : > { %11902 = vmatprep.mubr.msk.f32.mxu0 %vm14097_vm0, %v21390_v1 }
  0x73   : > { %11903 = vmatmul.mubr.msk.f32.gmra.mxu0 %vm834_vm1, %v776_v29  ;;  %v816_v29 = vld [vmem:[%s14265_s1 + $0x1e0] sm:$0xff] }
  0x74   : > { %11905 = vmatprep.mubr.msk.f32.mxu0 %vm14097_vm0, %v21390_v1 }
  0x77   : > { %11906 = vmatmul.mubr.msk.f32.gmra.mxu0 %vm834_vm1, %v777_v30 }
  0x78   : > { %11908 = vmatprep.mubr.msk.f32.mxu0 %vm14097_vm0, %v21390_v1 }
  0x7b   : > { %11909 = vmatmul.mubr.msk.f32.gmra.mxu0 %vm834_vm1, %v778_v31 }
  0x7c   : > { %11911 = vmatprep.mubr.msk.f32.mxu0 %vm14097_vm0, %v21390_v1 }
  0x7f   : > { %11912 = vmatmul.mubr.msk.f32.gmra.mxu0 %vm834_vm1, %v779_v32  ;;  %v817_v32 = vld [vmem:[%s14265_s1 + $0x1e8] sm:$0xff] }
  0x80   : > { %11914 = vmatprep.mubr.msk.f32.mxu0 %vm14097_vm0, %v21390_v1 }
  0x83   : > { %11915 = vmatmul.mubr.msk.f32.gmra.mxu0 %vm834_vm1, %v780_v33 }
  0x84   : > { %11917 = vmatprep.mubr.msk.f32.mxu0 %vm14097_vm0, %v21390_v1 }
  0x87   : > { %11918 = vmatmul.mubr.msk.f32.gmra.mxu0 %vm834_vm1, %v781_v34 }
  0x88   : > { %11920 = vmatprep.mubr.msk.f32.mxu0 %vm14097_vm0, %v21390_v1 }
  0x8b   : > { %11921 = vmatmul.mubr.msk.f32.gmra.mxu0 %vm834_vm1, %v782_v35  ;;  %v818_v35 = vld [vmem:[%s14265_s1 + $0x1f0] sm:$0xff] }
  0x8c   : > { %11923 = vmatprep.mubr.msk.f32.mxu0 %vm14097_vm0, %v21390_v1 }
  0x8f   : > { %11924 = vmatmul.mubr.msk.f32.gmra.mxu0 %vm834_vm1, %v783_v36 }
  0x90   : > { %11926 = vmatprep.mubr.msk.f32.mxu0 %vm14097_vm0, %v21390_v1 }
  0x93   : > { %11927 = vmatmul.mubr.msk.f32.gmra.mxu0 %vm834_vm1, %v784_v37 }
  0x94   : > { %11929 = vmatprep.mubr.msk.f32.mxu0 %vm14097_vm0, %v21390_v1 }
  0x97   : > { %11930 = vmatmul.mubr.msk.f32.gmra.mxu0 %vm834_vm1, %v785_v38 }
  0x98   : > { %11932 = vmatprep.mubr.msk.f32.mxu0 %vm14097_vm0, %v21390_v1 }
  0x9b   : > { %11933 = vmatmul.mubr.msk.f32.gmra.mxu0 %vm834_vm1, %v786_v39 }
  0x9c   : > { %11935 = vmatprep.mubr.msk.f32.mxu0 %vm14097_vm0, %v21390_v1 }
  0x9f   : > { %11936 = vmatmul.mubr.msk.f32.gmra.mxu0 %vm834_vm1, %v787_v40  ;;  %v14554_v40 = vld [vmem:[%s21332_s7 + $0x8] sm:$0x3f] }
  0xa0   : > { %11938 = vmatprep.mubr.msk.f32.mxu0 %vm14097_vm0, %v21390_v1  ;;  %1472 = vmatprep.mubr.f32.mxu1 %v14554_v40 }
  0xa3   : > { %11939 = vmatmul.mubr.msk.f32.gmra.mxu0 %vm834_vm1, %v788_v41 }
  0xa4   : > { %11941 = vmatprep.mubr.msk.f32.mxu0 %vm14097_vm0, %v21390_v1 }
  0xa7   : > { %11942 = vmatmul.mubr.msk.f32.gmra.mxu0 %vm834_vm1, %v789_v42  ;;  %v14560_v42 = vld [vmem:[%s21332_s7] sm:$0x3f] }
  0xa8   : > { %11944 = vmatprep.mubr.msk.f32.mxu0 %vm14097_vm0, %v21390_v1  ;;  %1858 = vxpose.xlu0.b32.start.end [1/1] (short) %v14560_v42, 128 }
  0xab   : > { %11945 = vmatmul.mubr.msk.f32.gmra.mxu0 %vm834_vm1, %v790_v43 }
  0xac   : > { %11947 = vmatprep.mubr.msk.f32.mxu0 %vm14097_vm0, %v21390_v1 }
  0xaf   : > { %11948 = vmatmul.mubr.msk.f32.gmra.mxu0 %vm834_vm1, %v791_v44 }
  0xb0   : > { %11950 = vmatprep.mubr.msk.f32.mxu0 %vm14097_vm0, %v21390_v1 }
  0xb3   : > { %11951 = vmatmul.mubr.msk.f32.gmra.mxu0 %vm834_vm1, %v792_v45 }
  0xb4   : > { %11953 = vmatprep.mubr.msk.f32.mxu0 %vm14097_vm0, %v21390_v1 }
  0xb7   : > { %11954 = vmatmul.mubr.msk.f32.gmra.mxu0 %vm834_vm1, %v793_v46 }
  0xb8   : > { %11956 = vmatprep.mubr.msk.f32.mxu0 %vm14097_vm0, %v21390_v1 }
  0xbb   : > { %11957 = vmatmul.mubr.msk.f32.gmra.mxu0 %vm834_vm1, %v794_v47 }
  0xbc   : > { %11959 = vmatprep.mubr.msk.f32.mxu0 %vm14097_vm0, %v21390_v1 }
  0xbf   : > { %11960 = vmatmul.mubr.msk.f32.gmra.mxu0 %vm834_vm1, %v795_v48 }
  0xc0   : > { %11962 = vmatprep.mubr.msk.f32.mxu0 %vm14097_vm0, %v21390_v1 }
  0xc3   : > { %11963 = vmatmul.mubr.msk.f32.gmra.mxu0 %vm834_vm1, %v796_v49 }
  0xc4   : > { %11965 = vmatprep.mubr.msk.f32.mxu0 %vm14097_vm0, %v21390_v1 }
  0xc7   : > { %11966 = vmatmul.mubr.msk.f32.gmra.mxu0 %vm834_vm1, %v797_v50 }
  0xc8   : > { %11968 = vmatprep.mubr.msk.f32.mxu0 %vm14097_vm0, %v21390_v1 }
  0xcb   : > { %11969 = vmatmul.mubr.msk.f32.gmra.mxu0 %vm834_vm1, %v798_v51 }
  0xcc   : > { %11971 = vmatprep.mubr.msk.f32.mxu0 %vm14097_vm0, %v21390_v1 }
  0xcf   : > { %11972 = vmatmul.mubr.msk.f32.gmra.mxu0 %vm834_vm1, %v799_v52 }
  0xd0   : > { %11974 = vmatprep.mubr.msk.f32.mxu0 %vm14097_vm0, %v21390_v1 }
  0xd3   : > { %11975 = vmatmul.mubr.msk.f32.gmra.mxu0 %vm834_vm1, %v800_v53 }
  0xd4   : > { %11977 = vmatprep.mubr.msk.f32.mxu0 %vm14097_vm0, %v21390_v1 }
  0xd7   : > { %11978 = vmatmul.mubr.msk.f32.gmra.mxu0 %vm834_vm1, %v801_v54 }
  0xd8   : > { %11980 = vmatprep.mubr.msk.f32.mxu0 %vm14097_vm0, %v21390_v1 }
  0xdb   : > { %11981 = vmatmul.mubr.msk.f32.gmra.mxu0 %vm834_vm1, %v802_v55 }
  0xdc   : > { %11983 = vmatprep.mubr.msk.f32.mxu0 %vm14097_vm0, %v21390_v1 }
  0xdf   : > { %11984 = vmatmul.mubr.msk.f32.gmra.mxu0 %vm834_vm1, %v803_v56 }
  0xe0   : > { %11986 = vmatprep.mubr.msk.f32.mxu0 %vm14097_vm0, %v21390_v1 }
  0xe3   : > { %v14466_v58 = vpop.f32.mrf.mxu0  ;;  %11987 = vmatmul.mubr.msk.f32.gmra.mxu0 %vm834_vm1, %v804_v57 }
  0xe4   : > { %11989 = vmatprep.mubr.msk.f32.mxu0 %vm14097_vm0, %v21390_v1 }
  0xe5   : > { %v11844_v60 = vpop.f32.mrf.mxu0  ;;  %1890 = vxpose.xlu0.b32.start.end [1/1] (short) %v14554_v40, 128 }
  0xe7   : > { %v14472_v61 = vpop.f32.mrf.mxu0  ;;  %11990 = vmatmul.mubr.msk.f32.gmra.mxu0 %vm834_vm1, %v805_v59 }
  0xe8   : > { %11992 = vmatprep.mubr.msk.f32.mxu0 %vm14097_vm0, %v21390_v1 }
  0xe9   : > { %v11847_v63 = vpop.f32.mrf.mxu0 }
  0xeb   : > { %v14478_v0 = vpop.f32.mrf.mxu0  ;;  %11993 = vmatmul.mubr.msk.f32.gmra.mxu0 %vm834_vm1, %v806_v62 }
  0xec   : > { %11995 = vmatprep.mubr.msk.f32.mxu0 %vm14097_vm0, %v21390_v1 }
  0xed   : > { %v11850_v3 = vpop.f32.mrf.mxu0 }
  0xef   : > { %v14484_v4 = vpop.f32.mrf.mxu0  ;;  %11996 = vmatmul.mubr.msk.f32.gmra.mxu0 %vm834_vm1, %v807_v2 }
  0xf0   : > { %11998 = vmatprep.mubr.msk.f32.mxu0 %vm14097_vm0, %v21390_v1 }
  0xf1   : > { %v11853_v6 = vpop.f32.mrf.mxu0 }
  0xf3   : > { %v14490_v7 = vpop.f32.mrf.mxu0  ;;  %11999 = vmatmul.mubr.msk.f32.gmra.mxu0 %vm834_vm1, %v808_v5 }
  0xf4   : > { %12001 = vmatprep.mubr.msk.f32.mxu0 %vm14097_vm0, %v21390_v1 }
  0xf5   : > { %v11856_v9 = vpop.f32.mrf.mxu0 }
  0xf7   : > { %v14496_v10 = vpop.f32.mrf.mxu0  ;;  %12002 = vmatmul.mubr.msk.f32.gmra.mxu0 %vm834_vm1, %v809_v8 }
  0xf8   : > { %12004 = vmatprep.mubr.msk.f32.mxu0 %vm14097_vm0, %v21390_v1 }
  0xf9   : > { %v11859_v12 = vpop.f32.mrf.mxu0 }
  0xfb   : > { %v14502_v13 = vpop.f32.mrf.mxu0  ;;  %12005 = vmatmul.mubr.msk.f32.gmra.mxu0 %vm834_vm1, %v810_v11 }
  0xfc   : > { %12007 = vmatprep.mubr.msk.f32.mxu0 %vm14097_vm0, %v21390_v1 }
  0xfd   : > { %v11862_v15 = vpop.f32.mrf.mxu0 }
  0xff   : > { %v14508_v16 = vpop.f32.mrf.mxu0  ;;  %12008 = vmatmul.mubr.msk.f32.gmra.mxu0 %vm834_vm1, %v811_v14 }
 0x100   : > { %12010 = vmatprep.mubr.msk.f32.mxu0 %vm14097_vm0, %v21390_v1 }
 0x101   : > { %v11865_v18 = vpop.f32.mrf.mxu0 }
 0x102   : > { %v14580_v18 = vld [vmem:[%s21336_s11] ss:$0 sm:$0xff] }
 0x103   : > { %v14514_v19 = vpop.f32.mrf.mxu0  ;;  %12011 = vmatmul.mubr.msk.f32.gmra.mxu0 %vm834_vm1, %v812_v17 }
 0x104   : > { %12013 = vmatprep.mubr.msk.f32.mxu0 %vm14097_vm0, %v21390_v1 }
 0x105   : > { %v11868_v21 = vpop.f32.mrf.mxu0 }
 0x107   : > { %v14520_v22 = vpop.f32.mrf.mxu0  ;;  %12014 = vmatmul.mubr.msk.f32.gmra.mxu0 %vm834_vm1, %v813_v20 }
 0x108   : > { %12016 = vmatprep.mubr.msk.f32.mxu0 %vm14097_vm0, %v21390_v1 }
 0x109   : > { %v11871_v24 = vpop.f32.mrf.mxu0 }
 0x10b   : > { %v14526_v25 = vpop.f32.mrf.mxu0  ;;  %12017 = vmatmul.mubr.msk.f32.gmra.mxu0 %vm834_vm1, %v814_v23 }
 0x10c   : > { %12019 = vmatprep.mubr.msk.f32.mxu0 %vm14097_vm0, %v21390_v1 }
 0x10d   : > { %v11874_v27 = vpop.f32.mrf.mxu0 }
 0x10f   : > { %v14532_v28 = vpop.f32.mrf.mxu0  ;;  %12020 = vmatmul.mubr.msk.f32.gmra.mxu0 %vm834_vm1, %v815_v26 }
 0x110   : > { %12022 = vmatprep.mubr.msk.f32.mxu0 %vm14097_vm0, %v21390_v1 }
 0x111   : > { %v11877_v30 = vpop.f32.mrf.mxu0 }
 0x113   : > { %v14538_v31 = vpop.f32.mrf.mxu0  ;;  %12023 = vmatmul.mubr.msk.f32.gmra.mxu0 %vm834_vm1, %v816_v29 }
 0x114   : > { %12025 = vmatprep.mubr.msk.f32.mxu0 %vm14097_vm0, %v21390_v1 }
 0x115   : > { %v11880_v33 = vpop.f32.mrf.mxu0 }
 0x117   : > { %v1155_v34 = vpop.f32.mrf.mxu0  ;;  %12026 = vmatmul.mubr.msk.f32.gmra.mxu0 %vm834_vm1, %v817_v32 }
 0x118   : > { %12028 = vmatprep.mubr.msk.f32.mxu0 %vm14097_vm0, %v21390_v1  ;;  %v14604_v32 = vadd.f32 %v14580_v18, %v1155_v34  ;;  %v14624_v34 = vadd.f32 %v14580_v18, %v14532_v28  ;;  %v14644_v28 = vadd.f32 %v14580_v18, %v14520_v22  ;;  %v14664_v22 = vadd.f32 %v14580_v18, %v14508_v16 }
 0x119   : > { %v11883_v36 = vpop.f32.mrf.mxu0 }
 0x11a   : > { %v14613_v36 = vadd.f32 %v14580_v18, %v14538_v31  ;;  %v14633_v31 = vadd.f32 %v14580_v18, %v14526_v25  ;;  %v14653_v25 = vadd.f32 %v14580_v18, %v14514_v19 }
 0x11b   : > { %v1160_v37 = vpop.f32.mrf.mxu0  ;;  %12029 = vmatmul.mubr.msk.f32.gmra.mxu0 %vm834_vm1, %v818_v35 }
 0x11c   : > { %12243 = vmatprep.mubr.msk.f32.mxu0 %vm14097_vm0, %v21390_v1  ;;  %v14594_v27 = vadd.f32 %v14580_v18, %v1160_v37 }
 0x11d   : > { %v11886_v38 = vpop.f32.mrf.mxu0 }
 0x11f   : > { %v1165_v39 = vpop.f32.mrf.mxu0 }
 0x120   : > { %v14587_v23 = vadd.f32 %v14580_v18, %v1165_v39 }
 0x121   : > { %v11889_v41 = vpop.f32.mrf.mxu0 }
 0x123   : > { %v14563_v43 = vpop.f32.mrf.mxu0 }
 0x125   : > { %v11892_v44 = vpop.f32.mrf.mxu0 }
 0x127   : > { %v14565_v45 = vpop.f32.mrf.mxu0 }
 0x129   : > { %v11895_v46 = vpop.f32.mrf.mxu0 }
 0x12b   : > { %v14567_v47 = vpop.f32.mrf.mxu0 }
 0x12d   : > { %v11898_v48 = vpop.f32.mrf.mxu0 }
 0x12f   : > { %v14569_v49 = vpop.f32.mrf.mxu0 }
 0x131   : > { %v11901_v50 = vpop.f32.mrf.mxu0 }
 0x133   : > { %v14571_v51 = vpop.f32.mrf.mxu0 }
 0x135   : > { %v11904_v52 = vpop.f32.mrf.mxu0 }
 0x137   : > { %v14573_v53 = vpop.f32.mrf.mxu0 }
 0x138   : > { %v14681_v16 = vadd.f32 %v14580_v18, %v14573_v53 }
 0x139   : > { %v11907_v54 = vpop.f32.mrf.mxu0 }
 0x13b   : > { %v14575_v55 = vpop.f32.mrf.mxu0 }
 0x13c   : > { %v14669_v19 = vadd.f32 %v14580_v18, %v14575_v55  ;;  %v14686_v55 = vadd.f32 %v14580_v18, %v14496_v10  ;;  %v14703_v10 = vadd.f32 %v14580_v18, %v14569_v49  ;;  %v14719_v49 = vld [vmem:[%s21332_s7 + $0x10] sm:$0x3f] }
 0x13d   : > { %v11910_v56 = vpop.f32.mrf.mxu0  ;;  %1922 = vxpose.xlu1.b32.start.end [1/1] (short) %v14719_v49, 128 }
 0x13f   : > { %v1205_v57 = vpop.f32.mrf.mxu0 }
 0x140   : > { %v14659_v54 = vadd.f32 %v14580_v18, %v1205_v57 }
 0x141   : > { %v11913_v59 = vpop.f32.mrf.mxu0 }
 0x142   : > { %v14674_v59 = vadd.f32 %v14580_v18, %v14502_v13  ;;  %v14691_v13 = vadd.f32 %v14580_v18, %v14571_v51  ;;  %v14708_v51 = vadd.f32 %v14580_v18, %v14484_v4 }
 0x143   : > { %v1210_v60 = vpop.f32.mrf.mxu0 }
 0x144   : > { %v14648_v50 = vadd.f32 %v14580_v18, %v1210_v60 }
 0x145   : > { %v11916_v62 = vpop.f32.mrf.mxu0 }
 0x146   : > { %v14696_v62 = vadd.f32 %v14580_v18, %v14490_v7  ;;  %v14713_v7 = vadd.f32 %v14580_v18, %v14567_v47  ;;  %v14731_v47 = vadd.f32 %v14580_v18, %v14565_v45 }
 0x147   : > { %v1215_v63 = vpop.f32.mrf.mxu0 }
 0x148   : > { %v14639_v46 = vadd.f32 %v14580_v18, %v1215_v63 }
 0x149   : > { %v11919_v2 = vpop.f32.mrf.mxu0 }
 0x14a   : > { %v14723_v2 = vadd.f32 %v14580_v18, %v14478_v0  ;;  %v14741_v0 = vadd.f32 %v14580_v18, %v14563_v43 }
 0x14b   : > { %v1220_v3 = vpop.f32.mrf.mxu0 }
 0x14c   : > { %v14628_v41 = vadd.f32 %v14580_v18, %v1220_v3  ;;  %v14736_v3 = vadd.f32 %v14580_v18, %v14472_v61  ;;  %v14753_v61 = vld [vmem:[%s21332_s7 + $0x18] sm:$0x3f] }
 0x14d   : > { %v11922_v5 = vpop.f32.mrf.mxu0 }
 0x14f   : > { %v1225_v6 = vpop.f32.mrf.mxu0 }
 0x150   : > { %v14619_v38 = vadd.f32 %v14580_v18, %v1225_v6  ;;  %v14746_v6 = vadd.f32 %v14580_v18, %v14466_v58 }
 0x151   : > { %v11925_v8 = vpop.f32.mrf.mxu0 }
 0x152   : > { %21604 = vst [vmem:[#allocation6_spill] sm:$0xff] %v14619_v38 }
 0x153   : > { %v1230_v9 = vpop.f32.mrf.mxu0 }
 0x154   : > { %v14608_v35 = vadd.f32 %v14580_v18, %v1230_v9 }
 0x155   : > { %v11928_v11 = vpop.f32.mrf.mxu0 }
 0x156   : > { %21603 = vst [vmem:[#allocation5_spill] sm:$0xff] %v14608_v35 }
 0x157   : > { %v1235_v12 = vpop.f32.mrf.mxu0 }
 0x158   : > { %v14600_v30 = vadd.f32 %v14580_v18, %v1235_v12 }
 0x159   : > { %v11931_v14 = vpop.f32.mrf.mxu0 }
 0x15a   : > { %21602 = vst [vmem:[#allocation4_spill] sm:$0xff] %v14600_v30 }
 0x15b   : > { %v1240_v15 = vpop.f32.mrf.mxu0 }
 0x15c   : > { %v14590_v26 = vadd.f32 %v14580_v18, %v1240_v15 }
 0x15d   : > { %v11934_v17 = vpop.f32.mrf.mxu0 }
 0x15e   : > { %21601 = vst [vmem:[#allocation3_spill] sm:$0xff] %v14590_v26 }
 0x15f   : > { %v1245_v20 = vpop.f32.mrf.mxu0 }
 0x160   : > { %v14584_v21 = vadd.f32 %v14580_v18, %v1245_v20 }
 0x161   : > { %v11937_v24 = vpop.f32.mrf.mxu0 }
 0x162   : > { %21600 = vst [vmem:[#allocation2_spill] sm:$0xff] %v14584_v21  ;;  %11087 = vmatprep.subr.mxu1 %v14584_v21 }
 0x163   : > { %v14596_v29 = vpop.f32.mrf.mxu0  ;;  %11088 = vmatpush3.msra.mxu1 %v14587_v23 }
 0x164   : > { %11089 = vmatprep.subr.mxu1 %v14590_v26 }
 0x165   : > { %v11940_v33 = vpop.f32.mrf.mxu0  ;;  %11090 = vmatpush3.msra.mxu1 %v14594_v27 }
 0x166   : > { %11091 = vmatprep.subr.mxu1 %v14600_v30 }
 0x167   : > { %v14615_v37 = vpop.f32.mrf.mxu0  ;;  %11092 = vmatpush3.msra.mxu1 %v14604_v32 }
 0x168   : > { %11093 = vmatprep.subr.mxu1 %v14608_v35 }
 0x169   : > { %v11943_v39 = vpop.f32.mrf.mxu0  ;;  %11094 = vmatpush3.msra.mxu1 %v14613_v36 }
 0x16a   : > { %11095 = vmatprep.subr.mxu1 %v14619_v38 }
 0x16b   : > { %v14635_v44 = vpop.f32.mrf.mxu0  ;;  %11096 = vmatpush3.msra.mxu1 %v14624_v34 }
 0x16c   : > { %11097 = vmatprep.subr.mxu1 %v14628_v41 }
 0x16d   : > { %v11946_v48 = vpop.f32.mrf.mxu0  ;;  %11098 = vmatpush3.msra.mxu1 %v14633_v31 }
 0x16e   : > { %11099 = vmatprep.subr.mxu1 %v14639_v46 }
 0x16f   : > { %v14655_v52 = vpop.f32.mrf.mxu0  ;;  %11100 = vmatpush3.msra.mxu1 %v14644_v28 }
 0x170   : > { %11101 = vmatprep.subr.mxu1 %v14648_v50 }
 0x171   : > { %v11949_v56 = vpop.f32.mrf.mxu0  ;;  %11102 = vmatpush3.msra.mxu1 %v14653_v25 }
 0x172   : > { %11103 = vmatprep.subr.mxu1 %v14659_v54 }
 0x173   : > { %v14676_v57 = vpop.f32.mrf.mxu0  ;;  %11104 = vmatpush3.msra.mxu1 %v14664_v22 }
 0x174   : > { %11105 = vmatprep.subr.mxu1 %v14669_v19 }
 0x175   : > { %v11952_v60 = vpop.f32.mrf.mxu0  ;;  %11106 = vmatpush3.msra.mxu1 %v14674_v59 }
 0x176   : > { %11107 = vmatprep.subr.mxu1 %v14681_v16 }
 0x177   : > { %v14698_v53 = vpop.f32.mrf.mxu0  ;;  %11108 = vmatpush3.msra.mxu1 %v14686_v55 }
 0x178   : > { %11109 = vmatprep.subr.mxu1 %v14691_v13 }
 0x179   : > { %v11955_v63 = vpop.f32.mrf.mxu0  ;;  %11110 = vmatpush3.msra.mxu1 %v14696_v62 }
 0x17a   : > { %11111 = vmatprep.subr.mxu1 %v14703_v10  ;;  %1954 = vxpose.xlu1.b32.start.end [1/1] (short) (narrow) %v14753_v61, 120 }
 0x17b   : > { %v14725_v4 = vpop.f32.mrf.mxu0  ;;  %11112 = vmatpush3.msra.mxu1 %v14708_v51 }
 0x17c   : > { %11113 = vmatprep.subr.mxu1 %v14713_v7 }
 0x17d   : > { %v11958_v5 = vpop.f32.mrf.mxu0  ;;  %11114 = vmatpush3.msra.mxu1 %v14723_v2 }
 0x17e   : > { %11115 = vmatprep.subr.mxu1 %v14731_v47 }
 0x17f   : > { %v1285_v45 = vpop.f32.mrf.mxu0  ;;  %11116 = vmatpush3.msra.mxu1 %v14736_v3 }
 0x180   : > { %11117 = vmatprep.subr.mxu1 %v14741_v0 }
 0x181   : > { %v11961_v8 = vpop.f32.mrf.mxu0  ;;  %11118 = vmatpush3.msra.mxu1 %v14746_v6 }
 0x182   : > { %1478 = vmatprep.subr.mxu1 %v21390_v1  ;;  %1473 = vmatmul.mubr.f32.vlgmr.msra.gmra.mxu1 %v14560_v42 }
 0x183   : > { %v1290_v58 = vpop.f32.mrf.mxu0  ;;  %10470 = vmatprep.mubr.msk.f32.mxu1 %vm1404_vm2, %v14753_v61 }
 0x185   : > { %v11964_v43 = vpop.f32.mrf.mxu0 }
 0x187   : > { %v1295_v9 = vpop.f32.mrf.mxu0 }
 0x189   : > { %v11967_v11 = vpop.f32.mrf.mxu0 }
 0x18b   : > { %v1300_v12 = vpop.f32.mrf.mxu0 }
 0x18d   : > { %v11970_v14 = vpop.f32.mrf.mxu0 }
 0x18f   : > { %v1305_v15 = vpop.f32.mrf.mxu0 }
 0x191   : > { %v11973_v17 = vpop.f32.mrf.mxu0 }
 0x193   : > { %v1310_v20 = vpop.f32.mrf.mxu0 }
 0x194   : > { %v14776_v17 = vadd.f32 %v14580_v18, %v1310_v20 }
 0x195   : > { %v11976_v24 = vpop.f32.mrf.mxu0 }
 0x196   : > { %21608 = vst [vmem:[#allocation10_spill] sm:$0xff] %v14776_v17 }
 0x197   : > { %v1315_v33 = vpop.f32.mrf.mxu0 }
 0x198   : > { %v14771_v11 = vadd.f32 %v14580_v18, %v1315_v33 }
 0x199   : > { %v11979_v39 = vpop.f32.mrf.mxu0 }
 0x19a   : > { %21607 = vst [vmem:[#allocation9_spill] sm:$0xff] %v14771_v11  ;;  %v14783_v39 = vadd.f32 %v14580_v18, %v1305_v15 }
 0x19b   : > { %v1320_v48 = vpop.f32.mrf.mxu0 }
 0x19c   : > { %v14764_v8 = vadd.f32 %v14580_v18, %v1320_v48  ;;  %21609 = vst [vmem:[#allocation11_spill] sm:$0xff] %v14783_v39  ;;  %v14788_v48 = vadd.f32 %v14580_v18, %v1300_v12 }
 0x19d   : > { %v11982_v56 = vpop.f32.mrf.mxu0 }
 0x19e   : > { %21606 = vst [vmem:[#allocation8_spill] sm:$0xff] %v14764_v8  ;;  %21610 = vst [vmem:[#allocation12_spill] sm:$0xff] %v14788_v48  ;;  %v14795_v56 = vadd.f32 %v14580_v18, %v1295_v9 }
 0x19f   : > { %v1325_v60 = vpop.f32.mrf.mxu0 }
 0x1a0   : > { %v14761_v63 = vadd.f32 %v14580_v18, %v1325_v60  ;;  %21611 = vst [vmem:[#allocation13_spill] sm:$0xff] %v14795_v56  ;;  %v14800_v60 = vadd.f32 %v14580_v18, %v1290_v58 }
 0x1a1   : > { %v11985_v5 = vpop.f32.mrf.mxu0 }
 0x1a2   : > { %21605 = vst [vmem:[#allocation7_spill] sm:$0xff] %v14761_v63  ;;  %1479 = vmatpush1.msra.mxu1 %v14761_v63  ;;  %21612 = vst [vmem:[#allocation14_spill] sm:$0xff] %v14800_v60  ;;  %v14807_v5 = vadd.f32 %v14580_v18, %v1285_v45 }
 0x1a3   : > { %v14767_v43 = vpop.f32.mrf.mxu0  ;;  %1480 = vmatprep.subr.mxu1 %v21390_v1 }
 0x1a4   : > { %1481 = vmatpush1.msra.mxu1 %v14764_v8  ;;  %21613 = vst [vmem:[#allocation15_spill] sm:$0xff] %v14807_v5 }
 0x1a5   : > { %v11988_v14 = vpop.f32.mrf.mxu0  ;;  %1482 = vmatprep.subr.mxu1 %v21390_v1 }
 0x1a6   : > { %1483 = vmatpush1.msra.mxu1 %v14771_v11  ;;  %v14813_v14 = vadd.f32 %v14580_v18, %v14725_v4 }
 0x1a7   : > { %v14779_v24 = vpop.f32.mrf.mxu0  ;;  %1484 = vmatprep.subr.mxu1 %v21390_v1 }
 0x1a8   : > { %1485 = vmatpush1.msra.mxu1 %v14776_v17  ;;  %21614 = vst [vmem:[#allocation16_spill] sm:$0xff] %v14813_v14 }
 0x1a9   : > { %v11991_v33 = vpop.f32.mrf.mxu0  ;;  %1486 = vmatprep.subr.mxu1 %v21390_v1 }
 0x1aa   : > { %1487 = vmatpush1.msra.mxu1 %v14783_v39  ;;  %v14821_v33 = vadd.f32 %v14580_v18, %v14698_v53 }
 0x1ab   : > { %v14791_v20 = vpop.f32.mrf.mxu0  ;;  %1488 = vmatprep.subr.mxu1 %v21390_v1 }
 0x1ac   : > { %1489 = vmatpush1.msra.mxu1 %v14788_v48  ;;  %21615 = vst [vmem:[#allocation17_spill] sm:$0xff] %v14821_v33 }
 0x1ad   : > { %v11994_v15 = vpop.f32.mrf.mxu0  ;;  %1490 = vmatprep.subr.mxu1 %v21390_v1 }
 0x1ae   : > { %1491 = vmatpush1.msra.mxu1 %v14795_v56  ;;  %v14827_v15 = vadd.f32 %v14580_v18, %v14676_v57  ;;  %v14840_v57 = vadd.f32 %v14580_v18, %v14635_v44 }
 0x1af   : > { %v14803_v12 = vpop.f32.mrf.mxu0  ;;  %1492 = vmatprep.subr.mxu1 %v21390_v1 }
 0x1b0   : > { %1493 = vmatpush1.msra.mxu1 %v14800_v60  ;;  %21616 = vst [vmem:[#allocation18_spill] sm:$0xff] %v14827_v15  ;;  %21618 = vst [vmem:[#allocation20_spill] sm:$0xff] %v14840_v57 }
 0x1b1   : > { %v11997_v9 = vpop.f32.mrf.mxu0  ;;  %1494 = vmatprep.subr.mxu1 %v21390_v1 }
 0x1b2   : > { %1495 = vmatpush1.msra.mxu1 %v14807_v5  ;;  %v14833_v9 = vadd.f32 %v14580_v18, %v14655_v52  ;;  %v14846_v52 = vadd.f32 %v14580_v18, %v14615_v37 }
 0x1b3   : > { %v14816_v58 = vpop.f32.mrf.mxu0  ;;  %1496 = vmatprep.subr.mxu1 %v21390_v1 }
 0x1b4   : > { %1497 = vmatpush1.msra.mxu1 %v14813_v14  ;;  %21617 = vst [vmem:[#allocation19_spill] sm:$0xff] %v14833_v9  ;;  %21619 = vst [vmem:[#allocation21_spill] sm:$0xff] %v14846_v52 }
 0x1b5   : > { %v12000_v45 = vpop.f32.mrf.mxu0  ;;  %1498 = vmatprep.subr.mxu1 %v21390_v1 }
 0x1b6   : > { %1499 = vmatpush1.msra.mxu1 %v14821_v33 }
 0x1b7   : > { %v1355_v4 = vpop.f32.mrf.mxu0  ;;  %1500 = vmatprep.subr.mxu1 %v21390_v1 }
 0x1b8   : > { %1501 = vmatpush1.msra.mxu1 %v14827_v15 }
 0x1b9   : > { %v12003_v53 = vpop.f32.mrf.mxu0  ;;  %1502 = vmatprep.subr.mxu1 %v21390_v1 }
 0x1ba   : > { %1503 = vmatpush1.msra.mxu1 %v14833_v9  ;;  %v14852_v53 = vadd.f32 %v14580_v18, %v14596_v29 }
 0x1bb   : > { %v1360_v45 = vpop.f32.mrf.mxu0  ;;  %1504 = vmatprep.subr.mxu1 %v21390_v1 }
 0x1bc   : > { %1505 = vmatpush1.msra.mxu1 %v14840_v57  ;;  %21620 = vst [vmem:[#allocation22_spill] sm:$0xff] %v14852_v53 }
 0x1bd   : > { %v12006_v15 = vpop.f32.mrf.mxu0  ;;  %1506 = vmatprep.subr.mxu1 %v21390_v1 }
 0x1be   : > { %1507 = vmatpush1.msra.mxu1 %v14846_v52 }
 0x1bf   : > { %v1365_v44 = vpop.f32.mrf.mxu0  ;;  %1508 = vmatprep.subr.mxu1 %v21390_v1 }
 0x1c0   : > { %1509 = vmatpush1.msra.mxu1 %v14852_v53 }
 0x1c1   : > { %v12009_v9 = vpop.f32.mrf.mxu0  ;;  %1512 = vmatprep.subr.mxu1 %v21390_v1 }
 0x1c3   : > { %v1370_v37 = vpop.f32.mrf.mxu0 }
 0x1c5   : > { %v12012_v33 = vpop.f32.mrf.mxu0 }
 0x1c6   : > { %v14902_v33 = vadd.f32 %v14580_v18, %v1355_v4  ;;  %v14920_v4 = vadd.f32 %v14580_v18, %v14791_v20  ;;  %v1579_v20 = vmul.f32 %v14584_v21, %v14584_v21 }
 0x1c7   : > { %v1375_v57 = vpop.f32.mrf.mxu0 }
 0x1c8   : > { %21630 = vst [vmem:[#allocation32_spill] sm:$0xff] %v14902_v33  ;;  %21633 = vst [vmem:[#allocation35_spill] sm:$0xff] %v14920_v4 }
 0x1c9   : > { %v12015_v15 = vpop.f32.mrf.mxu0 }
 0x1ca   : > { %v1559_v15 = vmul.f32 %v14624_v34, %v14624_v34 }
 0x1cb   : > { %v1380_v14 = vpop.f32.mrf.mxu0 }
 0x1cd   : > { %v12018_v5 = vpop.f32.mrf.mxu0 }
 0x1cf   : > { %v1385_v60 = vpop.f32.mrf.mxu0 }
 0x1d1   : > { %v12021_v56 = vpop.f32.mrf.mxu0 }
 0x1d2   : > { %v14887_v56 = vadd.f32 %v14580_v18, %v1370_v37  ;;  %v1560_v37 = vmul.f32 %v14613_v36, %v14613_v36 }
 0x1d3   : > { %v1390_v29 = vpop.f32.mrf.mxu0 }
 0x1d4   : > { %v14867_v5 = vadd.f32 %v14580_v18, %v1390_v29  ;;  %21627 = vst [vmem:[#allocation29_spill] sm:$0xff] %v14887_v56  ;;  %v1574_v29 = vmul.f32 %v14628_v41, %v14628_v41 }
 0x1d5   : > { %v12024_v48 = vpop.f32.mrf.mxu0 }
 0x1d6   : > { %21623 = vst [vmem:[#allocation25_spill] sm:$0xff] %v14867_v5  ;;  %v14872_v48 = vadd.f32 %v14580_v18, %v1385_v60  ;;  %v14892_v60 = vadd.f32 %v14580_v18, %v1365_v44  ;;  %v1576_v44 = vmul.f32 %v14608_v35, %v14608_v35  ;;  %v14045_v35 = vld [vmem:[%s21332_s7 + $0x8] sm:$0x3f] }
 0x1d7   : > { %v1395_v39 = vpop.f32.mrf.mxu0 }
 0x1d8   : > { %v14862_v9 = vadd.f32 %v14580_v18, %v1395_v39  ;;  %21624 = vst [vmem:[#allocation26_spill] sm:$0xff] %v14872_v48  ;;  %v14882_v39 = vadd.f32 %v14580_v18, %v1375_v57  ;;  %21628 = vst [vmem:[#allocation30_spill] sm:$0xff] %v14892_v60  ;;  %v14908_v57 = vadd.f32 %v14580_v18, %v14816_v58 }
 0x1d9   : > { %v12027_v52 = vpop.f32.mrf.mxu0  ;;  %v14926_v58 = vadd.f32 %v14580_v18, %v14779_v24  ;;  %v1578_v24 = vmul.f32 %v14590_v26, %v14590_v26 }
 0x1da   : > { %21622 = vst [vmem:[#allocation24_spill] sm:$0xff] %v14862_v9  ;;  %21626 = vst [vmem:[#allocation28_spill] sm:$0xff] %v14882_v39  ;;  %v1563_v52 = vmul.f32 %v14587_v23, %v14587_v23 }
 0x1db   : > { %v1400_v17 = vpop.f32.mrf.mxu0  ;;  %21631 = vst [vmem:[#allocation33_spill] sm:$0xff] %v14908_v57  ;;  %21634 = vst [vmem:[#allocation36_spill] sm:$0xff] %v14926_v58 }
 0x1dc   : > { %v14859_v11 = vadd.f32 %v14580_v18, %v1400_v17  ;;  %v14877_v17 = vadd.f32 %v14580_v18, %v1380_v14  ;;  %v14897_v14 = vadd.f32 %v14580_v18, %v1360_v45  ;;  %v14914_v45 = vadd.f32 %v14580_v18, %v14803_v12 }
 0x1dd   : > { %v12030_v53 = vpop.f32.mrf.mxu0  ;;  %v14932_v12 = vadd.f32 %v14580_v18, %v14767_v43  ;;  %v1562_v18 = vmul.f32 %v14594_v27, %v14594_v27  ;;  %v1577_v43 = vmul.f32 %v14600_v30, %v14600_v30 }
 0x1de   : > { %21621 = vst [vmem:[#allocation23_spill] sm:$0xff] %v14859_v11  ;;  %1513 = vmatpush2.msra.mxu1 %v14859_v11  ;;  %21625 = vst [vmem:[#allocation27_spill] sm:$0xff] %v14877_v17  ;;  %v1561_v53 = vmul.f32 %v14604_v32, %v14604_v32 }
 0x1df   : > { %1514 = vmatprep.subr.mxu1 %v21390_v1  ;;  %21629 = vst [vmem:[#allocation31_spill] sm:$0xff] %v14897_v14  ;;  %21632 = vst [vmem:[#allocation34_spill] sm:$0xff] %v14914_v45 }
 0x1e0   : > { %1515 = vmatpush2.msra.mxu1 %v14862_v9  ;;  %21635 = vst [vmem:[#allocation37_spill] sm:$0xff] %v14932_v12 }
 0x1e1   : > { %1516 = vmatprep.subr.mxu1 %v21390_v1 }
 0x1e2   : > { %1517 = vmatpush2.msra.mxu1 %v14867_v5 }
 0x1e3   : > { %1518 = vmatprep.subr.mxu1 %v21390_v1 }
 0x1e4   : > { %1519 = vmatpush2.msra.mxu1 %v14872_v48 }
 0x1e5   : > { %1520 = vmatprep.subr.mxu1 %v21390_v1 }
 0x1e6   : > { %1521 = vmatpush2.msra.mxu1 %v14877_v17 }
 0x1e7   : > { %1522 = vmatprep.subr.mxu1 %v21390_v1 }
 0x1e8   : > { %1523 = vmatpush2.msra.mxu1 %v14882_v39 }
 0x1e9   : > { %1524 = vmatprep.subr.mxu1 %v21390_v1 }
 0x1ea   : > { %1525 = vmatpush2.msra.mxu1 %v14887_v56 }
 0x1eb   : > { %1526 = vmatprep.subr.mxu1 %v21390_v1 }
 0x1ec   : > { %1527 = vmatpush2.msra.mxu1 %v14892_v60 }
 0x1ed   : > { %1528 = vmatprep.subr.mxu1 %v21390_v1 }
 0x1ee   : > { %1529 = vmatpush2.msra.mxu1 %v14897_v14 }
 0x1ef   : > { %1530 = vmatprep.subr.mxu1 %v21390_v1 }
 0x1f0   : > { %1531 = vmatpush2.msra.mxu1 %v14902_v33 }
 0x1f1   : > { %1532 = vmatprep.subr.mxu1 %v21390_v1 }
 0x1f2   : > { %1533 = vmatpush2.msra.mxu1 %v14908_v57 }
 0x1f3   : > { %1534 = vmatprep.subr.mxu1 %v21390_v1 }
 0x1f4   : > { %1535 = vmatpush2.msra.mxu1 %v14914_v45 }
 0x1f5   : > { %1536 = vmatprep.subr.mxu1 %v21390_v1 }
 0x1f6   : > { %1537 = vmatpush2.msra.mxu1 %v14920_v4 }
 0x1f7   : > { %1538 = vmatprep.subr.mxu1 %v21390_v1 }
 0x1f8   : > { %1539 = vmatpush2.msra.mxu1 %v14926_v58 }
 0x1f9   : > { %1540 = vmatprep.subr.mxu1 %v21390_v1 }
 0x1fa   : > { %1541 = vmatpush2.msra.mxu1 %v14932_v12 }
 0x1fb   : > { %1543 = vmatmul.mubr.f32.vlgmr.msra.gmra.mxu1 %v14719_v49  ;;  %11122 = vmatprep.subr.mxu1 %v1579_v20  ;;  %v1558_v20 = vmul.f32 %v14633_v31, %v14633_v31 }
 0x1fc   : > { %11123 = vmatpush3.msra.mxu1 %v1563_v52  ;;  %1675 = vmatprep.mubr.f32.mxu1 %v14554_v40  ;;  %v1575_v40 = vmul.f32 %v14619_v38, %v14619_v38  ;;  %v1573_v52 = vmul.f32 %v14639_v46, %v14639_v46 }
 0x1fd   : > { %11124 = vmatprep.subr.mxu1 %v1578_v24  ;;  %v1557_v24 = vmul.f32 %v14644_v28, %v14644_v28 }
 0x1fe   : > { %11125 = vmatpush3.msra.mxu1 %v1562_v18  ;;  %v1572_v18 = vmul.f32 %v14648_v50, %v14648_v50 }
 0x1ff   : > { %11126 = vmatprep.subr.mxu1 %v1577_v43  ;;  %v1556_v43 = vmul.f32 %v14653_v25, %v14653_v25 }
 0x200   : > { %11127 = vmatpush3.msra.mxu1 %v1561_v53  ;;  %v1571_v53 = vmul.f32 %v14659_v54, %v14659_v54 }
 0x201   : > { %11128 = vmatprep.subr.mxu1 %v1576_v44  ;;  %v1555_v44 = vmul.f32 %v14664_v22, %v14664_v22 }
 0x202   : > { %11129 = vmatpush3.msra.mxu1 %v1560_v37  ;;  %v1570_v37 = vmul.f32 %v14669_v19, %v14669_v19 }
 0x203   : > { %11130 = vmatprep.subr.mxu1 %v1575_v40  ;;  %v1554_v40 = vmul.f32 %v14674_v59, %v14674_v59 }
 0x204   : > { %11131 = vmatpush3.msra.mxu1 %v1559_v15  ;;  %v1569_v15 = vmul.f32 %v14681_v16, %v14681_v16 }
 0x205   : > { %11132 = vmatprep.subr.mxu1 %v1574_v29  ;;  %v1553_v29 = vmul.f32 %v14686_v55, %v14686_v55 }
 0x206   : > { %11133 = vmatpush3.msra.mxu1 %v1558_v20  ;;  %v1568_v20 = vmul.f32 %v14691_v13, %v14691_v13 }
 0x207   : > { %11134 = vmatprep.subr.mxu1 %v1573_v52  ;;  %v1552_v52 = vmul.f32 %v14696_v62, %v14696_v62 }
 0x208   : > { %11135 = vmatpush3.msra.mxu1 %v1557_v24  ;;  %v1567_v24 = vmul.f32 %v14703_v10, %v14703_v10 }
 0x209   : > { %11136 = vmatprep.subr.mxu1 %v1572_v18  ;;  %v1551_v18 = vmul.f32 %v14708_v51, %v14708_v51 }
 0x20a   : > { %11137 = vmatpush3.msra.mxu1 %v1556_v43  ;;  %v1566_v43 = vmul.f32 %v14713_v7, %v14713_v7 }
 0x20b   : > { %11138 = vmatprep.subr.mxu1 %v1571_v53  ;;  %v1550_v53 = vmul.f32 %v14723_v2, %v14723_v2 }
 0x20c   : > { %11139 = vmatpush3.msra.mxu1 %v1555_v44  ;;  %v1565_v44 = vmul.f32 %v14731_v47, %v14731_v47 }
 0x20d   : > { %11140 = vmatprep.subr.mxu1 %v1570_v37  ;;  %v1549_v37 = vmul.f32 %v14736_v3, %v14736_v3 }
 0x20e   : > { %11141 = vmatpush3.msra.mxu1 %v1554_v40  ;;  %v1564_v40 = vmul.f32 %v14741_v0, %v14741_v0 }
 0x20f   : > { %11142 = vmatprep.subr.mxu1 %v1569_v15  ;;  %v1548_v15 = vmul.f32 %v14746_v6, %v14746_v6 }
 0x210   : > { %11143 = vmatpush3.msra.mxu1 %v1553_v29  ;;  %v1595_v29 = vmul.f32 %v14761_v63, %v14761_v63 }
 0x211   : > { %11144 = vmatprep.subr.mxu1 %v1568_v20  ;;  %v1594_v20 = vmul.f32 %v14764_v8, %v14764_v8 }
 0x212   : > { %11145 = vmatpush3.msra.mxu1 %v1552_v52  ;;  %v21636_v52 = vld [vmem:[#allocation9_spill] sm:$0xff] }
 0x213   : > { %11146 = vmatprep.subr.mxu1 %v1567_v24  ;;  %v1593_v24 = vmul.f32 %v21636_v52, %v21636_v52 }
 0x214   : > { %11147 = vmatpush3.msra.mxu1 %v1551_v18  ;;  %v21637_v18 = vld [vmem:[#allocation10_spill] sm:$0xff] }
 0x215   : > { %11148 = vmatprep.subr.mxu1 %v1566_v43  ;;  %v21638_v43 = vld [vmem:[#allocation11_spill] sm:$0xff] }
 0x216   : > { %11149 = vmatpush3.msra.mxu1 %v1550_v53  ;;  %v1591_v53 = vmul.f32 %v21638_v43, %v21638_v43 }
 0x217   : > { %11150 = vmatprep.subr.mxu1 %v1565_v44 }
 0x218   : > { %11151 = vmatpush3.msra.mxu1 %v1549_v37  ;;  %v21640_v37 = vld [vmem:[#allocation13_spill] sm:$0xff] }
 0x219   : > { %11152 = vmatprep.subr.mxu1 %v1564_v40  ;;  %v1589_v40 = vmul.f32 %v21640_v37, %v21640_v37 }
 0x21a   : > { %11153 = vmatpush3.msra.mxu1 %v1548_v15  ;;  %v21641_v15 = vld [vmem:[#allocation14_spill] sm:$0xff] }
 0x21b   : > { %1676 = vmatmul.mubr.f32.vlgmr.msra.gmra.mxu1 %v14560_v42  ;;  %1681 = vmatprep.subr.mxu1 %v21390_v1  ;;  %v1592_v42 = vmul.f32 %v21637_v18, %v21637_v18 }
 0x21c   : > { %1682 = vmatpush1.msra.mxu1 %v1595_v29  ;;  %10471 = vmatprep.mubr.msk.f32.mxu1 %vm1404_vm2, %v14753_v61  ;;  %v21639_v61 = vld [vmem:[#allocation12_spill] sm:$0xff]  ;;  %v1588_v29 = vmul.f32 %v21641_v15, %v21641_v15 }
 0x21d   : > { %1683 = vmatprep.subr.mxu1 %v21390_v1  ;;  %v1590_v44 = vmul.f32 %v21639_v61, %v21639_v61 }
 0x21e   : > { %1684 = vmatpush1.msra.mxu1 %v1594_v20  ;;  %v21642_v20 = vld [vmem:[#allocation15_spill] sm:$0xff] }
 0x21f   : > { %1685 = vmatprep.subr.mxu1 %v21390_v1 }
 0x220   : > { %1686 = vmatpush1.msra.mxu1 %v1593_v24  ;;  %v1587_v24 = vmul.f32 %v21642_v20, %v21642_v20 }
 0x221   : > { %1687 = vmatprep.subr.mxu1 %v21390_v1 }
 0x222   : > { %1688 = vmatpush1.msra.mxu1 %v1592_v42  ;;  %v21643_v42 = vld [vmem:[#allocation16_spill] sm:$0xff] }
 0x223   : > { %1689 = vmatprep.subr.mxu1 %v21390_v1 }
 0x224   : > { %1690 = vmatpush1.msra.mxu1 %v1591_v53  ;;  %v1586_v53 = vmul.f32 %v21643_v42, %v21643_v42 }
 0x225   : > { %1691 = vmatprep.subr.mxu1 %v21390_v1 }
 0x226   : > { %1692 = vmatpush1.msra.mxu1 %v1590_v44  ;;  %v21644_v44 = vld [vmem:[#allocation17_spill] sm:$0xff] }
 0x227   : > { %1693 = vmatprep.subr.mxu1 %v21390_v1  ;;  %v1585_v63 = vmul.f32 %v21644_v44, %v21644_v44 }
 0x228   : > { %1694 = vmatpush1.msra.mxu1 %v1589_v40  ;;  %v21645_v40 = vld [vmem:[#allocation18_spill] sm:$0xff] }
 0x229   : > { %1695 = vmatprep.subr.mxu1 %v21390_v1  ;;  %v1584_v8 = vmul.f32 %v21645_v40, %v21645_v40 }
 0x22a   : > { %1696 = vmatpush1.msra.mxu1 %v1588_v29  ;;  %v21646_v29 = vld [vmem:[#allocation19_spill] sm:$0xff] }
 0x22b   : > { %1697 = vmatprep.subr.mxu1 %v21390_v1  ;;  %v1583_v52 = vmul.f32 %v21646_v29, %v21646_v29 }
 0x22c   : > { %1698 = vmatpush1.msra.mxu1 %v1587_v24  ;;  %v21647_v24 = vld [vmem:[#allocation20_spill] sm:$0xff] }
 0x22d   : > { %1699 = vmatprep.subr.mxu1 %v21390_v1  ;;  %v1582_v18 = vmul.f32 %v21647_v24, %v21647_v24 }
 0x22e   : > { %1700 = vmatpush1.msra.mxu1 %v1586_v53  ;;  %v21648_v53 = vld [vmem:[#allocation21_spill] sm:$0xff] }
 0x22f   : > { %1701 = vmatprep.subr.mxu1 %v21390_v1  ;;  %v1581_v43 = vmul.f32 %v21648_v53, %v21648_v53 }
 0x230   : > { %1702 = vmatpush1.msra.mxu1 %v1585_v63  ;;  %v21649_v63 = vld [vmem:[#allocation22_spill] sm:$0xff] }
 0x231   : > { %1703 = vmatprep.subr.mxu1 %v21390_v1  ;;  %v1580_v61 = vmul.f32 %v21649_v63, %v21649_v63 }
 0x232   : > { %1704 = vmatpush1.msra.mxu1 %v1584_v8  ;;  %v1610_v8 = vmul.f32 %v14859_v11, %v14859_v11 }
 0x233   : > { %1705 = vmatprep.subr.mxu1 %v21390_v1 }
 0x234   : > { %1706 = vmatpush1.msra.mxu1 %v1583_v52  ;;  %v1609_v52 = vmul.f32 %v14862_v9, %v14862_v9 }
 0x235   : > { %1707 = vmatprep.subr.mxu1 %v21390_v1 }
 0x236   : > { %1708 = vmatpush1.msra.mxu1 %v1582_v18  ;;  %v1608_v18 = vmul.f32 %v14867_v5, %v14867_v5 }
 0x237   : > { %1709 = vmatprep.subr.mxu1 %v21390_v1 }
 0x238   : > { %1710 = vmatpush1.msra.mxu1 %v1581_v43  ;;  %v1607_v43 = vmul.f32 %v14872_v48, %v14872_v48 }
 0x239   : > { %1711 = vmatprep.subr.mxu1 %v21390_v1 }
 0x23a   : > { %1712 = vmatpush1.msra.mxu1 %v1580_v61  ;;  %v1606_v61 = vmul.f32 %v14877_v17, %v14877_v17 }
 0x23b   : > { %1715 = vmatprep.subr.mxu1 %v21390_v1 }
 0x23c   : > { %1716 = vmatpush2.msra.mxu1 %v1610_v8  ;;  %v1605_v8 = vmul.f32 %v14882_v39, %v14882_v39 }
 0x23d   : > { %1717 = vmatprep.subr.mxu1 %v21390_v1 }
 0x23e   : > { %1718 = vmatpush2.msra.mxu1 %v1609_v52  ;;  %v1604_v52 = vmul.f32 %v14887_v56, %v14887_v56 }
 0x23f   : > { %1719 = vmatprep.subr.mxu1 %v21390_v1 }
 0x240   : > { %1720 = vmatpush2.msra.mxu1 %v1608_v18  ;;  %v1603_v18 = vmul.f32 %v14892_v60, %v14892_v60 }
 0x241   : > { %1721 = vmatprep.subr.mxu1 %v21390_v1 }
 0x242   : > { %1722 = vmatpush2.msra.mxu1 %v1607_v43  ;;  %v1602_v43 = vmul.f32 %v14897_v14, %v14897_v14 }
 0x243   : > { %1723 = vmatprep.subr.mxu1 %v21390_v1 }
 0x244   : > { %1724 = vmatpush2.msra.mxu1 %v1606_v61  ;;  %v1601_v61 = vmul.f32 %v14902_v33, %v14902_v33 }
 0x245   : > { %1725 = vmatprep.subr.mxu1 %v21390_v1 }
 0x246   : > { %1726 = vmatpush2.msra.mxu1 %v1605_v8  ;;  %v1600_v8 = vmul.f32 %v14908_v57, %v14908_v57 }
 0x247   : > { %1727 = vmatprep.subr.mxu1 %v21390_v1 }
 0x248   : > { %1728 = vmatpush2.msra.mxu1 %v1604_v52  ;;  %v1599_v52 = vmul.f32 %v14914_v45, %v14914_v45 }
 0x249   : > { %1729 = vmatprep.subr.mxu1 %v21390_v1 }
 0x24a   : > { %1730 = vmatpush2.msra.mxu1 %v1603_v18  ;;  %v1598_v18 = vmul.f32 %v14920_v4, %v14920_v4 }
 0x24b   : > { %1731 = vmatprep.subr.mxu1 %v21390_v1 }
 0x24c   : > { %1732 = vmatpush2.msra.mxu1 %v1602_v43  ;;  %v1597_v43 = vmul.f32 %v14926_v58, %v14926_v58 }
 0x24d   : > { %1733 = vmatprep.subr.mxu1 %v21390_v1 }
 0x24e   : > { %1734 = vmatpush2.msra.mxu1 %v1601_v61  ;;  %v1596_v61 = vmul.f32 %v14932_v12, %v14932_v12 }
 0x24f   : > { %1735 = vmatprep.subr.mxu1 %v21390_v1 }
 0x250   : > { %1736 = vmatpush2.msra.mxu1 %v1600_v8  ;;  %v751_v8 = vld [vmem:[%s21650_s25 + $0x38] sm:$0xff] }
 0x251   : > { %1737 = vmatprep.subr.mxu1 %v21390_v1 }
 0x252   : > { %1738 = vmatpush2.msra.mxu1 %v1599_v52  ;;  %v750_v52 = vld [vmem:[%s21650_s25 + $0x30] sm:$0xff] }
 0x253   : > { %1739 = vmatprep.subr.mxu1 %v21390_v1 }
 0x254   : > { %1740 = vmatpush2.msra.mxu1 %v1598_v18  ;;  %v749_v18 = vld [vmem:[%s21650_s25 + $0x28] sm:$0xff] }
 0x255   : > { %1741 = vmatprep.subr.mxu1 %v21390_v1 }
 0x256   : > { %1742 = vmatpush2.msra.mxu1 %v1597_v43  ;;  %v747_v43 = vld [vmem:[%s21650_s25 + $0x18] sm:$0xff] }
 0x257   : > { %1743 = vmatprep.subr.mxu1 %v21390_v1 }
 0x258   : > { %1744 = vmatpush2.msra.mxu1 %v1596_v61  ;;  %v746_v61 = vld [vmem:[%s21650_s25 + $0x10] sm:$0xff] }
 0x259   : > { %1746 = vmatmul.mubr.f32.vlgmr.msra.gmra.mxu1 %v14719_v49  ;;  %12031 = vmatprep.subr.mxu1 %v751_v8  ;;  %v748_v49 = vld [vmem:[%s21650_s25 + $0x20] sm:$0xff] }
 0x25a   : > { %12032 = vmatpush3.msra.mxu1 %v751_v8  ;;  %v745_v8 = vld [vmem:[%s21650_s25 + $0x8] sm:$0xff] }
 0x25b   : > { %12033 = vmatprep.subr.mxu1 %v750_v52 }
 0x25c   : > { %12034 = vmatpush3.msra.mxu1 %v750_v52  ;;  %v744_v52 = vld [vmem:[%s21650_s25] sm:$0xff] }
 0x25d   : > { %12035 = vmatprep.subr.mxu1 %v749_v18 }
 0x25e   : > { %12036 = vmatpush3.msra.mxu1 %v749_v18  ;;  %v11119_v18 = vpop.f32.mrf.mxu1 }
 0x25f   : > { %12037 = vmatprep.subr.mxu1 %v748_v49 }
 0x260   : > { %12038 = vmatpush3.msra.mxu1 %v748_v49  ;;  %v11120_v49 = vpop.f32.mrf.mxu1 }
 0x261   : > { %12039 = vmatprep.subr.mxu1 %v747_v43 }
 0x262   : > { %12040 = vmatpush3.msra.mxu1 %v747_v43  ;;  %v11121_v43 = vadd.f32 %v11120_v49, %v11119_v18 }
 0x263   : > { %12041 = vmatprep.subr.mxu1 %v746_v61 }
 0x264   : > { %12042 = vmatpush3.msra.mxu1 %v746_v61 }
 0x265   : > { %12043 = vmatprep.subr.mxu1 %v745_v8 }
 0x266   : > { %12044 = vmatpush3.msra.mxu1 %v745_v8 }
 0x267   : > { %12045 = vmatprep.subr.mxu1 %v744_v52 }
 0x268   : > { %12046 = vmatpush3.msra.mxu1 %v744_v52  ;;  %v15130_v52 = vpop.trf.xlu0 }
 0x269   : > { %12050 = vmatprep.subr.mxu1 %v21390_v1  ;;  %21651 = vst [vmem:[#allocation38_spill] sm:$0xff] %v15130_v52 }
 0x2bb   : > { %v1544_v11 = vpop.f32.mrf.mxu1 }
 0x2bc   : > { %v1545_v9 = vadd.f32 %v11121_v43, %v1544_v11  ;;  %v15132_v11 = vpop.trf.xlu0 }
 0x2bd   : > { %v1546_v61 = vpop.f32.mrf.mxu1  ;;  %21652 = vst [vmem:[#allocation39_spill] sm:$0xff] %v15132_v11 }
 0x2c0   : > { %v15134_v18 = vpop.trf.xlu0 }
 0x2c1   : > { %21653 = vst [vmem:[#allocation40_spill] sm:$0xff] %v15134_v18 }
 0x2db   : > { %v11154_v5 = vpop.f32.mrf.mxu1 }
 0x2dd   : > { %v11155_v48 = vpop.f32.mrf.mxu1 }
 0x2de   : > { %v11156_v17 = vadd.f32 %v11155_v48, %v11154_v5  ;;  %v15136_v5 = vpop.trf.xlu0 }
 0x2df   : > { %21654 = vst [vmem:[#allocation41_spill] sm:$0xff] %v15136_v5 }
 0x2e2   : > { %v15138_v48 = vpop.trf.xlu0 }
 0x2e3   : > { %21655 = vst [vmem:[#allocation42_spill] sm:$0xff] %v15138_v48 }
 0x319   : > { %v1747_v39 = vpop.f32.mrf.mxu1 }
 0x31a   : > { %v1748_v56 = vadd.f32 %v11156_v17, %v1747_v39  ;;  %v15140_v17 = vpop.trf.xlu0 }
 0x31b   : > { %v1749_v60 = vpop.f32.mrf.mxu1  ;;  %21656 = vst [vmem:[#allocation43_spill] sm:$0xff] %v15140_v17 }
 0x31c   : > { %v1752_v14 = vrot.slane %v1748_v56, 2 }
 0x31e   : > { %v1755_v8 = vsel %vm1754_vm3, %v1545_v9, %v1752_v14 }
 0x31f   : > { %12047 = vmatprep.mubr.msk.f32.mxu1 %vm834_vm1, %v1755_v8 }
 0x320   : > { %12048 = vmatmul.mubr.msk.f32.vlgmr.msra.gmra.mxu1 %vm834_vm1, %v1752_v14  ;;  %v15142_v14 = vpop.trf.xlu0 }
 0x321   : > { %12052 = vmatprep.mubr.msk.f32.mxu1 %vm14097_vm0, %v21390_v1  ;;  %21657 = vst [vmem:[#allocation44_spill] sm:$0xff] %v15142_v14 }
 0x324   : > { %v15144_v57 = vpop.trf.xlu0 }
 0x325   : > { %21658 = vst [vmem:[#allocation45_spill] sm:$0xff] %v15144_v57 }
 0x328   : > { %v15146_v58 = vpop.trf.xlu0 }
 0x329   : > { %21659 = vst [vmem:[#allocation46_spill] sm:$0xff] %v15146_v58 }
 0x32c   : > { %v15148_v12 = vpop.trf.xlu0 }
 0x32d   : > { %21660 = vst [vmem:[#allocation47_spill] sm:$0xff] %v15148_v12 }
 0x3e0   : > { %v12049_v9 = vpop.f32.mrf.mxu1 }
 0x3e1   : > { %v1837_v49 = vmul.f32 0.005952381, %v12049_v9  ;;  %v15150_v9 = vpop.trf.xlu0 }
 0x3e2   : > { %v1827_v39 = vpop.f32.mrf.mxu1  ;;  %21661 = vst [vmem:[#allocation48_spill] sm:$0xff] %v15150_v9 }
 0x3e3   : > { %v1836_v56 = vmul.f32 0.005952381, %v1827_v39 }
 0x3e5   : > { %v1838_v60 = vmul.f32 %v1836_v56, %v1836_v56 }
 0x3e7   : > { %v1840_v43 = vrot.slane %v1838_v60, 2 }
 0x3e9   : > { %v1842_v61 = vsub.f32 %v1836_v56, %v1840_v43  ;;  %v1843_v8 = vsub.f32 %v1837_v49, %v1840_v43 }
 0x3eb   : > { %v1844_v1 = vmax.f32 %v1842_v61, 0.0  ;;  %v1845_v33 = vmax.f32 %v1843_v8, 0.0 }
 0x3ed   : > { %v1846_v45 = vadd.f32 1e-05, %v1844_v1  ;;  %v1847_v4 = vadd.f32 1e-05, %v1845_v33  ;;  %v21662_v1 = vmov 0.0   ;;  %v15159_v33 = vpop.trf.xlu0 }
 0x3ee   : > { %21663 = vst [vmem:[#allocation49_spill] sm:$0xff] %v15159_v33 }
 0x3ef   : > { %13693 = vrsqrt.f32 %v1846_v45 }
 0x3f0   : > { %13695 = vrsqrt.f32 %v1847_v4 }
 0x3f1   : > { %v15174_v45 = vpop.trf.xlu0 }
 0x3f2   : > { %21664 = vst [vmem:[#allocation50_spill] sm:$0xff] %v15174_v45 }
 0x3f5   : > { %v15188_v4 = vpop.trf.xlu0 }
 0x3f6   : > { %21665 = vst [vmem:[#allocation51_spill] sm:$0xff] %v15188_v4 }
 0x3fc   : > { %v13694_v39 = vpop.eup %13693 }
 0x3fd   : > { %v13696_v37 = vpop.eup %13695  ;;  %v1853_v15 = vrot.slane %v13694_v39, 6 }
 0x3fe   : > { %v1854_v60 = vrot.slane %v13696_v37, 6  ;;  %v15202_v37 = vpop.trf.xlu0 }
 0x3ff   : > { %21666 = vst [vmem:[#allocation52_spill] sm:$0xff] %v15202_v37 }
 0x400   : > { %v1855_v49 = vsel %vm1852_vm4, %v1853_v15, %v1854_v60 }
 0x401   : > { %v1857_v43 = vmul.f32 %v1855_v49, %v1836_v56  ;;  %12242 = vmatpush3.msk.msra.mxu0 %vm1754_vm3, %v1855_v49 }
 0x402   : > { %12244 = vmatmul.mubr.msk.f32.vlgmr.msra.gmra.mxu0 %vm1986_vm5, %v15130_v52  ;;  %v15216_v15 = vpop.trf.xlu0 }
 0x403   : > { %12051 = vmatpush3.msk.msra.mxu1 %vm1754_vm3, %v1857_v43  ;;  %12246 = vmatprep.mubr.msk.f32.mxu0 %vm14097_vm0, %v21662_v1  ;;  %21667 = vst [vmem:[#allocation53_spill] sm:$0xff] %v15216_v15  ;;  %v15310_v43 = vpop.trf.xlu1 }
 0x404   : > { %12053 = vmatmul.mubr.msk.f32.vlgmr.msra.gmra.mxu1 %vm1986_vm5, %v15130_v52  ;;  %12432 = vmatprep.subr.mxu1 %v21662_v1  ;;  %21674 = vst [vmem:[#allocation60_spill] sm:$0xff] %v15310_v43 }
 0x405   : > { %12055 = vmatprep.mubr.msk.f32.mxu1 %vm14097_vm0, %v21662_v1 }
 0x406   : > { %12247 = vmatmul.mubr.msk.f32.gmra.mxu0 %vm1986_vm5, %v15132_v11  ;;  %v15230_v56 = vpop.trf.xlu0 }
 0x407   : > { %12249 = vmatprep.mubr.msk.f32.mxu0 %vm14097_vm0, %v21662_v1  ;;  %21668 = vst [vmem:[#allocation54_spill] sm:$0xff] %v15230_v56 }
 0x408   : > { %12056 = vmatmul.mubr.msk.f32.gmra.mxu1 %vm1986_vm5, %v15132_v11 }
 0x409   : > { %12058 = vmatprep.mubr.msk.f32.mxu1 %vm14097_vm0, %v21662_v1 }
 0x40a   : > { %12250 = vmatmul.mubr.msk.f32.gmra.mxu0 %vm1986_vm5, %v15134_v18  ;;  %v15244_v61 = vpop.trf.xlu0 }
 0x40b   : > { %12252 = vmatprep.mubr.msk.f32.mxu0 %vm14097_vm0, %v21662_v1  ;;  %21669 = vst [vmem:[#allocation55_spill] sm:$0xff] %v15244_v61 }
 0x40c   : > { %12059 = vmatmul.mubr.msk.f32.gmra.mxu1 %vm1986_vm5, %v15134_v18 }
 0x40d   : > { %12061 = vmatprep.mubr.msk.f32.mxu1 %vm14097_vm0, %v21662_v1 }
 0x40e   : > { %12253 = vmatmul.mubr.msk.f32.gmra.mxu0 %vm1986_vm5, %v15136_v5  ;;  %v15258_v8 = vpop.trf.xlu0 }
 0x40f   : > { %12255 = vmatprep.mubr.msk.f32.mxu0 %vm14097_vm0, %v21662_v1  ;;  %21670 = vst [vmem:[#allocation56_spill] sm:$0xff] %v15258_v8 }
 0x410   : > { %12062 = vmatmul.mubr.msk.f32.gmra.mxu1 %vm1986_vm5, %v15136_v5 }
 0x411   : > { %12064 = vmatprep.mubr.msk.f32.mxu1 %vm14097_vm0, %v21662_v1 }
 0x412   : > { %12256 = vmatmul.mubr.msk.f32.gmra.mxu0 %vm1986_vm5, %v15138_v48  ;;  %v15272_v39 = vpop.trf.xlu0 }
 0x413   : > { %12258 = vmatprep.mubr.msk.f32.mxu0 %vm14097_vm0, %v21662_v1  ;;  %21671 = vst [vmem:[#allocation57_spill] sm:$0xff] %v15272_v39 }
 0x414   : > { %12065 = vmatmul.mubr.msk.f32.gmra.mxu1 %vm1986_vm5, %v15138_v48 }
 0x415   : > { %12067 = vmatprep.mubr.msk.f32.mxu1 %vm14097_vm0, %v21662_v1 }
 0x416   : > { %12259 = vmatmul.mubr.msk.f32.gmra.mxu0 %vm1986_vm5, %v15140_v17  ;;  %v15286_v60 = vpop.trf.xlu0 }
 0x417   : > { %12261 = vmatprep.mubr.msk.f32.mxu0 %vm14097_vm0, %v21662_v1  ;;  %21672 = vst [vmem:[#allocation58_spill] sm:$0xff] %v15286_v60 }
 0x418   : > { %12068 = vmatmul.mubr.msk.f32.gmra.mxu1 %vm1986_vm5, %v15140_v17 }
 0x419   : > { %12070 = vmatprep.mubr.msk.f32.mxu1 %vm14097_vm0, %v21662_v1 }
 0x41a   : > { %12262 = vmatmul.mubr.msk.f32.gmra.mxu0 %vm1986_vm5, %v15142_v14  ;;  %v15300_v49 = vpop.trf.xlu0 }
 0x41b   : > { %12264 = vmatprep.mubr.msk.f32.mxu0 %vm14097_vm0, %v21662_v1  ;;  %21673 = vst [vmem:[#allocation59_spill] sm:$0xff] %v15300_v49 }
 0x41c   : > { %12071 = vmatmul.mubr.msk.f32.gmra.mxu1 %vm1986_vm5, %v15142_v14 }
 0x41d   : > { %12073 = vmatprep.mubr.msk.f32.mxu1 %vm14097_vm0, %v21662_v1 }
 0x41e   : > { %12265 = vmatmul.mubr.msk.f32.gmra.mxu0 %vm1986_vm5, %v15144_v57 }
 0x41f   : > { %12267 = vmatprep.mubr.msk.f32.mxu0 %vm14097_vm0, %v21662_v1 }
 0x420   : > { %12074 = vmatmul.mubr.msk.f32.gmra.mxu1 %vm1986_vm5, %v15144_v57 }
 0x421   : > { %12076 = vmatprep.mubr.msk.f32.mxu1 %vm14097_vm0, %v21662_v1 }
 0x422   : > { %12268 = vmatmul.mubr.msk.f32.gmra.mxu0 %vm1986_vm5, %v15146_v58 }
 0x423   : > { %12270 = vmatprep.mubr.msk.f32.mxu0 %vm14097_vm0, %v21662_v1 }
 0x424   : > { %12077 = vmatmul.mubr.msk.f32.gmra.mxu1 %vm1986_vm5, %v15146_v58 }
 0x425   : > { %12079 = vmatprep.mubr.msk.f32.mxu1 %vm14097_vm0, %v21662_v1 }
 0x426   : > { %12271 = vmatmul.mubr.msk.f32.gmra.mxu0 %vm1986_vm5, %v15148_v12 }
 0x427   : > { %12273 = vmatprep.mubr.msk.f32.mxu0 %vm14097_vm0, %v21662_v1 }
 0x428   : > { %12080 = vmatmul.mubr.msk.f32.gmra.mxu1 %vm1986_vm5, %v15148_v12 }
 0x429   : > { %12082 = vmatprep.mubr.msk.f32.mxu1 %vm14097_vm0, %v21662_v1 }
 0x42a   : > { %12274 = vmatmul.mubr.msk.f32.gmra.mxu0 %vm1986_vm5, %v15150_v9 }
 0x42b   : > { %12276 = vmatprep.mubr.msk.f32.mxu0 %vm14097_vm0, %v21662_v1 }
 0x42c   : > { %12083 = vmatmul.mubr.msk.f32.gmra.mxu1 %vm1986_vm5, %v15150_v9  ;;  %v3136_v9 = vld [vmem:[%s21337_s12 + $0x30] sm:$0xff] }
 0x42d   : > { %12085 = vmatprep.mubr.msk.f32.mxu1 %vm14097_vm0, %v21662_v1 }
 0x42e   : > { %12277 = vmatmul.mubr.msk.f32.gmra.mxu0 %vm1986_vm5, %v15159_v33 }
 0x42f   : > { %12279 = vmatprep.mubr.msk.f32.mxu0 %vm14097_vm0, %v21662_v1 }
 0x430   : > { %12086 = vmatmul.mubr.msk.f32.gmra.mxu1 %vm1986_vm5, %v15159_v33 }
 0x431   : > { %12088 = vmatprep.mubr.msk.f32.mxu1 %vm14097_vm0, %v21662_v1 }
 0x432   : > { %12280 = vmatmul.mubr.msk.f32.gmra.mxu0 %vm1986_vm5, %v15174_v45 }
 0x433   : > { %12282 = vmatprep.mubr.msk.f32.mxu0 %vm14097_vm0, %v21662_v1 }
 0x434   : > { %12089 = vmatmul.mubr.msk.f32.gmra.mxu1 %vm1986_vm5, %v15174_v45 }
 0x435   : > { %12091 = vmatprep.mubr.msk.f32.mxu1 %vm14097_vm0, %v21662_v1 }
 0x436   : > { %12283 = vmatmul.mubr.msk.f32.gmra.mxu0 %vm1986_vm5, %v15188_v4 }
 0x437   : > { %12285 = vmatprep.mubr.msk.f32.mxu0 %vm14097_vm0, %v21662_v1 }
 0x438   : > { %12092 = vmatmul.mubr.msk.f32.gmra.mxu1 %vm1986_vm5, %v15188_v4 }
 0x439   : > { %12094 = vmatprep.mubr.msk.f32.mxu1 %vm14097_vm0, %v21662_v1 }
 0x43a   : > { %12286 = vmatmul.mubr.msk.f32.gmra.mxu0 %vm1986_vm5, %v15202_v37 }
 0x43b   : > { %12288 = vmatprep.mubr.msk.f32.mxu0 %vm14097_vm0, %v21662_v1 }
 0x43c   : > { %12095 = vmatmul.mubr.msk.f32.gmra.mxu1 %vm1986_vm5, %v15202_v37  ;;  %v15316_v37 = vpop.trf.xlu0 }
 0x43d   : > { %12097 = vmatprep.mubr.msk.f32.mxu1 %vm14097_vm0, %v21662_v1  ;;  %21675 = vst [vmem:[#allocation61_spill] sm:$0xff] %v15316_v37 }
 0x43e   : > { %12289 = vmatmul.mubr.msk.f32.gmra.mxu0 %vm1986_vm5, %v15216_v15 }
 0x43f   : > { %12291 = vmatprep.mubr.msk.f32.mxu0 %vm14097_vm0, %v21662_v1 }
 0x440   : > { %12098 = vmatmul.mubr.msk.f32.gmra.mxu1 %vm1986_vm5, %v15216_v15  ;;  %v15326_v15 = vpop.trf.xlu1 }
 0x441   : > { %12100 = vmatprep.mubr.msk.f32.mxu1 %vm14097_vm0, %v21662_v1  ;;  %21676 = vst [vmem:[#allocation62_spill] sm:$0xff] %v15326_v15 }
 0x442   : > { %12292 = vmatmul.mubr.msk.f32.gmra.mxu0 %vm1986_vm5, %v15230_v56 }
 0x443   : > { %12294 = vmatprep.mubr.msk.f32.mxu0 %vm14097_vm0, %v21662_v1 }
 0x444   : > { %12101 = vmatmul.mubr.msk.f32.gmra.mxu1 %vm1986_vm5, %v15230_v56  ;;  %v15332_v56 = vpop.trf.xlu0 }
 0x445   : > { %12103 = vmatprep.mubr.msk.f32.mxu1 %vm14097_vm0, %v21662_v1  ;;  %21677 = vst [vmem:[#allocation63_spill] sm:$0xff] %v15332_v56 }
 0x446   : > { %12295 = vmatmul.mubr.msk.f32.gmra.mxu0 %vm1986_vm5, %v15244_v61 }
 0x447   : > { %12297 = vmatprep.mubr.msk.f32.mxu0 %vm14097_vm0, %v21662_v1 }
 0x448   : > { %12104 = vmatmul.mubr.msk.f32.gmra.mxu1 %vm1986_vm5, %v15244_v61  ;;  %v15342_v61 = vpop.trf.xlu1  ;;  %v15348_v4 = vpop.trf.xlu0 }
 0x449   : > { %12106 = vmatprep.mubr.msk.f32.mxu1 %vm14097_vm0, %v21662_v1  ;;  %21678 = vst [vmem:[#allocation64_spill] sm:$0xff] %v15342_v61  ;;  %21679 = vst [vmem:[#allocation65_spill] sm:$0xff] %v15348_v4 }
 0x44a   : > { %12298 = vmatmul.mubr.msk.f32.gmra.mxu0 %vm1986_vm5, %v15258_v8 }
 0x44b   : > { %12300 = vmatprep.mubr.msk.f32.mxu0 %vm14097_vm0, %v21662_v1 }
 0x44c   : > { %12107 = vmatmul.mubr.msk.f32.gmra.mxu1 %vm1986_vm5, %v15258_v8  ;;  %v15358_v8 = vpop.trf.xlu1 }
 0x44d   : > { %12109 = vmatprep.mubr.msk.f32.mxu1 %vm14097_vm0, %v21662_v1  ;;  %21680 = vst [vmem:[#allocation66_spill] sm:$0xff] %v15358_v8 }
 0x44e   : > { %12301 = vmatmul.mubr.msk.f32.gmra.mxu0 %vm1986_vm5, %v15272_v39 }
 0x44f   : > { %12303 = vmatprep.mubr.msk.f32.mxu0 %vm14097_vm0, %v21662_v1 }
 0x450   : > { %12110 = vmatmul.mubr.msk.f32.gmra.mxu1 %vm1986_vm5, %v15272_v39  ;;  %v15364_v39 = vpop.trf.xlu0 }
 0x451   : > { %12112 = vmatprep.mubr.msk.f32.mxu1 %vm14097_vm0, %v21662_v1  ;;  %21681 = vst [vmem:[#allocation67_spill] sm:$0xff] %v15364_v39 }
 0x452   : > { %12304 = vmatmul.mubr.msk.f32.gmra.mxu0 %vm1986_vm5, %v15286_v60 }
 0x453   : > { %12306 = vmatprep.mubr.msk.f32.mxu0 %vm14097_vm0, %v21662_v1 }
 0x454   : > { %12113 = vmatmul.mubr.msk.f32.gmra.mxu1 %vm1986_vm5, %v15286_v60  ;;  %v15374_v60 = vpop.trf.xlu1  ;;  %v15380_v45 = vpop.trf.xlu0 }
 0x455   : > { %12115 = vmatprep.mubr.msk.f32.mxu1 %vm14097_vm0, %v21662_v1  ;;  %21682 = vst [vmem:[#allocation68_spill] sm:$0xff] %v15374_v60  ;;  %21683 = vst [vmem:[#allocation69_spill] sm:$0xff] %v15380_v45 }
 0x456   : > { %12307 = vmatmul.mubr.msk.f32.gmra.mxu0 %vm1986_vm5, %v15300_v49 }
 0x457   : > { %12309 = vmatprep.mubr.msk.f32.mxu0 %vm14097_vm0, %v21662_v1 }
 0x458   : > { %12116 = vmatmul.mubr.msk.f32.gmra.mxu1 %vm1986_vm5, %v15300_v49  ;;  %v15390_v49 = vpop.trf.xlu1 }
 0x459   : > { %12118 = vmatprep.mubr.msk.f32.mxu1 %vm14097_vm0, %v21662_v1  ;;  %21684 = vst [vmem:[#allocation70_spill] sm:$0xff] %v15390_v49 }
 0x45a   : > { %12310 = vmatmul.mubr.msk.f32.gmra.mxu0 %vm1986_vm5, %v15316_v37 }
 0x45b   : > { %12312 = vmatprep.mubr.msk.f32.mxu0 %vm14097_vm0, %v21662_v1 }
 0x45c   : > { %12119 = vmatmul.mubr.msk.f32.gmra.mxu1 %vm1986_vm5, %v15316_v37  ;;  %v15396_v37 = vpop.trf.xlu0 }
 0x45d   : > { %12121 = vmatprep.mubr.msk.f32.mxu1 %vm14097_vm0, %v21662_v1  ;;  %21685 = vst [vmem:[#allocation71_spill] sm:$0xff] %v15396_v37 }
 0x45e   : > { %12313 = vmatmul.mubr.msk.f32.gmra.mxu0 %vm1986_vm5, %v15332_v56 }
 0x45f   : > { %12315 = vmatprep.mubr.msk.f32.mxu0 %vm14097_vm0, %v21662_v1 }
 0x460   : > { %12122 = vmatmul.mubr.msk.f32.gmra.mxu1 %vm1986_vm5, %v15332_v56  ;;  %v15406_v56 = vpop.trf.xlu1  ;;  %v15412_v33 = vpop.trf.xlu0 }
 0x461   : > { %12124 = vmatprep.mubr.msk.f32.mxu1 %vm14097_vm0, %v21662_v1  ;;  %21686 = vst [vmem:[#allocation72_spill] sm:$0xff] %v15406_v56  ;;  %21687 = vst [vmem:[#allocation73_spill] sm:$0xff] %v15412_v33 }
 0x462   : > { %12316 = vmatmul.mubr.msk.f32.gmra.mxu0 %vm1986_vm5, %v15348_v4 }
 0x463   : > { %12318 = vmatprep.mubr.msk.f32.mxu0 %vm14097_vm0, %v21662_v1 }
 0x464   : > { %12125 = vmatmul.mubr.msk.f32.gmra.mxu1 %vm1986_vm5, %v15348_v4  ;;  %v15422_v4 = vpop.trf.xlu1 }
 0x465   : > { %12127 = vmatprep.mubr.msk.f32.mxu1 %vm14097_vm0, %v21662_v1  ;;  %21688 = vst [vmem:[#allocation74_spill] sm:$0xff] %v15422_v4 }
 0x466   : > { %12319 = vmatmul.mubr.msk.f32.gmra.mxu0 %vm1986_vm5, %v15364_v39 }
 0x467   : > { %12321 = vmatprep.mubr.msk.f32.mxu0 %vm14097_vm0, %v21662_v1 }
 0x468   : > { %12128 = vmatmul.mubr.msk.f32.gmra.mxu1 %vm1986_vm5, %v15364_v39  ;;  %v15428_v39 = vpop.trf.xlu0 }
 0x469   : > { %12130 = vmatprep.mubr.msk.f32.mxu1 %vm14097_vm0, %v21662_v1  ;;  %21689 = vst [vmem:[#allocation75_spill] sm:$0xff] %v15428_v39 }
 0x46a   : > { %12322 = vmatmul.mubr.msk.f32.gmra.mxu0 %vm1986_vm5, %v15380_v45 }
 0x46b   : > { %12324 = vmatprep.mubr.msk.f32.mxu0 %vm14097_vm0, %v21662_v1 }
 0x46c   : > { %12131 = vmatmul.mubr.msk.f32.gmra.mxu1 %vm1986_vm5, %v15380_v45  ;;  %v3137_v45 = vld [vmem:[%s21337_s12 + $0x38] sm:$0xff]  ;;  %v15455_v12 = vpop.trf.xlu0 }
 0x46d   : > { %12133 = vmatprep.mubr.msk.f32.mxu1 %vm14097_vm0, %v21662_v1  ;;  %12433 = vmatpush3.msra.mxu1 %v3137_v45  ;;  %v3135_v45 = vld [vmem:[%s21337_s12 + $0x28] sm:$0xff]  ;;  %21691 = vst [vmem:[#allocation77_spill] sm:$0xff] %v15455_v12 }
 0x46e   : > { %12325 = vmatmul.mubr.msk.f32.gmra.mxu0 %vm1986_vm5, %v15396_v37  ;;  %12434 = vmatprep.subr.mxu1 %v21662_v1 }
 0x46f   : > { %12327 = vmatprep.mubr.msk.f32.mxu0 %vm14097_vm0, %v21662_v1  ;;  %12435 = vmatpush3.msra.mxu1 %v3136_v9  ;;  %v3134_v9 = vld [vmem:[%s21337_s12 + $0x20] sm:$0xff] }
 0x470   : > { %12134 = vmatmul.mubr.msk.f32.gmra.mxu1 %vm1986_vm5, %v15396_v37  ;;  %v15445_v37 = vpop.trf.xlu1  ;;  %12436 = vmatprep.subr.mxu1 %v21662_v1 }
 0x471   : > { %12136 = vmatprep.mubr.msk.f32.mxu1 %vm14097_vm0, %v21662_v1  ;;  %21690 = vst [vmem:[#allocation76_spill] sm:$0xff] %v15445_v37  ;;  %12437 = vmatpush3.msra.mxu1 %v3135_v45  ;;  %v3133_v45 = vld [vmem:[%s21337_s12 + $0x18] sm:$0xff] }
 0x472   : > { %12328 = vmatmul.mubr.msk.f32.gmra.mxu0 %vm1986_vm5, %v15412_v33  ;;  %12438 = vmatprep.subr.mxu1 %v21662_v1 }
 0x473   : > { %12330 = vmatprep.mubr.msk.f32.mxu0 %vm14097_vm0, %v21662_v1  ;;  %12439 = vmatpush3.msra.mxu1 %v3134_v9  ;;  %v3132_v9 = vld [vmem:[%s21337_s12 + $0x10] sm:$0xff] }
 0x474   : > { %12137 = vmatmul.mubr.msk.f32.gmra.mxu1 %vm1986_vm5, %v15412_v33  ;;  %12440 = vmatprep.subr.mxu1 %v21662_v1  ;;  %v15473_v33 = vpop.trf.xlu1 }
 0x475   : > { %12139 = vmatprep.mubr.msk.f32.mxu1 %vm14097_vm0, %v21662_v1  ;;  %21692 = vst [vmem:[#allocation78_spill] sm:$0xff] %v15473_v33  ;;  %12441 = vmatpush3.msra.mxu1 %v3133_v45  ;;  %v3131_v45 = vld [vmem:[%s21337_s12 + $0x8] sm:$0xff] }
 0x476   : > { %12331 = vmatmul.mubr.msk.f32.gmra.mxu0 %vm1986_vm5, %v15428_v39  ;;  %12442 = vmatprep.subr.mxu1 %v21662_v1 }
 0x477   : > { %12333 = vmatprep.mubr.msk.f32.mxu0 %vm14097_vm0, %v21662_v1  ;;  %12443 = vmatpush3.msra.mxu1 %v3132_v9  ;;  %v3130_v9 = vld [vmem:[%s21337_s12] sm:$0xff] }
 0x478   : > { %12140 = vmatmul.mubr.msk.f32.gmra.mxu1 %vm1986_vm5, %v15428_v39  ;;  %v15481_v39 = vpop.trf.xlu0  ;;  %12444 = vmatprep.subr.mxu1 %v21662_v1 }
 0x479   : > { %12142 = vmatprep.mubr.msk.f32.mxu1 %vm14097_vm0, %v21662_v1  ;;  %21693 = vst [vmem:[#allocation79_spill] sm:$0xff] %v15481_v39  ;;  %12445 = vmatpush3.msra.mxu1 %v3131_v45 }
 0x47a   : > { %12334 = vmatmul.mubr.msk.f32.gmra.mxu0 %vm1986_vm5, %v15455_v12  ;;  %12446 = vmatprep.subr.mxu1 %v21662_v1 }
 0x47b   : > { %12336 = vmatprep.mubr.msk.f32.mxu0 %vm14097_vm0, %v21662_v1  ;;  %12447 = vmatpush3.msra.mxu1 %v3130_v9 }
 0x47c   : > { %12143 = vmatmul.mubr.msk.f32.gmra.mxu1 %vm1986_vm5, %v15455_v12  ;;  %v15501_v12 = vpop.trf.xlu1  ;;  %12847 = vmatprep.subr.mxu1 %v21662_v1 }
 0x47d   : > { %12145 = vmatprep.mubr.msk.f32.mxu1 %vm14097_vm0, %v21662_v1  ;;  %21694 = vst [vmem:[#allocation80_spill] sm:$0xff] %v15501_v12 }
 0x47e   : > { %12337 = vmatmul.mubr.msk.f32.gmra.mxu0 %vm1986_vm5, %v15481_v39 }
 0x47f   : > { %12339 = vmatprep.mubr.msk.f32.mxu0 %vm14097_vm0, %v21662_v1 }
 0x480   : > { %12146 = vmatmul.mubr.msk.f32.gmra.mxu1 %vm1986_vm5, %v15481_v39  ;;  %v15516_v45 = vpop.trf.xlu1 }
 0x481   : > { %12148 = vmatprep.mubr.msk.f32.mxu1 %vm14097_vm0, %v21662_v1  ;;  %21695 = vst [vmem:[#allocation81_spill] sm:$0xff] %v15516_v45 }
 0x482   : > { %12340 = vmatmul.mubr.msk.f32.gmra.mxu0 %vm1986_vm5, %v15310_v43 }
 0x483   : > { %12342 = vmatprep.mubr.msk.f32.mxu0 %vm14097_vm0, %v21662_v1 }
 0x484   : > { %12149 = vmatmul.mubr.msk.f32.gmra.mxu1 %vm1986_vm5, %v15310_v43  ;;  %v15530_v9 = vpop.trf.xlu1 }
 0x485   : > { %12151 = vmatprep.mubr.msk.f32.mxu1 %vm14097_vm0, %v21662_v1  ;;  %21696 = vst [vmem:[#allocation82_spill] sm:$0xff] %v15530_v9 }
 0x486   : > { %12343 = vmatmul.mubr.msk.f32.gmra.mxu0 %vm1986_vm5, %v15326_v15 }
 0x487   : > { %12345 = vmatprep.mubr.msk.f32.mxu0 %vm14097_vm0, %v21662_v1 }
 0x488   : > { %12152 = vmatmul.mubr.msk.f32.gmra.mxu1 %vm1986_vm5, %v15326_v15  ;;  %v15544_v15 = vpop.trf.xlu1 }
 0x489   : > { %12154 = vmatprep.mubr.msk.f32.mxu1 %vm14097_vm0, %v21662_v1  ;;  %21697 = vst [vmem:[#allocation83_spill] sm:$0xff] %v15544_v15 }
 0x48a   : > { %12346 = vmatmul.mubr.msk.f32.gmra.mxu0 %vm1986_vm5, %v15342_v61 }
 0x48b   : > { %12348 = vmatprep.mubr.msk.f32.mxu0 %vm14097_vm0, %v21662_v1 }
 0x48c   : > { %12155 = vmatmul.mubr.msk.f32.gmra.mxu1 %vm1986_vm5, %v15342_v61 }
 0x48d   : > { %12157 = vmatprep.mubr.msk.f32.mxu1 %vm14097_vm0, %v21662_v1 }
 0x48e   : > { %12349 = vmatmul.mubr.msk.f32.gmra.mxu0 %vm1986_vm5, %v15358_v8 }
 0x48f   : > { %12351 = vmatprep.mubr.msk.f32.mxu0 %vm14097_vm0, %v21662_v1 }
 0x490   : > { %12158 = vmatmul.mubr.msk.f32.gmra.mxu1 %vm1986_vm5, %v15358_v8  ;;  %v15558_v8 = vpop.trf.xlu1 }
 0x491   : > { %12160 = vmatprep.mubr.msk.f32.mxu1 %vm14097_vm0, %v21662_v1  ;;  %21698 = vst [vmem:[#allocation84_spill] sm:$0xff] %v15558_v8 }
 0x492   : > { %12352 = vmatmul.mubr.msk.f32.gmra.mxu0 %vm1986_vm5, %v15374_v60 }
 0x493   : > { %12354 = vmatprep.mubr.msk.f32.mxu0 %vm14097_vm0, %v21662_v1 }
 0x494   : > { %12161 = vmatmul.mubr.msk.f32.gmra.mxu1 %vm1986_vm5, %v15374_v60  ;;  %v15572_v60 = vpop.trf.xlu1 }
 0x495   : > { %12163 = vmatprep.mubr.msk.f32.mxu1 %vm14097_vm0, %v21662_v1  ;;  %21699 = vst [vmem:[#allocation85_spill] sm:$0xff] %v15572_v60 }
 0x496   : > { %12355 = vmatmul.mubr.msk.f32.gmra.mxu0 %vm1986_vm5, %v15390_v49 }
 0x497   : > { %12357 = vmatprep.mubr.msk.f32.mxu0 %vm14097_vm0, %v21662_v1 }
 0x498   : > { %12164 = vmatmul.mubr.msk.f32.gmra.mxu1 %vm1986_vm5, %v15390_v49 }
 0x499   : > { %12166 = vmatprep.mubr.msk.f32.mxu1 %vm14097_vm0, %v21662_v1 }
 0x49a   : > { %12358 = vmatmul.mubr.msk.f32.gmra.mxu0 %vm1986_vm5, %v15406_v56 }
 0x49b   : > { %12360 = vmatprep.mubr.msk.f32.mxu0 %vm14097_vm0, %v21662_v1 }
 0x49c   : > { %12167 = vmatmul.mubr.msk.f32.gmra.mxu1 %vm1986_vm5, %v15406_v56  ;;  %v15586_v56 = vpop.trf.xlu1 }
 0x49d   : > { %12169 = vmatprep.mubr.msk.f32.mxu1 %vm14097_vm0, %v21662_v1  ;;  %21700 = vst [vmem:[#allocation86_spill] sm:$0xff] %v15586_v56 }
 0x49e   : > { %12361 = vmatmul.mubr.msk.f32.gmra.mxu0 %vm1986_vm5, %v15422_v4 }
 0x49f   : > { %12363 = vmatprep.mubr.msk.f32.mxu0 %vm14097_vm0, %v21662_v1 }
 0x4a0   : > { %12170 = vmatmul.mubr.msk.f32.gmra.mxu1 %vm1986_vm5, %v15422_v4  ;;  %v15600_v4 = vpop.trf.xlu1 }
 0x4a1   : > { %12172 = vmatprep.mubr.msk.f32.mxu1 %vm14097_vm0, %v21662_v1  ;;  %21701 = vst [vmem:[#allocation87_spill] sm:$0xff] %v15600_v4 }
 0x4a2   : > { %12364 = vmatmul.mubr.msk.f32.gmra.mxu0 %vm1986_vm5, %v15445_v37 }
 0x4a3   : > { %12366 = vmatprep.mubr.msk.f32.mxu0 %vm14097_vm0, %v21662_v1 }
 0x4a4   : > { %12173 = vmatmul.mubr.msk.f32.gmra.mxu1 %vm1986_vm5, %v15445_v37 }
 0x4a5   : > { %12175 = vmatprep.mubr.msk.f32.mxu1 %vm14097_vm0, %v21662_v1 }
 0x4a6   : > { %12367 = vmatmul.mubr.msk.f32.gmra.mxu0 %vm1986_vm5, %v15473_v33 }
 0x4a7   : > { %12369 = vmatprep.mubr.msk.f32.mxu0 %vm14097_vm0, %v21662_v1 }
 0x4a8   : > { %12176 = vmatmul.mubr.msk.f32.gmra.mxu1 %vm1986_vm5, %v15473_v33  ;;  %v15614_v33 = vpop.trf.xlu1 }
 0x4a9   : > { %12178 = vmatprep.mubr.msk.f32.mxu1 %vm14097_vm0, %v21662_v1  ;;  %21702 = vst [vmem:[#allocation88_spill] sm:$0xff] %v15614_v33 }
 0x4aa   : > { %12370 = vmatmul.mubr.msk.f32.gmra.mxu0 %vm1986_vm5, %v15501_v12 }
 0x4ab   : > { %12372 = vmatprep.mubr.msk.f32.mxu0 %vm14097_vm0, %v21662_v1 }
 0x4ac   : > { %12179 = vmatmul.mubr.msk.f32.gmra.mxu1 %vm1986_vm5, %v15501_v12  ;;  %v15628_v12 = vpop.trf.xlu1 }
 0x4ad   : > { %12181 = vmatprep.mubr.msk.f32.mxu1 %vm14097_vm0, %v21662_v1  ;;  %21703 = vst [vmem:[#allocation89_spill] sm:$0xff] %v15628_v12 }
 0x4ae   : > { %12373 = vmatmul.mubr.msk.f32.gmra.mxu0 %vm1986_vm5, %v15516_v45 }
 0x4af   : > { %12375 = vmatprep.mubr.msk.f32.mxu0 %vm14097_vm0, %v21662_v1 }
 0x4b0   : > { %12182 = vmatmul.mubr.msk.f32.gmra.mxu1 %vm1986_vm5, %v15516_v45 }
 0x4b1   : > { %12184 = vmatprep.mubr.msk.f32.mxu1 %vm14097_vm0, %v21662_v1 }
 0x4b2   : > { %12376 = vmatmul.mubr.msk.f32.gmra.mxu0 %vm1986_vm5, %v15530_v9 }
 0x4b3   : > { %12378 = vmatprep.mubr.msk.f32.mxu0 %vm14097_vm0, %v21662_v1 }
 0x4b4   : > { %12185 = vmatmul.mubr.msk.f32.gmra.mxu1 %vm1986_vm5, %v15530_v9  ;;  %v15642_v9 = vpop.trf.xlu1 }
 0x4b5   : > { %12187 = vmatprep.mubr.msk.f32.mxu1 %vm14097_vm0, %v21662_v1  ;;  %21704 = vst [vmem:[#allocation90_spill] sm:$0xff] %v15642_v9 }
 0x4b6   : > { %12379 = vmatmul.mubr.msk.f32.gmra.mxu0 %vm1986_vm5, %v15544_v15 }
 0x4b7   : > { %12381 = vmatprep.mubr.msk.f32.mxu0 %vm14097_vm0, %v21662_v1 }
 0x4b8   : > { %12188 = vmatmul.mubr.msk.f32.gmra.mxu1 %vm1986_vm5, %v15544_v15  ;;  %v15656_v15 = vpop.trf.xlu1 }
 0x4b9   : > { %12190 = vmatprep.mubr.msk.f32.mxu1 %vm14097_vm0, %v21662_v1  ;;  %21705 = vst [vmem:[#allocation91_spill] sm:$0xff] %v15656_v15 }
 0x4ba   : > { %12382 = vmatmul.mubr.msk.f32.gmra.mxu0 %vm1986_vm5, %v15558_v8 }
 0x4bb   : > { %12384 = vmatprep.mubr.msk.f32.mxu0 %vm14097_vm0, %v21662_v1 }
 0x4bc   : > { %12191 = vmatmul.mubr.msk.f32.gmra.mxu1 %vm1986_vm5, %v15558_v8  ;;  %v15676_v61 = vpop.trf.xlu1 }
 0x4bd   : > { %12193 = vmatprep.mubr.msk.f32.mxu1 %vm14097_vm0, %v21662_v1  ;;  %21706 = vst [vmem:[#allocation92_spill] sm:$0xff] %v15676_v61 }
 0x4be   : > { %12385 = vmatmul.mubr.msk.f32.gmra.mxu0 %vm1986_vm5, %v15572_v60 }
 0x4bf   : > { %12387 = vmatprep.mubr.msk.f32.mxu0 %vm14097_vm0, %v21662_v1 }
 0x4c0   : > { %12194 = vmatmul.mubr.msk.f32.gmra.mxu1 %vm1986_vm5, %v15572_v60 }
 0x4c1   : > { %12196 = vmatprep.mubr.msk.f32.mxu1 %vm14097_vm0, %v21662_v1 }
 0x4c2   : > { %v15658_v45 = vpop.f32.mrf.mxu0  ;;  %12388 = vmatmul.mubr.msk.f32.gmra.mxu0 %vm1986_vm5, %v15586_v56 }
 0x4c3   : > { %12390 = vmatprep.mubr.msk.f32.mxu0 %vm14097_vm0, %v21662_v1 }
 0x4c4   : > { %v15664_v8 = vpop.f32.mrf.mxu1  ;;  %12197 = vmatmul.mubr.msk.f32.gmra.mxu1 %vm1986_vm5, %v15586_v56  ;;  %v12245_v37 = vpop.f32.mrf.mxu0 }
 0x4c5   : > { %12199 = vmatprep.mubr.msk.f32.mxu1 %vm14097_vm0, %v21662_v1 }
 0x4c6   : > { %v12054_v60 = vpop.f32.mrf.mxu1  ;;  %v15670_v49 = vpop.f32.mrf.mxu0  ;;  %12391 = vmatmul.mubr.msk.f32.gmra.mxu0 %vm1986_vm5, %v15600_v4 }
 0x4c7   : > { %12393 = vmatprep.mubr.msk.f32.mxu0 %vm14097_vm0, %v21662_v1 }
 0x4c8   : > { %v15678_v43 = vpop.f32.mrf.mxu1  ;;  %12200 = vmatmul.mubr.msk.f32.gmra.mxu1 %vm1986_vm5, %v15600_v4  ;;  %v12248_v37 = vpop.f32.mrf.mxu0 }
 0x4c9   : > { %12202 = vmatprep.mubr.msk.f32.mxu1 %vm14097_vm0, %v21662_v1  ;;  %v15696_v37 = vpop.trf.xlu1 }
 0x4ca   : > { %v12057_v60 = vpop.f32.mrf.mxu1  ;;  %v15684_v56 = vpop.f32.mrf.mxu0  ;;  %12394 = vmatmul.mubr.msk.f32.gmra.mxu0 %vm1986_vm5, %v15614_v33  ;;  %21707 = vst [vmem:[#allocation93_spill] sm:$0xff] %v15696_v37 }
 0x4cb   : > { %12396 = vmatprep.mubr.msk.f32.mxu0 %vm14097_vm0, %v21662_v1 }
 0x4cc   : > { %v15690_v39 = vpop.f32.mrf.mxu1  ;;  %12203 = vmatmul.mubr.msk.f32.gmra.mxu1 %vm1986_vm5, %v15614_v33  ;;  %v12251_v58 = vpop.f32.mrf.mxu0 }
 0x4cd   : > { %12205 = vmatprep.mubr.msk.f32.mxu1 %vm14097_vm0, %v21662_v1 }
 0x4ce   : > { %v12060_v60 = vpop.f32.mrf.mxu1  ;;  %v15698_v4 = vpop.f32.mrf.mxu0  ;;  %12397 = vmatmul.mubr.msk.f32.gmra.mxu0 %vm1986_vm5, %v15628_v12 }
 0x4cf   : > { %12399 = vmatprep.mubr.msk.f32.mxu0 %vm14097_vm0, %v21662_v1  ;;  %v15716_v60 = vpop.trf.xlu1 }
 0x4d0   : > { %v15704_v57 = vpop.f32.mrf.mxu1  ;;  %12206 = vmatmul.mubr.msk.f32.gmra.mxu1 %vm1986_vm5, %v15628_v12  ;;  %v12254_v58 = vpop.f32.mrf.mxu0  ;;  %21708 = vst [vmem:[#allocation94_spill] sm:$0xff] %v15716_v60 }
 0x4d1   : > { %12208 = vmatprep.mubr.msk.f32.mxu1 %vm14097_vm0, %v21662_v1 }
 0x4d2   : > { %v12063_v33 = vpop.f32.mrf.mxu1  ;;  %v15710_v14 = vpop.f32.mrf.mxu0  ;;  %12400 = vmatmul.mubr.msk.f32.gmra.mxu0 %vm1986_vm5, %v15642_v9 }
 0x4d3   : > { %12402 = vmatprep.mubr.msk.f32.mxu0 %vm14097_vm0, %v21662_v1 }
 0x4d4   : > { %v15718_v17 = vpop.f32.mrf.mxu1  ;;  %12209 = vmatmul.mubr.msk.f32.gmra.mxu1 %vm1986_vm5, %v15642_v9  ;;  %v12257_v58 = vpop.f32.mrf.mxu0 }
 0x4d5   : > { %12211 = vmatprep.mubr.msk.f32.mxu1 %vm14097_vm0, %v21662_v1  ;;  %v15736_v58 = vpop.trf.xlu1 }
 0x4d6   : > { %v12066_v33 = vpop.f32.mrf.mxu1  ;;  %v15724_v12 = vpop.f32.mrf.mxu0  ;;  %12403 = vmatmul.mubr.msk.f32.gmra.mxu0 %vm1986_vm5, %v15656_v15  ;;  %21709 = vst [vmem:[#allocation95_spill] sm:$0xff] %v15736_v58 }
 0x4d7   : > { %12405 = vmatprep.mubr.msk.f32.mxu0 %vm14097_vm0, %v21662_v1 }
 0x4d8   : > { %v15730_v48 = vpop.f32.mrf.mxu1  ;;  %12212 = vmatmul.mubr.msk.f32.gmra.mxu1 %vm1986_vm5, %v15656_v15  ;;  %v12260_v5 = vpop.f32.mrf.mxu0 }
 0x4d9   : > { %12214 = vmatprep.mubr.msk.f32.mxu1 %vm14097_vm0, %v21662_v1 }
 0x4da   : > { %v12069_v33 = vpop.f32.mrf.mxu1  ;;  %v15738_v9 = vpop.f32.mrf.mxu0  ;;  %12406 = vmatmul.mubr.msk.f32.gmra.mxu0 %vm1986_vm5, %v15676_v61 }
 0x4db   : > { %12408 = vmatprep.mubr.msk.f32.mxu0 %vm14097_vm0, %v21662_v1  ;;  %v15756_v33 = vpop.trf.xlu1 }
 0x4dc   : > { %v15744_v18 = vpop.f32.mrf.mxu1  ;;  %12215 = vmatmul.mubr.msk.f32.gmra.mxu1 %vm1986_vm5, %v15676_v61  ;;  %v12263_v5 = vpop.f32.mrf.mxu0  ;;  %21710 = vst [vmem:[#allocation96_spill] sm:$0xff] %v15756_v33 }
 0x4dd   : > { %12217 = vmatprep.mubr.msk.f32.mxu1 %vm14097_vm0, %v21662_v1 }
 0x4de   : > { %v12072_v15 = vpop.f32.mrf.mxu1  ;;  %v15750_v11 = vpop.f32.mrf.mxu0  ;;  %12409 = vmatmul.mubr.msk.f32.gmra.mxu0 %vm1986_vm5, %v15696_v37 }
 0x4df   : > { %12411 = vmatprep.mubr.msk.f32.mxu0 %vm14097_vm0, %v21662_v1 }
 0x4e0   : > { %v15758_v52 = vpop.f32.mrf.mxu1  ;;  %12218 = vmatmul.mubr.msk.f32.gmra.mxu1 %vm1986_vm5, %v15696_v37  ;;  %v12266_v5 = vpop.f32.mrf.mxu0 }
 0x4e1   : > { %12220 = vmatprep.mubr.msk.f32.mxu1 %vm14097_vm0, %v21662_v1  ;;  %v15776_v5 = vpop.trf.xlu1 }
 0x4e2   : > { %v12075_v15 = vpop.f32.mrf.mxu1  ;;  %v15764_v61 = vpop.f32.mrf.mxu0  ;;  %12412 = vmatmul.mubr.msk.f32.gmra.mxu0 %vm1986_vm5, %v15716_v60  ;;  %21711 = vst [vmem:[#allocation97_spill] sm:$0xff] %v15776_v5 }
 0x4e3   : > { %12414 = vmatprep.mubr.msk.f32.mxu0 %vm14097_vm0, %v21662_v1 }
 0x4e4   : > { %v15770_v20 = vpop.f32.mrf.mxu1  ;;  %12221 = vmatmul.mubr.msk.f32.gmra.mxu1 %vm1986_vm5, %v15716_v60  ;;  %v12269_v42 = vpop.f32.mrf.mxu0 }
 0x4e5   : > { %12223 = vmatprep.mubr.msk.f32.mxu1 %vm14097_vm0, %v21662_v1 }
 0x4e6   : > { %v12078_v15 = vpop.f32.mrf.mxu1  ;;  %v15778_v37 = vpop.f32.mrf.mxu0  ;;  %12415 = vmatmul.mubr.msk.f32.gmra.mxu0 %vm1986_vm5, %v15736_v58 }
 0x4e7   : > { %12417 = vmatprep.mubr.msk.f32.mxu0 %vm14097_vm0, %v21662_v1  ;;  %v15796_v15 = vpop.trf.xlu1 }
 0x4e8   : > { %v15784_v44 = vpop.f32.mrf.mxu1  ;;  %12224 = vmatmul.mubr.msk.f32.gmra.mxu1 %vm1986_vm5, %v15736_v58  ;;  %v12272_v42 = vpop.f32.mrf.mxu0  ;;  %21712 = vst [vmem:[#allocation98_spill] sm:$0xff] %v15796_v15 }
 0x4e9   : > { %12226 = vmatprep.mubr.msk.f32.mxu1 %vm14097_vm0, %v21662_v1 }
 0x4ea   : > { %v12081_v60 = vpop.f32.mrf.mxu1  ;;  %v15790_v40 = vpop.f32.mrf.mxu0  ;;  %12418 = vmatmul.mubr.msk.f32.gmra.mxu0 %vm1986_vm5, %v15756_v33 }
 0x4eb   : > { %12420 = vmatprep.mubr.msk.f32.mxu0 %vm14097_vm0, %v21662_v1 }
 0x4ec   : > { %v15798_v29 = vpop.f32.mrf.mxu1  ;;  %12227 = vmatmul.mubr.msk.f32.gmra.mxu1 %vm1986_vm5, %v15756_v33  ;;  %v12275_v42 = vpop.f32.mrf.mxu0 }
 0x4ed   : > { %12229 = vmatprep.mubr.msk.f32.mxu1 %vm14097_vm0, %v21662_v1  ;;  %v15816_v42 = vpop.trf.xlu1 }
 0x4ee   : > { %v12084_v60 = vpop.f32.mrf.mxu1  ;;  %v15804_v58 = vpop.f32.mrf.mxu0  ;;  %12421 = vmatmul.mubr.msk.f32.gmra.mxu0 %vm1986_vm5, %v15776_v5  ;;  %21713 = vst [vmem:[#allocation99_spill] sm:$0xff] %v15816_v42 }
 0x4ef   : > { %12423 = vmatprep.mubr.msk.f32.mxu0 %vm14097_vm0, %v21662_v1 }
 0x4f0   : > { %v15810_v24 = vpop.f32.mrf.mxu1  ;;  %12230 = vmatmul.mubr.msk.f32.gmra.mxu1 %vm1986_vm5, %v15776_v5  ;;  %v12278_v53 = vpop.f32.mrf.mxu0 }
 0x4f1   : > { %12232 = vmatprep.mubr.msk.f32.mxu1 %vm14097_vm0, %v21662_v1  ;;  %v15836_v26 = vpop.trf.xlu1 }
 0x4f2   : > { %v12087_v60 = vpop.f32.mrf.mxu1  ;;  %v15818_v33 = vpop.f32.mrf.mxu0  ;;  %12424 = vmatmul.mubr.msk.f32.gmra.mxu0 %vm1986_vm5, %v15796_v15  ;;  %21714 = vst [vmem:[#allocation100_spill] sm:$0xff] %v15836_v26 }
 0x4f3   : > { %12426 = vmatprep.mubr.msk.f32.mxu0 %vm14097_vm0, %v21662_v1  ;;  %v2941_v60 = vmul.f32 %v15658_v45, %v14746_v6  ;;  %v2942_v45 = vmul.f32 %v15670_v49, %v14736_v3 }
 0x4f4   : > { %v15824_v63 = vpop.f32.mrf.mxu1  ;;  %12233 = vmatmul.mubr.msk.f32.gmra.mxu1 %vm1986_vm5, %v15796_v15  ;;  %v12281_v53 = vpop.f32.mrf.mxu0 }
 0x4f5   : > { %12235 = vmatprep.mubr.msk.f32.mxu1 %vm14097_vm0, %v21662_v1  ;;  %v3004_v6 = vsub.f32 %v2941_v60, %v15664_v8  ;;  %v3005_v49 = vsub.f32 %v2942_v45, %v15678_v43  ;;  %v2943_v60 = vmul.f32 %v15684_v56, %v14723_v2  ;;  %v2944_v43 = vmul.f32 %v15698_v4, %v14708_v51 }
 0x4f6   : > { %v12090_v5 = vpop.f32.mrf.mxu1  ;;  %v15832_v21 = vpop.f32.mrf.mxu0  ;;  %12427 = vmatmul.mubr.msk.f32.gmra.mxu0 %vm1986_vm5, %v15816_v42 }
 0x4f7   : > { %12429 = vmatprep.mubr.msk.f32.mxu0 %vm14097_vm0, %v21662_v1  ;;  %v3067_v3 = vmax.f32 %v3004_v6, 0.0 }
 0x4f8   : > { %v15840_v30 = vpop.f32.mrf.mxu1  ;;  %12236 = vmatmul.mubr.msk.f32.gmra.mxu1 %vm1986_vm5, %v15816_v42  ;;  %v12284_v53 = vpop.f32.mrf.mxu0 }
 0x4f9   : > { %12238 = vmatprep.mubr.msk.f32.mxu1 %vm14097_vm0, %v21662_v1 }
 0x4fa   : > { %v12093_v5 = vpop.f32.mrf.mxu1  ;;  %v15849_v15 = vpop.f32.mrf.mxu0  ;;  %12430 = vmatmul.mubr.msk.f32.gmra.mxu0 %vm1986_vm5, %v15836_v26 }
 0x4fb   : > { %3778 = vmatprep.mubr.f32.mxu0 %v14045_v35 }
 0x4fc   : > { %v15856_v53 = vpop.f32.mrf.mxu1  ;;  %12239 = vmatmul.mubr.msk.f32.gmra.mxu1 %vm1986_vm5, %v15836_v26  ;;  %v12287_v8 = vpop.f32.mrf.mxu0  ;;  %v3006_v26 = vsub.f32 %v2943_v60, %v15690_v39  ;;  %v2945_v39 = vmul.f32 %v15710_v14, %v14696_v62 }
 0x4fd   : > { %12448 = vmatprep.mubr.msk.f32.mxu1 %vm14097_vm0, %v21662_v1  ;;  %v3068_v8 = vmax.f32 %v3005_v49, 0.0 }
 0x4fe   : > { %v12096_v5 = vpop.f32.mrf.mxu1  ;;  %v15865_v42 = vpop.f32.mrf.mxu0 }
 0x4ff   : > { %v3007_v5 = vsub.f32 %v2944_v43, %v15704_v57 }
 0x500   : > { %v15867_v38 = vpop.f32.mrf.mxu1  ;;  %v12290_v35 = vpop.f32.mrf.mxu0  ;;  %12449 = vmatmul.mubr.msk.f32.vlgmr.msra.gmra.mxu1 %vm834_vm1, %v3067_v3  ;;  %v3069_v3 = vmax.f32 %v3006_v26, 0.0  ;;  %v2946_v26 = vmul.f32 %v15724_v12, %v14686_v55 }
 0x501   : > { %12451 = vmatprep.mubr.msk.f32.mxu1 %vm14097_vm0, %v21662_v1  ;;  %v3070_v35 = vmax.f32 %v3007_v5, 0.0 }
 0x502   : > { %v12099_v6 = vpop.f32.mrf.mxu1  ;;  %v15875_v45 = vpop.f32.mrf.mxu0 }
 0x504   : > { %v15877_v2 = vpop.f32.mrf.mxu1  ;;  %v12293_v56 = vpop.f32.mrf.mxu0  ;;  %12452 = vmatmul.mubr.msk.f32.gmra.mxu1 %vm834_vm1, %v3068_v8  ;;  %v3008_v8 = vsub.f32 %v2945_v39, %v15718_v17  ;;  %v2947_v17 = vmul.f32 %v15738_v9, %v14674_v59 }
 0x505   : > { %12454 = vmatprep.mubr.msk.f32.mxu1 %vm14097_vm0, %v21662_v1  ;;  %v3009_v56 = vsub.f32 %v2946_v26, %v15730_v48  ;;  %v2948_v48 = vmul.f32 %v15750_v11, %v14664_v22 }
 0x506   : > { %v12102_v49 = vpop.f32.mrf.mxu1  ;;  %v15885_v60 = vpop.f32.mrf.mxu0  ;;  %v3071_v6 = vmax.f32 %v3008_v8, 0.0 }
 0x507   : > { %v3072_v39 = vmax.f32 %v3009_v56, 0.0  ;;  %v3010_v49 = vsub.f32 %v2947_v17, %v15744_v18  ;;  %v3011_v26 = vsub.f32 %v2948_v48, %v15758_v52  ;;  %v2949_v18 = vmul.f32 %v15764_v61, %v14653_v25 }
 0x508   : > { %v15887_v51 = vpop.f32.mrf.mxu1  ;;  %v12296_v4 = vpop.f32.mrf.mxu0  ;;  %12455 = vmatmul.mubr.msk.f32.gmra.mxu1 %vm834_vm1, %v3069_v3  ;;  %v2950_v52 = vmul.f32 %v15778_v37, %v14644_v28 }
 0x509   : > { %12457 = vmatprep.mubr.msk.f32.mxu1 %vm14097_vm0, %v21662_v1  ;;  %v3073_v8 = vmax.f32 %v3010_v49, 0.0  ;;  %v3012_v56 = vsub.f32 %v2949_v18, %v15770_v20  ;;  %v2951_v20 = vmul.f32 %v15790_v40, %v14633_v31 }
 0x50a   : > { %v12105_v57 = vpop.f32.mrf.mxu1  ;;  %v15895_v43 = vpop.f32.mrf.mxu0 }
 0x50c   : > { %v15897_v62 = vpop.f32.mrf.mxu1  ;;  %v12299_v14 = vpop.f32.mrf.mxu0  ;;  %12458 = vmatmul.mubr.msk.f32.gmra.mxu1 %vm834_vm1, %v3070_v35 }
 0x50d   : > { %12460 = vmatprep.mubr.msk.f32.mxu1 %vm14097_vm0, %v21662_v1 }
 0x50e   : > { %v12108_v3 = vpop.f32.mrf.mxu1  ;;  %v15905_v5 = vpop.f32.mrf.mxu0 }
 0x510   : > { %v15907_v55 = vpop.f32.mrf.mxu1  ;;  %v12302_v12 = vpop.f32.mrf.mxu0  ;;  %12461 = vmatmul.mubr.msk.f32.gmra.mxu1 %vm834_vm1, %v3071_v6  ;;  %v3074_v6 = vmax.f32 %v3011_v26, 0.0 }
 0x511   : > { %12463 = vmatprep.mubr.msk.f32.mxu1 %vm14097_vm0, %v21662_v1  ;;  %v3075_v12 = vmax.f32 %v3012_v56, 0.0 }
 0x512   : > { %v12111_v4 = vpop.f32.mrf.mxu1  ;;  %v15915_v35 = vpop.f32.mrf.mxu0 }
 0x514   : > { %v15917_v59 = vpop.f32.mrf.mxu1  ;;  %v12305_v9 = vpop.f32.mrf.mxu0  ;;  %12464 = vmatmul.mubr.msk.f32.gmra.mxu1 %vm834_vm1, %v3072_v39  ;;  %v3013_v39 = vsub.f32 %v2950_v52, %v15784_v44  ;;  %v2952_v44 = vmul.f32 %v15804_v58, %v14624_v34 }
 0x515   : > { %12466 = vmatprep.mubr.msk.f32.mxu1 %vm14097_vm0, %v21662_v1  ;;  %v3014_v9 = vsub.f32 %v2951_v20, %v15798_v29  ;;  %v2953_v29 = vmul.f32 %v15818_v33, %v14613_v36 }
 0x516   : > { %v12114_v57 = vpop.f32.mrf.mxu1  ;;  %v15925_v14 = vpop.f32.mrf.mxu0  ;;  %v3076_v4 = vmax.f32 %v3013_v39, 0.0 }
 0x517   : > { %v3077_v18 = vmax.f32 %v3014_v9, 0.0  ;;  %v3015_v57 = vsub.f32 %v2952_v44, %v15810_v24  ;;  %v3016_v52 = vsub.f32 %v2953_v29, %v15824_v63  ;;  %v2954_v24 = vmul.f32 %v15832_v21, %v14604_v32 }
 0x518   : > { %v15927_v22 = vpop.f32.mrf.mxu1  ;;  %v12308_v11 = vpop.f32.mrf.mxu0  ;;  %12467 = vmatmul.mubr.msk.f32.gmra.mxu1 %vm834_vm1, %v3073_v8  ;;  %v2955_v63 = vmul.f32 %v15849_v15, %v14594_v27 }
 0x519   : > { %12469 = vmatprep.mubr.msk.f32.mxu1 %vm14097_vm0, %v21662_v1  ;;  %v3078_v56 = vmax.f32 %v3015_v57, 0.0  ;;  %v3017_v39 = vsub.f32 %v2954_v24, %v15840_v30  ;;  %v2956_v30 = vmul.f32 %v15865_v42, %v14587_v23 }
 0x51a   : > { %v12117_v17 = vpop.f32.mrf.mxu1  ;;  %v15935_v3 = vpop.f32.mrf.mxu0 }
 0x51c   : > { %v15937_v25 = vpop.f32.mrf.mxu1  ;;  %v12311_v61 = vpop.f32.mrf.mxu0  ;;  %12470 = vmatmul.mubr.msk.f32.gmra.mxu1 %vm834_vm1, %v3074_v6 }
 0x51d   : > { %12472 = vmatprep.mubr.msk.f32.mxu1 %vm14097_vm0, %v21662_v1 }
 0x51e   : > { %v12120_v49 = vpop.f32.mrf.mxu1  ;;  %v15945_v48 = vpop.f32.mrf.mxu0 }
 0x520   : > { %v15947_v28 = vpop.f32.mrf.mxu1  ;;  %v12314_v37 = vpop.f32.mrf.mxu0  ;;  %12473 = vmatmul.mubr.msk.f32.gmra.mxu1 %vm834_vm1, %v3075_v12  ;;  %v3079_v12 = vmax.f32 %v3016_v52, 0.0 }
 0x521   : > { %12475 = vmatprep.mubr.msk.f32.mxu1 %vm14097_vm0, %v21662_v1  ;;  %v3080_v37 = vmax.f32 %v3017_v39, 0.0 }
 0x522   : > { %v12123_v8 = vpop.f32.mrf.mxu1  ;;  %v15955_v26 = vpop.f32.mrf.mxu0 }
 0x524   : > { %v15957_v31 = vpop.f32.mrf.mxu1  ;;  %v12317_v40 = vpop.f32.mrf.mxu0  ;;  %12476 = vmatmul.mubr.msk.f32.gmra.mxu1 %vm834_vm1, %v3076_v4  ;;  %v3018_v4 = vsub.f32 %v2955_v63, %v15856_v53  ;;  %v2957_v53 = vmul.f32 %v15875_v45, %v14741_v0 }
 0x525   : > { %12478 = vmatprep.mubr.msk.f32.mxu1 %vm14097_vm0, %v21662_v1  ;;  %v3019_v40 = vsub.f32 %v2956_v30, %v15867_v38  ;;  %v2958_v38 = vmul.f32 %v15885_v60, %v14731_v47 }
 0x526   : > { %v12126_v11 = vpop.f32.mrf.mxu1  ;;  %v15965_v6 = vpop.f32.mrf.mxu0  ;;  %v3081_v8 = vmax.f32 %v3018_v4, 0.0 }
 0x527   : > { %v3082_v29 = vmax.f32 %v3019_v40, 0.0  ;;  %v3020_v11 = vsub.f32 %v2957_v53, %v15877_v2  ;;  %v3021_v24 = vsub.f32 %v2958_v38, %v15887_v51  ;;  %v2959_v2 = vmul.f32 %v15895_v43, %v14713_v7 }
 0x528   : > { %v15967_v34 = vpop.f32.mrf.mxu1  ;;  %v12320_v58 = vpop.f32.mrf.mxu0  ;;  %12479 = vmatmul.mubr.msk.f32.gmra.mxu1 %vm834_vm1, %v3077_v18  ;;  %v2960_v51 = vmul.f32 %v15905_v5, %v14703_v10 }
 0x529   : > { %12481 = vmatprep.mubr.msk.f32.mxu1 %vm14097_vm0, %v21662_v1  ;;  %v3083_v52 = vmax.f32 %v3020_v11, 0.0  ;;  %v3022_v39 = vsub.f32 %v2959_v2, %v15897_v62  ;;  %v2961_v62 = vmul.f32 %v15915_v35, %v14691_v13 }
 0x52a   : > { %v12129_v17 = vpop.f32.mrf.mxu1  ;;  %v15975_v61 = vpop.f32.mrf.mxu0 }
 0x52c   : > { %v15977_v36 = vpop.f32.mrf.mxu1  ;;  %v12323_v33 = vpop.f32.mrf.mxu0  ;;  %12482 = vmatmul.mubr.msk.f32.gmra.mxu1 %vm834_vm1, %v3078_v56 }
 0x52d   : > { %12484 = vmatprep.mubr.msk.f32.mxu1 %vm14097_vm0, %v21662_v1 }
 0x52e   : > { %v12132_v20 = vpop.f32.mrf.mxu1  ;;  %v15985_v49 = vpop.f32.mrf.mxu0 }
 0x530   : > { %v15987_v21 = vpop.f32.mrf.mxu1  ;;  %v12326_v32 = vpop.f32.mrf.mxu0  ;;  %12485 = vmatmul.mubr.msk.f32.gmra.mxu1 %vm834_vm1, %v3079_v12  ;;  %v3084_v12 = vmax.f32 %v3021_v24, 0.0 }
 0x531   : > { %12487 = vmatprep.mubr.msk.f32.mxu1 %vm14097_vm0, %v21662_v1  ;;  %v3085_v32 = vmax.f32 %v3022_v39, 0.0 }
 0x532   : > { %v12135_v9 = vpop.f32.mrf.mxu1  ;;  %v15995_v44 = vpop.f32.mrf.mxu0 }
 0x534   : > { %v15997_v27 = vpop.f32.mrf.mxu1  ;;  %v12329_v15 = vpop.f32.mrf.mxu0  ;;  %12488 = vmatmul.mubr.msk.f32.gmra.mxu1 %vm834_vm1, %v3080_v37  ;;  %v3023_v37 = vsub.f32 %v2960_v51, %v15907_v55  ;;  %v2962_v55 = vmul.f32 %v15925_v14, %v14681_v16 }
 0x535   : > { %12490 = vmatprep.mubr.msk.f32.mxu1 %vm14097_vm0, %v21662_v1  ;;  %v3024_v15 = vsub.f32 %v2961_v62, %v15917_v59  ;;  %v2963_v59 = vmul.f32 %v15935_v3, %v14669_v19 }
 0x536   : > { %v12138_v18 = vpop.f32.mrf.mxu1  ;;  %v16005_v57 = vpop.f32.mrf.mxu0  ;;  %v3086_v9 = vmax.f32 %v3023_v37, 0.0 }
 0x537   : > { %v3087_v53 = vmax.f32 %v3024_v15, 0.0  ;;  %v3025_v18 = vsub.f32 %v2962_v55, %v15927_v22  ;;  %v3026_v38 = vsub.f32 %v2963_v59, %v15937_v25  ;;  %v2964_v22 = vmul.f32 %v15945_v48, %v14659_v54 }
 0x538   : > { %v16007_v23 = vpop.f32.mrf.mxu1  ;;  %v12332_v42 = vpop.f32.mrf.mxu0  ;;  %12491 = vmatmul.mubr.msk.f32.gmra.mxu1 %vm834_vm1, %v3081_v8  ;;  %v2965_v25 = vmul.f32 %v15955_v26, %v14648_v50 }
 0x539   : > { %12493 = vmatprep.mubr.msk.f32.mxu1 %vm14097_vm0, %v21662_v1  ;;  %v3088_v11 = vmax.f32 %v3025_v18, 0.0  ;;  %v3027_v24 = vsub.f32 %v2964_v22, %v15947_v28  ;;  %v2966_v28 = vmul.f32 %v15965_v6, %v14639_v46 }
 0x53a   : > { %v12141_v58 = vpop.f32.mrf.mxu1  ;;  %v16015_v56 = vpop.f32.mrf.mxu0 }
 0x53c   : > { %v16017_v0 = vpop.f32.mrf.mxu1  ;;  %v12335_v45 = vpop.f32.mrf.mxu0  ;;  %12494 = vmatmul.mubr.msk.f32.gmra.mxu1 %vm834_vm1, %v3082_v29 }
 0x53d   : > { %12496 = vmatprep.mubr.msk.f32.mxu1 %vm14097_vm0, %v21662_v1 }
 0x53e   : > { %v12144_v17 = vpop.f32.mrf.mxu1  ;;  %v16025_v33 = vpop.f32.mrf.mxu0 }
 0x540   : > { %v16027_v47 = vpop.f32.mrf.mxu1  ;;  %v12338_v60 = vpop.f32.mrf.mxu0  ;;  %12497 = vmatmul.mubr.msk.f32.gmra.mxu1 %vm834_vm1, %v3083_v52  ;;  %v3089_v52 = vmax.f32 %v3026_v38, 0.0 }
 0x541   : > { %12499 = vmatprep.mubr.msk.f32.mxu1 %vm14097_vm0, %v21662_v1  ;;  %v3090_v60 = vmax.f32 %v3027_v24, 0.0  ;;  %v21718_v24 = vld [vmem:[#allocation3_spill] sm:$0xff] }
 0x542   : > { %v12147_v63 = vpop.f32.mrf.mxu1  ;;  %v16035_v20 = vpop.f32.mrf.mxu0 }
 0x544   : > { %v16037_v7 = vpop.f32.mrf.mxu1  ;;  %v12341_v43 = vpop.f32.mrf.mxu0  ;;  %12500 = vmatmul.mubr.msk.f32.gmra.mxu1 %vm834_vm1, %v3084_v12  ;;  %v3028_v12 = vsub.f32 %v2965_v25, %v15957_v31  ;;  %v2967_v31 = vmul.f32 %v15975_v61, %v14628_v41 }
 0x545   : > { %12502 = vmatprep.mubr.msk.f32.mxu1 %vm14097_vm0, %v21662_v1  ;;  %v3029_v43 = vsub.f32 %v2966_v28, %v15967_v34  ;;  %v21719_v28 = vld [vmem:[#allocation2_spill] sm:$0xff] }
 0x546   : > { %v12150_v4 = vpop.f32.mrf.mxu1  ;;  %v16045_v30 = vpop.f32.mrf.mxu0  ;;  %v3091_v63 = vmax.f32 %v3028_v12, 0.0 }
 0x547   : > { %v3092_v62 = vmax.f32 %v3029_v43, 0.0  ;;  %v3030_v4 = vsub.f32 %v2967_v31, %v15977_v36 }
 0x548   : > { %v16047_v10 = vpop.f32.mrf.mxu1  ;;  %v12344_v5 = vpop.f32.mrf.mxu0  ;;  %12503 = vmatmul.mubr.msk.f32.gmra.mxu1 %vm834_vm1, %v3085_v32 }
 0x549   : > { %12505 = vmatprep.mubr.msk.f32.mxu1 %vm14097_vm0, %v21662_v1  ;;  %v21715_v5 = vld [vmem:[#allocation6_spill] sm:$0xff]  ;;  %v3093_v55 = vmax.f32 %v3030_v4, 0.0 }
 0x54a   : > { %v12153_v8 = vpop.f32.mrf.mxu1  ;;  %v16055_v40 = vpop.f32.mrf.mxu0  ;;  %v2968_v34 = vmul.f32 %v15985_v49, %v21715_v5 }
 0x54c   : > { %v16057_v13 = vpop.f32.mrf.mxu1  ;;  %v12347_v35 = vpop.f32.mrf.mxu0  ;;  %12506 = vmatmul.mubr.msk.f32.gmra.mxu1 %vm834_vm1, %v3086_v9  ;;  %v3031_v8 = vsub.f32 %v2968_v34, %v15987_v21 }
 0x54d   : > { %12508 = vmatprep.mubr.msk.f32.mxu1 %vm14097_vm0, %v21662_v1  ;;  %v21716_v35 = vld [vmem:[#allocation5_spill] sm:$0xff] }
 0x54e   : > { %v12156_v42 = vpop.f32.mrf.mxu1  ;;  %v16065_v29 = vpop.f32.mrf.mxu0  ;;  %v2969_v36 = vmul.f32 %v15995_v44, %v21716_v35 }
 0x54f   : > { %v3094_v42 = vmax.f32 %v3031_v8, 0.0 }
 0x550   : > { %v16067_v16 = vpop.f32.mrf.mxu1  ;;  %v12350_v14 = vpop.f32.mrf.mxu0  ;;  %12509 = vmatmul.mubr.msk.f32.gmra.mxu1 %vm834_vm1, %v3087_v53 }
 0x551   : > { %12511 = vmatprep.mubr.msk.f32.mxu1 %vm14097_vm0, %v21662_v1  ;;  %v3032_v14 = vsub.f32 %v2969_v36, %v15997_v27  ;;  %v2971_v27 = vmul.f32 %v16015_v56, %v21718_v24 }
 0x552   : > { %v12159_v58 = vpop.f32.mrf.mxu1  ;;  %v16075_v45 = vpop.f32.mrf.mxu0 }
 0x553   : > { %v3034_v12 = vsub.f32 %v2971_v27, %v16017_v0 }
 0x554   : > { %v16077_v19 = vpop.f32.mrf.mxu1  ;;  %v12353_v3 = vpop.f32.mrf.mxu0  ;;  %12512 = vmatmul.mubr.msk.f32.gmra.mxu1 %vm834_vm1, %v3088_v11  ;;  %v21717_v11 = vld [vmem:[#allocation4_spill] sm:$0xff] }
 0x555   : > { %12514 = vmatprep.mubr.msk.f32.mxu1 %vm14097_vm0, %v21662_v1  ;;  %v2970_v21 = vmul.f32 %v16005_v57, %v21717_v11  ;;  %v3095_v3 = vmax.f32 %v3032_v14, 0.0  ;;  %v3097_v43 = vmax.f32 %v3034_v12, 0.0 }
 0x556   : > { %v12162_v2 = vpop.f32.mrf.mxu1  ;;  %v16085_v17 = vpop.f32.mrf.mxu0 }
 0x558   : > { %v16087_v54 = vpop.f32.mrf.mxu1  ;;  %v12356_v48 = vpop.f32.mrf.mxu0  ;;  %12515 = vmatmul.mubr.msk.f32.gmra.mxu1 %vm834_vm1, %v3089_v52  ;;  %v3033_v52 = vsub.f32 %v2970_v21, %v16007_v23  ;;  %v2972_v23 = vmul.f32 %v16025_v33, %v21719_v28 }
 0x559   : > { %12517 = vmatprep.mubr.msk.f32.mxu1 %vm14097_vm0, %v21662_v1 }
 0x55a   : > { %v12165_v39 = vpop.f32.mrf.mxu1  ;;  %v16095_v51 = vpop.f32.mrf.mxu0  ;;  %v3035_v31 = vsub.f32 %v2972_v23, %v16027_v47 }
 0x55c   : > { %v16097_v50 = vpop.f32.mrf.mxu1  ;;  %v12359_v26 = vpop.f32.mrf.mxu0  ;;  %12518 = vmatmul.mubr.msk.f32.gmra.mxu1 %vm834_vm1, %v3090_v60  ;;  %v3096_v60 = vmax.f32 %v3033_v52, 0.0  ;;  %v3098_v5 = vmax.f32 %v3035_v31, 0.0 }
 0x55d   : > { %12520 = vmatprep.mubr.msk.f32.mxu1 %vm14097_vm0, %v21662_v1 }
 0x55e   : > { %v12168_v32 = vpop.f32.mrf.mxu1  ;;  %v16105_v37 = vpop.f32.mrf.mxu0 }
 0x55f   : > { %v21720_v32 = vld [vmem:[#allocation22_spill] sm:$0xff] }
 0x560   : > { %v16107_v46 = vpop.f32.mrf.mxu1  ;;  %v12362_v6 = vpop.f32.mrf.mxu0  ;;  %12521 = vmatmul.mubr.msk.f32.gmra.mxu1 %vm834_vm1, %v3091_v63  ;;  %v2973_v0 = vmul.f32 %v16035_v20, %v21720_v32 }
 0x561   : > { %12523 = vmatprep.mubr.msk.f32.mxu1 %vm14097_vm0, %v21662_v1 }
 0x562   : > { %v12171_v9 = vpop.f32.mrf.mxu1  ;;  %v16115_v15 = vpop.f32.mrf.mxu0  ;;  %v3036_v34 = vsub.f32 %v2973_v0, %v16037_v7 }
 0x563   : > { %v21721_v9 = vld [vmem:[#allocation21_spill] sm:$0xff] }
 0x564   : > { %v16117_v41 = vpop.f32.mrf.mxu1  ;;  %v12365_v61 = vpop.f32.mrf.mxu0  ;;  %12524 = vmatmul.mubr.msk.f32.gmra.mxu1 %vm834_vm1, %v3092_v62  ;;  %v2974_v47 = vmul.f32 %v16045_v30, %v21721_v9  ;;  %v3099_v35 = vmax.f32 %v3036_v34, 0.0 }
 0x565   : > { %12526 = vmatprep.mubr.msk.f32.mxu1 %vm14097_vm0, %v21662_v1 }
 0x566   : > { %v12174_v53 = vpop.f32.mrf.mxu1  ;;  %v16125_v18 = vpop.f32.mrf.mxu0  ;;  %v3037_v36 = vsub.f32 %v2974_v47, %v16047_v10 }
 0x567   : > { %v21722_v53 = vld [vmem:[#allocation20_spill] sm:$0xff] }
 0x568   : > { %v16127_v49 = vpop.f32.mrf.mxu1  ;;  %v12368_v59 = vpop.f32.mrf.mxu0  ;;  %12527 = vmatmul.mubr.msk.f32.gmra.mxu1 %vm834_vm1, %v3093_v55  ;;  %v2975_v7 = vmul.f32 %v16055_v40, %v21722_v53  ;;  %v3100_v11 = vmax.f32 %v3037_v36, 0.0 }
 0x569   : > { %12529 = vmatprep.mubr.msk.f32.mxu1 %vm14097_vm0, %v21662_v1 }
 0x56a   : > { %v12177_v38 = vpop.f32.mrf.mxu1  ;;  %v16135_v22 = vpop.f32.mrf.mxu0  ;;  %v3038_v21 = vsub.f32 %v2975_v7, %v16057_v13 }
 0x56b   : > { %v21723_v38 = vld [vmem:[#allocation19_spill] sm:$0xff] }
 0x56c   : > { %v16137_v44 = vpop.f32.mrf.mxu1  ;;  %v12371_v58 = vpop.f32.mrf.mxu0  ;;  %12530 = vmatmul.mubr.msk.f32.gmra.mxu1 %vm834_vm1, %v3094_v42  ;;  %v2976_v10 = vmul.f32 %v16065_v29, %v21723_v38  ;;  %v3101_v24 = vmax.f32 %v3038_v21, 0.0 }
 0x56d   : > { %12532 = vmatprep.mubr.msk.f32.mxu1 %vm14097_vm0, %v21662_v1 }
 0x56e   : > { %v12180_v25 = vpop.f32.mrf.mxu1  ;;  %v16145_v2 = vpop.f32.mrf.mxu0  ;;  %v3039_v27 = vsub.f32 %v2976_v10, %v16067_v16 }
 0x56f   : > { %v21724_v25 = vld [vmem:[#allocation18_spill] sm:$0xff] }
 0x570   : > { %v16147_v57 = vpop.f32.mrf.mxu1  ;;  %v12374_v48 = vpop.f32.mrf.mxu0  ;;  %12533 = vmatmul.mubr.msk.f32.gmra.mxu1 %vm834_vm1, %v3095_v3  ;;  %v2977_v13 = vmul.f32 %v16075_v45, %v21724_v25  ;;  %v3102_v28 = vmax.f32 %v3039_v27, 0.0 }
 0x571   : > { %12535 = vmatprep.mubr.msk.f32.mxu1 %vm14097_vm0, %v21662_v1 }
 0x572   : > { %v12183_v39 = vpop.f32.mrf.mxu1  ;;  %v16155_v26 = vpop.f32.mrf.mxu0  ;;  %v3040_v23 = vsub.f32 %v2977_v13, %v16077_v19 }
 0x573   : > { %v21725_v39 = vld [vmem:[#allocation17_spill] sm:$0xff] }
 0x574   : > { %v16157_v56 = vpop.f32.mrf.mxu1  ;;  %v12377_v63 = vpop.f32.mrf.mxu0  ;;  %12536 = vmatmul.mubr.msk.f32.gmra.mxu1 %vm834_vm1, %v3096_v60  ;;  %v2978_v16 = vmul.f32 %v16085_v17, %v21725_v39  ;;  %v3103_v32 = vmax.f32 %v3040_v23, 0.0 }
 0x575   : > { %12538 = vmatprep.mubr.msk.f32.mxu1 %vm14097_vm0, %v21662_v1 }
 0x576   : > { %v12186_v6 = vpop.f32.mrf.mxu1  ;;  %v16165_v62 = vpop.f32.mrf.mxu0  ;;  %v3041_v0 = vsub.f32 %v2978_v16, %v16087_v54 }
 0x577   : > { %v21726_v6 = vld [vmem:[#allocation16_spill] sm:$0xff] }
 0x578   : > { %v16167_v33 = vpop.f32.mrf.mxu1  ;;  %v12380_v4 = vpop.f32.mrf.mxu0  ;;  %12539 = vmatmul.mubr.msk.f32.gmra.mxu1 %vm834_vm1, %v3097_v43  ;;  %v2979_v19 = vmul.f32 %v16095_v51, %v21726_v6  ;;  %v3104_v9 = vmax.f32 %v3041_v0, 0.0 }
 0x579   : > { %12541 = vmatprep.mubr.msk.f32.mxu1 %vm14097_vm0, %v21662_v1 }
 0x57a   : > { %v12189_v61 = vpop.f32.mrf.mxu1  ;;  %v16175_v55 = vpop.f32.mrf.mxu0  ;;  %v3042_v47 = vsub.f32 %v2979_v19, %v16097_v50 }
 0x57b   : > { %v21727_v61 = vld [vmem:[#allocation15_spill] sm:$0xff] }
 0x57c   : > { %v16177_v20 = vpop.f32.mrf.mxu1  ;;  %v12383_v8 = vpop.f32.mrf.mxu0  ;;  %12542 = vmatmul.mubr.msk.f32.gmra.mxu1 %vm834_vm1, %v3098_v5  ;;  %v2980_v54 = vmul.f32 %v16105_v37, %v21727_v61  ;;  %v3105_v53 = vmax.f32 %v3042_v47, 0.0 }
 0x57d   : > { %12544 = vmatprep.mubr.msk.f32.mxu1 %vm14097_vm0, %v21662_v1 }
 0x57e   : > { %v12192_v59 = vpop.f32.mrf.mxu1  ;;  %v16185_v42 = vpop.f32.mrf.mxu0  ;;  %v3043_v7 = vsub.f32 %v2980_v54, %v16107_v46 }
 0x57f   : > { %v21728_v59 = vld [vmem:[#allocation14_spill] sm:$0xff] }
 0x580   : > { %v16187_v30 = vpop.f32.mrf.mxu1  ;;  %v12386_v14 = vpop.f32.mrf.mxu0  ;;  %12545 = vmatmul.mubr.msk.f32.gmra.mxu1 %vm834_vm1, %v3099_v35  ;;  %v2981_v50 = vmul.f32 %v16115_v15, %v21728_v59  ;;  %v3106_v38 = vmax.f32 %v3043_v7, 0.0 }
 0x581   : > { %12547 = vmatprep.mubr.msk.f32.mxu1 %vm14097_vm0, %v21662_v1 }
 0x582   : > { %v12195_v58 = vpop.f32.mrf.mxu1  ;;  %v16195_v3 = vpop.f32.mrf.mxu0  ;;  %v3044_v10 = vsub.f32 %v2981_v50, %v16117_v41 }
 0x583   : > { %v21729_v58 = vld [vmem:[#allocation13_spill] sm:$0xff] }
 0x584   : > { %v16197_v40 = vpop.f32.mrf.mxu1  ;;  %v12389_v52 = vpop.f32.mrf.mxu0  ;;  %12548 = vmatmul.mubr.msk.f32.gmra.mxu1 %vm834_vm1, %v3100_v11  ;;  %v2982_v46 = vmul.f32 %v16125_v18, %v21729_v58  ;;  %v3107_v25 = vmax.f32 %v3044_v10, 0.0 }
 0x585   : > { %12550 = vmatprep.mubr.msk.f32.mxu1 %vm14097_vm0, %v21662_v1 }
 0x586   : > { %v12198_v48 = vpop.f32.mrf.mxu1  ;;  %v16205_v60 = vpop.f32.mrf.mxu0  ;;  %v3045_v13 = vsub.f32 %v2982_v46, %v16127_v49 }
 0x587   : > { %v21730_v48 = vld [vmem:[#allocation12_spill] sm:$0xff] }
 0x588   : > { %v16207_v29 = vpop.f32.mrf.mxu1  ;;  %v12392_v12 = vpop.f32.mrf.mxu0  ;;  %12551 = vmatmul.mubr.msk.f32.gmra.mxu1 %vm834_vm1, %v3101_v24  ;;  %v2983_v41 = vmul.f32 %v16135_v22, %v21730_v48  ;;  %v3108_v39 = vmax.f32 %v3045_v13, 0.0 }
 0x589   : > { %12553 = vmatprep.mubr.msk.f32.mxu1 %vm14097_vm0, %v21662_v1 }
 0x58a   : > { %v12201_v63 = vpop.f32.mrf.mxu1  ;;  %v16215_v43 = vpop.f32.mrf.mxu0  ;;  %v3046_v16 = vsub.f32 %v2983_v41, %v16137_v44 }
 0x58b   : > { %v21731_v63 = vld [vmem:[#allocation11_spill] sm:$0xff] }
 0x58c   : > { %v16217_v45 = vpop.f32.mrf.mxu1  ;;  %v12395_v31 = vpop.f32.mrf.mxu0  ;;  %12554 = vmatmul.mubr.msk.f32.gmra.mxu1 %vm834_vm1, %v3102_v28  ;;  %v2984_v49 = vmul.f32 %v16145_v2, %v21731_v63  ;;  %v3109_v6 = vmax.f32 %v3046_v16, 0.0 }
 0x58d   : > { %12556 = vmatprep.mubr.msk.f32.mxu1 %vm14097_vm0, %v21662_v1 }
 0x58e   : > { %v12204_v4 = vpop.f32.mrf.mxu1  ;;  %v16225_v5 = vpop.f32.mrf.mxu0  ;;  %v3047_v19 = vsub.f32 %v2984_v49, %v16147_v57 }
 0x58f   : > { %v21732_v4 = vld [vmem:[#allocation10_spill] sm:$0xff] }
 0x590   : > { %v16227_v17 = vpop.f32.mrf.mxu1  ;;  %v12398_v34 = vpop.f32.mrf.mxu0  ;;  %12557 = vmatmul.mubr.msk.f32.gmra.mxu1 %vm834_vm1, %v3103_v32  ;;  %v2985_v44 = vmul.f32 %v16155_v26, %v21732_v4  ;;  %v3110_v61 = vmax.f32 %v3047_v19, 0.0 }
 0x591   : > { %12559 = vmatprep.mubr.msk.f32.mxu1 %vm14097_vm0, %v21662_v1 }
 0x592   : > { %v12207_v8 = vpop.f32.mrf.mxu1  ;;  %v16235_v35 = vpop.f32.mrf.mxu0  ;;  %v3048_v54 = vsub.f32 %v2985_v44, %v16157_v56 }
 0x593   : > { %v21733_v8 = vld [vmem:[#allocation9_spill] sm:$0xff] }
 0x594   : > { %v16237_v51 = vpop.f32.mrf.mxu1  ;;  %v12401_v36 = vpop.f32.mrf.mxu0  ;;  %12560 = vmatmul.mubr.msk.f32.gmra.mxu1 %vm834_vm1, %v3104_v9  ;;  %v2986_v57 = vmul.f32 %v16165_v62, %v21733_v8  ;;  %v3111_v59 = vmax.f32 %v3048_v54, 0.0  ;;  %v21739_v8 = vld [vmem:[#allocation34_spill] sm:$0xff] }
 0x595   : > { %12562 = vmatprep.mubr.msk.f32.mxu1 %vm14097_vm0, %v21662_v1 }
 0x596   : > { %v12210_v14 = vpop.f32.mrf.mxu1  ;;  %v16245_v11 = vpop.f32.mrf.mxu0  ;;  %v3049_v50 = vsub.f32 %v2986_v57, %v16167_v33  ;;  %v2992_v57 = vmul.f32 %v16225_v5, %v21739_v8 }
 0x597   : > { %v21734_v14 = vld [vmem:[#allocation8_spill] sm:$0xff] }
 0x598   : > { %v16247_v37 = vpop.f32.mrf.mxu1  ;;  %v12404_v21 = vpop.f32.mrf.mxu0  ;;  %12563 = vmatmul.mubr.msk.f32.gmra.mxu1 %vm834_vm1, %v3105_v53  ;;  %v2987_v56 = vmul.f32 %v16175_v55, %v21734_v14  ;;  %v3112_v58 = vmax.f32 %v3049_v50, 0.0 }
 0x599   : > { %12565 = vmatprep.mubr.msk.f32.mxu1 %vm14097_vm0, %v21662_v1 }
 0x59a   : > { %v12213_v52 = vpop.f32.mrf.mxu1  ;;  %v16255_v24 = vpop.f32.mrf.mxu0  ;;  %v3050_v46 = vsub.f32 %v2987_v56, %v16177_v20 }
 0x59b   : > { %v21735_v52 = vld [vmem:[#allocation7_spill] sm:$0xff] }
 0x59c   : > { %v16257_v15 = vpop.f32.mrf.mxu1  ;;  %v12407_v27 = vpop.f32.mrf.mxu0  ;;  %12566 = vmatmul.mubr.msk.f32.gmra.mxu1 %vm834_vm1, %v3106_v38  ;;  %v2988_v33 = vmul.f32 %v16185_v42, %v21735_v52  ;;  %v3113_v48 = vmax.f32 %v3050_v46, 0.0  ;;  %v21742_v52 = vld [vmem:[#allocation31_spill] sm:$0xff] }
 0x59d   : > { %12568 = vmatprep.mubr.msk.f32.mxu1 %vm14097_vm0, %v21662_v1 }
 0x59e   : > { %v12216_v12 = vpop.f32.mrf.mxu1  ;;  %v16265_v28 = vpop.f32.mrf.mxu0  ;;  %v3051_v41 = vsub.f32 %v2988_v33, %v16187_v30  ;;  %v2995_v33 = vmul.f32 %v16255_v24, %v21742_v52 }
 0x59f   : > { %v21736_v12 = vld [vmem:[#allocation37_spill] sm:$0xff] }
 0x5a0   : > { %v16267_v18 = vpop.f32.mrf.mxu1  ;;  %v12410_v23 = vpop.f32.mrf.mxu0  ;;  %12569 = vmatmul.mubr.msk.f32.gmra.mxu1 %vm834_vm1, %v3107_v25  ;;  %v2989_v20 = vmul.f32 %v16195_v3, %v21736_v12  ;;  %v3114_v63 = vmax.f32 %v3051_v41, 0.0 }
 0x5a1   : > { %12571 = vmatprep.mubr.msk.f32.mxu1 %vm14097_vm0, %v21662_v1 }
 0x5a2   : > { %v12219_v31 = vpop.f32.mrf.mxu1  ;;  %v16275_v32 = vpop.f32.mrf.mxu0  ;;  %v3052_v49 = vsub.f32 %v2989_v20, %v16197_v40 }
 0x5a3   : > { %v21737_v31 = vld [vmem:[#allocation36_spill] sm:$0xff] }
 0x5a4   : > { %v16277_v22 = vpop.f32.mrf.mxu1  ;;  %v12413_v0 = vpop.f32.mrf.mxu0  ;;  %12572 = vmatmul.mubr.msk.f32.gmra.mxu1 %vm834_vm1, %v3108_v39  ;;  %v2990_v30 = vmul.f32 %v16205_v60, %v21737_v31  ;;  %v3115_v4 = vmax.f32 %v3052_v49, 0.0  ;;  %v21745_v31 = vld [vmem:[#allocation28_spill] sm:$0xff] }
 0x5a5   : > { %12574 = vmatprep.mubr.msk.f32.mxu1 %vm14097_vm0, %v21662_v1 }
 0x5a6   : > { %v12222_v34 = vpop.f32.mrf.mxu1  ;;  %v16285_v9 = vpop.f32.mrf.mxu0  ;;  %v3053_v44 = vsub.f32 %v2990_v30, %v16207_v29 }
 0x5a7   : > { %v21738_v34 = vld [vmem:[#allocation35_spill] sm:$0xff]  ;;  %v2998_v30 = vmul.f32 %v16285_v9, %v21745_v31 }
 0x5a8   : > { %v16287_v2 = vpop.f32.mrf.mxu1  ;;  %v12416_v47 = vpop.f32.mrf.mxu0  ;;  %12575 = vmatmul.mubr.msk.f32.gmra.mxu1 %vm834_vm1, %v3109_v6  ;;  %v2991_v40 = vmul.f32 %v16215_v43, %v21738_v34  ;;  %v3116_v60 = vmax.f32 %v3053_v44, 0.0  ;;  %v3055_v43 = vsub.f32 %v2992_v57, %v16227_v17  ;;  %v21748_v57 = vld [vmem:[#allocation25_spill] sm:$0xff] }
 0x5a9   : > { %12577 = vmatprep.mubr.msk.f32.mxu1 %vm14097_vm0, %v21662_v1 }
 0x5aa   : > { %v12225_v36 = vpop.f32.mrf.mxu1  ;;  %v16295_v53 = vpop.f32.mrf.mxu0  ;;  %v3054_v54 = vsub.f32 %v2991_v40, %v16217_v45  ;;  %v3118_v45 = vmax.f32 %v3055_v43, 0.0 }
 0x5ac   : > { %v16297_v26 = vpop.f32.mrf.mxu1  ;;  %v12419_v7 = vpop.f32.mrf.mxu0  ;;  %12578 = vmatmul.mubr.msk.f32.gmra.mxu1 %vm834_vm1, %v3110_v61  ;;  %v3117_v29 = vmax.f32 %v3054_v54, 0.0 }
 0x5ad   : > { %12580 = vmatprep.mubr.msk.f32.mxu1 %vm14097_vm0, %v21662_v1 }
 0x5ae   : > { %v12228_v21 = vpop.f32.mrf.mxu1  ;;  %v16305_v38 = vpop.f32.mrf.mxu0 }
 0x5af   : > { %v21741_v21 = vld [vmem:[#allocation32_spill] sm:$0xff] }
 0x5b0   : > { %v16307_v62 = vpop.f32.mrf.mxu1  ;;  %v12422_v10 = vpop.f32.mrf.mxu0  ;;  %12581 = vmatmul.mubr.msk.f32.gmra.mxu1 %vm834_vm1, %v3111_v59  ;;  %v21740_v59 = vld [vmem:[#allocation33_spill] sm:$0xff] }
 0x5b1   : > { %12583 = vmatprep.mubr.msk.f32.mxu1 %vm14097_vm0, %v21662_v1  ;;  %v2993_v50 = vmul.f32 %v16235_v35, %v21740_v59  ;;  %v2994_v10 = vmul.f32 %v16245_v11, %v21741_v21  ;;  %v3058_v11 = vsub.f32 %v2995_v33, %v16257_v15  ;;  %v21749_v59 = vld [vmem:[#allocation24_spill] sm:$0xff] }
 0x5b2   : > { %v12231_v27 = vpop.f32.mrf.mxu1  ;;  %v16315_v25 = vpop.f32.mrf.mxu0 }
 0x5b3   : > { %v3056_v5 = vsub.f32 %v2993_v50, %v16237_v51  ;;  %v3057_v35 = vsub.f32 %v2994_v10, %v16247_v37  ;;  %v3121_v37 = vmax.f32 %v3058_v11, 0.0 }
 0x5b4   : > { %v16317_v55 = vpop.f32.mrf.mxu1  ;;  %v12425_v13 = vpop.f32.mrf.mxu0  ;;  %12584 = vmatmul.mubr.msk.f32.gmra.mxu1 %vm834_vm1, %v3112_v58 }
 0x5b5   : > { %12586 = vmatprep.mubr.msk.f32.mxu1 %vm14097_vm0, %v21662_v1  ;;  %v3119_v17 = vmax.f32 %v3056_v5, 0.0  ;;  %v3120_v51 = vmax.f32 %v3057_v35, 0.0  ;;  %v21750_v5 = vld [vmem:[#allocation23_spill] sm:$0xff] }
 0x5b6   : > { %v12234_v23 = vpop.f32.mrf.mxu1  ;;  %v16325_v39 = vpop.f32.mrf.mxu0 }
 0x5b7   : > { %v21744_v23 = vld [vmem:[#allocation29_spill] sm:$0xff]  ;;  %v3002_v50 = vmul.f32 %v16325_v39, %v21749_v59 }
 0x5b8   : > { %v16327_v42 = vpop.f32.mrf.mxu1  ;;  %v12428_v16 = vpop.f32.mrf.mxu0  ;;  %12587 = vmatmul.mubr.msk.f32.gmra.mxu1 %vm834_vm1, %v3113_v48  ;;  %v21743_v48 = vld [vmem:[#allocation30_spill] sm:$0xff] }
 0x5b9   : > { %12589 = vmatprep.mubr.msk.f32.mxu1 %vm14097_vm0, %v21662_v1  ;;  %v2996_v41 = vmul.f32 %v16265_v28, %v21743_v48  ;;  %v2997_v16 = vmul.f32 %v16275_v32, %v21744_v23  ;;  %v3061_v32 = vsub.f32 %v2998_v30, %v16287_v2 }
 0x5ba   : > { %v12237_v0 = vpop.f32.mrf.mxu1  ;;  %v16335_v6 = vpop.f32.mrf.mxu0 }
 0x5bb   : > { %v3059_v24 = vsub.f32 %v2996_v41, %v16267_v18  ;;  %v3060_v28 = vsub.f32 %v2997_v16, %v16277_v22  ;;  %v3124_v22 = vmax.f32 %v3061_v32, 0.0  ;;  %v3003_v21 = vmul.f32 %v16335_v6, %v21750_v5 }
 0x5bc   : > { %v16337_v3 = vpop.f32.mrf.mxu1  ;;  %v12431_v19 = vpop.f32.mrf.mxu0  ;;  %12590 = vmatmul.mubr.msk.f32.gmra.mxu1 %vm834_vm1, %v3114_v63 }
 0x5bd   : > { %12592 = vmatprep.mubr.msk.f32.mxu1 %vm14097_vm0, %v21662_v1  ;;  %v3122_v15 = vmax.f32 %v3059_v24, 0.0  ;;  %v3123_v18 = vmax.f32 %v3060_v28, 0.0  ;;  %v3066_v39 = vsub.f32 %v3003_v21, %v16337_v3 }
 0x5be   : > { %v12240_v47 = vpop.f32.mrf.mxu1 }
 0x5bf   : > { %v21747_v47 = vld [vmem:[#allocation26_spill] sm:$0xff] }
 0x5c0   : > { %v16345_v61 = vpop.f32.mrf.mxu1  ;;  %12593 = vmatmul.mubr.msk.f32.gmra.mxu1 %vm834_vm1, %v3115_v4  ;;  %v21746_v4 = vld [vmem:[#allocation27_spill] sm:$0xff] }
 0x5c1   : > { %12595 = vmatprep.mubr.msk.f32.mxu1 %vm14097_vm0, %v21662_v1  ;;  %v2999_v44 = vmul.f32 %v16295_v53, %v21746_v4 }
 0x5c2   : > { %v12450_v36 = vpop.f32.mrf.mxu1 }
 0x5c3   : > { %v3062_v9 = vsub.f32 %v2999_v44, %v16297_v26  ;;  %v3001_v36 = vmul.f32 %v16315_v25, %v21748_v57  ;;  %v3065_v25 = vsub.f32 %v3002_v50, %v16327_v42  ;;  %v3129_v42 = vmax.f32 %v3066_v39, 0.0 }
 0x5c4   : > { %v16353_v7 = vpop.f32.mrf.mxu1  ;;  %12596 = vmatmul.mubr.msk.f32.gmra.mxu1 %vm834_vm1, %v3116_v60  ;;  %v3000_v60 = vmul.f32 %v16305_v38, %v21747_v47 }
 0x5c5   : > { %12598 = vmatprep.mubr.msk.f32.mxu1 %vm14097_vm0, %v21662_v1  ;;  %v3125_v2 = vmax.f32 %v3062_v9, 0.0  ;;  %v3064_v38 = vsub.f32 %v3001_v36, %v16317_v55  ;;  %v3128_v55 = vmax.f32 %v3065_v25, 0.0 }
 0x5c6   : > { %v12453_v14 = vpop.f32.mrf.mxu1  ;;  %v3063_v53 = vsub.f32 %v3000_v60, %v16307_v62 }
 0x5c7   : > { %v3127_v62 = vmax.f32 %v3064_v38, 0.0 }
 0x5c8   : > { %v16361_v56 = vpop.f32.mrf.mxu1  ;;  %12599 = vmatmul.mubr.msk.f32.gmra.mxu1 %vm834_vm1, %v3117_v29  ;;  %v3126_v26 = vmax.f32 %v3063_v53, 0.0 }
 0x5c9   : > { %12601 = vmatprep.mubr.msk.f32.mxu1 %vm14097_vm0, %v21662_v1 }
 0x5ca   : > { %v12456_v58 = vpop.f32.mrf.mxu1 }
 0x5cc   : > { %v16369_v46 = vpop.f32.mrf.mxu1  ;;  %12602 = vmatmul.mubr.msk.f32.gmra.mxu1 %vm834_vm1, %v3118_v45 }
 0x5cd   : > { %12604 = vmatprep.mubr.msk.f32.mxu1 %vm14097_vm0, %v21662_v1 }
 0x5ce   : > { %v12459_v27 = vpop.f32.mrf.mxu1 }
 0x5d0   : > { %v16377_v13 = vpop.f32.mrf.mxu1  ;;  %12605 = vmatmul.mubr.msk.f32.gmra.mxu1 %vm834_vm1, %v3119_v17 }
 0x5d1   : > { %12607 = vmatprep.mubr.msk.f32.mxu1 %vm14097_vm0, %v21662_v1 }
 0x5d2   : > { %v12462_v12 = vpop.f32.mrf.mxu1 }
 0x5d4   : > { %v16385_v20 = vpop.f32.mrf.mxu1  ;;  %12608 = vmatmul.mubr.msk.f32.gmra.mxu1 %vm834_vm1, %v3120_v51 }
 0x5d5   : > { %12610 = vmatprep.mubr.msk.f32.mxu1 %vm14097_vm0, %v21662_v1 }
 0x5d6   : > { %v12465_v63 = vpop.f32.mrf.mxu1 }
 0x5d8   : > { %v16393_v49 = vpop.f32.mrf.mxu1  ;;  %12611 = vmatmul.mubr.msk.f32.gmra.mxu1 %vm834_vm1, %v3121_v37 }
 0x5d9   : > { %12613 = vmatprep.mubr.msk.f32.mxu1 %vm14097_vm0, %v21662_v1 }
 0x5da   : > { %v12468_v0 = vpop.f32.mrf.mxu1 }
 0x5dc   : > { %v16401_v19 = vpop.f32.mrf.mxu1  ;;  %12614 = vmatmul.mubr.msk.f32.gmra.mxu1 %vm834_vm1, %v3122_v15 }
 0x5dd   : > { %12616 = vmatprep.mubr.msk.f32.mxu1 %vm14097_vm0, %v21662_v1 }
 0x5de   : > { %v12471_v34 = vpop.f32.mrf.mxu1 }
 0x5e0   : > { %v16409_v40 = vpop.f32.mrf.mxu1  ;;  %12617 = vmatmul.mubr.msk.f32.gmra.mxu1 %vm834_vm1, %v3123_v18 }
 0x5e1   : > { %12619 = vmatprep.mubr.msk.f32.mxu1 %vm14097_vm0, %v21662_v1 }
 0x5e2   : > { %v12474_v54 = vpop.f32.mrf.mxu1 }
 0x5e4   : > { %v16417_v8 = vpop.f32.mrf.mxu1  ;;  %12620 = vmatmul.mubr.msk.f32.gmra.mxu1 %vm834_vm1, %v3124_v22 }
 0x5e5   : > { %12622 = vmatprep.mubr.msk.f32.mxu1 %vm14097_vm0, %v21662_v1 }
 0x5e6   : > { %v12477_v29 = vpop.f32.mrf.mxu1 }
 0x5e8   : > { %v16425_v43 = vpop.f32.mrf.mxu1  ;;  %12623 = vmatmul.mubr.msk.f32.gmra.mxu1 %vm834_vm1, %v3125_v2 }
 0x5e9   : > { %12625 = vmatprep.mubr.msk.f32.mxu1 %vm14097_vm0, %v21662_v1 }
 0x5ea   : > { %v12480_v14 = vpop.f32.mrf.mxu1 }
 0x5ec   : > { %v16433_v45 = vpop.f32.mrf.mxu1  ;;  %12626 = vmatmul.mubr.msk.f32.gmra.mxu1 %vm834_vm1, %v3126_v26  ;;  %v16470_v26 = vld [vmem:[%s21338_s13] ss:$0 sm:$0xff] }
 0x5ed   : > { %12628 = vmatprep.mubr.msk.f32.mxu1 %vm14097_vm0, %v21662_v1 }
 0x5ee   : > { %v12483_v10 = vpop.f32.mrf.mxu1 }
 0x5f0   : > { %v16441_v58 = vpop.f32.mrf.mxu1  ;;  %12629 = vmatmul.mubr.msk.f32.gmra.mxu1 %vm834_vm1, %v3127_v62 }
 0x5f1   : > { %12631 = vmatprep.mubr.msk.f32.mxu1 %vm14097_vm0, %v21662_v1 }
 0x5f2   : > { %v12486_v17 = vpop.f32.mrf.mxu1 }
 0x5f3   : > { %v16502_v17 = vadd.f32 %v16470_v26, %v16441_v58  ;;  %v16522_v58 = vadd.f32 %v16470_v26, %v16425_v43  ;;  %v16542_v43 = vadd.f32 %v16470_v26, %v16409_v40 }
 0x5f4   : > { %v3465_v35 = vpop.f32.mrf.mxu1  ;;  %12632 = vmatmul.mubr.msk.f32.gmra.mxu1 %vm834_vm1, %v3128_v55 }
 0x5f5   : > { %12634 = vmatprep.mubr.msk.f32.mxu1 %vm14097_vm0, %v21662_v1  ;;  %v16493_v10 = vadd.f32 %v16470_v26, %v3465_v35  ;;  %v16513_v35 = vadd.f32 %v16470_v26, %v16433_v45  ;;  %v16533_v45 = vadd.f32 %v16470_v26, %v16417_v8  ;;  %v16553_v8 = vadd.f32 %v16470_v26, %v16401_v19 }
 0x5f6   : > { %v12489_v6 = vpop.f32.mrf.mxu1 }
 0x5f8   : > { %v3470_v52 = vpop.f32.mrf.mxu1  ;;  %12635 = vmatmul.mubr.msk.f32.gmra.mxu1 %vm834_vm1, %v3129_v42 }
 0x5f9   : > { %12849 = vmatprep.mubr.msk.f32.mxu1 %vm14097_vm0, %v21662_v1  ;;  %v16483_v25 = vadd.f32 %v16470_v26, %v3470_v52 }
 0x5fa   : > { %v12492_v33 = vpop.f32.mrf.mxu1 }
 0x5fc   : > { %v3475_v27 = vpop.f32.mrf.mxu1 }
 0x5fd   : > { %v16476_v50 = vadd.f32 %v16470_v26, %v3475_v27 }
 0x5fe   : > { %v12495_v51 = vpop.f32.mrf.mxu1 }
 0x600   : > { %v16453_v11 = vpop.f32.mrf.mxu1 }
 0x602   : > { %v12498_v3 = vpop.f32.mrf.mxu1 }
 0x604   : > { %v16455_v48 = vpop.f32.mrf.mxu1 }
 0x606   : > { %v12501_v41 = vpop.f32.mrf.mxu1 }
 0x608   : > { %v16457_v12 = vpop.f32.mrf.mxu1 }
 0x60a   : > { %v12504_v37 = vpop.f32.mrf.mxu1 }
 0x60c   : > { %v16459_v24 = vpop.f32.mrf.mxu1 }
 0x60e   : > { %v12507_v23 = vpop.f32.mrf.mxu1 }
 0x610   : > { %v16461_v16 = vpop.f32.mrf.mxu1 }
 0x612   : > { %v12510_v63 = vpop.f32.mrf.mxu1 }
 0x614   : > { %v16463_v15 = vpop.f32.mrf.mxu1 }
 0x615   : > { %v16570_v19 = vadd.f32 %v16470_v26, %v16463_v15 }
 0x616   : > { %v12513_v28 = vpop.f32.mrf.mxu1 }
 0x617   : > { %v16563_v28 = vadd.f32 %v16470_v26, %v16393_v49  ;;  %v16580_v49 = vadd.f32 %v16470_v26, %v16461_v16  ;;  %v16597_v16 = vadd.f32 %v16470_v26, %v16369_v46  ;;  %v16614_v46 = vadd.f32 %v16470_v26, %v16455_v48 }
 0x618   : > { %v16465_v31 = vpop.f32.mrf.mxu1 }
 0x619   : > { %v16558_v40 = vadd.f32 %v16470_v26, %v16465_v31  ;;  %v16575_v31 = vadd.f32 %v16470_v26, %v16385_v20  ;;  %v16592_v20 = vadd.f32 %v16470_v26, %v16459_v24 }
 0x61a   : > { %v12516_v30 = vpop.f32.mrf.mxu1 }
 0x61c   : > { %v3515_v0 = vpop.f32.mrf.mxu1 }
 0x61d   : > { %v16548_v23 = vadd.f32 %v16470_v26, %v3515_v0 }
 0x61e   : > { %v12519_v18 = vpop.f32.mrf.mxu1 }
 0x61f   : > { %v16585_v18 = vadd.f32 %v16470_v26, %v16377_v13  ;;  %v16602_v13 = vadd.f32 %v16470_v26, %v16457_v12  ;;  %v16619_v12 = vadd.f32 %v16470_v26, %v16353_v7 }
 0x620   : > { %v3520_v32 = vpop.f32.mrf.mxu1 }
 0x621   : > { %v16537_v41 = vadd.f32 %v16470_v26, %v3520_v32 }
 0x622   : > { %v12522_v4 = vpop.f32.mrf.mxu1 }
 0x623   : > { %21758 = vst [vmem:[#allocation20_spill] sm:$0xff] %v16537_v41  ;;  %v16607_v4 = vadd.f32 %v16470_v26, %v16361_v56  ;;  %v16624_v56 = vadd.f32 %v16470_v26, %v16453_v11  ;;  %v16638_v11 = vld [vmem:[%s21332_s7] sm:$0x3f] }
 0x624   : > { %v3525_v44 = vpop.f32.mrf.mxu1 }
 0x625   : > { %v16528_v51 = vadd.f32 %v16470_v26, %v3525_v44 }
 0x626   : > { %v12525_v34 = vpop.f32.mrf.mxu1 }
 0x627   : > { %21757 = vst [vmem:[#allocation21_spill] sm:$0xff] %v16528_v51  ;;  %v16629_v34 = vadd.f32 %v16470_v26, %v16345_v61  ;;  %v16644_v61 = vld [vmem:[%s21332_s7 + $0x18] sm:$0x3f] }
 0x628   : > { %v3530_v22 = vpop.f32.mrf.mxu1 }
 0x629   : > { %v16517_v33 = vadd.f32 %v16470_v26, %v3530_v22 }
 0x62a   : > { %v12528_v9 = vpop.f32.mrf.mxu1 }
 0x62b   : > { %21756 = vst [vmem:[#allocation22_spill] sm:$0xff] %v16517_v33 }
 0x62c   : > { %v3535_v47 = vpop.f32.mrf.mxu1 }
 0x62d   : > { %v16508_v6 = vadd.f32 %v16470_v26, %v3535_v47 }
 0x62e   : > { %v12531_v60 = vpop.f32.mrf.mxu1 }
 0x62f   : > { %21755 = vst [vmem:[#allocation2_spill] sm:$0xff] %v16508_v6 }
 0x630   : > { %v3540_v54 = vpop.f32.mrf.mxu1 }
 0x631   : > { %v16497_v39 = vadd.f32 %v16470_v26, %v3540_v54 }
 0x632   : > { %v12534_v2 = vpop.f32.mrf.mxu1 }
 0x633   : > { %21754 = vst [vmem:[#allocation3_spill] sm:$0xff] %v16497_v39 }
 0x634   : > { %v3545_v53 = vpop.f32.mrf.mxu1 }
 0x635   : > { %v16489_v21 = vadd.f32 %v16470_v26, %v3545_v53 }
 0x636   : > { %v12537_v57 = vpop.f32.mrf.mxu1 }
 0x637   : > { %21753 = vst [vmem:[#allocation4_spill] sm:$0xff] %v16489_v21 }
 0x638   : > { %v3550_v36 = vpop.f32.mrf.mxu1 }
 0x639   : > { %v16479_v62 = vadd.f32 %v16470_v26, %v3550_v36 }
 0x63a   : > { %v12540_v29 = vpop.f32.mrf.mxu1 }
 0x63b   : > { %21752 = vst [vmem:[#allocation5_spill] sm:$0xff] %v16479_v62 }
 0x63c   : > { %v3555_v38 = vpop.f32.mrf.mxu1 }
 0x63d   : > { %v16473_v59 = vadd.f32 %v16470_v26, %v3555_v38 }
 0x63e   : > { %v12543_v14 = vpop.f32.mrf.mxu1 }
 0x63f   : > { %21751 = vst [vmem:[#allocation6_spill] sm:$0xff] %v16473_v59  ;;  %11366 = vmatprep.subr.mxu0 %v16473_v59 }
 0x640   : > { %v16485_v5 = vpop.f32.mrf.mxu1  ;;  %11367 = vmatpush3.msra.mxu0 %v16476_v50 }
 0x641   : > { %11368 = vmatprep.subr.mxu0 %v16479_v62 }
 0x642   : > { %v12546_v55 = vpop.f32.mrf.mxu1  ;;  %11369 = vmatpush3.msra.mxu0 %v16483_v25 }
 0x643   : > { %11370 = vmatprep.subr.mxu0 %v16489_v21 }
 0x644   : > { %v16504_v42 = vpop.f32.mrf.mxu1  ;;  %11371 = vmatpush3.msra.mxu0 %v16493_v10 }
 0x645   : > { %11372 = vmatprep.subr.mxu0 %v16497_v39 }
 0x646   : > { %v12549_v52 = vpop.f32.mrf.mxu1  ;;  %11373 = vmatpush3.msra.mxu0 %v16502_v17 }
 0x647   : > { %11374 = vmatprep.subr.mxu0 %v16508_v6 }
 0x648   : > { %v16524_v27 = vpop.f32.mrf.mxu1  ;;  %11375 = vmatpush3.msra.mxu0 %v16513_v35 }
 0x649   : > { %11376 = vmatprep.subr.mxu0 %v16517_v33 }
 0x64a   : > { %v12552_v3 = vpop.f32.mrf.mxu1  ;;  %11377 = vmatpush3.msra.mxu0 %v16522_v58 }
 0x64b   : > { %11378 = vmatprep.subr.mxu0 %v16528_v51 }
 0x64c   : > { %v16544_v37 = vpop.f32.mrf.mxu1  ;;  %11379 = vmatpush3.msra.mxu0 %v16533_v45 }
 0x64d   : > { %11380 = vmatprep.subr.mxu0 %v16537_v41 }
 0x64e   : > { %v12555_v63 = vpop.f32.mrf.mxu1  ;;  %11381 = vmatpush3.msra.mxu0 %v16542_v43 }
 0x64f   : > { %11382 = vmatprep.subr.mxu0 %v16548_v23 }
 0x650   : > { %v16565_v30 = vpop.f32.mrf.mxu1  ;;  %11383 = vmatpush3.msra.mxu0 %v16553_v8 }
 0x651   : > { %11384 = vmatprep.subr.mxu0 %v16558_v40 }
 0x652   : > { %v12558_v0 = vpop.f32.mrf.mxu1  ;;  %11385 = vmatpush3.msra.mxu0 %v16563_v28 }
 0x653   : > { %11386 = vmatprep.subr.mxu0 %v16570_v19 }
 0x654   : > { %v16587_v15 = vpop.f32.mrf.mxu1  ;;  %11387 = vmatpush3.msra.mxu0 %v16575_v31 }
 0x655   : > { %11388 = vmatprep.subr.mxu0 %v16580_v49 }
 0x656   : > { %v12561_v32 = vpop.f32.mrf.mxu1  ;;  %11389 = vmatpush3.msra.mxu0 %v16585_v18 }
 0x657   : > { %11390 = vmatprep.subr.mxu0 %v16592_v20 }
 0x658   : > { %v16609_v24 = vpop.f32.mrf.mxu1  ;;  %11391 = vmatpush3.msra.mxu0 %v16597_v16 }
 0x659   : > { %11392 = vmatprep.subr.mxu0 %v16602_v13 }
 0x65a   : > { %v12564_v44 = vpop.f32.mrf.mxu1  ;;  %11393 = vmatpush3.msra.mxu0 %v16607_v4 }
 0x65b   : > { %11394 = vmatprep.subr.mxu0 %v16614_v46 }
 0x65c   : > { %v3595_v48 = vpop.f32.mrf.mxu1  ;;  %11395 = vmatpush3.msra.mxu0 %v16619_v12 }
 0x65d   : > { %11396 = vmatprep.subr.mxu0 %v16624_v56 }
 0x65e   : > { %v12567_v7 = vpop.f32.mrf.mxu1  ;;  %11397 = vmatpush3.msra.mxu0 %v16629_v34 }
 0x65f   : > { %3784 = vmatprep.subr.mxu0 %v21662_v1  ;;  %3779 = vmatmul.mubr.f32.vlgmr.msra.gmra.mxu0 %v16638_v11 }
 0x660   : > { %v3600_v22 = vpop.f32.mrf.mxu1  ;;  %10666 = vmatprep.mubr.msk.f32.mxu0 %vm1404_vm2, %v16644_v61 }
 0x662   : > { %v12570_v9 = vpop.f32.mrf.mxu1 }
 0x664   : > { %v3605_v47 = vpop.f32.mrf.mxu1 }
 0x666   : > { %v12573_v60 = vpop.f32.mrf.mxu1 }
 0x668   : > { %v3610_v54 = vpop.f32.mrf.mxu1 }
 0x66a   : > { %v12576_v2 = vpop.f32.mrf.mxu1 }
 0x66c   : > { %v3615_v53 = vpop.f32.mrf.mxu1 }
 0x66e   : > { %v12579_v57 = vpop.f32.mrf.mxu1 }
 0x66f   : > { %v16671_v57 = vadd.f32 %v16470_v26, %v3615_v53 }
 0x670   : > { %v3620_v36 = vpop.f32.mrf.mxu1 }
 0x671   : > { %v16664_v60 = vadd.f32 %v16470_v26, %v3620_v36  ;;  %21763 = vst [vmem:[#allocation15_spill] sm:$0xff] %v16671_v57 }
 0x672   : > { %v12582_v29 = vpop.f32.mrf.mxu1 }
 0x673   : > { %21762 = vst [vmem:[#allocation16_spill] sm:$0xff] %v16664_v60 }
 0x674   : > { %v3625_v38 = vpop.f32.mrf.mxu1 }
 0x675   : > { %v16659_v7 = vadd.f32 %v16470_v26, %v3625_v38  ;;  %v16676_v38 = vadd.f32 %v16470_v26, %v3610_v54 }
 0x676   : > { %v12585_v14 = vpop.f32.mrf.mxu1 }
 0x677   : > { %21761 = vst [vmem:[#allocation17_spill] sm:$0xff] %v16659_v7  ;;  %21764 = vst [vmem:[#allocation14_spill] sm:$0xff] %v16676_v38  ;;  %v16683_v14 = vadd.f32 %v16470_v26, %v3605_v47 }
 0x678   : > { %v3630_v55 = vpop.f32.mrf.mxu1 }
 0x679   : > { %v16652_v32 = vadd.f32 %v16470_v26, %v3630_v55  ;;  %21765 = vst [vmem:[#allocation13_spill] sm:$0xff] %v16683_v14  ;;  %v16688_v55 = vadd.f32 %v16470_v26, %v3600_v22 }
 0x67a   : > { %v12588_v52 = vpop.f32.mrf.mxu1 }
 0x67b   : > { %21760 = vst [vmem:[#allocation18_spill] sm:$0xff] %v16652_v32  ;;  %21766 = vst [vmem:[#allocation12_spill] sm:$0xff] %v16688_v55  ;;  %v16695_v52 = vadd.f32 %v16470_v26, %v3595_v48 }
 0x67c   : > { %v3635_v3 = vpop.f32.mrf.mxu1 }
 0x67d   : > { %v16649_v63 = vadd.f32 %v16470_v26, %v3635_v3  ;;  %21767 = vst [vmem:[#allocation11_spill] sm:$0xff] %v16695_v52  ;;  %v16701_v3 = vadd.f32 %v16470_v26, %v16609_v24 }
 0x67e   : > { %v12591_v0 = vpop.f32.mrf.mxu1 }
 0x67f   : > { %21759 = vst [vmem:[#allocation19_spill] sm:$0xff] %v16649_v63  ;;  %3785 = vmatpush1.msra.mxu0 %v16649_v63  ;;  %21768 = vst [vmem:[#allocation10_spill] sm:$0xff] %v16701_v3  ;;  %v16709_v0 = vadd.f32 %v16470_v26, %v16587_v15 }
 0x680   : > { %v16655_v44 = vpop.f32.mrf.mxu1  ;;  %3786 = vmatprep.subr.mxu0 %v21662_v1 }
 0x681   : > { %3787 = vmatpush1.msra.mxu0 %v16652_v32  ;;  %21769 = vst [vmem:[#allocation9_spill] sm:$0xff] %v16709_v0 }
 0x682   : > { %v12594_v9 = vpop.f32.mrf.mxu1  ;;  %3788 = vmatprep.subr.mxu0 %v21662_v1 }
 0x683   : > { %3789 = vmatpush1.msra.mxu0 %v16659_v7  ;;  %v16715_v9 = vadd.f32 %v16470_v26, %v16565_v30 }
 0x684   : > { %v16667_v2 = vpop.f32.mrf.mxu1  ;;  %3790 = vmatprep.subr.mxu0 %v21662_v1 }
 0x685   : > { %3791 = vmatpush1.msra.mxu0 %v16664_v60  ;;  %21770 = vst [vmem:[#allocation8_spill] sm:$0xff] %v16715_v9 }
 0x686   : > { %v12597_v29 = vpop.f32.mrf.mxu1  ;;  %3792 = vmatprep.subr.mxu0 %v21662_v1 }
 0x687   : > { %3793 = vmatpush1.msra.mxu0 %v16671_v57  ;;  %v16721_v29 = vadd.f32 %v16470_v26, %v16544_v37 }
 0x688   : > { %v16679_v36 = vpop.f32.mrf.mxu1  ;;  %3794 = vmatprep.subr.mxu0 %v21662_v1 }
 0x689   : > { %3795 = vmatpush1.msra.mxu0 %v16676_v38  ;;  %21771 = vst [vmem:[#allocation7_spill] sm:$0xff] %v16721_v29 }
 0x68a   : > { %v12600_v53 = vpop.f32.mrf.mxu1  ;;  %3796 = vmatprep.subr.mxu0 %v21662_v1 }
 0x68b   : > { %3797 = vmatpush1.msra.mxu0 %v16683_v14  ;;  %v16727_v53 = vadd.f32 %v16470_v26, %v16524_v27 }
 0x68c   : > { %v16691_v54 = vpop.f32.mrf.mxu1  ;;  %3798 = vmatprep.subr.mxu0 %v21662_v1 }
 0x68d   : > { %3799 = vmatpush1.msra.mxu0 %v16688_v55  ;;  %21772 = vst [vmem:[#allocation37_spill] sm:$0xff] %v16727_v53 }
 0x68e   : > { %v12603_v47 = vpop.f32.mrf.mxu1  ;;  %3800 = vmatprep.subr.mxu0 %v21662_v1 }
 0x68f   : > { %3801 = vmatpush1.msra.mxu0 %v16695_v52  ;;  %v16733_v47 = vadd.f32 %v16470_v26, %v16504_v42 }
 0x690   : > { %v16704_v22 = vpop.f32.mrf.mxu1  ;;  %3802 = vmatprep.subr.mxu0 %v21662_v1 }
 0x691   : > { %3803 = vmatpush1.msra.mxu0 %v16701_v3  ;;  %21773 = vst [vmem:[#allocation36_spill] sm:$0xff] %v16733_v47 }
 0x692   : > { %v12606_v48 = vpop.f32.mrf.mxu1  ;;  %3804 = vmatprep.subr.mxu0 %v21662_v1 }
 0x693   : > { %3805 = vmatpush1.msra.mxu0 %v16709_v0  ;;  %v16739_v48 = vadd.f32 %v16470_v26, %v16485_v5 }
 0x694   : > { %v3665_v24 = vpop.f32.mrf.mxu1  ;;  %3806 = vmatprep.subr.mxu0 %v21662_v1 }
 0x695   : > { %3807 = vmatpush1.msra.mxu0 %v16715_v9  ;;  %21774 = vst [vmem:[#allocation35_spill] sm:$0xff] %v16739_v48 }
 0x696   : > { %v12609_v15 = vpop.f32.mrf.mxu1  ;;  %3808 = vmatprep.subr.mxu0 %v21662_v1 }
 0x697   : > { %3809 = vmatpush1.msra.mxu0 %v16721_v29 }
 0x698   : > { %v3670_v30 = vpop.f32.mrf.mxu1  ;;  %3810 = vmatprep.subr.mxu0 %v21662_v1 }
 0x699   : > { %3811 = vmatpush1.msra.mxu0 %v16727_v53 }
 0x69a   : > { %v12612_v37 = vpop.f32.mrf.mxu1  ;;  %3812 = vmatprep.subr.mxu0 %v21662_v1 }
 0x69b   : > { %3813 = vmatpush1.msra.mxu0 %v16733_v47 }
 0x69c   : > { %v3675_v27 = vpop.f32.mrf.mxu1  ;;  %3814 = vmatprep.subr.mxu0 %v21662_v1 }
 0x69d   : > { %3815 = vmatpush1.msra.mxu0 %v16739_v48 }
 0x69e   : > { %v12615_v15 = vpop.f32.mrf.mxu1  ;;  %3818 = vmatprep.subr.mxu0 %v21662_v1 }
 0x6a0   : > { %v3680_v42 = vpop.f32.mrf.mxu1 }
 0x6a2   : > { %v12618_v29 = vpop.f32.mrf.mxu1 }
 0x6a3   : > { %v16789_v29 = vadd.f32 %v16470_v26, %v3665_v24  ;;  %v16807_v24 = vadd.f32 %v16470_v26, %v16679_v36  ;;  %v3885_v36 = vmul.f32 %v16473_v59, %v16473_v59 }
 0x6a4   : > { %v3685_v53 = vpop.f32.mrf.mxu1 }
 0x6a5   : > { %21784 = vst [vmem:[#allocation25_spill] sm:$0xff] %v16789_v29  ;;  %21787 = vst [vmem:[#allocation101_spill] sm:$0xff] %v16807_v24 }
 0x6a6   : > { %v12621_v37 = vpop.f32.mrf.mxu1 }
 0x6a7   : > { %v3882_v37 = vmul.f32 %v16497_v39, %v16497_v39 }
 0x6a8   : > { %v3690_v9 = vpop.f32.mrf.mxu1 }
 0x6aa   : > { %v12624_v0 = vpop.f32.mrf.mxu1 }
 0x6ac   : > { %v3695_v3 = vpop.f32.mrf.mxu1 }
 0x6ae   : > { %v12627_v52 = vpop.f32.mrf.mxu1 }
 0x6af   : > { %v16774_v52 = vadd.f32 %v16470_v26, %v3680_v42  ;;  %v3867_v42 = vmul.f32 %v16493_v10, %v16493_v10 }
 0x6b0   : > { %v3700_v5 = vpop.f32.mrf.mxu1 }
 0x6b1   : > { %v16754_v0 = vadd.f32 %v16470_v26, %v3700_v5  ;;  %21781 = vst [vmem:[#allocation28_spill] sm:$0xff] %v16774_v52  ;;  %v3866_v5 = vmul.f32 %v16502_v17, %v16502_v17 }
 0x6b2   : > { %v12630_v55 = vpop.f32.mrf.mxu1 }
 0x6b3   : > { %21777 = vst [vmem:[#allocation32_spill] sm:$0xff] %v16754_v0  ;;  %v16759_v55 = vadd.f32 %v16470_v26, %v3695_v3  ;;  %v16779_v3 = vadd.f32 %v16470_v26, %v3675_v27  ;;  %v3883_v27 = vmul.f32 %v16489_v21, %v16489_v21 }
 0x6b4   : > { %v3705_v14 = vpop.f32.mrf.mxu1 }
 0x6b5   : > { %v16749_v15 = vadd.f32 %v16470_v26, %v3705_v14  ;;  %21778 = vst [vmem:[#allocation31_spill] sm:$0xff] %v16759_v55  ;;  %v16769_v14 = vadd.f32 %v16470_v26, %v3685_v53  ;;  %21782 = vst [vmem:[#allocation27_spill] sm:$0xff] %v16779_v3  ;;  %v16795_v53 = vadd.f32 %v16470_v26, %v16704_v22 }
 0x6b6   : > { %v12633_v47 = vpop.f32.mrf.mxu1  ;;  %v16813_v22 = vadd.f32 %v16470_v26, %v16667_v2  ;;  %v16831_v2 = vld [vmem:[%s21332_s7 + $0x10] sm:$0x3f] }
 0x6b7   : > { %21776 = vst [vmem:[#allocation33_spill] sm:$0xff] %v16749_v15  ;;  %21780 = vst [vmem:[#allocation29_spill] sm:$0xff] %v16769_v14  ;;  %v3869_v47 = vmul.f32 %v16476_v50, %v16476_v50 }
 0x6b8   : > { %v3710_v38 = vpop.f32.mrf.mxu1  ;;  %21785 = vst [vmem:[#allocation24_spill] sm:$0xff] %v16795_v53  ;;  %21788 = vst [vmem:[#allocation102_spill] sm:$0xff] %v16813_v22 }
 0x6b9   : > { %v16746_v57 = vadd.f32 %v16470_v26, %v3710_v38  ;;  %v16764_v38 = vadd.f32 %v16470_v26, %v3690_v9  ;;  %v16784_v9 = vadd.f32 %v16470_v26, %v3670_v30  ;;  %v16801_v30 = vadd.f32 %v16470_v26, %v16691_v54 }
 0x6ba   : > { %v12636_v48 = vpop.f32.mrf.mxu1  ;;  %v16819_v54 = vadd.f32 %v16470_v26, %v16655_v44  ;;  %v3884_v26 = vmul.f32 %v16479_v62, %v16479_v62  ;;  %v3868_v44 = vmul.f32 %v16483_v25, %v16483_v25  ;;  %v21864_v62 = vld [vmem:[#allocation99_spill] sm:$0xff] }
 0x6bb   : > { %21775 = vst [vmem:[#allocation34_spill] sm:$0xff] %v16746_v57  ;;  %3819 = vmatpush2.msra.mxu0 %v16746_v57  ;;  %21779 = vst [vmem:[#allocation30_spill] sm:$0xff] %v16764_v38  ;;  %v14049_v48 = vld [vmem:[%s21332_s7 + $0x8] sm:$0x3f] }
 0x6bc   : > { %3820 = vmatprep.subr.mxu0 %v21662_v1  ;;  %21783 = vst [vmem:[#allocation26_spill] sm:$0xff] %v16784_v9  ;;  %21786 = vst [vmem:[#allocation23_spill] sm:$0xff] %v16801_v30 }
 0x6bd   : > { %3821 = vmatpush2.msra.mxu0 %v16749_v15  ;;  %21789 = vst [vmem:[#allocation103_spill] sm:$0xff] %v16819_v54 }
 0x6be   : > { %3822 = vmatprep.subr.mxu0 %v21662_v1 }
 0x6bf   : > { %3823 = vmatpush2.msra.mxu0 %v16754_v0 }
 0x6c0   : > { %3824 = vmatprep.subr.mxu0 %v21662_v1 }
 0x6c1   : > { %3825 = vmatpush2.msra.mxu0 %v16759_v55 }
 0x6c2   : > { %3826 = vmatprep.subr.mxu0 %v21662_v1 }
 0x6c3   : > { %3827 = vmatpush2.msra.mxu0 %v16764_v38 }
 0x6c4   : > { %3828 = vmatprep.subr.mxu0 %v21662_v1 }
 0x6c5   : > { %3829 = vmatpush2.msra.mxu0 %v16769_v14 }
 0x6c6   : > { %3830 = vmatprep.subr.mxu0 %v21662_v1 }
 0x6c7   : > { %3831 = vmatpush2.msra.mxu0 %v16774_v52 }
 0x6c8   : > { %3832 = vmatprep.subr.mxu0 %v21662_v1 }
 0x6c9   : > { %3833 = vmatpush2.msra.mxu0 %v16779_v3 }
 0x6ca   : > { %3834 = vmatprep.subr.mxu0 %v21662_v1 }
 0x6cb   : > { %3835 = vmatpush2.msra.mxu0 %v16784_v9 }
 0x6cc   : > { %3836 = vmatprep.subr.mxu0 %v21662_v1 }
 0x6cd   : > { %3837 = vmatpush2.msra.mxu0 %v16789_v29 }
 0x6ce   : > { %3838 = vmatprep.subr.mxu0 %v21662_v1 }
 0x6cf   : > { %3839 = vmatpush2.msra.mxu0 %v16795_v53 }
 0x6d0   : > { %3840 = vmatprep.subr.mxu0 %v21662_v1 }
 0x6d1   : > { %3841 = vmatpush2.msra.mxu0 %v16801_v30 }
 0x6d2   : > { %3842 = vmatprep.subr.mxu0 %v21662_v1 }
 0x6d3   : > { %3843 = vmatpush2.msra.mxu0 %v16807_v24 }
 0x6d4   : > { %3844 = vmatprep.subr.mxu0 %v21662_v1 }
 0x6d5   : > { %3845 = vmatpush2.msra.mxu0 %v16813_v22 }
 0x6d6   : > { %3846 = vmatprep.subr.mxu0 %v21662_v1 }
 0x6d7   : > { %3847 = vmatpush2.msra.mxu0 %v16819_v54 }
 0x6d8   : > { %3849 = vmatmul.mubr.f32.vlgmr.msra.gmra.mxu0 %v16831_v2  ;;  %11401 = vmatprep.subr.mxu0 %v3885_v36  ;;  %v3881_v36 = vmul.f32 %v16508_v6, %v16508_v6 }
 0x6d9   : > { %11402 = vmatpush3.msra.mxu0 %v3869_v47  ;;  %3981 = vmatprep.mubr.f32.mxu0 %v14049_v48  ;;  %v3865_v47 = vmul.f32 %v16513_v35, %v16513_v35  ;;  %v3879_v48 = vmul.f32 %v16528_v51, %v16528_v51  ;;  %v14058_v51 = vld [vmem:[%s14265_s1] sm:$0xff] }
 0x6da   : > { %11403 = vmatprep.subr.mxu0 %v3884_v26  ;;  %v3880_v26 = vmul.f32 %v16517_v33, %v16517_v33  ;;  %v21865_v33 = vld [vmem:[#allocation100_spill] sm:$0xff] }
 0x6db   : > { %11404 = vmatpush3.msra.mxu0 %v3868_v44  ;;  %v3864_v44 = vmul.f32 %v16522_v58, %v16522_v58 }
 0x6dc   : > { %11405 = vmatprep.subr.mxu0 %v3883_v27  ;;  %v3863_v27 = vmul.f32 %v16533_v45, %v16533_v45 }
 0x6dd   : > { %11406 = vmatpush3.msra.mxu0 %v3867_v42  ;;  %v3878_v42 = vmul.f32 %v16537_v41, %v16537_v41 }
 0x6de   : > { %11407 = vmatprep.subr.mxu0 %v3882_v37  ;;  %v3862_v37 = vmul.f32 %v16542_v43, %v16542_v43 }
 0x6df   : > { %11408 = vmatpush3.msra.mxu0 %v3866_v5  ;;  %v3877_v5 = vmul.f32 %v16548_v23, %v16548_v23 }
 0x6e0   : > { %11409 = vmatprep.subr.mxu0 %v3881_v36  ;;  %v3861_v36 = vmul.f32 %v16553_v8, %v16553_v8 }
 0x6e1   : > { %11410 = vmatpush3.msra.mxu0 %v3865_v47  ;;  %v3876_v47 = vmul.f32 %v16558_v40, %v16558_v40 }
 0x6e2   : > { %11411 = vmatprep.subr.mxu0 %v3880_v26  ;;  %v3860_v26 = vmul.f32 %v16563_v28, %v16563_v28 }
 0x6e3   : > { %11412 = vmatpush3.msra.mxu0 %v3864_v44  ;;  %v3875_v44 = vmul.f32 %v16570_v19, %v16570_v19 }
 0x6e4   : > { %11413 = vmatprep.subr.mxu0 %v3879_v48  ;;  %v3859_v48 = vmul.f32 %v16575_v31, %v16575_v31 }
 0x6e5   : > { %11414 = vmatpush3.msra.mxu0 %v3863_v27  ;;  %v3874_v27 = vmul.f32 %v16580_v49, %v16580_v49 }
 0x6e6   : > { %11415 = vmatprep.subr.mxu0 %v3878_v42  ;;  %v3858_v42 = vmul.f32 %v16585_v18, %v16585_v18 }
 0x6e7   : > { %11416 = vmatpush3.msra.mxu0 %v3862_v37  ;;  %v3873_v37 = vmul.f32 %v16592_v20, %v16592_v20 }
 0x6e8   : > { %11417 = vmatprep.subr.mxu0 %v3877_v5  ;;  %v3857_v5 = vmul.f32 %v16597_v16, %v16597_v16 }
 0x6e9   : > { %11418 = vmatpush3.msra.mxu0 %v3861_v36  ;;  %v3872_v36 = vmul.f32 %v16602_v13, %v16602_v13 }
 0x6ea   : > { %11419 = vmatprep.subr.mxu0 %v3876_v47  ;;  %v3856_v47 = vmul.f32 %v16607_v4, %v16607_v4 }
 0x6eb   : > { %11420 = vmatpush3.msra.mxu0 %v3860_v26  ;;  %v3871_v26 = vmul.f32 %v16614_v46, %v16614_v46 }
 0x6ec   : > { %11421 = vmatprep.subr.mxu0 %v3875_v44  ;;  %v3855_v44 = vmul.f32 %v16619_v12, %v16619_v12 }
 0x6ed   : > { %11422 = vmatpush3.msra.mxu0 %v3859_v48  ;;  %v3870_v48 = vmul.f32 %v16624_v56, %v16624_v56 }
 0x6ee   : > { %11423 = vmatprep.subr.mxu0 %v3874_v27  ;;  %v3854_v27 = vmul.f32 %v16629_v34, %v16629_v34 }
 0x6ef   : > { %11424 = vmatpush3.msra.mxu0 %v3858_v42  ;;  %v3901_v42 = vmul.f32 %v16649_v63, %v16649_v63 }
 0x6f0   : > { %11425 = vmatprep.subr.mxu0 %v3873_v37  ;;  %v3900_v37 = vmul.f32 %v16652_v32, %v16652_v32 }
 0x6f1   : > { %11426 = vmatpush3.msra.mxu0 %v3857_v5  ;;  %v3899_v5 = vmul.f32 %v16659_v7, %v16659_v7 }
 0x6f2   : > { %11427 = vmatprep.subr.mxu0 %v3872_v36  ;;  %v21790_v36 = vld [vmem:[#allocation15_spill] sm:$0xff] }
 0x6f3   : > { %11428 = vmatpush3.msra.mxu0 %v3856_v47  ;;  %v3897_v47 = vmul.f32 %v21790_v36, %v21790_v36 }
 0x6f4   : > { %11429 = vmatprep.subr.mxu0 %v3871_v26 }
 0x6f5   : > { %11430 = vmatpush3.msra.mxu0 %v3855_v44  ;;  %v21792_v44 = vld [vmem:[#allocation13_spill] sm:$0xff] }
 0x6f6   : > { %11431 = vmatprep.subr.mxu0 %v3870_v48  ;;  %v3895_v48 = vmul.f32 %v21792_v44, %v21792_v44 }
 0x6f7   : > { %11432 = vmatpush3.msra.mxu0 %v3854_v27  ;;  %v21793_v27 = vld [vmem:[#allocation12_spill] sm:$0xff] }
 0x6f8   : > { %3982 = vmatmul.mubr.f32.vlgmr.msra.gmra.mxu0 %v16638_v11  ;;  %3987 = vmatprep.subr.mxu0 %v21662_v1  ;;  %v3898_v11 = vmul.f32 %v16664_v60, %v16664_v60 }
 0x6f9   : > { %3988 = vmatpush1.msra.mxu0 %v3901_v42  ;;  %10667 = vmatprep.mubr.msk.f32.mxu0 %vm1404_vm2, %v16644_v61  ;;  %v21791_v61 = vld [vmem:[#allocation14_spill] sm:$0xff]  ;;  %v3894_v42 = vmul.f32 %v21793_v27, %v21793_v27 }
 0x6fa   : > { %3989 = vmatprep.subr.mxu0 %v21662_v1  ;;  %v3896_v26 = vmul.f32 %v21791_v61, %v21791_v61 }
 0x6fb   : > { %3990 = vmatpush1.msra.mxu0 %v3900_v37  ;;  %v21794_v37 = vld [vmem:[#allocation11_spill] sm:$0xff] }
 0x6fc   : > { %3991 = vmatprep.subr.mxu0 %v21662_v1 }
 0x6fd   : > { %3992 = vmatpush1.msra.mxu0 %v3899_v5  ;;  %v3893_v5 = vmul.f32 %v21794_v37, %v21794_v37 }
 0x6fe   : > { %3993 = vmatprep.subr.mxu0 %v21662_v1 }
 0x6ff   : > { %3994 = vmatpush1.msra.mxu0 %v3898_v11  ;;  %v21795_v11 = vld [vmem:[#allocation10_spill] sm:$0xff] }
 0x700   : > { %3995 = vmatprep.subr.mxu0 %v21662_v1 }
 0x701   : > { %3996 = vmatpush1.msra.mxu0 %v3897_v47  ;;  %v3892_v47 = vmul.f32 %v21795_v11, %v21795_v11 }
 0x702   : > { %3997 = vmatprep.subr.mxu0 %v21662_v1 }
 0x703   : > { %3998 = vmatpush1.msra.mxu0 %v3896_v26  ;;  %v21796_v26 = vld [vmem:[#allocation9_spill] sm:$0xff] }
 0x704   : > { %3999 = vmatprep.subr.mxu0 %v21662_v1  ;;  %v3891_v63 = vmul.f32 %v21796_v26, %v21796_v26 }
 0x705   : > { %4000 = vmatpush1.msra.mxu0 %v3895_v48  ;;  %v21797_v48 = vld [vmem:[#allocation8_spill] sm:$0xff] }
 0x706   : > { %4001 = vmatprep.subr.mxu0 %v21662_v1  ;;  %v3890_v32 = vmul.f32 %v21797_v48, %v21797_v48 }
 0x707   : > { %4002 = vmatpush1.msra.mxu0 %v3894_v42  ;;  %v21798_v42 = vld [vmem:[#allocation7_spill] sm:$0xff] }
 0x708   : > { %4003 = vmatprep.subr.mxu0 %v21662_v1  ;;  %v3889_v7 = vmul.f32 %v21798_v42, %v21798_v42 }
 0x709   : > { %4004 = vmatpush1.msra.mxu0 %v3893_v5  ;;  %v21799_v5 = vld [vmem:[#allocation37_spill] sm:$0xff] }
 0x70a   : > { %4005 = vmatprep.subr.mxu0 %v21662_v1  ;;  %v3888_v60 = vmul.f32 %v21799_v5, %v21799_v5 }
 0x70b   : > { %4006 = vmatpush1.msra.mxu0 %v3892_v47  ;;  %v21800_v47 = vld [vmem:[#allocation36_spill] sm:$0xff] }
 0x70c   : > { %4007 = vmatprep.subr.mxu0 %v21662_v1  ;;  %v3887_v36 = vmul.f32 %v21800_v47, %v21800_v47 }
 0x70d   : > { %4008 = vmatpush1.msra.mxu0 %v3891_v63  ;;  %v21801_v63 = vld [vmem:[#allocation35_spill] sm:$0xff] }
 0x70e   : > { %4009 = vmatprep.subr.mxu0 %v21662_v1  ;;  %v3886_v61 = vmul.f32 %v21801_v63, %v21801_v63 }
 0x70f   : > { %4010 = vmatpush1.msra.mxu0 %v3890_v32  ;;  %v3916_v32 = vmul.f32 %v16746_v57, %v16746_v57 }
 0x710   : > { %4011 = vmatprep.subr.mxu0 %v21662_v1 }
 0x711   : > { %4012 = vmatpush1.msra.mxu0 %v3889_v7  ;;  %v3915_v7 = vmul.f32 %v16749_v15, %v16749_v15 }
 0x712   : > { %4013 = vmatprep.subr.mxu0 %v21662_v1 }
 0x713   : > { %4014 = vmatpush1.msra.mxu0 %v3888_v60  ;;  %v3914_v60 = vmul.f32 %v16754_v0, %v16754_v0 }
 0x714   : > { %4015 = vmatprep.subr.mxu0 %v21662_v1 }
 0x715   : > { %4016 = vmatpush1.msra.mxu0 %v3887_v36  ;;  %v3913_v36 = vmul.f32 %v16759_v55, %v16759_v55 }
 0x716   : > { %4017 = vmatprep.subr.mxu0 %v21662_v1 }
 0x717   : > { %4018 = vmatpush1.msra.mxu0 %v3886_v61  ;;  %v3912_v61 = vmul.f32 %v16764_v38, %v16764_v38 }
 0x718   : > { %4021 = vmatprep.subr.mxu0 %v21662_v1 }
 0x719   : > { %4022 = vmatpush2.msra.mxu0 %v3916_v32  ;;  %v3911_v32 = vmul.f32 %v16769_v14, %v16769_v14 }
 0x71a   : > { %4023 = vmatprep.subr.mxu0 %v21662_v1 }
 0x71b   : > { %4024 = vmatpush2.msra.mxu0 %v3915_v7  ;;  %v3910_v7 = vmul.f32 %v16774_v52, %v16774_v52 }
 0x71c   : > { %4025 = vmatprep.subr.mxu0 %v21662_v1 }
 0x71d   : > { %4026 = vmatpush2.msra.mxu0 %v3914_v60  ;;  %v3909_v60 = vmul.f32 %v16779_v3, %v16779_v3 }
 0x71e   : > { %4027 = vmatprep.subr.mxu0 %v21662_v1 }
 0x71f   : > { %4028 = vmatpush2.msra.mxu0 %v3913_v36  ;;  %v3908_v36 = vmul.f32 %v16784_v9, %v16784_v9 }
 0x720   : > { %4029 = vmatprep.subr.mxu0 %v21662_v1 }
 0x721   : > { %4030 = vmatpush2.msra.mxu0 %v3912_v61  ;;  %v3907_v61 = vmul.f32 %v16789_v29, %v16789_v29 }
 0x722   : > { %4031 = vmatprep.subr.mxu0 %v21662_v1 }
 0x723   : > { %4032 = vmatpush2.msra.mxu0 %v3911_v32  ;;  %v3906_v32 = vmul.f32 %v16795_v53, %v16795_v53 }
 0x724   : > { %4033 = vmatprep.subr.mxu0 %v21662_v1 }
 0x725   : > { %4034 = vmatpush2.msra.mxu0 %v3910_v7  ;;  %v3905_v7 = vmul.f32 %v16801_v30, %v16801_v30 }
 0x726   : > { %4035 = vmatprep.subr.mxu0 %v21662_v1 }
 0x727   : > { %4036 = vmatpush2.msra.mxu0 %v3909_v60  ;;  %v3904_v60 = vmul.f32 %v16807_v24, %v16807_v24 }
 0x728   : > { %4037 = vmatprep.subr.mxu0 %v21662_v1 }
 0x729   : > { %4038 = vmatpush2.msra.mxu0 %v3908_v36  ;;  %v3903_v36 = vmul.f32 %v16813_v22, %v16813_v22 }
 0x72a   : > { %4039 = vmatprep.subr.mxu0 %v21662_v1 }
 0x72b   : > { %4040 = vmatpush2.msra.mxu0 %v3907_v61  ;;  %v3902_v61 = vmul.f32 %v16819_v54, %v16819_v54 }
 0x72c   : > { %4041 = vmatprep.subr.mxu0 %v21662_v1 }
 0x72d   : > { %4042 = vmatpush2.msra.mxu0 %v3906_v32  ;;  %v14050_v32 = vld [vmem:[%s21650_s25 + $0x38] sm:$0xff] }
 0x72e   : > { %4043 = vmatprep.subr.mxu0 %v21662_v1 }
 0x72f   : > { %4044 = vmatpush2.msra.mxu0 %v3905_v7  ;;  %v14051_v7 = vld [vmem:[%s21650_s25 + $0x30] sm:$0xff] }
 0x730   : > { %4045 = vmatprep.subr.mxu0 %v21662_v1 }
 0x731   : > { %4046 = vmatpush2.msra.mxu0 %v3904_v60  ;;  %v14052_v60 = vld [vmem:[%s21650_s25 + $0x28] sm:$0xff] }
 0x732   : > { %4047 = vmatprep.subr.mxu0 %v21662_v1 }
 0x733   : > { %4048 = vmatpush2.msra.mxu0 %v3903_v36  ;;  %v14054_v36 = vld [vmem:[%s21650_s25 + $0x18] sm:$0xff] }
 0x734   : > { %4049 = vmatprep.subr.mxu0 %v21662_v1 }
 0x735   : > { %4050 = vmatpush2.msra.mxu0 %v3902_v61  ;;  %v14055_v61 = vld [vmem:[%s21650_s25 + $0x10] sm:$0xff] }
 0x736   : > { %4052 = vmatmul.mubr.f32.vlgmr.msra.gmra.mxu0 %v16831_v2  ;;  %12637 = vmatprep.subr.mxu0 %v14050_v32  ;;  %v14053_v2 = vld [vmem:[%s21650_s25 + $0x20] sm:$0xff] }
 0x737   : > { %12638 = vmatpush3.msra.mxu0 %v14050_v32  ;;  %v14056_v32 = vld [vmem:[%s21650_s25 + $0x8] sm:$0xff] }
 0x738   : > { %12639 = vmatprep.subr.mxu0 %v14051_v7 }
 0x739   : > { %12640 = vmatpush3.msra.mxu0 %v14051_v7  ;;  %v14057_v7 = vld [vmem:[%s21650_s25] sm:$0xff] }
 0x73a   : > { %12641 = vmatprep.subr.mxu0 %v14052_v60 }
 0x73b   : > { %12642 = vmatpush3.msra.mxu0 %v14052_v60  ;;  %v11398_v60 = vpop.f32.mrf.mxu0 }
 0x73c   : > { %12643 = vmatprep.subr.mxu0 %v14053_v2 }
 0x73d   : > { %12644 = vmatpush3.msra.mxu0 %v14053_v2  ;;  %v11399_v2 = vpop.f32.mrf.mxu0 }
 0x73e   : > { %12645 = vmatprep.subr.mxu0 %v14054_v36 }
 0x73f   : > { %12646 = vmatpush3.msra.mxu0 %v14054_v36  ;;  %v11400_v36 = vadd.f32 %v11399_v2, %v11398_v60 }
 0x740   : > { %12647 = vmatprep.subr.mxu0 %v14055_v61 }
 0x741   : > { %12648 = vmatpush3.msra.mxu0 %v14055_v61 }
 0x742   : > { %12649 = vmatprep.subr.mxu0 %v14056_v32 }
 0x743   : > { %12650 = vmatpush3.msra.mxu0 %v14056_v32 }
 0x744   : > { %12651 = vmatprep.subr.mxu0 %v14057_v7 }
 0x745   : > { %12652 = vmatpush3.msra.mxu0 %v14057_v7 }
 0x746   : > { %12656 = vmatprep.subr.mxu0 %v21662_v1 }
 0x798   : > { %v3850_v57 = vpop.f32.mrf.mxu0 }
 0x799   : > { %v3851_v15 = vadd.f32 %v11400_v36, %v3850_v57 }
 0x79a   : > { %v3852_v61 = vpop.f32.mrf.mxu0 }
 0x7b8   : > { %v11433_v0 = vpop.f32.mrf.mxu0 }
 0x7ba   : > { %v11434_v55 = vpop.f32.mrf.mxu0 }
 0x7bb   : > { %v11435_v38 = vadd.f32 %v11434_v55, %v11433_v0 }
 0x7f6   : > { %v4053_v14 = vpop.f32.mrf.mxu0 }
 0x7f7   : > { %v4054_v52 = vadd.f32 %v11435_v38, %v4053_v14 }
 0x7f8   : > { %v4055_v32 = vpop.f32.mrf.mxu0 }
 0x7f9   : > { %v4058_v3 = vrot.slane %v4054_v52, 2 }
 0x7fb   : > { %v4060_v9 = vsel %vm1754_vm3, %v3851_v15, %v4058_v3 }
 0x7fc   : > { %12653 = vmatprep.mubr.msk.f32.mxu0 %vm834_vm1, %v4060_v9 }
 0x7fd   : > { %12654 = vmatmul.mubr.msk.f32.vlgmr.msra.gmra.mxu0 %vm834_vm1, %v4058_v3 }
 0x7fe   : > { %12658 = vmatprep.mubr.msk.f32.mxu0 %vm14097_vm0, %v21662_v1 }
 0x8bd   : > { %v12655_v7 = vpop.f32.mrf.mxu0 }
 0x8be   : > { %v4142_v36 = vmul.f32 0.005952381, %v12655_v7  ;;  %v21802_v7 = vld [vmem:[#allocation38_spill] sm:$0xff] }
 0x8bf   : > { %v4132_v60 = vpop.f32.mrf.mxu0 }
 0x8c0   : > { %v4141_v57 = vmul.f32 0.005952381, %v4132_v60 }
 0x8c2   : > { %v4143_v2 = vmul.f32 %v4141_v57, %v4141_v57 }
 0x8c4   : > { %v4145_v61 = vrot.slane %v4143_v2, 2  ;;  %v6735_v2 = vld [vmem:[%s17049_s29 + $0x8] sm:$0xff] }
 0x8c5   : > { %6758 = vrot.lane.b32.xlu1 %v6735_v2, %s14098_s30  ;;  %v21814_v2 = vld [vmem:[#allocation49_spill] sm:$0xff] }
 0x8c6   : > { %v4147_v0 = vsub.f32 %v4141_v57, %v4145_v61  ;;  %v4148_v55 = vsub.f32 %v4142_v36, %v4145_v61  ;;  %v21806_v36 = vld [vmem:[#allocation41_spill] sm:$0xff]  ;;  %v6736_v61 = vld [vmem:[%s17049_s29 + $0x10] sm:$0xff] }
 0x8c8   : > { %v4149_v38 = vmax.f32 %v4147_v0, 0.0  ;;  %v4150_v14 = vmax.f32 %v4148_v55, 0.0  ;;  %v21807_v0 = vld [vmem:[#allocation42_spill] sm:$0xff]  ;;  %v6737_v55 = vld [vmem:[%s17049_s29 + $0x18] sm:$0xff] }
 0x8c9   : > { %6760 = vrot.lane.b32.xlu1 %v6736_v61, %s14098_s30  ;;  %v21815_v61 = vld [vmem:[#allocation50_spill] sm:$0xff] }
 0x8ca   : > { %v4151_v52 = vadd.f32 1e-05, %v4149_v38  ;;  %v4152_v32 = vadd.f32 1e-05, %v4150_v14  ;;  %v21808_v38 = vld [vmem:[#allocation43_spill] sm:$0xff]  ;;  %v6738_v14 = vld [vmem:[%s17049_s29 + $0x20] sm:$0xff] }
 0x8cc   : > { %13697 = vrsqrt.f32 %v4151_v52  ;;  %v21809_v52 = vld [vmem:[#allocation44_spill] sm:$0xff] }
 0x8cd   : > { %13699 = vrsqrt.f32 %v4152_v32  ;;  %6762 = vrot.lane.b32.xlu1 %v6737_v55, %s14098_s30  ;;  %v6739_v32 = vld [vmem:[%s17049_s29 + $0x28] sm:$0xff]  ;;  %v21817_v55 = vld [vmem:[#allocation52_spill] sm:$0xff] }
 0x8d1   : > { %6764 = vrot.lane.b32.xlu1 %v6738_v14, %s14098_s30  ;;  %v21819_v14 = vld [vmem:[#allocation54_spill] sm:$0xff] }
 0x8d5   : > { %6766 = vrot.lane.b32.xlu1 %v6739_v32, %s14098_s30  ;;  %v21821_v32 = vld [vmem:[#allocation56_spill] sm:$0xff] }
 0x8d9   : > { %v13698_v15 = vpop.eup %13697 }
 0x8da   : > { %v13700_v3 = vpop.eup %13699  ;;  %v4157_v9 = vrot.slane %v13698_v15, 6  ;;  %v21810_v15 = vld [vmem:[#allocation45_spill] sm:$0xff] }
 0x8db   : > { %v4158_v29 = vrot.slane %v13700_v3, 6  ;;  %v6740_v3 = vld [vmem:[%s17049_s29 + $0x30] sm:$0xff] }
 0x8dd   : > { %v4159_v53 = vsel %vm1852_vm4, %v4157_v9, %v4158_v29  ;;  %v21803_v29 = vld [vmem:[#allocation39_spill] sm:$0xff]  ;;  %v21811_v9 = vld [vmem:[#allocation46_spill] sm:$0xff] }
 0x8de   : > { %v4161_v60 = vmul.f32 %v4159_v53, %v4141_v57  ;;  %12848 = vmatpush3.msk.msra.mxu1 %vm1754_vm3, %v4159_v53  ;;  %v6734_v53 = vld [vmem:[%s17049_s29] sm:$0xff]  ;;  %v21805_v57 = vld [vmem:[#allocation40_spill] sm:$0xff] }
 0x8df   : > { %12850 = vmatmul.mubr.msk.f32.vlgmr.msra.gmra.mxu1 %vm1986_vm5, %v21802_v7  ;;  %13243 = vmatprep.subr.mxu1 %v21662_v1 }
 0x8e0   : > { %12657 = vmatpush3.msk.msra.mxu0 %vm1754_vm3, %v4161_v60  ;;  %12852 = vmatprep.mubr.msk.f32.mxu1 %vm14097_vm0, %v21662_v1  ;;  %v6741_v60 = vld [vmem:[%s17049_s29 + $0x38] sm:$0xff] }
 0x8e1   : > { %12659 = vmatmul.mubr.msk.f32.vlgmr.msra.gmra.mxu0 %vm1986_vm5, %v21802_v7  ;;  %13038 = vmatprep.subr.mxu0 %v21662_v1  ;;  %v21812_v7 = vld [vmem:[#allocation47_spill] sm:$0xff] }
 0x8e2   : > { %12661 = vmatprep.mubr.msk.f32.mxu0 %vm14097_vm0, %v21662_v1  ;;  %6756 = vrot.lane.b32.xlu0 %v6734_v53, %s14098_s30  ;;  %v21813_v53 = vld [vmem:[#allocation48_spill] sm:$0xff] }
 0x8e3   : > { %12853 = vmatmul.mubr.msk.f32.gmra.mxu1 %vm1986_vm5, %v21803_v29  ;;  %6770 = vrot.lane.b32.xlu1 %v6741_v60, %s14098_s30  ;;  %v21825_v60 = vld [vmem:[#allocation61_spill] sm:$0xff] }
 0x8e4   : > { %12855 = vmatprep.mubr.msk.f32.mxu1 %vm14097_vm0, %v21662_v1 }
 0x8e5   : > { %12662 = vmatmul.mubr.msk.f32.gmra.mxu0 %vm1986_vm5, %v21803_v29  ;;  %v6742_v29 = vld [vmem:[%s17049_s29 + $0x40] sm:$0xff] }
 0x8e6   : > { %12664 = vmatprep.mubr.msk.f32.mxu0 %vm14097_vm0, %v21662_v1  ;;  %6768 = vrot.lane.b32.xlu0 %v6740_v3, %s14098_s30  ;;  %v21823_v3 = vld [vmem:[#allocation58_spill] sm:$0xff] }
 0x8e7   : > { %12856 = vmatmul.mubr.msk.f32.gmra.mxu1 %vm1986_vm5, %v21805_v57 }
 0x8e8   : > { %12858 = vmatprep.mubr.msk.f32.mxu1 %vm14097_vm0, %v21662_v1 }
 0x8e9   : > { %12665 = vmatmul.mubr.msk.f32.gmra.mxu0 %vm1986_vm5, %v21805_v57  ;;  %v6743_v57 = vld [vmem:[%s17049_s29 + $0x48] sm:$0xff] }
 0x8ea   : > { %12667 = vmatprep.mubr.msk.f32.mxu0 %vm14097_vm0, %v21662_v1  ;;  %6772 = vrot.lane.b32.xlu0 %v6742_v29, %s14098_s30  ;;  %v6831_v29 = vld [vmem:[%s21341_s16 + $0x78] sm:$0xff] }
 0x8eb   : > { %12859 = vmatmul.mubr.msk.f32.gmra.mxu1 %vm1986_vm5, %v21806_v36  ;;  %6774 = vrot.lane.b32.xlu1 %v6743_v57, %s14098_s30  ;;  %v21827_v57 = vld [vmem:[#allocation65_spill] sm:$0xff] }
 0x8ec   : > { %12861 = vmatprep.mubr.msk.f32.mxu1 %vm14097_vm0, %v21662_v1  ;;  %13244 = vmatpush3.msra.mxu1 %v6831_v29  ;;  %v6821_v29 = vld [vmem:[%s21341_s16 + $0x28] sm:$0xff] }
 0x8ed   : > { %12668 = vmatmul.mubr.msk.f32.gmra.mxu0 %vm1986_vm5, %v21806_v36  ;;  %v6744_v36 = vld [vmem:[%s17049_s29 + $0x50] sm:$0xf]  ;;  %13245 = vmatprep.subr.mxu1 %v21662_v1  ;;  %s14102_s29 = smov 8  }
 0x8ee   : > { %12670 = vmatprep.mubr.msk.f32.mxu0 %vm14097_vm0, %v21662_v1  ;;  %6776 = vrot.lane.b32.xlu0 %v6744_v36, %s14098_s30  ;;  %v6828_v36 = vld [vmem:[%s21341_s16 + $0x60] sm:$0xff] }
 0x8ef   : > { %12862 = vmatmul.mubr.msk.f32.gmra.mxu1 %vm1986_vm5, %v21807_v0 }
 0x8f0   : > { %12864 = vmatprep.mubr.msk.f32.mxu1 %vm14097_vm0, %v21662_v1 }
 0x8f1   : > { %12671 = vmatmul.mubr.msk.f32.gmra.mxu0 %vm1986_vm5, %v21807_v0  ;;  %v21816_v0 = vld [vmem:[#allocation51_spill] sm:$0xff] }
 0x8f2   : > { %12673 = vmatprep.mubr.msk.f32.mxu0 %vm14097_vm0, %v21662_v1 }
 0x8f3   : > { %12865 = vmatmul.mubr.msk.f32.gmra.mxu1 %vm1986_vm5, %v21808_v38 }
 0x8f4   : > { %12867 = vmatprep.mubr.msk.f32.mxu1 %vm14097_vm0, %v21662_v1 }
 0x8f5   : > { %12674 = vmatmul.mubr.msk.f32.gmra.mxu0 %vm1986_vm5, %v21808_v38  ;;  %v21818_v38 = vld [vmem:[#allocation53_spill] sm:$0xff] }
 0x8f6   : > { %12676 = vmatprep.mubr.msk.f32.mxu0 %vm14097_vm0, %v21662_v1 }
 0x8f7   : > { %12868 = vmatmul.mubr.msk.f32.gmra.mxu1 %vm1986_vm5, %v21809_v52 }
 0x8f8   : > { %12870 = vmatprep.mubr.msk.f32.mxu1 %vm14097_vm0, %v21662_v1 }
 0x8f9   : > { %12677 = vmatmul.mubr.msk.f32.gmra.mxu0 %vm1986_vm5, %v21809_v52  ;;  %v21820_v52 = vld [vmem:[#allocation55_spill] sm:$0xff] }
 0x8fa   : > { %12679 = vmatprep.mubr.msk.f32.mxu0 %vm14097_vm0, %v21662_v1 }
 0x8fb   : > { %12871 = vmatmul.mubr.msk.f32.gmra.mxu1 %vm1986_vm5, %v21810_v15 }
 0x8fc   : > { %12873 = vmatprep.mubr.msk.f32.mxu1 %vm14097_vm0, %v21662_v1 }
 0x8fd   : > { %12680 = vmatmul.mubr.msk.f32.gmra.mxu0 %vm1986_vm5, %v21810_v15  ;;  %v21822_v15 = vld [vmem:[#allocation57_spill] sm:$0xff] }
 0x8fe   : > { %12682 = vmatprep.mubr.msk.f32.mxu0 %vm14097_vm0, %v21662_v1 }
 0x8ff   : > { %12874 = vmatmul.mubr.msk.f32.gmra.mxu1 %vm1986_vm5, %v21811_v9 }
 0x900   : > { %12876 = vmatprep.mubr.msk.f32.mxu1 %vm14097_vm0, %v21662_v1 }
 0x901   : > { %12683 = vmatmul.mubr.msk.f32.gmra.mxu0 %vm1986_vm5, %v21811_v9  ;;  %v21824_v9 = vld [vmem:[#allocation59_spill] sm:$0xff] }
 0x902   : > { %12685 = vmatprep.mubr.msk.f32.mxu0 %vm14097_vm0, %v21662_v1 }
 0x903   : > { %12877 = vmatmul.mubr.msk.f32.gmra.mxu1 %vm1986_vm5, %v21812_v7 }
 0x904   : > { %12879 = vmatprep.mubr.msk.f32.mxu1 %vm14097_vm0, %v21662_v1 }
 0x905   : > { %12686 = vmatmul.mubr.msk.f32.gmra.mxu0 %vm1986_vm5, %v21812_v7  ;;  %v21826_v7 = vld [vmem:[#allocation63_spill] sm:$0xff] }
 0x906   : > { %12688 = vmatprep.mubr.msk.f32.mxu0 %vm14097_vm0, %v21662_v1 }
 0x907   : > { %12880 = vmatmul.mubr.msk.f32.gmra.mxu1 %vm1986_vm5, %v21813_v53 }
 0x908   : > { %12882 = vmatprep.mubr.msk.f32.mxu1 %vm14097_vm0, %v21662_v1 }
 0x909   : > { %12689 = vmatmul.mubr.msk.f32.gmra.mxu0 %vm1986_vm5, %v21813_v53  ;;  %v6830_v53 = vld [vmem:[%s21341_s16 + $0x70] sm:$0xff] }
 0x90a   : > { %12691 = vmatprep.mubr.msk.f32.mxu0 %vm14097_vm0, %v21662_v1  ;;  %13246 = vmatpush3.msra.mxu1 %v6830_v53  ;;  %v21832_v53 = vld [vmem:[#allocation75_spill] sm:$0xff] }
 0x90b   : > { %12883 = vmatmul.mubr.msk.f32.gmra.mxu1 %vm1986_vm5, %v21814_v2  ;;  %13247 = vmatprep.subr.mxu1 %v21662_v1 }
 0x90c   : > { %12885 = vmatprep.mubr.msk.f32.mxu1 %vm14097_vm0, %v21662_v1 }
 0x90d   : > { %12692 = vmatmul.mubr.msk.f32.gmra.mxu0 %vm1986_vm5, %v21814_v2  ;;  %v6829_v2 = vld [vmem:[%s21341_s16 + $0x68] sm:$0xff] }
 0x90e   : > { %12694 = vmatprep.mubr.msk.f32.mxu0 %vm14097_vm0, %v21662_v1  ;;  %13248 = vmatpush3.msra.mxu1 %v6829_v2  ;;  %v6820_v2 = vld [vmem:[%s21341_s16 + $0x20] sm:$0xff] }
 0x90f   : > { %12886 = vmatmul.mubr.msk.f32.gmra.mxu1 %vm1986_vm5, %v21815_v61  ;;  %13249 = vmatprep.subr.mxu1 %v21662_v1 }
 0x910   : > { %12888 = vmatprep.mubr.msk.f32.mxu1 %vm14097_vm0, %v21662_v1  ;;  %13250 = vmatpush3.msra.mxu1 %v6828_v36  ;;  %v21833_v36 = vld [vmem:[#allocation77_spill] sm:$0xff] }
 0x911   : > { %12695 = vmatmul.mubr.msk.f32.gmra.mxu0 %vm1986_vm5, %v21815_v61  ;;  %v21828_v61 = vld [vmem:[#allocation67_spill] sm:$0xff]  ;;  %13251 = vmatprep.subr.mxu1 %v21662_v1 }
 0x912   : > { %12697 = vmatprep.mubr.msk.f32.mxu0 %vm14097_vm0, %v21662_v1 }
 0x913   : > { %12889 = vmatmul.mubr.msk.f32.gmra.mxu1 %vm1986_vm5, %v21816_v0 }
 0x914   : > { %12891 = vmatprep.mubr.msk.f32.mxu1 %vm14097_vm0, %v21662_v1 }
 0x915   : > { %12698 = vmatmul.mubr.msk.f32.gmra.mxu0 %vm1986_vm5, %v21816_v0  ;;  %v6827_v0 = vld [vmem:[%s21341_s16 + $0x58] sm:$0xff] }
 0x916   : > { %12700 = vmatprep.mubr.msk.f32.mxu0 %vm14097_vm0, %v21662_v1  ;;  %13252 = vmatpush3.msra.mxu1 %v6827_v0  ;;  %v6819_v0 = vld [vmem:[%s21341_s16 + $0x18] sm:$0xff] }
 0x917   : > { %12892 = vmatmul.mubr.msk.f32.gmra.mxu1 %vm1986_vm5, %v21817_v55  ;;  %13253 = vmatprep.subr.mxu1 %v21662_v1 }
 0x918   : > { %12894 = vmatprep.mubr.msk.f32.mxu1 %vm14097_vm0, %v21662_v1 }
 0x919   : > { %12701 = vmatmul.mubr.msk.f32.gmra.mxu0 %vm1986_vm5, %v21817_v55  ;;  %v6826_v55 = vld [vmem:[%s21341_s16 + $0x50] sm:$0xff] }
 0x91a   : > { %12703 = vmatprep.mubr.msk.f32.mxu0 %vm14097_vm0, %v21662_v1  ;;  %13254 = vmatpush3.msra.mxu1 %v6826_v55  ;;  %v21834_v55 = vld [vmem:[#allocation79_spill] sm:$0xff] }
 0x91b   : > { %12895 = vmatmul.mubr.msk.f32.gmra.mxu1 %vm1986_vm5, %v21818_v38  ;;  %13255 = vmatprep.subr.mxu1 %v21662_v1 }
 0x91c   : > { %12897 = vmatprep.mubr.msk.f32.mxu1 %vm14097_vm0, %v21662_v1 }
 0x91d   : > { %12704 = vmatmul.mubr.msk.f32.gmra.mxu0 %vm1986_vm5, %v21818_v38  ;;  %v21829_v38 = vld [vmem:[#allocation69_spill] sm:$0xff] }
 0x91e   : > { %12706 = vmatprep.mubr.msk.f32.mxu0 %vm14097_vm0, %v21662_v1 }
 0x91f   : > { %12898 = vmatmul.mubr.msk.f32.gmra.mxu1 %vm1986_vm5, %v21819_v14 }
 0x920   : > { %12900 = vmatprep.mubr.msk.f32.mxu1 %vm14097_vm0, %v21662_v1 }
 0x921   : > { %12707 = vmatmul.mubr.msk.f32.gmra.mxu0 %vm1986_vm5, %v21819_v14  ;;  %v6825_v14 = vld [vmem:[%s21341_s16 + $0x48] sm:$0xff] }
 0x922   : > { %12709 = vmatprep.mubr.msk.f32.mxu0 %vm14097_vm0, %v21662_v1  ;;  %13256 = vmatpush3.msra.mxu1 %v6825_v14  ;;  %v6818_v14 = vld [vmem:[%s21341_s16 + $0x10] sm:$0xff] }
 0x923   : > { %12901 = vmatmul.mubr.msk.f32.gmra.mxu1 %vm1986_vm5, %v21820_v52  ;;  %13257 = vmatprep.subr.mxu1 %v21662_v1 }
 0x924   : > { %12903 = vmatprep.mubr.msk.f32.mxu1 %vm14097_vm0, %v21662_v1 }
 0x925   : > { %12710 = vmatmul.mubr.msk.f32.gmra.mxu0 %vm1986_vm5, %v21820_v52  ;;  %v6824_v52 = vld [vmem:[%s21341_s16 + $0x40] sm:$0xff] }
 0x926   : > { %12712 = vmatprep.mubr.msk.f32.mxu0 %vm14097_vm0, %v21662_v1  ;;  %13258 = vmatpush3.msra.mxu1 %v6824_v52  ;;  %v21835_v52 = vld [vmem:[#allocation60_spill] sm:$0xff] }
 0x927   : > { %12904 = vmatmul.mubr.msk.f32.gmra.mxu1 %vm1986_vm5, %v21821_v32  ;;  %13259 = vmatprep.subr.mxu1 %v21662_v1 }
 0x928   : > { %12906 = vmatprep.mubr.msk.f32.mxu1 %vm14097_vm0, %v21662_v1 }
 0x929   : > { %12713 = vmatmul.mubr.msk.f32.gmra.mxu0 %vm1986_vm5, %v21821_v32  ;;  %v21830_v32 = vld [vmem:[#allocation71_spill] sm:$0xff] }
 0x92a   : > { %12715 = vmatprep.mubr.msk.f32.mxu0 %vm14097_vm0, %v21662_v1 }
 0x92b   : > { %12907 = vmatmul.mubr.msk.f32.gmra.mxu1 %vm1986_vm5, %v21822_v15 }
 0x92c   : > { %12909 = vmatprep.mubr.msk.f32.mxu1 %vm14097_vm0, %v21662_v1 }
 0x92d   : > { %12716 = vmatmul.mubr.msk.f32.gmra.mxu0 %vm1986_vm5, %v21822_v15  ;;  %v6823_v15 = vld [vmem:[%s21341_s16 + $0x38] sm:$0xff] }
 0x92e   : > { %12718 = vmatprep.mubr.msk.f32.mxu0 %vm14097_vm0, %v21662_v1  ;;  %13260 = vmatpush3.msra.mxu1 %v6823_v15  ;;  %v6817_v15 = vld [vmem:[%s21341_s16 + $0x8] sm:$0xff] }
 0x92f   : > { %12910 = vmatmul.mubr.msk.f32.gmra.mxu1 %vm1986_vm5, %v21823_v3  ;;  %13261 = vmatprep.subr.mxu1 %v21662_v1 }
 0x930   : > { %12912 = vmatprep.mubr.msk.f32.mxu1 %vm14097_vm0, %v21662_v1 }
 0x931   : > { %12719 = vmatmul.mubr.msk.f32.gmra.mxu0 %vm1986_vm5, %v21823_v3  ;;  %v5123_v3 = vld [vmem:[%s21339_s14 + $0x38] sm:$0xff] }
 0x932   : > { %12721 = vmatprep.mubr.msk.f32.mxu0 %vm14097_vm0, %v21662_v1  ;;  %13039 = vmatpush3.msra.mxu0 %v5123_v3  ;;  %v21836_v3 = vld [vmem:[#allocation62_spill] sm:$0xff] }
 0x933   : > { %12913 = vmatmul.mubr.msk.f32.gmra.mxu1 %vm1986_vm5, %v21824_v9  ;;  %13040 = vmatprep.subr.mxu0 %v21662_v1 }
 0x934   : > { %12915 = vmatprep.mubr.msk.f32.mxu1 %vm14097_vm0, %v21662_v1 }
 0x935   : > { %12722 = vmatmul.mubr.msk.f32.gmra.mxu0 %vm1986_vm5, %v21824_v9  ;;  %v6822_v9 = vld [vmem:[%s21341_s16 + $0x30] sm:$0xff] }
 0x936   : > { %12724 = vmatprep.mubr.msk.f32.mxu0 %vm14097_vm0, %v21662_v1  ;;  %13262 = vmatpush3.msra.mxu1 %v6822_v9  ;;  %v5117_v9 = vld [vmem:[%s21339_s14 + $0x8] sm:$0xff] }
 0x937   : > { %12916 = vmatmul.mubr.msk.f32.gmra.mxu1 %vm1986_vm5, %v21825_v60  ;;  %13263 = vmatprep.subr.mxu1 %v21662_v1  ;;  %v6759_v47 = vpop.permute.xlu1 %6758 }
 0x938   : > { %12918 = vmatprep.mubr.msk.f32.mxu1 %vm14097_vm0, %v21662_v1  ;;  %13264 = vmatpush3.msra.mxu1 %v6821_v29  ;;  %v5116_v29 = vld [vmem:[%s21339_s14] sm:$0xff] }
 0x939   : > { %12725 = vmatmul.mubr.msk.f32.gmra.mxu0 %vm1986_vm5, %v21825_v60  ;;  %v21831_v60 = vld [vmem:[#allocation73_spill] sm:$0xff]  ;;  %13265 = vmatprep.subr.mxu1 %v21662_v1 }
 0x93a   : > { %12727 = vmatprep.mubr.msk.f32.mxu0 %vm14097_vm0, %v21662_v1  ;;  %13266 = vmatpush3.msra.mxu1 %v6820_v2  ;;  %v21840_v2 = vld [vmem:[#allocation70_spill] sm:$0xff] }
 0x93b   : > { %12919 = vmatmul.mubr.msk.f32.gmra.mxu1 %vm1986_vm5, %v21826_v7  ;;  %13267 = vmatprep.subr.mxu1 %v21662_v1 }
 0x93c   : > { %12921 = vmatprep.mubr.msk.f32.mxu1 %vm14097_vm0, %v21662_v1  ;;  %13268 = vmatpush3.msra.mxu1 %v6819_v0  ;;  %v21843_v0 = vld [vmem:[#allocation76_spill] sm:$0xff] }
 0x93d   : > { %12728 = vmatmul.mubr.msk.f32.gmra.mxu0 %vm1986_vm5, %v21826_v7  ;;  %v5122_v7 = vld [vmem:[%s21339_s14 + $0x30] sm:$0xff]  ;;  %13269 = vmatprep.subr.mxu1 %v21662_v1 }
 0x93e   : > { %12730 = vmatprep.mubr.msk.f32.mxu0 %vm14097_vm0, %v21662_v1  ;;  %13041 = vmatpush3.msra.mxu0 %v5122_v7  ;;  %v21837_v7 = vld [vmem:[#allocation64_spill] sm:$0xff] }
 0x93f   : > { %12922 = vmatmul.mubr.msk.f32.gmra.mxu1 %vm1986_vm5, %v21827_v57  ;;  %13042 = vmatprep.subr.mxu0 %v21662_v1 }
 0x940   : > { %12924 = vmatprep.mubr.msk.f32.mxu1 %vm14097_vm0, %v21662_v1  ;;  %13270 = vmatpush3.msra.mxu1 %v6818_v14  ;;  %v21846_v14 = vld [vmem:[#allocation81_spill] sm:$0xff] }
 0x941   : > { %12731 = vmatmul.mubr.msk.f32.gmra.mxu0 %vm1986_vm5, %v21827_v57  ;;  %v5121_v57 = vld [vmem:[%s21339_s14 + $0x28] sm:$0xff]  ;;  %13271 = vmatprep.subr.mxu1 %v21662_v1 }
 0x942   : > { %12733 = vmatprep.mubr.msk.f32.mxu0 %vm14097_vm0, %v21662_v1  ;;  %13043 = vmatpush3.msra.mxu0 %v5121_v57  ;;  %v21839_v57 = vld [vmem:[#allocation68_spill] sm:$0xff] }
 0x943   : > { %12925 = vmatmul.mubr.msk.f32.gmra.mxu1 %vm1986_vm5, %v21828_v61  ;;  %13044 = vmatprep.subr.mxu0 %v21662_v1 }
 0x944   : > { %12927 = vmatprep.mubr.msk.f32.mxu1 %vm14097_vm0, %v21662_v1  ;;  %13272 = vmatpush3.msra.mxu1 %v6817_v15  ;;  %v21849_v15 = vld [vmem:[#allocation84_spill] sm:$0xff] }
 0x945   : > { %12734 = vmatmul.mubr.msk.f32.gmra.mxu0 %vm1986_vm5, %v21828_v61  ;;  %v5120_v61 = vld [vmem:[%s21339_s14 + $0x20] sm:$0xff]  ;;  %13273 = vmatprep.subr.mxu1 %v21662_v1 }
 0x946   : > { %12736 = vmatprep.mubr.msk.f32.mxu0 %vm14097_vm0, %v21662_v1  ;;  %13045 = vmatpush3.msra.mxu0 %v5120_v61  ;;  %v21842_v61 = vld [vmem:[#allocation74_spill] sm:$0xff] }
 0x947   : > { %12928 = vmatmul.mubr.msk.f32.gmra.mxu1 %vm1986_vm5, %v21829_v38  ;;  %13046 = vmatprep.subr.mxu0 %v21662_v1 }
 0x948   : > { %12930 = vmatprep.mubr.msk.f32.mxu1 %vm14097_vm0, %v21662_v1 }
 0x949   : > { %12737 = vmatmul.mubr.msk.f32.gmra.mxu0 %vm1986_vm5, %v21829_v38  ;;  %v5119_v38 = vld [vmem:[%s21339_s14 + $0x18] sm:$0xff] }
 0x94a   : > { %12739 = vmatprep.mubr.msk.f32.mxu0 %vm14097_vm0, %v21662_v1  ;;  %13047 = vmatpush3.msra.mxu0 %v5119_v38  ;;  %v21845_v38 = vld [vmem:[#allocation80_spill] sm:$0xff] }
 0x94b   : > { %12931 = vmatmul.mubr.msk.f32.gmra.mxu1 %vm1986_vm5, %v21830_v32  ;;  %13048 = vmatprep.subr.mxu0 %v21662_v1 }
 0x94c   : > { %12933 = vmatprep.mubr.msk.f32.mxu1 %vm14097_vm0, %v21662_v1 }
 0x94d   : > { %12740 = vmatmul.mubr.msk.f32.gmra.mxu0 %vm1986_vm5, %v21830_v32  ;;  %v5118_v32 = vld [vmem:[%s21339_s14 + $0x10] sm:$0xff] }
 0x94e   : > { %12742 = vmatprep.mubr.msk.f32.mxu0 %vm14097_vm0, %v21662_v1  ;;  %13049 = vmatpush3.msra.mxu0 %v5118_v32  ;;  %v21848_v32 = vld [vmem:[#allocation83_spill] sm:$0xff] }
 0x94f   : > { %12934 = vmatmul.mubr.msk.f32.gmra.mxu1 %vm1986_vm5, %v21831_v60  ;;  %13050 = vmatprep.subr.mxu0 %v21662_v1 }
 0x950   : > { %12936 = vmatprep.mubr.msk.f32.mxu1 %vm14097_vm0, %v21662_v1  ;;  %13051 = vmatpush3.msra.mxu0 %v5117_v9 }
 0x951   : > { %12743 = vmatmul.mubr.msk.f32.gmra.mxu0 %vm1986_vm5, %v21831_v60  ;;  %v6816_v60 = vld [vmem:[%s21341_s16] sm:$0xff]  ;;  %13052 = vmatprep.subr.mxu0 %v21662_v1 }
 0x952   : > { %12745 = vmatprep.mubr.msk.f32.mxu0 %vm14097_vm0, %v21662_v1  ;;  %13274 = vmatpush3.msra.mxu1 %v6816_v60  ;;  %v21851_v60 = vld [vmem:[#allocation86_spill] sm:$0xff] }
 0x953   : > { %12937 = vmatmul.mubr.msk.f32.gmra.mxu1 %vm1986_vm5, %v21832_v53  ;;  %13308 = vmatprep.subr.mxu1 %v21662_v1 }
 0x954   : > { %12939 = vmatprep.mubr.msk.f32.mxu1 %vm14097_vm0, %v21662_v1  ;;  %13053 = vmatpush3.msra.mxu0 %v5116_v29  ;;  %v6757_v21 = vpop.permute.xlu0 %6756 }
 0x955   : > { %12746 = vmatmul.mubr.msk.f32.gmra.mxu0 %vm1986_vm5, %v21832_v53  ;;  %v21838_v53 = vld [vmem:[#allocation66_spill] sm:$0xff]  ;;  %13563 = vmatprep.subr.mxu0 %v21662_v1 }
 0x956   : > { %12748 = vmatprep.mubr.msk.f32.mxu0 %vm14097_vm0, %v21662_v1 }
 0x957   : > { %12940 = vmatmul.mubr.msk.f32.gmra.mxu1 %vm1986_vm5, %v21833_v36 }
 0x958   : > { %12942 = vmatprep.mubr.msk.f32.mxu1 %vm14097_vm0, %v21662_v1 }
 0x959   : > { %12749 = vmatmul.mubr.msk.f32.gmra.mxu0 %vm1986_vm5, %v21833_v36  ;;  %v21841_v36 = vld [vmem:[#allocation72_spill] sm:$0xff] }
 0x95a   : > { %12751 = vmatprep.mubr.msk.f32.mxu0 %vm14097_vm0, %v21662_v1 }
 0x95b   : > { %12943 = vmatmul.mubr.msk.f32.gmra.mxu1 %vm1986_vm5, %v21834_v55 }
 0x95c   : > { %12945 = vmatprep.mubr.msk.f32.mxu1 %vm14097_vm0, %v21662_v1 }
 0x95d   : > { %12752 = vmatmul.mubr.msk.f32.gmra.mxu0 %vm1986_vm5, %v21834_v55  ;;  %v21844_v55 = vld [vmem:[#allocation78_spill] sm:$0xff] }
 0x95e   : > { %12754 = vmatprep.mubr.msk.f32.mxu0 %vm14097_vm0, %v21662_v1 }
 0x95f   : > { %12946 = vmatmul.mubr.msk.f32.gmra.mxu1 %vm1986_vm5, %v21835_v52 }
 0x960   : > { %12948 = vmatprep.mubr.msk.f32.mxu1 %vm14097_vm0, %v21662_v1 }
 0x961   : > { %12755 = vmatmul.mubr.msk.f32.gmra.mxu0 %vm1986_vm5, %v21835_v52  ;;  %v21847_v52 = vld [vmem:[#allocation82_spill] sm:$0xff] }
 0x962   : > { %12757 = vmatprep.mubr.msk.f32.mxu0 %vm14097_vm0, %v21662_v1 }
 0x963   : > { %12949 = vmatmul.mubr.msk.f32.gmra.mxu1 %vm1986_vm5, %v21836_v3 }
 0x964   : > { %12951 = vmatprep.mubr.msk.f32.mxu1 %vm14097_vm0, %v21662_v1 }
 0x965   : > { %12758 = vmatmul.mubr.msk.f32.gmra.mxu0 %vm1986_vm5, %v21836_v3  ;;  %v21850_v3 = vld [vmem:[#allocation85_spill] sm:$0xff] }
 0x966   : > { %12760 = vmatprep.mubr.msk.f32.mxu0 %vm14097_vm0, %v21662_v1 }
 0x967   : > { %12952 = vmatmul.mubr.msk.f32.gmra.mxu1 %vm1986_vm5, %v21837_v7 }
 0x968   : > { %12954 = vmatprep.mubr.msk.f32.mxu1 %vm14097_vm0, %v21662_v1 }
 0x969   : > { %12761 = vmatmul.mubr.msk.f32.gmra.mxu0 %vm1986_vm5, %v21837_v7 }
 0x96a   : > { %12763 = vmatprep.mubr.msk.f32.mxu0 %vm14097_vm0, %v21662_v1 }
 0x96b   : > { %12955 = vmatmul.mubr.msk.f32.gmra.mxu1 %vm1986_vm5, %v21838_v53 }
 0x96c   : > { %12957 = vmatprep.mubr.msk.f32.mxu1 %vm14097_vm0, %v21662_v1 }
 0x96d   : > { %12764 = vmatmul.mubr.msk.f32.gmra.mxu0 %vm1986_vm5, %v21838_v53 }
 0x96e   : > { %12766 = vmatprep.mubr.msk.f32.mxu0 %vm14097_vm0, %v21662_v1 }
 0x96f   : > { %12958 = vmatmul.mubr.msk.f32.gmra.mxu1 %vm1986_vm5, %v21839_v57 }
 0x970   : > { %12960 = vmatprep.mubr.msk.f32.mxu1 %vm14097_vm0, %v21662_v1 }
 0x971   : > { %12767 = vmatmul.mubr.msk.f32.gmra.mxu0 %vm1986_vm5, %v21839_v57 }
 0x972   : > { %12769 = vmatprep.mubr.msk.f32.mxu0 %vm14097_vm0, %v21662_v1 }
 0x973   : > { %12961 = vmatmul.mubr.msk.f32.gmra.mxu1 %vm1986_vm5, %v21840_v2 }
 0x974   : > { %12963 = vmatprep.mubr.msk.f32.mxu1 %vm14097_vm0, %v21662_v1 }
 0x975   : > { %12770 = vmatmul.mubr.msk.f32.gmra.mxu0 %vm1986_vm5, %v21840_v2  ;;  %v21852_v2 = vld [vmem:[#allocation87_spill] sm:$0xff] }
 0x976   : > { %12772 = vmatprep.mubr.msk.f32.mxu0 %vm14097_vm0, %v21662_v1 }
 0x977   : > { %12964 = vmatmul.mubr.msk.f32.gmra.mxu1 %vm1986_vm5, %v21841_v36 }
 0x978   : > { %12966 = vmatprep.mubr.msk.f32.mxu1 %vm14097_vm0, %v21662_v1 }
 0x979   : > { %12773 = vmatmul.mubr.msk.f32.gmra.mxu0 %vm1986_vm5, %v21841_v36 }
 0x97a   : > { %12775 = vmatprep.mubr.msk.f32.mxu0 %vm14097_vm0, %v21662_v1 }
 0x97b   : > { %12967 = vmatmul.mubr.msk.f32.gmra.mxu1 %vm1986_vm5, %v21842_v61 }
 0x97c   : > { %12969 = vmatprep.mubr.msk.f32.mxu1 %vm14097_vm0, %v21662_v1 }
 0x97d   : > { %12776 = vmatmul.mubr.msk.f32.gmra.mxu0 %vm1986_vm5, %v21842_v61 }
 0x97e   : > { %12778 = vmatprep.mubr.msk.f32.mxu0 %vm14097_vm0, %v21662_v1 }
 0x97f   : > { %12970 = vmatmul.mubr.msk.f32.gmra.mxu1 %vm1986_vm5, %v21843_v0 }
 0x980   : > { %12972 = vmatprep.mubr.msk.f32.mxu1 %vm14097_vm0, %v21662_v1 }
 0x981   : > { %12779 = vmatmul.mubr.msk.f32.gmra.mxu0 %vm1986_vm5, %v21843_v0 }
 0x982   : > { %12781 = vmatprep.mubr.msk.f32.mxu0 %vm14097_vm0, %v21662_v1 }
 0x983   : > { %12973 = vmatmul.mubr.msk.f32.gmra.mxu1 %vm1986_vm5, %v21844_v55 }
 0x984   : > { %12975 = vmatprep.mubr.msk.f32.mxu1 %vm14097_vm0, %v21662_v1 }
 0x985   : > { %12782 = vmatmul.mubr.msk.f32.gmra.mxu0 %vm1986_vm5, %v21844_v55 }
 0x986   : > { %12784 = vmatprep.mubr.msk.f32.mxu0 %vm14097_vm0, %v21662_v1 }
 0x987   : > { %12976 = vmatmul.mubr.msk.f32.gmra.mxu1 %vm1986_vm5, %v21845_v38 }
 0x988   : > { %12978 = vmatprep.mubr.msk.f32.mxu1 %vm14097_vm0, %v21662_v1 }
 0x989   : > { %12785 = vmatmul.mubr.msk.f32.gmra.mxu0 %vm1986_vm5, %v21845_v38  ;;  %v21853_v38 = vld [vmem:[#allocation88_spill] sm:$0xff] }
 0x98a   : > { %12787 = vmatprep.mubr.msk.f32.mxu0 %vm14097_vm0, %v21662_v1 }
 0x98b   : > { %12979 = vmatmul.mubr.msk.f32.gmra.mxu1 %vm1986_vm5, %v21846_v14 }
 0x98c   : > { %12981 = vmatprep.mubr.msk.f32.mxu1 %vm14097_vm0, %v21662_v1 }
 0x98d   : > { %12788 = vmatmul.mubr.msk.f32.gmra.mxu0 %vm1986_vm5, %v21846_v14 }
 0x98e   : > { %12790 = vmatprep.mubr.msk.f32.mxu0 %vm14097_vm0, %v21662_v1 }
 0x98f   : > { %12982 = vmatmul.mubr.msk.f32.gmra.mxu1 %vm1986_vm5, %v21847_v52 }
 0x990   : > { %12984 = vmatprep.mubr.msk.f32.mxu1 %vm14097_vm0, %v21662_v1 }
 0x991   : > { %12791 = vmatmul.mubr.msk.f32.gmra.mxu0 %vm1986_vm5, %v21847_v52 }
 0x992   : > { %12793 = vmatprep.mubr.msk.f32.mxu0 %vm14097_vm0, %v21662_v1 }
 0x993   : > { %12985 = vmatmul.mubr.msk.f32.gmra.mxu1 %vm1986_vm5, %v21848_v32 }
 0x994   : > { %12987 = vmatprep.mubr.msk.f32.mxu1 %vm14097_vm0, %v21662_v1 }
 0x995   : > { %12794 = vmatmul.mubr.msk.f32.gmra.mxu0 %vm1986_vm5, %v21848_v32 }
 0x996   : > { %12796 = vmatprep.mubr.msk.f32.mxu0 %vm14097_vm0, %v21662_v1 }
 0x997   : > { %12988 = vmatmul.mubr.msk.f32.gmra.mxu1 %vm1986_vm5, %v21849_v15 }
 0x998   : > { %12990 = vmatprep.mubr.msk.f32.mxu1 %vm14097_vm0, %v21662_v1 }
 0x999   : > { %12797 = vmatmul.mubr.msk.f32.gmra.mxu0 %vm1986_vm5, %v21849_v15 }
 0x99a   : > { %12799 = vmatprep.mubr.msk.f32.mxu0 %vm14097_vm0, %v21662_v1 }
 0x99b   : > { %12991 = vmatmul.mubr.msk.f32.gmra.mxu1 %vm1986_vm5, %v21850_v3 }
 0x99c   : > { %12993 = vmatprep.mubr.msk.f32.mxu1 %vm14097_vm0, %v21662_v1 }
 0x99d   : > { %12800 = vmatmul.mubr.msk.f32.gmra.mxu0 %vm1986_vm5, %v21850_v3  ;;  %v21854_v3 = vld [vmem:[#allocation89_spill] sm:$0xff] }
 0x99e   : > { %12802 = vmatprep.mubr.msk.f32.mxu0 %vm14097_vm0, %v21662_v1 }
 0x99f   : > { %v17539_v9 = vpop.f32.mrf.mxu1  ;;  %12994 = vmatmul.mubr.msk.f32.gmra.mxu1 %vm1986_vm5, %v21851_v60 }
 0x9a0   : > { %12996 = vmatprep.mubr.msk.f32.mxu1 %vm14097_vm0, %v21662_v1 }
 0x9a1   : > { %v17545_v7 = vpop.f32.mrf.mxu0  ;;  %12803 = vmatmul.mubr.msk.f32.gmra.mxu0 %vm1986_vm5, %v21851_v60  ;;  %v12851_v29 = vpop.f32.mrf.mxu1 }
 0x9a2   : > { %12805 = vmatprep.mubr.msk.f32.mxu0 %vm14097_vm0, %v21662_v1 }
 0x9a3   : > { %v12660_v53 = vpop.f32.mrf.mxu0  ;;  %v17551_v57 = vpop.f32.mrf.mxu1  ;;  %12997 = vmatmul.mubr.msk.f32.gmra.mxu1 %vm1986_vm5, %v21852_v2 }
 0x9a4   : > { %12999 = vmatprep.mubr.msk.f32.mxu1 %vm14097_vm0, %v21662_v1 }
 0x9a5   : > { %v17557_v36 = vpop.f32.mrf.mxu0  ;;  %12806 = vmatmul.mubr.msk.f32.gmra.mxu0 %vm1986_vm5, %v21852_v2  ;;  %v12854_v61 = vpop.f32.mrf.mxu1 }
 0x9a6   : > { %12808 = vmatprep.mubr.msk.f32.mxu0 %vm14097_vm0, %v21662_v1  ;;  %v21855_v61 = vld [vmem:[#allocation90_spill] sm:$0xff] }
 0x9a7   : > { %v12663_v0 = vpop.f32.mrf.mxu0  ;;  %v17563_v55 = vpop.f32.mrf.mxu1  ;;  %13000 = vmatmul.mubr.msk.f32.gmra.mxu1 %vm1986_vm5, %v21853_v38 }
 0x9a8   : > { %13002 = vmatprep.mubr.msk.f32.mxu1 %vm14097_vm0, %v21662_v1 }
 0x9a9   : > { %v17569_v14 = vpop.f32.mrf.mxu0  ;;  %12809 = vmatmul.mubr.msk.f32.gmra.mxu0 %vm1986_vm5, %v21853_v38  ;;  %v12857_v52 = vpop.f32.mrf.mxu1 }
 0x9aa   : > { %12811 = vmatprep.mubr.msk.f32.mxu0 %vm14097_vm0, %v21662_v1 }
 0x9ab   : > { %v12666_v32 = vpop.f32.mrf.mxu0  ;;  %v17575_v15 = vpop.f32.mrf.mxu1  ;;  %13003 = vmatmul.mubr.msk.f32.gmra.mxu1 %vm1986_vm5, %v21854_v3 }
 0x9ac   : > { %13005 = vmatprep.mubr.msk.f32.mxu1 %vm14097_vm0, %v21662_v1 }
 0x9ad   : > { %v17581_v60 = vpop.f32.mrf.mxu0  ;;  %12812 = vmatmul.mubr.msk.f32.gmra.mxu0 %vm1986_vm5, %v21854_v3  ;;  %v12860_v29 = vpop.f32.mrf.mxu1  ;;  %v21856_v3 = vld [vmem:[#allocation91_spill] sm:$0xff] }
 0x9ae   : > { %12814 = vmatprep.mubr.msk.f32.mxu0 %vm14097_vm0, %v21662_v1 }
 0x9af   : > { %v12669_v53 = vpop.f32.mrf.mxu0  ;;  %v17587_v2 = vpop.f32.mrf.mxu1  ;;  %13006 = vmatmul.mubr.msk.f32.gmra.mxu1 %vm1986_vm5, %v21855_v61 }
 0x9b0   : > { %13008 = vmatprep.mubr.msk.f32.mxu1 %vm14097_vm0, %v21662_v1 }
 0x9b1   : > { %v17593_v0 = vpop.f32.mrf.mxu0  ;;  %12815 = vmatmul.mubr.msk.f32.gmra.mxu0 %vm1986_vm5, %v21855_v61  ;;  %v12863_v38 = vpop.f32.mrf.mxu1 }
 0x9b2   : > { %12817 = vmatprep.mubr.msk.f32.mxu0 %vm14097_vm0, %v21662_v1 }
 0x9b3   : > { %v12672_v52 = vpop.f32.mrf.mxu0  ;;  %v17599_v32 = vpop.f32.mrf.mxu1  ;;  %13009 = vmatmul.mubr.msk.f32.gmra.mxu1 %vm1986_vm5, %v21856_v3 }
 0x9b4   : > { %13011 = vmatprep.mubr.msk.f32.mxu1 %vm14097_vm0, %v21662_v1  ;;  %v21857_v52 = vld [vmem:[#allocation92_spill] sm:$0xff] }
 0x9b5   : > { %v17605_v29 = vpop.f32.mrf.mxu0  ;;  %12818 = vmatmul.mubr.msk.f32.gmra.mxu0 %vm1986_vm5, %v21856_v3  ;;  %v12866_v53 = vpop.f32.mrf.mxu1 }
 0x9b6   : > { %12820 = vmatprep.mubr.msk.f32.mxu0 %vm14097_vm0, %v21662_v1 }
 0x9b7   : > { %v12675_v61 = vpop.f32.mrf.mxu0  ;;  %v17611_v38 = vpop.f32.mrf.mxu1  ;;  %13012 = vmatmul.mubr.msk.f32.gmra.mxu1 %vm1986_vm5, %v21857_v52 }
 0x9b8   : > { %13014 = vmatprep.mubr.msk.f32.mxu1 %vm14097_vm0, %v21662_v1  ;;  %v21858_v61 = vld [vmem:[#allocation93_spill] sm:$0xff] }
 0x9b9   : > { %v17617_v30 = vpop.f32.mrf.mxu0  ;;  %12821 = vmatmul.mubr.msk.f32.gmra.mxu0 %vm1986_vm5, %v21857_v52  ;;  %v12869_v24 = vpop.f32.mrf.mxu1 }
 0x9ba   : > { %12823 = vmatprep.mubr.msk.f32.mxu0 %vm14097_vm0, %v21662_v1 }
 0x9bb   : > { %v12678_v3 = vpop.f32.mrf.mxu0  ;;  %v17623_v53 = vpop.f32.mrf.mxu1  ;;  %13015 = vmatmul.mubr.msk.f32.gmra.mxu1 %vm1986_vm5, %v21858_v61 }
 0x9bc   : > { %13017 = vmatprep.mubr.msk.f32.mxu1 %vm14097_vm0, %v21662_v1  ;;  %v21859_v3 = vld [vmem:[#allocation94_spill] sm:$0xff] }
 0x9bd   : > { %v17629_v22 = vpop.f32.mrf.mxu0  ;;  %12824 = vmatmul.mubr.msk.f32.gmra.mxu0 %vm1986_vm5, %v21858_v61  ;;  %v12872_v54 = vpop.f32.mrf.mxu1 }
 0x9be   : > { %12826 = vmatprep.mubr.msk.f32.mxu0 %vm14097_vm0, %v21662_v1 }
 0x9bf   : > { %v12681_v24 = vpop.f32.mrf.mxu0  ;;  %v17635_v52 = vpop.f32.mrf.mxu1  ;;  %13018 = vmatmul.mubr.msk.f32.gmra.mxu1 %vm1986_vm5, %v21859_v3 }
 0x9c0   : > { %13020 = vmatprep.mubr.msk.f32.mxu1 %vm14097_vm0, %v21662_v1  ;;  %v21860_v24 = vld [vmem:[#allocation95_spill] sm:$0xff] }
 0x9c1   : > { %v17641_v44 = vpop.f32.mrf.mxu0  ;;  %12827 = vmatmul.mubr.msk.f32.gmra.mxu0 %vm1986_vm5, %v21859_v3  ;;  %v12875_v27 = vpop.f32.mrf.mxu1 }
 0x9c2   : > { %12829 = vmatprep.mubr.msk.f32.mxu0 %vm14097_vm0, %v21662_v1 }
 0x9c3   : > { %v12684_v54 = vpop.f32.mrf.mxu0  ;;  %v17647_v61 = vpop.f32.mrf.mxu1  ;;  %13021 = vmatmul.mubr.msk.f32.gmra.mxu1 %vm1986_vm5, %v21860_v24 }
 0x9c4   : > { %13023 = vmatprep.mubr.msk.f32.mxu1 %vm14097_vm0, %v21662_v1  ;;  %v21861_v54 = vld [vmem:[#allocation96_spill] sm:$0xff] }
 0x9c5   : > { %v17653_v37 = vpop.f32.mrf.mxu0  ;;  %12830 = vmatmul.mubr.msk.f32.gmra.mxu0 %vm1986_vm5, %v21860_v24  ;;  %v12878_v11 = vpop.f32.mrf.mxu1 }
 0x9c6   : > { %12832 = vmatprep.mubr.msk.f32.mxu0 %vm14097_vm0, %v21662_v1 }
 0x9c7   : > { %v12687_v27 = vpop.f32.mrf.mxu0  ;;  %v17659_v3 = vpop.f32.mrf.mxu1  ;;  %13024 = vmatmul.mubr.msk.f32.gmra.mxu1 %vm1986_vm5, %v21861_v54 }
 0x9c8   : > { %13026 = vmatprep.mubr.msk.f32.mxu1 %vm14097_vm0, %v21662_v1  ;;  %v21862_v27 = vld [vmem:[#allocation97_spill] sm:$0xff] }
 0x9c9   : > { %v17665_v26 = vpop.f32.mrf.mxu0  ;;  %12833 = vmatmul.mubr.msk.f32.gmra.mxu0 %vm1986_vm5, %v21861_v54  ;;  %v12881_v48 = vpop.f32.mrf.mxu1 }
 0x9ca   : > { %12835 = vmatprep.mubr.msk.f32.mxu0 %vm14097_vm0, %v21662_v1 }
 0x9cb   : > { %v12690_v11 = vpop.f32.mrf.mxu0  ;;  %v17671_v24 = vpop.f32.mrf.mxu1  ;;  %13027 = vmatmul.mubr.msk.f32.gmra.mxu1 %vm1986_vm5, %v21862_v27 }
 0x9cc   : > { %13029 = vmatprep.mubr.msk.f32.mxu1 %vm14097_vm0, %v21662_v1  ;;  %v21863_v11 = vld [vmem:[#allocation98_spill] sm:$0xff] }
 0x9cd   : > { %v17677_v42 = vpop.f32.mrf.mxu0  ;;  %12836 = vmatmul.mubr.msk.f32.gmra.mxu0 %vm1986_vm5, %v21862_v27  ;;  %v12884_v5 = vpop.f32.mrf.mxu1 }
 0x9ce   : > { %12838 = vmatprep.mubr.msk.f32.mxu0 %vm14097_vm0, %v21662_v1  ;;  %v4927_v5 = vmul.f32 %v17539_v9, %v16629_v34  ;;  %v6761_v34 = vpop.permute.xlu1 %6760 }
 0x9cf   : > { %v12693_v48 = vpop.f32.mrf.mxu0  ;;  %v17683_v54 = vpop.f32.mrf.mxu1  ;;  %13030 = vmatmul.mubr.msk.f32.gmra.mxu1 %vm1986_vm5, %v21863_v11 }
 0x9d0   : > { %13032 = vmatprep.mubr.msk.f32.mxu1 %vm14097_vm0, %v21662_v1  ;;  %v4990_v9 = vsub.f32 %v4927_v5, %v17545_v7  ;;  %v4929_v5 = vmul.f32 %v17563_v55, %v16607_v4  ;;  %v4930_v55 = vmul.f32 %v17575_v15, %v16597_v16 }
 0x9d1   : > { %v17689_v63 = vpop.f32.mrf.mxu0  ;;  %12839 = vmatmul.mubr.msk.f32.gmra.mxu0 %vm1986_vm5, %v21863_v11  ;;  %v12887_v27 = vpop.f32.mrf.mxu1 }
 0x9d2   : > { %12841 = vmatprep.mubr.msk.f32.mxu0 %vm14097_vm0, %v21662_v1  ;;  %v4928_v27 = vmul.f32 %v17551_v57, %v16619_v12  ;;  %v5053_v12 = vmax.f32 %v4990_v9, 0.0  ;;  %v4993_v15 = vsub.f32 %v4930_v55, %v17581_v60 }
 0x9d3   : > { %v12696_v48 = vpop.f32.mrf.mxu0  ;;  %v17697_v59 = vpop.f32.mrf.mxu1  ;;  %13033 = vmatmul.mubr.msk.f32.gmra.mxu1 %vm1986_vm5, %v21864_v62 }
 0x9d4   : > { %13035 = vmatprep.mubr.msk.f32.mxu1 %vm14097_vm0, %v21662_v1  ;;  %v4991_v57 = vsub.f32 %v4928_v27, %v17557_v36  ;;  %v4992_v36 = vsub.f32 %v4929_v5, %v17569_v14  ;;  %v14061_v5 = vld [vmem:[%s14265_s1 + $0x18] sm:$0xff] }
 0x9d5   : > { %v17703_v39 = vpop.f32.mrf.mxu0  ;;  %12842 = vmatmul.mubr.msk.f32.gmra.mxu0 %vm1986_vm5, %v21864_v62  ;;  %v12890_v11 = vpop.f32.mrf.mxu1  ;;  %v6789_v62 = vsel %vm834_vm1, %v14058_v51, %v6757_v21  ;;  %v14059_v51 = vld [vmem:[%s14265_s1 + $0x8] sm:$0xff] }
 0x9d6   : > { %12844 = vmatprep.mubr.msk.f32.mxu0 %vm14097_vm0, %v21662_v1  ;;  %v6790_v41 = vsel %vm834_vm1, %v14059_v51, %v6759_v47  ;;  %v5054_v4 = vmax.f32 %v4991_v57, 0.0  ;;  %v5055_v14 = vmax.f32 %v4992_v36, 0.0 }
 0x9d7   : > { %v12699_v48 = vpop.f32.mrf.mxu0  ;;  %v17712_v6 = vpop.f32.mrf.mxu1  ;;  %13036 = vmatmul.mubr.msk.f32.gmra.mxu1 %vm1986_vm5, %v21865_v33 }
 0x9d8   : > { %13275 = vmatprep.mubr.msk.f32.mxu1 %vm14097_vm0, %v21662_v1 }
 0x9d9   : > { %v17720_v11 = vpop.f32.mrf.mxu0  ;;  %12845 = vmatmul.mubr.msk.f32.gmra.mxu0 %vm1986_vm5, %v21865_v33  ;;  %v12893_v7 = vpop.f32.mrf.mxu1 }
 0x9da   : > { %13054 = vmatprep.mubr.msk.f32.mxu0 %vm14097_vm0, %v21662_v1  ;;  %v6763_v33 = vpop.permute.xlu1 %6762 }
 0x9db   : > { %v12702_v48 = vpop.f32.mrf.mxu0  ;;  %v17729_v21 = vpop.f32.mrf.mxu1  ;;  %13276 = vmatmul.mubr.f32.vlgmr.msra.gmra.mxu1 %v6789_v62  ;;  %v14060_v62 = vld [vmem:[%s14265_s1 + $0x10] sm:$0xff] }
 0x9dc   : > { %13278 = vmatprep.mubr.msk.f32.mxu1 %vm14097_vm0, %v21662_v1  ;;  %v6791_v48 = vsel %vm834_vm1, %v14060_v62, %v6761_v34 }
 0x9dd   : > { %v17735_v7 = vpop.f32.mrf.mxu0  ;;  %v12896_v9 = vpop.f32.mrf.mxu1  ;;  %13055 = vmatmul.mubr.msk.f32.vlgmr.msra.gmra.mxu0 %vm834_vm1, %v5053_v12 }
 0x9de   : > { %13057 = vmatprep.mubr.msk.f32.mxu0 %vm14097_vm0, %v21662_v1  ;;  %v6765_v16 = vpop.permute.xlu1 %6764  ;;  %v6792_v9 = vsel %vm834_vm1, %v14061_v5, %v6763_v33  ;;  %v14062_v33 = vld [vmem:[%s14265_s1 + $0x20] sm:$0xff]  ;;  %v6769_v5 = vpop.permute.xlu0 %6768 }
 0x9df   : > { %v12705_v27 = vpop.f32.mrf.mxu0  ;;  %v17743_v47 = vpop.f32.mrf.mxu1  ;;  %13279 = vmatmul.mubr.f32.gmra.mxu1 %v6790_v41  ;;  %v4931_v41 = vmul.f32 %v17587_v2, %v16585_v18  ;;  %v5056_v18 = vmax.f32 %v4993_v15, 0.0  ;;  %v4932_v2 = vmul.f32 %v17599_v32, %v16575_v31  ;;  %v6793_v62 = vsel %vm834_vm1, %v14062_v33, %v6765_v16 }
 0x9e0   : > { %13281 = vmatprep.mubr.msk.f32.mxu1 %vm14097_vm0, %v21662_v1  ;;  %v4933_v32 = vmul.f32 %v17611_v38, %v16563_v28  ;;  %v4934_v38 = vmul.f32 %v17623_v53, %v16553_v8  ;;  %v4935_v53 = vmul.f32 %v17635_v52, %v16542_v43  ;;  %v4936_v52 = vmul.f32 %v17647_v61, %v16533_v45 }
 0x9e1   : > { %v17749_v12 = vpop.f32.mrf.mxu0  ;;  %v12899_v51 = vpop.f32.mrf.mxu1  ;;  %13058 = vmatmul.mubr.msk.f32.gmra.mxu0 %vm834_vm1, %v5054_v4  ;;  %v4994_v60 = vsub.f32 %v4931_v41, %v17593_v0  ;;  %v4995_v0 = vsub.f32 %v4932_v2, %v17605_v29  ;;  %v14063_v41 = vld [vmem:[%s14265_s1 + $0x28] sm:$0xff]  ;;  %v14064_v2 = vld [vmem:[%s14265_s1 + $0x30] sm:$0xff]  ;;  %v4937_v61 = vmul.f32 %v17659_v3, %v16522_v58  ;;  %v4938_v3 = vmul.f32 %v17671_v24, %v16513_v35 }
 0x9e2   : > { %13060 = vmatprep.mubr.msk.f32.mxu0 %vm14097_vm0, %v21662_v1  ;;  %v4996_v29 = vsub.f32 %v4933_v32, %v17617_v30  ;;  %v4997_v30 = vsub.f32 %v4934_v38, %v17629_v22  ;;  %v4998_v22 = vsub.f32 %v4935_v53, %v17641_v44  ;;  %v4999_v44 = vsub.f32 %v4936_v52, %v17653_v37 }
 0x9e3   : > { %v12708_v57 = vpop.f32.mrf.mxu0  ;;  %v17757_v34 = vpop.f32.mrf.mxu1  ;;  %13282 = vmatmul.mubr.f32.gmra.mxu1 %v6791_v48  ;;  %v5057_v31 = vmax.f32 %v4994_v60, 0.0  ;;  %v5058_v28 = vmax.f32 %v4995_v0, 0.0  ;;  %v14065_v0 = vld [vmem:[%s14265_s1 + $0x38] sm:$0xff]  ;;  %v5000_v37 = vsub.f32 %v4937_v61, %v17665_v26  ;;  %v5001_v35 = vsub.f32 %v4938_v3, %v17677_v42 }
 0x9e4   : > { %13284 = vmatprep.mubr.msk.f32.mxu1 %vm14097_vm0, %v21662_v1  ;;  %v6767_v48 = vpop.permute.xlu1 %6766  ;;  %v5059_v8 = vmax.f32 %v4996_v29, 0.0  ;;  %v5060_v43 = vmax.f32 %v4997_v30, 0.0  ;;  %v5061_v45 = vmax.f32 %v4998_v22, 0.0  ;;  %v5062_v58 = vmax.f32 %v4999_v44, 0.0 }
 0x9e5   : > { %v17763_v4 = vpop.f32.mrf.mxu0  ;;  %v12902_v27 = vpop.f32.mrf.mxu1  ;;  %13061 = vmatmul.mubr.msk.f32.gmra.mxu0 %vm834_vm1, %v5055_v14  ;;  %v6794_v57 = vsel %vm834_vm1, %v14063_v41, %v6767_v48  ;;  %v5063_v26 = vmax.f32 %v5000_v37, 0.0  ;;  %v4939_v24 = vmul.f32 %v17683_v54, %v16502_v17  ;;  %v4940_v17 = vmul.f32 %v17697_v59, %v16493_v10 }
 0x9e6   : > { %13063 = vmatprep.mubr.msk.f32.mxu0 %vm14097_vm0, %v21662_v1 }
 0x9e7   : > { %v12711_v36 = vpop.f32.mrf.mxu0  ;;  %v17771_v55 = vpop.f32.mrf.mxu1  ;;  %13285 = vmatmul.mubr.f32.gmra.mxu1 %v6792_v9  ;;  %v5002_v42 = vsub.f32 %v4939_v24, %v17689_v63  ;;  %v4941_v63 = vmul.f32 %v17712_v6, %v16483_v25 }
 0x9e8   : > { %13287 = vmatprep.mubr.msk.f32.mxu1 %vm14097_vm0, %v21662_v1  ;;  %v6795_v36 = vsel %vm834_vm1, %v14064_v2, %v6769_v5  ;;  %v6771_v33 = vpop.permute.xlu1 %6770 }
 0x9e9   : > { %v17777_v51 = vpop.f32.mrf.mxu0  ;;  %v12905_v14 = vpop.f32.mrf.mxu1  ;;  %13064 = vmatmul.mubr.msk.f32.gmra.mxu0 %vm834_vm1, %v5056_v18  ;;  %v6796_v32 = vsel %vm834_vm1, %v14065_v0, %v6771_v33  ;;  %v5065_v61 = vmax.f32 %v5002_v42, 0.0 }
 0x9ea   : > { %13066 = vmatprep.mubr.msk.f32.mxu0 %vm14097_vm0, %v21662_v1 }
 0x9eb   : > { %v12714_v15 = vpop.f32.mrf.mxu0  ;;  %v17785_v16 = vpop.f32.mrf.mxu1  ;;  %13288 = vmatmul.mubr.f32.gmra.mxu1 %v6793_v62 }
 0x9ec   : > { %13290 = vmatprep.mubr.msk.f32.mxu1 %vm14097_vm0, %v21662_v1  ;;  %v6773_v15 = vpop.permute.xlu0 %6772  ;;  %v6775_v38 = vpop.permute.xlu1 %6774 }
 0x9ed   : > { %v17791_v9 = vpop.f32.mrf.mxu0  ;;  %v12908_v27 = vpop.f32.mrf.mxu1  ;;  %13067 = vmatmul.mubr.msk.f32.gmra.mxu0 %vm834_vm1, %v5057_v31 }
 0x9ee   : > { %13069 = vmatprep.mubr.msk.f32.mxu0 %vm14097_vm0, %v21662_v1 }
 0x9ef   : > { %v12717_v18 = vpop.f32.mrf.mxu0  ;;  %v17799_v60 = vpop.f32.mrf.mxu1  ;;  %13291 = vmatmul.mubr.f32.gmra.mxu1 %v6794_v57 }
 0x9f0   : > { %13293 = vmatprep.mubr.msk.f32.mxu1 %vm14097_vm0, %v21662_v1  ;;  %v6777_v30 = vpop.permute.xlu0 %6776 }
 0x9f1   : > { %v17805_v62 = vpop.f32.mrf.mxu0  ;;  %v12911_v48 = vpop.f32.mrf.mxu1  ;;  %13070 = vmatmul.mubr.msk.f32.gmra.mxu0 %vm834_vm1, %v5058_v28  ;;  %v14066_v28 = vld [vmem:[%s14265_s1 + $0x40] sm:$0xff] }
 0x9f2   : > { %13072 = vmatprep.mubr.msk.f32.mxu0 %vm14097_vm0, %v21662_v1  ;;  %v6797_v29 = vsel %vm834_vm1, %v14066_v28, %v6773_v15  ;;  %v14067_v48 = vld [vmem:[%s14265_s1 + $0x48] sm:$0xff]  ;;  %v14068_v15 = vld [vmem:[%s14265_s1 + $0x50] sm:$0xff] }
 0x9f3   : > { %v12720_v14 = vpop.f32.mrf.mxu0  ;;  %v17813_v31 = vpop.f32.mrf.mxu1  ;;  %13294 = vmatmul.mubr.f32.gmra.mxu1 %v6795_v36 }
 0x9f4   : > { %13296 = vmatprep.mubr.msk.f32.mxu1 %vm14097_vm0, %v21662_v1 }
 0x9f5   : > { %v17819_v41 = vpop.f32.mrf.mxu0  ;;  %v12914_v57 = vpop.f32.mrf.mxu1  ;;  %13073 = vmatmul.mubr.msk.f32.gmra.mxu0 %vm834_vm1, %v5059_v8  ;;  %v6798_v8 = vsel %vm834_vm1, %v14067_v48, %v6775_v38  ;;  %v5064_v38 = vmax.f32 %v5001_v35, 0.0 }
 0x9f6   : > { %13075 = vmatprep.mubr.msk.f32.mxu0 %vm14097_vm0, %v21662_v1  ;;  %v6799_v57 = vsel %vm834_vm1, %v14068_v15, %v6777_v30 }
 0x9f7   : > { %v12723_v5 = vpop.f32.mrf.mxu0  ;;  %v17827_v27 = vpop.f32.mrf.mxu1  ;;  %13297 = vmatmul.mubr.f32.gmra.mxu1 %v6796_v32 }
 0x9f8   : > { %13299 = vmatprep.mubr.msk.f32.mxu1 %vm14097_vm0, %v21662_v1 }
 0x9f9   : > { %v17833_v18 = vpop.f32.mrf.mxu0  ;;  %v12917_v2 = vpop.f32.mrf.mxu1  ;;  %13076 = vmatmul.mubr.msk.f32.gmra.mxu0 %vm834_vm1, %v5060_v43 }
 0x9fa   : > { %13078 = vmatprep.mubr.msk.f32.mxu0 %vm14097_vm0, %v21662_v1 }
 0x9fb   : > { %v12726_v36 = vpop.f32.mrf.mxu0  ;;  %v17841_v33 = vpop.f32.mrf.mxu1  ;;  %13300 = vmatmul.mubr.f32.gmra.mxu1 %v6797_v29 }
 0x9fc   : > { %13302 = vmatprep.mubr.msk.f32.mxu1 %vm14097_vm0, %v21662_v1  ;;  %v5003_v36 = vsub.f32 %v4940_v17, %v17703_v39  ;;  %v4942_v39 = vmul.f32 %v17729_v21, %v16476_v50 }
 0x9fd   : > { %v17847_v53 = vpop.f32.mrf.mxu0  ;;  %v12920_v14 = vpop.f32.mrf.mxu1  ;;  %13079 = vmatmul.mubr.msk.f32.gmra.mxu0 %vm834_vm1, %v5061_v45 }
 0x9fe   : > { %13081 = vmatprep.mubr.msk.f32.mxu0 %vm14097_vm0, %v21662_v1  ;;  %v5066_v30 = vmax.f32 %v5003_v36, 0.0  ;;  %v5004_v14 = vsub.f32 %v4941_v63, %v17720_v11  ;;  %v4943_v11 = vmul.f32 %v17743_v47, %v16624_v56 }
 0x9ff   : > { %v12729_v0 = vpop.f32.mrf.mxu0  ;;  %v17855_v32 = vpop.f32.mrf.mxu1  ;;  %13303 = vmatmul.mubr.f32.gmra.mxu1 %v6798_v8 }
 0xa00   : > { %13305 = vmatprep.mubr.msk.f32.mxu1 %vm14097_vm0, %v21662_v1  ;;  %v5067_v3 = vmax.f32 %v5004_v14, 0.0  ;;  %v5005_v0 = vsub.f32 %v4942_v39, %v17735_v7  ;;  %v4944_v7 = vmul.f32 %v17757_v34, %v16614_v46 }
 0xa01   : > { %v17861_v43 = vpop.f32.mrf.mxu0  ;;  %v12923_v22 = vpop.f32.mrf.mxu1  ;;  %13082 = vmatmul.mubr.msk.f32.gmra.mxu0 %vm834_vm1, %v5062_v58 }
 0xa02   : > { %13084 = vmatprep.mubr.msk.f32.mxu0 %vm14097_vm0, %v21662_v1  ;;  %v5068_v22 = vmax.f32 %v5005_v0, 0.0 }
 0xa03   : > { %v12732_v52 = vpop.f32.mrf.mxu0  ;;  %v17869_v5 = vpop.f32.mrf.mxu1  ;;  %13306 = vmatmul.mubr.f32.gmra.mxu1 %v6799_v57 }
 0xa04   : > { %13340 = vmatprep.mubr.msk.f32.mxu1 %vm14097_vm0, %v21662_v1 }
 0xa05   : > { %v17873_v28 = vpop.f32.mrf.mxu0  ;;  %v12926_v29 = vpop.f32.mrf.mxu1  ;;  %13085 = vmatmul.mubr.msk.f32.gmra.mxu0 %vm834_vm1, %v5063_v26  ;;  %v5006_v26 = vsub.f32 %v4943_v11, %v17749_v12  ;;  %v4945_v12 = vmul.f32 %v17771_v55, %v16602_v13 }
 0xa06   : > { %13087 = vmatprep.mubr.msk.f32.mxu0 %vm14097_vm0, %v21662_v1  ;;  %v5007_v29 = vsub.f32 %v4944_v7, %v17763_v4  ;;  %v4946_v4 = vmul.f32 %v17785_v16, %v16592_v20 }
 0xa07   : > { %v12735_v54 = vpop.f32.mrf.mxu0  ;;  %v17881_v2 = vpop.f32.mrf.mxu1  ;;  %v5069_v52 = vmax.f32 %v5006_v26, 0.0 }
 0xa08   : > { %v5070_v17 = vmax.f32 %v5007_v29, 0.0  ;;  %v5008_v54 = vsub.f32 %v4945_v12, %v17777_v51  ;;  %v5009_v63 = vsub.f32 %v4946_v4, %v17791_v9  ;;  %v4947_v51 = vmul.f32 %v17799_v60, %v16580_v49 }
 0xa09   : > { %v17883_v45 = vpop.f32.mrf.mxu0  ;;  %v12929_v44 = vpop.f32.mrf.mxu1  ;;  %13088 = vmatmul.mubr.msk.f32.gmra.mxu0 %vm834_vm1, %v5064_v38  ;;  %v4948_v9 = vmul.f32 %v17813_v31, %v16570_v19 }
 0xa0a   : > { %13090 = vmatprep.mubr.msk.f32.mxu0 %vm14097_vm0, %v21662_v1  ;;  %v5071_v36 = vmax.f32 %v5008_v54, 0.0  ;;  %v5010_v14 = vsub.f32 %v4947_v51, %v17805_v62  ;;  %v4949_v62 = vmul.f32 %v17827_v27, %v16558_v40 }
 0xa0b   : > { %v12738_v48 = vpop.f32.mrf.mxu0  ;;  %v17891_v8 = vpop.f32.mrf.mxu1 }
 0xa0d   : > { %v17893_v59 = vpop.f32.mrf.mxu0  ;;  %v12932_v10 = vpop.f32.mrf.mxu1  ;;  %13091 = vmatmul.mubr.msk.f32.gmra.mxu0 %vm834_vm1, %v5065_v61 }
 0xa0e   : > { %13093 = vmatprep.mubr.msk.f32.mxu0 %vm14097_vm0, %v21662_v1 }
 0xa0f   : > { %v12741_v58 = vpop.f32.mrf.mxu0  ;;  %v17901_v37 = vpop.f32.mrf.mxu1 }
 0xa11   : > { %v17903_v25 = vpop.f32.mrf.mxu0  ;;  %v12935_v6 = vpop.f32.mrf.mxu1  ;;  %13094 = vmatmul.mubr.msk.f32.gmra.mxu0 %vm834_vm1, %v5066_v30  ;;  %v5072_v30 = vmax.f32 %v5009_v63, 0.0 }
 0xa12   : > { %13096 = vmatprep.mubr.msk.f32.mxu0 %vm14097_vm0, %v21662_v1  ;;  %v5073_v6 = vmax.f32 %v5010_v14, 0.0 }
 0xa13   : > { %v12744_v15 = vpop.f32.mrf.mxu0  ;;  %v17911_v57 = vpop.f32.mrf.mxu1 }
 0xa15   : > { %v17913_v50 = vpop.f32.mrf.mxu0  ;;  %v12938_v21 = vpop.f32.mrf.mxu1  ;;  %13097 = vmatmul.mubr.msk.f32.gmra.mxu0 %vm834_vm1, %v5067_v3  ;;  %v5011_v3 = vsub.f32 %v4948_v9, %v17819_v41  ;;  %v4950_v41 = vmul.f32 %v17841_v33, %v16548_v23 }
 0xa16   : > { %13099 = vmatprep.mubr.msk.f32.mxu0 %vm14097_vm0, %v21662_v1  ;;  %v5012_v21 = vsub.f32 %v4949_v62, %v17833_v18  ;;  %v6811_v62 = vld [vmem:[%s21868_s0 + $0x58] sm:$0xff] }
 0xa17   : > { %v12747_v35 = vpop.f32.mrf.mxu0  ;;  %v17921_v24 = vpop.f32.mrf.mxu1  ;;  %v5074_v15 = vmax.f32 %v5011_v3, 0.0 }
 0xa18   : > { %v5075_v7 = vmax.f32 %v5012_v21, 0.0  ;;  %v5013_v35 = vsub.f32 %v4950_v41, %v17847_v53  ;;  %v21871_v21 = vld [vmem:[#allocation3_spill] sm:$0xff] }
 0xa19   : > { %v17923_v56 = vpop.f32.mrf.mxu0  ;;  %v12941_v47 = vpop.f32.mrf.mxu1  ;;  %13100 = vmatmul.mubr.msk.f32.gmra.mxu0 %vm834_vm1, %v5068_v22  ;;  %v4955_v41 = vmul.f32 %v17901_v37, %v21871_v21  ;;  %v6801_v21 = vld [vmem:[%s21868_s0 + $0x8] sm:$0xff] }
 0xa1a   : > { %13102 = vmatprep.mubr.msk.f32.mxu0 %vm14097_vm0, %v21662_v1  ;;  %v21866_v47 = vld [vmem:[#allocation20_spill] sm:$0xff]  ;;  %v5076_v12 = vmax.f32 %v5013_v35, 0.0 }
 0xa1b   : > { %v12750_v38 = vpop.f32.mrf.mxu0  ;;  %v17931_v42 = vpop.f32.mrf.mxu1  ;;  %v4951_v18 = vmul.f32 %v17855_v32, %v21866_v47  ;;  %v6815_v32 = vld [vmem:[%s21868_s0 + $0x78] sm:$0xff] }
 0xa1c   : > { %13309 = vmatpush3.msra.mxu1 %v6815_v32 }
 0xa1d   : > { %v17933_v46 = vpop.f32.mrf.mxu0  ;;  %v12944_v34 = vpop.f32.mrf.mxu1  ;;  %13103 = vmatmul.mubr.msk.f32.gmra.mxu0 %vm834_vm1, %v5069_v52  ;;  %v5014_v38 = vsub.f32 %v4951_v18, %v17861_v43  ;;  %13310 = vmatprep.subr.mxu1 %v21662_v1  ;;  %v6814_v43 = vld [vmem:[%s21868_s0 + $0x70] sm:$0xff]  ;;  %v5018_v18 = vsub.f32 %v4955_v41, %v17903_v25 }
 0xa1e   : > { %13105 = vmatprep.mubr.msk.f32.mxu0 %vm14097_vm0, %v21662_v1  ;;  %v21867_v34 = vld [vmem:[#allocation21_spill] sm:$0xff]  ;;  %13311 = vmatpush3.msra.mxu1 %v6814_v43  ;;  %v6806_v25 = vld [vmem:[%s21868_s0 + $0x30] sm:$0xff] }
 0xa1f   : > { %v12753_v44 = vpop.f32.mrf.mxu0  ;;  %v17941_v61 = vpop.f32.mrf.mxu1  ;;  %v4952_v53 = vmul.f32 %v17869_v5, %v21867_v34  ;;  %v5077_v5 = vmax.f32 %v5014_v38, 0.0  ;;  %13312 = vmatprep.subr.mxu1 %v21662_v1  ;;  %v6807_v34 = vld [vmem:[%s21868_s0 + $0x38] sm:$0xff] }
 0xa21   : > { %v17943_v13 = vpop.f32.mrf.mxu0  ;;  %v12947_v55 = vpop.f32.mrf.mxu1  ;;  %13106 = vmatmul.mubr.msk.f32.gmra.mxu0 %vm834_vm1, %v5070_v17 }
 0xa22   : > { %13108 = vmatprep.mubr.msk.f32.mxu0 %vm14097_vm0, %v21662_v1  ;;  %v5015_v55 = vsub.f32 %v4952_v53, %v17873_v28  ;;  %v6812_v28 = vld [vmem:[%s21868_s0 + $0x60] sm:$0xff] }
 0xa23   : > { %v12756_v48 = vpop.f32.mrf.mxu0  ;;  %v17951_v10 = vpop.f32.mrf.mxu1 }
 0xa25   : > { %v17953_v20 = vpop.f32.mrf.mxu0  ;;  %v12950_v16 = vpop.f32.mrf.mxu1  ;;  %13109 = vmatmul.mubr.msk.f32.gmra.mxu0 %vm834_vm1, %v5071_v36  ;;  %v21869_v36 = vld [vmem:[#allocation22_spill] sm:$0xff] }
 0xa26   : > { %13111 = vmatprep.mubr.msk.f32.mxu0 %vm14097_vm0, %v21662_v1  ;;  %v4953_v63 = vmul.f32 %v17881_v2, %v21869_v36  ;;  %v6813_v16 = vld [vmem:[%s21868_s0 + $0x68] sm:$0xff]  ;;  %v5078_v2 = vmax.f32 %v5015_v55, 0.0 }
 0xa27   : > { %v12759_v39 = vpop.f32.mrf.mxu0  ;;  %v17961_v58 = vpop.f32.mrf.mxu1  ;;  %13313 = vmatpush3.msra.mxu1 %v6813_v16  ;;  %v6805_v36 = vld [vmem:[%s21868_s0 + $0x28] sm:$0xff] }
 0xa28   : > { %13314 = vmatprep.subr.mxu1 %v21662_v1  ;;  %v5016_v9 = vsub.f32 %v4953_v63, %v17883_v45  ;;  %v21870_v39 = vld [vmem:[#allocation2_spill] sm:$0xff]  ;;  %v6810_v45 = vld [vmem:[%s21868_s0 + $0x50] sm:$0xff] }
 0xa29   : > { %v17963_v49 = vpop.f32.mrf.mxu0  ;;  %v12953_v60 = vpop.f32.mrf.mxu1  ;;  %13112 = vmatmul.mubr.msk.f32.gmra.mxu0 %vm834_vm1, %v5072_v30  ;;  %13315 = vmatpush3.msra.mxu1 %v6812_v28 }
 0xa2a   : > { %13114 = vmatprep.mubr.msk.f32.mxu0 %vm14097_vm0, %v21662_v1  ;;  %v4954_v60 = vmul.f32 %v17891_v8, %v21870_v39  ;;  %13316 = vmatprep.subr.mxu1 %v21662_v1  ;;  %v5079_v8 = vmax.f32 %v5016_v9, 0.0  ;;  %v6803_v39 = vld [vmem:[%s21868_s0 + $0x18] sm:$0xff] }
 0xa2b   : > { %v12762_v0 = vpop.f32.mrf.mxu0  ;;  %v17971_v11 = vpop.f32.mrf.mxu1  ;;  %13317 = vmatpush3.msra.mxu1 %v6811_v62 }
 0xa2c   : > { %13318 = vmatprep.subr.mxu1 %v21662_v1 }
 0xa2d   : > { %v17973_v19 = vpop.f32.mrf.mxu0  ;;  %v12956_v31 = vpop.f32.mrf.mxu1  ;;  %13115 = vmatmul.mubr.msk.f32.gmra.mxu0 %vm834_vm1, %v5073_v6  ;;  %13319 = vmatpush3.msra.mxu1 %v6810_v45 }
 0xa2e   : > { %13117 = vmatprep.mubr.msk.f32.mxu0 %vm14097_vm0, %v21662_v1  ;;  %13320 = vmatprep.subr.mxu1 %v21662_v1 }
 0xa2f   : > { %v12765_v22 = vpop.f32.mrf.mxu0  ;;  %v17981_v26 = vpop.f32.mrf.mxu1 }
 0xa31   : > { %v17983_v40 = vpop.f32.mrf.mxu0  ;;  %v12959_v27 = vpop.f32.mrf.mxu1  ;;  %13118 = vmatmul.mubr.msk.f32.gmra.mxu0 %vm834_vm1, %v5074_v15  ;;  %v5017_v15 = vsub.f32 %v4954_v60, %v17893_v59  ;;  %v6808_v59 = vld [vmem:[%s21868_s0 + $0x40] sm:$0xff] }
 0xa32   : > { %13120 = vmatprep.mubr.msk.f32.mxu0 %vm14097_vm0, %v21662_v1 }
 0xa33   : > { %v12768_v52 = vpop.f32.mrf.mxu0  ;;  %v17991_v29 = vpop.f32.mrf.mxu1  ;;  %v5080_v37 = vmax.f32 %v5017_v15, 0.0 }
 0xa34   : > { %v21872_v52 = vld [vmem:[#allocation4_spill] sm:$0xff] }
 0xa35   : > { %v17993_v23 = vpop.f32.mrf.mxu0  ;;  %v12962_v33 = vpop.f32.mrf.mxu1  ;;  %13121 = vmatmul.mubr.msk.f32.gmra.mxu0 %vm834_vm1, %v5075_v7  ;;  %v6809_v7 = vld [vmem:[%s21868_s0 + $0x48] sm:$0xff] }
 0xa36   : > { %13123 = vmatprep.mubr.msk.f32.mxu0 %vm14097_vm0, %v21662_v1  ;;  %13321 = vmatpush3.msra.mxu1 %v6809_v7  ;;  %v4956_v33 = vmul.f32 %v17911_v57, %v21872_v52  ;;  %v5081_v57 = vmax.f32 %v5018_v18, 0.0 }
 0xa37   : > { %v12771_v17 = vpop.f32.mrf.mxu0  ;;  %v18001_v54 = vpop.f32.mrf.mxu1  ;;  %13322 = vmatprep.subr.mxu1 %v21662_v1 }
 0xa38   : > { %13323 = vmatpush3.msra.mxu1 %v6808_v59  ;;  %v5019_v32 = vsub.f32 %v4956_v33, %v17913_v50  ;;  %v6804_v50 = vld [vmem:[%s21868_s0 + $0x20] sm:$0xff] }
 0xa39   : > { %v18006_v4 = vpop.f32.mrf.mxu0  ;;  %v12965_v44 = vpop.f32.mrf.mxu1  ;;  %13124 = vmatmul.mubr.msk.f32.gmra.mxu0 %vm834_vm1, %v5076_v12  ;;  %13324 = vmatprep.subr.mxu1 %v21662_v1 }
 0xa3a   : > { %13126 = vmatprep.mubr.msk.f32.mxu0 %vm14097_vm0, %v21662_v1  ;;  %13325 = vmatpush3.msra.mxu1 %v6807_v34  ;;  %v21873_v44 = vld [vmem:[#allocation5_spill] sm:$0xff] }
 0xa3b   : > { %v12774_v51 = vpop.f32.mrf.mxu0  ;;  %v18018_v48 = vpop.f32.mrf.mxu1  ;;  %13326 = vmatprep.subr.mxu1 %v21662_v1  ;;  %v4957_v43 = vmul.f32 %v17921_v24, %v21873_v44  ;;  %v5082_v24 = vmax.f32 %v5019_v32, 0.0  ;;  %v21877_v34 = vld [vmem:[#allocation37_spill] sm:$0xff] }
 0xa3c   : > { %13327 = vmatpush3.msra.mxu1 %v6806_v25 }
 0xa3d   : > { %v18024_v30 = vpop.f32.mrf.mxu0  ;;  %v12968_v14 = vpop.f32.mrf.mxu1  ;;  %13127 = vmatmul.mubr.msk.f32.gmra.mxu0 %vm834_vm1, %v5077_v5  ;;  %13328 = vmatprep.subr.mxu1 %v21662_v1  ;;  %v5020_v16 = vsub.f32 %v4957_v43, %v17923_v56  ;;  %v6802_v56 = vld [vmem:[%s21868_s0 + $0x10] sm:$0xff] }
 0xa3e   : > { %13129 = vmatprep.mubr.msk.f32.mxu0 %vm14097_vm0, %v21662_v1  ;;  %13329 = vmatpush3.msra.mxu1 %v6805_v36  ;;  %v21874_v14 = vld [vmem:[#allocation6_spill] sm:$0xff] }
 0xa3f   : > { %v12777_v6 = vpop.f32.mrf.mxu0  ;;  %v18036_v3 = vpop.f32.mrf.mxu1  ;;  %13330 = vmatprep.subr.mxu1 %v21662_v1  ;;  %v4958_v28 = vmul.f32 %v17931_v42, %v21874_v14  ;;  %v5083_v42 = vmax.f32 %v5020_v16, 0.0  ;;  %v21879_v14 = vld [vmem:[#allocation8_spill] sm:$0xff] }
 0xa40   : > { %13331 = vmatpush3.msra.mxu1 %v6804_v50 }
 0xa41   : > { %v18042_v0 = vpop.f32.mrf.mxu0  ;;  %v12971_v31 = vpop.f32.mrf.mxu1  ;;  %13130 = vmatmul.mubr.msk.f32.gmra.mxu0 %vm834_vm1, %v5078_v2  ;;  %13332 = vmatprep.subr.mxu1 %v21662_v1  ;;  %v5021_v62 = vsub.f32 %v4958_v28, %v17933_v46  ;;  %v6800_v46 = vld [vmem:[%s21868_s0] sm:$0xff] }
 0xa42   : > { %13132 = vmatprep.mubr.msk.f32.mxu0 %vm14097_vm0, %v21662_v1  ;;  %13333 = vmatpush3.msra.mxu1 %v6803_v39  ;;  %v21875_v31 = vld [vmem:[#allocation35_spill] sm:$0xff] }
 0xa43   : > { %v12780_v22 = vpop.f32.mrf.mxu0  ;;  %v18054_v27 = vpop.f32.mrf.mxu1  ;;  %13334 = vmatprep.subr.mxu1 %v21662_v1  ;;  %v4959_v45 = vmul.f32 %v17941_v61, %v21875_v31  ;;  %v5084_v61 = vmax.f32 %v5021_v62, 0.0 }
 0xa44   : > { %13335 = vmatpush3.msra.mxu1 %v6802_v56 }
 0xa45   : > { %v18060_v35 = vpop.f32.mrf.mxu0  ;;  %v12974_v47 = vpop.f32.mrf.mxu1  ;;  %13133 = vmatmul.mubr.msk.f32.gmra.mxu0 %vm834_vm1, %v5079_v8  ;;  %13336 = vmatprep.subr.mxu1 %v21662_v1  ;;  %v5022_v7 = vsub.f32 %v4959_v45, %v17943_v13 }
 0xa46   : > { %13135 = vmatprep.mubr.msk.f32.mxu0 %vm14097_vm0, %v21662_v1  ;;  %13337 = vmatpush3.msra.mxu1 %v6801_v21  ;;  %v21876_v47 = vld [vmem:[#allocation36_spill] sm:$0xff] }
 0xa47   : > { %v12783_v12 = vpop.f32.mrf.mxu0  ;;  %v18072_v38 = vpop.f32.mrf.mxu1  ;;  %13338 = vmatprep.subr.mxu1 %v21662_v1  ;;  %v4960_v59 = vmul.f32 %v17951_v10, %v21876_v47  ;;  %v4961_v10 = vmul.f32 %v17961_v58, %v21877_v34 }
 0xa48   : > { %13339 = vmatpush3.msra.mxu1 %v6800_v46  ;;  %v5085_v12 = vmax.f32 %v5022_v7, 0.0 }
 0xa49   : > { %v18078_v53 = vpop.f32.mrf.mxu0  ;;  %v12977_v17 = vpop.f32.mrf.mxu1  ;;  %13136 = vmatmul.mubr.msk.f32.gmra.mxu0 %vm834_vm1, %v5080_v37  ;;  %13343 = vmatprep.subr.mxu1 %v21662_v1  ;;  %v5023_v13 = vsub.f32 %v4960_v59, %v17953_v20  ;;  %v5024_v43 = vsub.f32 %v4961_v10, %v17963_v49  ;;  %v4963_v49 = vmul.f32 %v17981_v26, %v21879_v14 }
 0xa4a   : > { %13138 = vmatprep.mubr.msk.f32.mxu0 %vm14097_vm0, %v21662_v1 }
 0xa4b   : > { %v12786_v5 = vpop.f32.mrf.mxu0  ;;  %v18090_v55 = vpop.f32.mrf.mxu1  ;;  %v5086_v44 = vmax.f32 %v5023_v13, 0.0  ;;  %v5026_v56 = vsub.f32 %v4963_v49, %v17983_v40 }
 0xa4c   : > { %v21878_v5 = vld [vmem:[#allocation7_spill] sm:$0xff] }
 0xa4d   : > { %v18096_v63 = vpop.f32.mrf.mxu0  ;;  %v12980_v51 = vpop.f32.mrf.mxu1  ;;  %13139 = vmatmul.mubr.msk.f32.gmra.mxu0 %vm834_vm1, %v5081_v57  ;;  %v4962_v20 = vmul.f32 %v17971_v11, %v21878_v5 }
 0xa4e   : > { %13141 = vmatprep.mubr.msk.f32.mxu0 %vm14097_vm0, %v21662_v1 }
 0xa4f   : > { %v12789_v2 = vpop.f32.mrf.mxu0  ;;  %v18108_v9 = vpop.f32.mrf.mxu1  ;;  %v5025_v16 = vsub.f32 %v4962_v20, %v17973_v19 }
 0xa51   : > { %v18114_v60 = vpop.f32.mrf.mxu0  ;;  %v12983_v6 = vpop.f32.mrf.mxu1  ;;  %13142 = vmatmul.mubr.msk.f32.gmra.mxu0 %vm834_vm1, %v5082_v24  ;;  %v5087_v24 = vmax.f32 %v5024_v43, 0.0 }
 0xa52   : > { %13144 = vmatprep.mubr.msk.f32.mxu0 %vm14097_vm0, %v21662_v1  ;;  %v5088_v6 = vmax.f32 %v5025_v16, 0.0 }
 0xa53   : > { %v12792_v8 = vpop.f32.mrf.mxu0  ;;  %v18126_v15 = vpop.f32.mrf.mxu1 }
 0xa54   : > { %v5089_v8 = vmax.f32 %v5026_v56, 0.0 }
 0xa55   : > { %v18132_v41 = vpop.f32.mrf.mxu0  ;;  %v12986_v22 = vpop.f32.mrf.mxu1  ;;  %13145 = vmatmul.mubr.msk.f32.gmra.mxu0 %vm834_vm1, %v5083_v42  ;;  %v21880_v42 = vld [vmem:[#allocation9_spill] sm:$0xff] }
 0xa56   : > { %13147 = vmatprep.mubr.msk.f32.mxu0 %vm14097_vm0, %v21662_v1  ;;  %v4964_v19 = vmul.f32 %v17991_v29, %v21880_v42  ;;  %v21881_v22 = vld [vmem:[#allocation10_spill] sm:$0xff] }
 0xa57   : > { %v12795_v37 = vpop.f32.mrf.mxu0  ;;  %v18144_v18 = vpop.f32.mrf.mxu1  ;;  %v4965_v40 = vmul.f32 %v18001_v54, %v21881_v22 }
 0xa58   : > { %v5027_v21 = vsub.f32 %v4964_v19, %v17993_v23  ;;  %v21882_v37 = vld [vmem:[#allocation11_spill] sm:$0xff] }
 0xa59   : > { %v18147_v52 = vpop.f32.mrf.mxu0  ;;  %v12989_v33 = vpop.f32.mrf.mxu1  ;;  %13148 = vmatmul.mubr.msk.f32.gmra.mxu0 %vm834_vm1, %v5084_v61  ;;  %v5028_v59 = vsub.f32 %v4965_v40, %v18006_v4  ;;  %v4966_v23 = vmul.f32 %v18018_v48, %v21882_v37 }
 0xa5a   : > { %13150 = vmatprep.mubr.msk.f32.mxu0 %vm14097_vm0, %v21662_v1  ;;  %v5090_v47 = vmax.f32 %v5027_v21, 0.0 }
 0xa5b   : > { %v12798_v17 = vpop.f32.mrf.mxu0  ;;  %v18155_v25 = vpop.f32.mrf.mxu1  ;;  %v5091_v34 = vmax.f32 %v5028_v59, 0.0  ;;  %v5029_v10 = vsub.f32 %v4966_v23, %v18024_v30 }
 0xa5c   : > { %v21883_v17 = vld [vmem:[#allocation12_spill] sm:$0xff] }
 0xa5d   : > { %v18157_v57 = vpop.f32.mrf.mxu0  ;;  %v12992_v32 = vpop.f32.mrf.mxu1  ;;  %13151 = vmatmul.mubr.msk.f32.gmra.mxu0 %vm834_vm1, %v5085_v12  ;;  %v4967_v4 = vmul.f32 %v18036_v3, %v21883_v17  ;;  %v5092_v5 = vmax.f32 %v5029_v10, 0.0 }
 0xa5e   : > { %13153 = vmatprep.mubr.msk.f32.mxu0 %vm14097_vm0, %v21662_v1 }
 0xa5f   : > { %v12801_v36 = vpop.f32.mrf.mxu0  ;;  %v18165_v51 = vpop.f32.mrf.mxu1  ;;  %v5030_v20 = vsub.f32 %v4967_v4, %v18042_v0  ;;  %v21890_v4 = vld [vmem:[#allocation18_spill] sm:$0xff] }
 0xa60   : > { %v21884_v36 = vld [vmem:[#allocation13_spill] sm:$0xff] }
 0xa61   : > { %v18167_v58 = vpop.f32.mrf.mxu0  ;;  %v12995_v50 = vpop.f32.mrf.mxu1  ;;  %13154 = vmatmul.mubr.msk.f32.gmra.mxu0 %vm834_vm1, %v5086_v44  ;;  %v4968_v30 = vmul.f32 %v18054_v27, %v21884_v36  ;;  %v5093_v14 = vmax.f32 %v5030_v20, 0.0  ;;  %v5711_v20 = vld [vmem:[%s18272_s5 + $0x58] sm:$0xff] }
 0xa62   : > { %13156 = vmatprep.mubr.msk.f32.mxu0 %vm14097_vm0, %v21662_v1 }
 0xa63   : > { %v12804_v28 = vpop.f32.mrf.mxu0  ;;  %v18175_v2 = vpop.f32.mrf.mxu1  ;;  %v5031_v49 = vsub.f32 %v4968_v30, %v18060_v35  ;;  %v5712_v30 = vld [vmem:[%s18272_s5 + $0x60] sm:$0xff] }
 0xa64   : > { %v21885_v28 = vld [vmem:[#allocation14_spill] sm:$0xff] }
 0xa65   : > { %v18177_v11 = vpop.f32.mrf.mxu0  ;;  %v12998_v39 = vpop.f32.mrf.mxu1  ;;  %13157 = vmatmul.mubr.msk.f32.gmra.mxu0 %vm834_vm1, %v5087_v24  ;;  %v4969_v0 = vmul.f32 %v18072_v38, %v21885_v28  ;;  %v5094_v42 = vmax.f32 %v5031_v49, 0.0 }
 0xa66   : > { %13159 = vmatprep.mubr.msk.f32.mxu0 %vm14097_vm0, %v21662_v1 }
 0xa67   : > { %v12807_v62 = vpop.f32.mrf.mxu0  ;;  %v18185_v31 = vpop.f32.mrf.mxu1  ;;  %v5032_v19 = vsub.f32 %v4969_v0, %v18078_v53 }
 0xa68   : > { %v21886_v62 = vld [vmem:[#allocation15_spill] sm:$0xff] }
 0xa69   : > { %v18187_v26 = vpop.f32.mrf.mxu0  ;;  %v13001_v45 = vpop.f32.mrf.mxu1  ;;  %13160 = vmatmul.mubr.msk.f32.gmra.mxu0 %vm834_vm1, %v5088_v6  ;;  %v4970_v35 = vmul.f32 %v18090_v55, %v21886_v62  ;;  %v5095_v22 = vmax.f32 %v5032_v19, 0.0 }
 0xa6a   : > { %13162 = vmatprep.mubr.msk.f32.mxu0 %vm14097_vm0, %v21662_v1 }
 0xa6b   : > { %v12810_v46 = vpop.f32.mrf.mxu0  ;;  %v18195_v61 = vpop.f32.mrf.mxu1  ;;  %v5033_v40 = vsub.f32 %v4970_v35, %v18096_v63  ;;  %v5713_v35 = vld [vmem:[%s18272_s5 + $0x68] sm:$0xff] }
 0xa6c   : > { %v21887_v46 = vld [vmem:[#allocation16_spill] sm:$0xff] }
 0xa6d   : > { %v18197_v29 = vpop.f32.mrf.mxu0  ;;  %v13004_v7 = vpop.f32.mrf.mxu1  ;;  %13163 = vmatmul.mubr.msk.f32.gmra.mxu0 %vm834_vm1, %v5089_v8  ;;  %v4971_v53 = vmul.f32 %v18108_v9, %v21887_v46  ;;  %v5096_v37 = vmax.f32 %v5033_v40, 0.0 }
 0xa6e   : > { %13165 = vmatprep.mubr.msk.f32.mxu0 %vm14097_vm0, %v21662_v1 }
 0xa6f   : > { %v12813_v33 = vpop.f32.mrf.mxu0  ;;  %v18205_v12 = vpop.f32.mrf.mxu1  ;;  %v5034_v23 = vsub.f32 %v4971_v53, %v18114_v60  ;;  %v5710_v60 = vld [vmem:[%s18272_s5 + $0x50] sm:$0xff] }
 0xa70   : > { %v21888_v33 = vld [vmem:[#allocation17_spill] sm:$0xff]  ;;  %v5773_v36 = vmax.f32 %v5710_v60, 0.0 }
 0xa71   : > { %v18207_v54 = vpop.f32.mrf.mxu0  ;;  %v13007_v13 = vpop.f32.mrf.mxu1  ;;  %13166 = vmatmul.mubr.msk.f32.gmra.mxu0 %vm834_vm1, %v5090_v47  ;;  %v4972_v63 = vmul.f32 %v18126_v15, %v21888_v33  ;;  %v5097_v15 = vmax.f32 %v5034_v23, 0.0 }
 0xa72   : > { %13168 = vmatprep.mubr.msk.f32.mxu0 %vm14097_vm0, %v21662_v1 }
 0xa73   : > { %v12816_v32 = vpop.f32.mrf.mxu0  ;;  %v18215_v44 = vpop.f32.mrf.mxu1  ;;  %v5035_v17 = vsub.f32 %v4972_v63, %v18132_v41  ;;  %v21893_v63 = vld [vmem:[#allocation102_spill] sm:$0xff] }
 0xa74   : > { %v4973_v32 = vmul.f32 %v18144_v18, %v21890_v4  ;;  %v21891_v18 = vld [vmem:[#allocation19_spill] sm:$0xff] }
 0xa75   : > { %v18217_v48 = vpop.f32.mrf.mxu0  ;;  %v13010_v43 = vpop.f32.mrf.mxu1  ;;  %13169 = vmatmul.mubr.msk.f32.gmra.mxu0 %vm834_vm1, %v5091_v34  ;;  %v5098_v41 = vmax.f32 %v5035_v17, 0.0  ;;  %v4974_v28 = vmul.f32 %v18155_v25, %v21891_v18 }
 0xa76   : > { %13171 = vmatprep.mubr.msk.f32.mxu0 %vm14097_vm0, %v21662_v1  ;;  %v5036_v49 = vsub.f32 %v4973_v32, %v18147_v52 }
 0xa77   : > { %v12819_v50 = vpop.f32.mrf.mxu0  ;;  %v18225_v24 = vpop.f32.mrf.mxu1  ;;  %v5037_v25 = vsub.f32 %v4974_v28, %v18157_v57 }
 0xa78   : > { %v5099_v52 = vmax.f32 %v5036_v49, 0.0  ;;  %v5714_v49 = vld [vmem:[%s18272_s5 + $0x70] sm:$0xff] }
 0xa79   : > { %v18227_v3 = vpop.f32.mrf.mxu0  ;;  %v13013_v16 = vpop.f32.mrf.mxu1  ;;  %13172 = vmatmul.mubr.msk.f32.gmra.mxu0 %vm834_vm1, %v5092_v5  ;;  %v5100_v33 = vmax.f32 %v5037_v25, 0.0 }
 0xa7a   : > { %13174 = vmatprep.mubr.msk.f32.mxu0 %vm14097_vm0, %v21662_v1 }
 0xa7b   : > { %v12822_v39 = vpop.f32.mrf.mxu0  ;;  %v18235_v6 = vpop.f32.mrf.mxu1 }
 0xa7d   : > { %v18237_v27 = vpop.f32.mrf.mxu0  ;;  %v13016_v56 = vpop.f32.mrf.mxu1  ;;  %13175 = vmatmul.mubr.msk.f32.gmra.mxu0 %vm834_vm1, %v5093_v14  ;;  %v5774_v14 = vmax.f32 %v5711_v20, 0.0 }
 0xa7e   : > { %13177 = vmatprep.mubr.msk.f32.mxu0 %vm14097_vm0, %v21662_v1  ;;  %v5775_v56 = vmax.f32 %v5712_v30, 0.0 }
 0xa7f   : > { %v12825_v45 = vpop.f32.mrf.mxu0  ;;  %v18245_v8 = vpop.f32.mrf.mxu1 }
 0xa80   : > { %v18305_v45 = vmin.f32 %v5774_v14, 1.0  ;;  %v18312_v53 = vmin.f32 %v5775_v56, 1.0 }
 0xa81   : > { %v18247_v38 = vpop.f32.mrf.mxu0  ;;  %v13019_v21 = vpop.f32.mrf.mxu1  ;;  %13178 = vmatmul.mubr.msk.f32.gmra.mxu0 %vm834_vm1, %v5094_v42  ;;  %v18297_v42 = vmin.f32 %v5773_v36, 1.0  ;;  %v21894_v36 = vld [vmem:[#allocation101_spill] sm:$0xff] }
 0xa82   : > { %13180 = vmatprep.mubr.msk.f32.mxu0 %vm14097_vm0, %v21662_v1  ;;  %v21892_v21 = vld [vmem:[#allocation103_spill] sm:$0xff]  ;;  %v5963_v57 = vsub.f32 1.0, %v18305_v45  ;;  %v4977_v30 = vmul.f32 %v18185_v31, %v21894_v36  ;;  %v5715_v31 = vld [vmem:[%s18272_s5 + $0x78] sm:$0xff] }
 0xa83   : > { %v12828_v7 = vpop.f32.mrf.mxu0  ;;  %v18255_v55 = vpop.f32.mrf.mxu1 }
 0xa84   : > { %v5962_v7 = vsub.f32 1.0, %v18297_v42 }
 0xa85   : > { %v18257_v47 = vpop.f32.mrf.mxu0  ;;  %v13022_v59 = vpop.f32.mrf.mxu1  ;;  %13181 = vmatmul.mubr.msk.f32.gmra.mxu0 %vm834_vm1, %v5095_v22  ;;  %v4975_v22 = vmul.f32 %v18165_v51, %v21892_v21 }
 0xa86   : > { %13183 = vmatprep.mubr.msk.f32.mxu0 %vm14097_vm0, %v21662_v1  ;;  %v5776_v59 = vmax.f32 %v5713_v35, 0.0  ;;  %v6025_v17 = vmax.f32 %v5962_v7, 1e-05  ;;  %v21896_v35 = vld [vmem:[#allocation23_spill] sm:$0xff] }
 0xa87   : > { %v12831_v13 = vpop.f32.mrf.mxu0  ;;  %v18265_v34 = vpop.f32.mrf.mxu1  ;;  %v5038_v51 = vsub.f32 %v4975_v22, %v18167_v58  ;;  %v6026_v58 = vmax.f32 %v5963_v57, 1e-05 }
 0xa88   : > { %v4976_v13 = vmul.f32 %v18175_v2, %v21893_v63  ;;  %v18327_v4 = vmin.f32 %v5776_v59, 1.0  ;;  %13701 = vrcp.f32 %v6025_v17  ;;  %v5778_v59 = vmax.f32 %v5715_v31, 0.0 }
 0xa89   : > { %v18274_v9 = vpop.f32.mrf.mxu0  ;;  %v13025_v10 = vpop.f32.mrf.mxu1  ;;  %13184 = vmatmul.mubr.msk.f32.gmra.mxu0 %vm834_vm1, %v5096_v37  ;;  %v5101_v2 = vmax.f32 %v5038_v51, 0.0  ;;  %13703 = vrcp.f32 %v6026_v58 }
 0xa8a   : > { %13186 = vmatprep.mubr.msk.f32.mxu0 %vm14097_vm0, %v21662_v1  ;;  %v5039_v20 = vsub.f32 %v4976_v13, %v18177_v11  ;;  %v5965_v18 = vsub.f32 1.0, %v18327_v4  ;;  %v5777_v11 = vmax.f32 %v5714_v49, 0.0 }
 0xa8b   : > { %v12834_v43 = vpop.f32.mrf.mxu0  ;;  %v18283_v5 = vpop.f32.mrf.mxu1 }
 0xa8c   : > { %v5102_v56 = vmax.f32 %v5039_v20, 0.0  ;;  %v6028_v22 = vmax.f32 %v5965_v18, 1e-05  ;;  %v18358_v57 = vmin.f32 %v5777_v11, 1.0 }
 0xa8d   : > { %v18287_v50 = vpop.f32.mrf.mxu0  ;;  %v13028_v16 = vpop.f32.mrf.mxu1  ;;  %13187 = vmatmul.mubr.msk.f32.gmra.mxu0 %vm834_vm1, %v5097_v15  ;;  %v5964_v15 = vsub.f32 1.0, %v18312_v53 }
 0xa8e   : > { %13189 = vmatprep.mubr.msk.f32.mxu0 %vm14097_vm0, %v21662_v1 }
 0xa8f   : > { %v12837_v0 = vpop.f32.mrf.mxu0  ;;  %v18295_v39 = vpop.f32.mrf.mxu1 }
 0xa91   : > { %v18299_v19 = vpop.f32.mrf.mxu0  ;;  %v13031_v62 = vpop.f32.mrf.mxu1  ;;  %13190 = vmatmul.mubr.msk.f32.gmra.mxu0 %vm834_vm1, %v5098_v41  ;;  %v6027_v41 = vmax.f32 %v5964_v15, 1e-05 }
 0xa92   : > { %13192 = vmatprep.mubr.msk.f32.mxu0 %vm14097_vm0, %v21662_v1  ;;  %v5040_v62 = vsub.f32 %v4977_v30, %v18187_v26 }
 0xa93   : > { %v12840_v40 = vpop.f32.mrf.mxu0  ;;  %v18310_v46 = vpop.f32.mrf.mxu1  ;;  %13705 = vrcp.f32 %v6027_v41  ;;  %v5899_v41 = vmax.f32 %v18297_v42, 1e-05 }
 0xa94   : > { %v5103_v26 = vmax.f32 %v5040_v62, 0.0  ;;  %13707 = vrcp.f32 %v6028_v22 }
 0xa95   : > { %v18315_v37 = vpop.f32.mrf.mxu0  ;;  %v13034_v23 = vpop.f32.mrf.mxu1  ;;  %13193 = vmatmul.mubr.msk.f32.gmra.mxu0 %vm834_vm1, %v5099_v52  ;;  %v4978_v52 = vmul.f32 %v18195_v61, %v21896_v35 }
 0xa96   : > { %13195 = vmatprep.mubr.msk.f32.mxu0 %vm14097_vm0, %v21662_v1  ;;  %v5716_v23 = vld [vmem:[%s18272_s5 + $0x80] sm:$0xff]  ;;  %v13702_v18 = vpop.eup %13701 }
 0xa97   : > { %v12843_v10 = vpop.f32.mrf.mxu0  ;;  %v18324_v60 = vpop.f32.mrf.mxu1  ;;  %v5041_v61 = vsub.f32 %v4978_v52, %v18197_v29  ;;  %v5966_v29 = vsub.f32 1.0, %v18358_v57  ;;  %v21902_v52 = vld [vmem:[#allocation26_spill] sm:$0xff] }
 0xa98   : > { %v5779_v10 = vmax.f32 %v5716_v23, 0.0  ;;  %v13704_v62 = vpop.eup %13703 }
 0xa99   : > { %v18329_v32 = vpop.f32.mrf.mxu0  ;;  %v13037_v43 = vpop.f32.mrf.mxu1  ;;  %13196 = vmatmul.mubr.msk.f32.gmra.mxu0 %vm834_vm1, %v5100_v33  ;;  %v21898_v33 = vld [vmem:[#allocation24_spill] sm:$0xff]  ;;  %v5104_v58 = vmax.f32 %v5041_v61, 0.0 }
 0xa9a   : > { %13198 = vmatprep.mubr.msk.f32.mxu0 %vm14097_vm0, %v21662_v1  ;;  %v4979_v51 = vmul.f32 %v18205_v12, %v21898_v33  ;;  %v18366_v43 = vmin.f32 %v5778_v59, 1.0  ;;  %v18376_v49 = vmin.f32 %v5779_v10, 1.0  ;;  %v5901_v59 = vmax.f32 %v18312_v53, 1e-05  ;;  %v21904_v10 = vld [vmem:[#allocation27_spill] sm:$0xff] }
 0xa9b   : > { %v12846_v16 = vpop.f32.mrf.mxu0  ;;  %v18337_v14 = vpop.f32.mrf.mxu1 }
 0xa9c   : > { %v5042_v12 = vsub.f32 %v4979_v51, %v18207_v54  ;;  %v5717_v16 = vld [vmem:[%s18272_s5 + $0x88] sm:$0xff]  ;;  %v5967_v31 = vsub.f32 1.0, %v18366_v43  ;;  %v5900_v54 = vmax.f32 %v18305_v45, 1e-05  ;;  %v5968_v61 = vsub.f32 1.0, %v18376_v49 }
 0xa9d   : > { %v18341_v28 = vpop.f32.mrf.mxu0  ;;  %13199 = vmatmul.mubr.msk.f32.gmra.mxu0 %vm834_vm1, %v5101_v2  ;;  %v13277_v0 = vpop.f32.mrf.mxu1  ;;  %v21900_v2 = vld [vmem:[#allocation25_spill] sm:$0xff] }
 0xa9e   : > { %21895 = vst [vmem:[#allocation38_spill] sm:$0xff] %v18341_v28  ;;  %13201 = vmatprep.mubr.msk.f32.mxu0 %vm14097_vm0, %v21662_v1  ;;  %v4980_v20 = vmul.f32 %v18215_v44, %v21900_v2  ;;  %v6029_v44 = vmax.f32 %v5966_v29, 1e-05  ;;  %v5105_v42 = vmax.f32 %v5042_v12, 0.0  ;;  %v6030_v51 = vmax.f32 %v5967_v31, 1e-05 }
 0xa9f   : > { %v13056_v25 = vpop.f32.mrf.mxu0  ;;  %v18350_v21 = vpop.f32.mrf.mxu1  ;;  %v6101_v53 = vmul.f32 %v13704_v62, %v5900_v54  ;;  %v5719_v54 = vld [vmem:[%s18272_s5 + $0x98] sm:$0xff] }
 0xaa0   : > { %v5043_v35 = vsub.f32 %v4980_v20, %v18217_v48  ;;  %v4981_v25 = vmul.f32 %v18225_v24, %v21902_v52  ;;  %v13706_v23 = vpop.eup %13705  ;;  %v4982_v48 = vmul.f32 %v18235_v6, %v21904_v10  ;;  %v18399_v24 = vld [vmem:[%s21342_s17] ss:$0 sm:$0xff]  ;;  %13709 = vrcp.f32 %v6029_v44  ;;  %v21908_v10 = vld [vmem:[#allocation29_spill] sm:$0xff] }
 0xaa1   : > { %v18352_v40 = vpop.f32.mrf.mxu0  ;;  %13202 = vmatmul.mubr.msk.f32.gmra.mxu0 %vm834_vm1, %v5102_v56  ;;  %v13280_v7 = vpop.f32.mrf.mxu1  ;;  %v5780_v56 = vmax.f32 %v5717_v16, 0.0  ;;  %v18408_v12 = vadd.f32 %v18399_v24, %v18350_v21  ;;  %v6103_v20 = vmul.f32 %v13706_v23, %v5901_v59  ;;  %v6031_v16 = vmax.f32 %v5968_v61, 1e-05 }
 0xaa2   : > { %21897 = vst [vmem:[#allocation39_spill] sm:$0xff] %v18352_v40  ;;  %13204 = vmatprep.mubr.msk.f32.mxu0 %vm14097_vm0, %v21662_v1  ;;  %v5106_v29 = vmax.f32 %v5043_v35, 0.0  ;;  %v5045_v44 = vsub.f32 %v4982_v48, %v18237_v27  ;;  %v4984_v48 = vmul.f32 %v18255_v55, %v21908_v10 }
 0xaa3   : > { %v13059_v63 = vpop.f32.mrf.mxu0  ;;  %v6915_v13 = vpop.f32.mrf.mxu1  ;;  %v6977_v62 = vmul.f32 %v18408_v12, %v18408_v12 }
 0xaa4   : > { %v5718_v63 = vld [vmem:[%s18272_s5 + $0x90] sm:$0xff] }
 0xaa5   : > { %v18363_v15 = vpop.f32.mrf.mxu0  ;;  %13205 = vmatmul.mubr.msk.f32.gmra.mxu0 %vm834_vm1, %v5103_v26  ;;  %v13283_v17 = vpop.f32.mrf.mxu1  ;;  %v6099_v26 = vmul.f32 %v13702_v18, %v5899_v41  ;;  %v5781_v41 = vmax.f32 %v5718_v63, 0.0 }
 0xaa6   : > { %21899 = vst [vmem:[#allocation40_spill] sm:$0xff] %v18363_v15  ;;  %13207 = vmatprep.mubr.msk.f32.mxu0 %vm14097_vm0, %v21662_v1  ;;  %v18403_v17 = vmin.f32 %v5780_v56, 1.0  ;;  %v13708_v18 = vpop.eup %13707 }
 0xaa7   : > { %v13062_v36 = vpop.f32.mrf.mxu0  ;;  %v6920_v30 = vpop.f32.mrf.mxu1  ;;  %13711 = vlog2.f32 %v6099_v26 }
 0xaa8   : > { %v5902_v36 = vmax.f32 %v18327_v4, 1e-05  ;;  %13713 = vrcp.f32 %v6030_v51  ;;  %v21906_v4 = vld [vmem:[#allocation28_spill] sm:$0xff]  ;;  %v5108_v51 = vmax.f32 %v5045_v44, 0.0 }
 0xaa9   : > { %v18378_v0 = vpop.f32.mrf.mxu0  ;;  %13208 = vmatmul.mubr.msk.f32.gmra.mxu0 %vm834_vm1, %v5104_v58  ;;  %v13286_v11 = vpop.f32.mrf.mxu1  ;;  %v5044_v58 = vsub.f32 %v4981_v25, %v18227_v3  ;;  %v18416_v3 = vadd.f32 %v18399_v24, %v6915_v13  ;;  %v4983_v56 = vmul.f32 %v18245_v8, %v21906_v4  ;;  %13715 = vlog2.f32 %v6101_v53 }
 0xaaa   : > { %21901 = vst [vmem:[#allocation41_spill] sm:$0xff] %v18378_v0  ;;  %13210 = vmatprep.mubr.msk.f32.mxu0 %vm14097_vm0, %v21662_v1  ;;  %v18413_v11 = vadd.f32 %v18399_v24, %v18337_v14  ;;  %v5969_v14 = vsub.f32 1.0, %v18403_v17  ;;  %13717 = vlog2.f32 %v6103_v20  ;;  %v18433_v27 = vmul.f32 %v13708_v18, %v5902_v36 }
 0xaab   : > { %v13065_v22 = vpop.f32.mrf.mxu0  ;;  %v6925_v7 = vpop.f32.mrf.mxu1  ;;  %v5107_v13 = vmax.f32 %v5044_v58, 0.0  ;;  %13719 = vrcp.f32 %v6031_v16  ;;  %v18435_v8 = vmin.f32 %v5781_v41, 1.0  ;;  %v5782_v25 = vmax.f32 %v5719_v54, 0.0 }
 0xaac   : > { %v6976_v22 = vmul.f32 %v18413_v11, %v18413_v11  ;;  %v6959_v59 = vadd.f32 %v18408_v12, %v18413_v11  ;;  %v6978_v23 = vmul.f32 %v18416_v3, %v18416_v3  ;;  %v5046_v63 = vsub.f32 %v4983_v56, %v18247_v38 }
 0xaad   : > { %v18390_v33 = vpop.f32.mrf.mxu0  ;;  %13211 = vmatmul.mubr.msk.f32.gmra.mxu0 %vm834_vm1, %v5105_v42  ;;  %v13289_v45 = vpop.f32.mrf.mxu1  ;;  %v18431_v42 = vadd.f32 %v18399_v24, %v6920_v30  ;;  %v18444_v30 = vadd.f32 %v18399_v24, %v6925_v7  ;;  %v6032_v53 = vmax.f32 %v5969_v14, 1e-05  ;;  %v5903_v38 = vmax.f32 %v18358_v57, 1e-05  ;;  %v21910_v14 = vld [vmem:[#allocation30_spill] sm:$0xff] }
 0xaae   : > { %21903 = vst [vmem:[#allocation42_spill] sm:$0xff] %v18390_v33  ;;  %13213 = vmatprep.mubr.msk.f32.mxu0 %vm14097_vm0, %v21662_v1  ;;  %v5720_v45 = vld [vmem:[%s18272_s5 + $0xa0] sm:$0xff]  ;;  %v6960_v7 = vadd.f32 %v6959_v59, %v18416_v3  ;;  %v5970_v16 = vsub.f32 1.0, %v18435_v8  ;;  %v18463_v55 = vmin.f32 %v5782_v25, 1.0  ;;  %v5109_v57 = vmax.f32 %v5046_v63, 0.0  ;;  %v5754_v33 = vld [vmem:[%s18272_s5 + $0x1b0] sm:$0xff] }
 0xaaf   : > { %v13068_v6 = vpop.f32.mrf.mxu0  ;;  %v6930_v2 = vpop.f32.mrf.mxu1  ;;  %v6979_v58 = vmul.f32 %v18431_v42, %v18431_v42  ;;  %v5783_v41 = vmax.f32 %v5720_v45, 0.0  ;;  %v6980_v54 = vmul.f32 %v18444_v30, %v18444_v30  ;;  %v5047_v56 = vsub.f32 %v4984_v48, %v18257_v47 }
 0xab0   : > { %v18459_v6 = vadd.f32 %v18399_v24, %v6930_v2  ;;  %13721 = vrcp.f32 %v6032_v53  ;;  %v5904_v47 = vmax.f32 %v18366_v43, 1e-05 }
 0xab1   : > { %v18418_v31 = vpop.f32.mrf.mxu0  ;;  %13214 = vmatmul.mubr.msk.f32.gmra.mxu0 %vm834_vm1, %v5106_v29  ;;  %v13292_v21 = vpop.f32.mrf.mxu1  ;;  %v6987_v29 = vadd.f32 %v6977_v62, %v6976_v22  ;;  %v18487_v45 = vmin.f32 %v5783_v41, 1.0  ;;  %13723 = vlog2.f32 %v18433_v27  ;;  %v21912_v41 = vld [vmem:[#allocation31_spill] sm:$0xff] }
 0xab2   : > { %21905 = vst [vmem:[#allocation43_spill] sm:$0xff] %v18418_v31  ;;  %13216 = vmatprep.mubr.msk.f32.mxu0 %vm14097_vm0, %v21662_v1  ;;  %v6961_v21 = vadd.f32 %v6960_v7, %v18431_v42  ;;  %v13710_v62 = vpop.eup %13709  ;;  %v6981_v25 = vmul.f32 %v18459_v6, %v18459_v6 }
 0xab3   : > { %v13071_v35 = vpop.f32.mrf.mxu0  ;;  %v6935_v52 = vpop.f32.mrf.mxu1  ;;  %v6988_v18 = vadd.f32 %v6987_v29, %v6978_v23  ;;  %v5972_v27 = vsub.f32 1.0, %v18487_v45 }
 0xab4   : > { %v18469_v44 = vadd.f32 %v18399_v24, %v6935_v52  ;;  %v6962_v52 = vadd.f32 %v6961_v21, %v18444_v30 }
 0xab5   : > { %v18446_v26 = vpop.f32.mrf.mxu0  ;;  %13217 = vmatmul.mubr.msk.f32.gmra.mxu0 %vm834_vm1, %v5107_v13  ;;  %v13295_v61 = vpop.f32.mrf.mxu1  ;;  %v4985_v13 = vmul.f32 %v18265_v34, %v21910_v14  ;;  %v6989_v35 = vadd.f32 %v6988_v18, %v6979_v58  ;;  %v6033_v34 = vmax.f32 %v5970_v16, 1e-05  ;;  %v5110_v58 = vmax.f32 %v5047_v56, 0.0 }
 0xab6   : > { %21907 = vst [vmem:[#allocation44_spill] sm:$0xff] %v18446_v26  ;;  %13219 = vmatprep.mubr.msk.f32.mxu0 %vm14097_vm0, %v21662_v1  ;;  %v5971_v61 = vsub.f32 1.0, %v18463_v55  ;;  %v6963_v10 = vadd.f32 %v6962_v52, %v18459_v6  ;;  %v6982_v48 = vmul.f32 %v18469_v44, %v18469_v44  ;;  %v4986_v18 = vmul.f32 %v18283_v5, %v21912_v41 }
 0xab7   : > { %v13074_v20 = vpop.f32.mrf.mxu0  ;;  %v6940_v36 = vpop.f32.mrf.mxu1  ;;  %v6990_v63 = vadd.f32 %v6989_v35, %v6980_v54  ;;  %13725 = vrcp.f32 %v6033_v34 }
 0xab8   : > { %v18483_v22 = vadd.f32 %v18399_v24, %v6940_v36  ;;  %v5048_v20 = vsub.f32 %v4985_v13, %v18274_v9  ;;  %v6107_v36 = vmul.f32 %v13710_v62, %v5903_v38  ;;  %v6964_v54 = vadd.f32 %v6963_v10, %v18469_v44 }
 0xab9   : > { %v18471_v2 = vpop.f32.mrf.mxu0  ;;  %13220 = vmatmul.mubr.msk.f32.gmra.mxu0 %vm834_vm1, %v5108_v51  ;;  %v13298_v4 = vpop.f32.mrf.mxu1  ;;  %v6991_v21 = vadd.f32 %v6990_v63, %v6981_v25  ;;  %v6034_v13 = vmax.f32 %v5971_v61, 1e-05  ;;  %v21914_v63 = vld [vmem:[#allocation32_spill] sm:$0xff]  ;;  %v5049_v10 = vsub.f32 %v4986_v18, %v18287_v50 }
 0xaba   : > { %21909 = vst [vmem:[#allocation45_spill] sm:$0xff] %v18471_v2  ;;  %13222 = vmatprep.mubr.msk.f32.mxu0 %vm14097_vm0, %v21662_v1  ;;  %v13712_v51 = vpop.eup %13711  ;;  %v6983_v4 = vmul.f32 %v18483_v22, %v18483_v22  ;;  %v6965_v5 = vadd.f32 %v6964_v54, %v18483_v22  ;;  %v4987_v34 = vmul.f32 %v18295_v39, %v21914_v63  ;;  %13727 = vlog2.f32 %v6107_v36 }
 0xabb   : > { %v13077_v59 = vpop.f32.mrf.mxu0  ;;  %v6945_v23 = vpop.f32.mrf.mxu1  ;;  %v6992_v62 = vadd.f32 %v6991_v21, %v6982_v48  ;;  %v6225_v61 = vmul.f32 0.6931472, %v13712_v51  ;;  %v5905_v39 = vmax.f32 %v18376_v49, 1e-05  ;;  %13729 = vrcp.f32 %v6034_v13  ;;  %v21915_v13 = vld [vmem:[#allocation33_spill] sm:$0xff] }
 0xabc   : > { %v18493_v53 = vadd.f32 %v18399_v24, %v6945_v23  ;;  %v13714_v7 = vpop.eup %13713  ;;  %v5111_v23 = vmax.f32 %v5048_v20, 0.0  ;;  %v5050_v54 = vsub.f32 %v4987_v34, %v18299_v19  ;;  %v5906_v49 = vmax.f32 %v18403_v17, 1e-05  ;;  %v18544_v19 = vld [vmem:[%s21340_s15] ss:$0 sm:$0xff] }
 0xabd   : > { %v18495_v29 = vpop.f32.mrf.mxu0  ;;  %13223 = vmatmul.mubr.msk.f32.gmra.mxu0 %vm834_vm1, %v5109_v57  ;;  %v13301_v43 = vpop.f32.mrf.mxu1  ;;  %v6109_v59 = vmul.f32 %v13714_v7, %v5904_v47  ;;  %v6993_v48 = vadd.f32 %v6992_v62, %v6983_v4  ;;  %v6035_v7 = vmax.f32 %v5972_v27, 1e-05 }
 0xabe   : > { %21911 = vst [vmem:[#allocation46_spill] sm:$0xff] %v18495_v29  ;;  %13225 = vmatprep.mubr.msk.f32.mxu0 %vm14097_vm0, %v21662_v1  ;;  %v13716_v16 = vpop.eup %13715  ;;  %v6984_v35 = vmul.f32 %v18493_v53, %v18493_v53  ;;  %v6966_v43 = vadd.f32 %v6965_v5, %v18493_v53 }
 0xabf   : > { %v13080_v57 = vpop.f32.mrf.mxu0  ;;  %v6950_v56 = vpop.f32.mrf.mxu1  ;;  %v6227_v50 = vmul.f32 0.6931472, %v13716_v16  ;;  %13731 = vlog2.f32 %v6109_v59  ;;  %v4988_v16 = vmul.f32 %v18310_v46, %v21915_v13  ;;  %v5113_v46 = vmax.f32 %v5050_v54, 0.0 }
 0xac0   : > { %v13718_v14 = vpop.eup %13717  ;;  %v18508_v9 = vadd.f32 %v18399_v24, %v6950_v56  ;;  %v6994_v20 = vadd.f32 %v6993_v48, %v6984_v35  ;;  %v5112_v56 = vmax.f32 %v5049_v10, 0.0  ;;  %13733 = vrcp.f32 %v6035_v7 }
 0xac1   : > { %v13720_v38 = vpop.eup %13719  ;;  %v18514_v52 = vpop.f32.mrf.mxu0  ;;  %13226 = vmatmul.mubr.msk.f32.gmra.mxu0 %vm834_vm1, %v5110_v58  ;;  %v6229_v10 = vmul.f32 0.6931472, %v13718_v14 }
 0xac2   : > { %21913 = vst [vmem:[#allocation47_spill] sm:$0xff] %v18514_v52  ;;  %v13304_v25 = vpop.f32.mrf.mxu1  ;;  %13228 = vmatprep.mubr.msk.f32.mxu0 %vm14097_vm0, %v21662_v1  ;;  %v6985_v41 = vmul.f32 %v18508_v9, %v18508_v9  ;;  %v6967_v51 = vadd.f32 %v6966_v43, %v18508_v9  ;;  %v13722_v57 = vpop.eup %13721  ;;  %v6111_v59 = vmul.f32 %v13720_v38, %v5905_v39 }
 0xac3   : > { %v13083_v58 = vpop.f32.mrf.mxu0  ;;  %v6113_v48 = vmul.f32 %v13722_v57, %v5906_v49  ;;  %v13724_v43 = vpop.eup %13723 }
 0xac4   : > { %v6955_v21 = vpop.f32.mrf.mxu1  ;;  %v6995_v27 = vadd.f32 %v6994_v20, %v6985_v41  ;;  %v5051_v41 = vsub.f32 %v4988_v16, %v18315_v37  ;;  %v21916_v58 = vld [vmem:[#allocation34_spill] sm:$0xff]  ;;  %13735 = vlog2.f32 %v6111_v59 }
 0xac5   : > { %v18526_v47 = vadd.f32 %v18399_v24, %v6955_v21  ;;  %v5436_v36 = vpop.f32.mrf.mxu0  ;;  %13229 = vmatmul.mubr.msk.f32.gmra.mxu0 %vm834_vm1, %v5111_v23  ;;  %v4989_v38 = vmul.f32 %v18324_v60, %v21916_v58  ;;  %v6231_v60 = vmul.f32 0.6931472, %v13724_v43  ;;  %13737 = vlog2.f32 %v6113_v48 }
 0xac6   : > { %v13307_v18 = vpop.f32.mrf.mxu1  ;;  %13231 = vmatprep.mubr.msk.f32.mxu0 %vm14097_vm0, %v21662_v1  ;;  %v5437_v25 = vadd.f32 %v18544_v19, %v5436_v36  ;;  %v5907_v36 = vmax.f32 %v18435_v8, 1e-05  ;;  %v5114_v49 = vmax.f32 %v5051_v41, 0.0  ;;  %v5909_v41 = vmax.f32 %v18487_v45, 1e-05 }
 0xac7   : > { %v6968_v4 = vsel %vm6404_vm6, %v18526_v47, 0.0  ;;  %v6986_v24 = vmul.f32 %v18526_v47, %v18526_v47  ;;  %v13086_v5 = vpop.f32.mrf.mxu0  ;;  %v13726_v18 = vpop.eup %13725 }
 0xac8   : > { %v6969_v62 = vadd.f32 %v6968_v4, %v6967_v51  ;;  %v18555_v20 = vadd.f32 %v6225_v61, %v5437_v25  ;;  %v13728_v61 = vpop.eup %13727 }
 0xac9   : > { %v6996_v35 = vsel %vm6404_vm6, %v6986_v24, 0.0  ;;  %v5441_v63 = vpop.f32.mrf.mxu0  ;;  %13232 = vmatmul.mubr.msk.f32.gmra.mxu0 %vm834_vm1, %v5112_v56  ;;  %v13730_v5 = vpop.eup %13729 }
 0xaca   : > { %v6970_v17 = vrot.slane %v6969_v62, 4  ;;  %v6997_v23 = vadd.f32 %v6996_v35, %v6995_v27  ;;  %v5442_v34 = vadd.f32 %v18544_v19, %v5441_v63  ;;  %13234 = vmatprep.mubr.msk.f32.mxu0 %vm14097_vm0, %v21662_v1  ;;  %21917 = vst [vmem:[#allocation48_spill] sm:$0xff] %v18555_v20  ;;  %v6405_v13 = vrot.slane %v18555_v20, 4 }
 0xacb   : > { %v13089_v7 = vpop.f32.mrf.mxu0  ;;  %v6115_v27 = vmul.f32 %v13726_v18, %v5907_v36 }
 0xacc   : > { %v6971_v21 = vadd.f32 %v6970_v17, %v6969_v62  ;;  %v6998_v39 = vrot.slane %v6997_v23, 4  ;;  %v6341_v51 = vadd.f32 %v6227_v50, %v5442_v34  ;;  %v5052_v50 = vsub.f32 %v4989_v38, %v18329_v32  ;;  %v13732_v17 = vpop.eup %13731 }
 0xacd   : > { %v5446_v14 = vpop.f32.mrf.mxu0  ;;  %13235 = vmatmul.mubr.msk.f32.gmra.mxu0 %vm834_vm1, %v5113_v46  ;;  %v5908_v62 = vmax.f32 %v18463_v55, 1e-05  ;;  %v6233_v55 = vmul.f32 0.6931472, %v13728_v61  ;;  %13739 = vlog2.f32 %v6115_v27  ;;  %v13734_v58 = vpop.eup %13733  ;;  %v6235_v45 = vmul.f32 0.6931472, %v13732_v17 }
 0xace   : > { %v6972_v54 = vrot.slane %v6971_v21, 2  ;;  %v6999_v4 = vadd.f32 %v6998_v39, %v6997_v23  ;;  %v6406_v24 = vrot.slane %v6341_v51, 4  ;;  %v5447_v37 = vadd.f32 %v18544_v19, %v5446_v14  ;;  %13237 = vmatprep.mubr.msk.f32.mxu0 %vm14097_vm0, %v21662_v1 }
 0xacf   : > { %v13092_v56 = vpop.f32.mrf.mxu0  ;;  %v5115_v46 = vmax.f32 %v5052_v50, 0.0  ;;  %v6117_v43 = vmul.f32 %v13730_v5, %v5908_v62  ;;  %v6119_v14 = vmul.f32 %v13734_v58, %v5909_v41 }
 0xad0   : > { %v6973_v57 = vadd.f32 %v6972_v54, %v6971_v21  ;;  %v7000_v8 = vrot.slane %v6999_v4, 2  ;;  %v6342_v16 = vadd.f32 %v6229_v10, %v5447_v37  ;;  %v18570_v32 = vsel %vm6404_vm6, %v6405_v13, %v6406_v24 }
 0xad1   : > { %v5451_v59 = vpop.f32.mrf.mxu0  ;;  %13238 = vmatmul.mubr.msk.f32.gmra.mxu0 %vm834_vm1, %v5114_v49  ;;  %21918 = vst [vmem:[#allocation49_spill] sm:$0xff] %v18570_v32  ;;  %13741 = vlog2.f32 %v6117_v43  ;;  %v13736_v37 = vpop.eup %13735 }
 0xad2   : > { %v6974_v35 = vrot.slane %v6973_v57, 1  ;;  %v7001_v25 = vadd.f32 %v7000_v8, %v6999_v4  ;;  %v6408_v23 = vrot.slane %v6342_v16, 4  ;;  %v5452_v63 = vadd.f32 %v18544_v19, %v5451_v59  ;;  %13240 = vmatprep.mubr.msk.f32.mxu0 %vm14097_vm0, %v21662_v1  ;;  %v13738_v50 = vpop.eup %13737 }
 0xad3   : > { %v13095_v10 = vpop.f32.mrf.mxu0  ;;  %v6237_v56 = vmul.f32 0.6931472, %v13736_v37  ;;  %13743 = vlog2.f32 %v6119_v14 }
 0xad4   : > { %v7002_v34 = vrot.slane %v7001_v25, 1  ;;  %v6343_v48 = vadd.f32 %v6231_v60, %v5452_v63  ;;  %v6975_v38 = vadd.f32 %v6974_v35, %v6973_v57  ;;  %v18575_v7 = vsel %vm6404_vm6, %v6406_v24, %v6408_v23 }
 0xad5   : > { %v5456_v21 = vpop.f32.mrf.mxu0  ;;  %13241 = vmatmul.mubr.msk.f32.gmra.mxu0 %vm834_vm1, %v5115_v46  ;;  %21919 = vst [vmem:[#allocation50_spill] sm:$0xff] %v18575_v7 }
 0xad6   : > { %v7003_v39 = vadd.f32 %v7002_v34, %v7001_v25  ;;  %v6410_v51 = vrot.slane %v6343_v48, 4  ;;  %v5457_v36 = vadd.f32 %v18544_v19, %v5456_v21  ;;  %13585 = vmatprep.mubr.msk.f32.mxu0 %vm14097_vm0, %v21662_v1  ;;  %v6239_v25 = vmul.f32 0.6931472, %v13738_v50 }
 0xad7   : > { %v13098_v18 = vpop.f32.mrf.mxu0 }
 0xad8   : > { %v7005_v54 = vsel %vm7004_vm7, %v6975_v38, %v7003_v39  ;;  %v6344_v4 = vadd.f32 %v6233_v55, %v5457_v36  ;;  %v18584_v24 = vsel %vm6404_vm6, %v6408_v23, %v6410_v51  ;;  %v5732_v39 = vld [vmem:[%s18272_s5 + $0x100] sm:$0xff]  ;;  %v5733_v18 = vld [vmem:[%s18272_s5 + $0x108] sm:$0xff] }
 0xad9   : > { %13341 = vmatmul.mubr.f32.vlgmr.msra.gmra.mxu1 %v7005_v54  ;;  %v5461_v60 = vpop.f32.mrf.mxu0  ;;  %21920 = vst [vmem:[#allocation51_spill] sm:$0xff] %v18584_v24 }
 0xada   : > { %13375 = vmatprep.mubr.msk.f32.mxu1 %vm14097_vm0, %v21662_v1  ;;  %v6412_v61 = vrot.slane %v6344_v4, 4  ;;  %v5462_v49 = vadd.f32 %v18544_v19, %v5461_v60  ;;  %v13740_v59 = vpop.eup %13739  ;;  %v5795_v60 = vmax.f32 %v5732_v39, 0.0 }
 0xadb   : > { %v13101_v57 = vpop.f32.mrf.mxu0  ;;  %v6241_v55 = vmul.f32 0.6931472, %v13740_v59 }
 0xadc   : > { %v6345_v8 = vadd.f32 %v6235_v45, %v5462_v49  ;;  %v18588_v16 = vsel %vm6404_vm6, %v6410_v51, %v6412_v61  ;;  %v5796_v49 = vmax.f32 %v5733_v18, 0.0 }
 0xadd   : > { %v5466_v13 = vpop.f32.mrf.mxu0  ;;  %21921 = vst [vmem:[#allocation52_spill] sm:$0xff] %v18588_v16 }
 0xade   : > { %v6414_v27 = vrot.slane %v6345_v8, 4  ;;  %v5467_v62 = vadd.f32 %v18544_v19, %v5466_v13  ;;  %v13742_v48 = vpop.eup %13741 }
 0xadf   : > { %v13104_v5 = vpop.f32.mrf.mxu0  ;;  %v6243_v36 = vmul.f32 0.6931472, %v13742_v48 }
 0xae0   : > { %v6346_v35 = vadd.f32 %v6237_v56, %v5467_v62  ;;  %v18592_v23 = vsel %vm6404_vm6, %v6412_v61, %v6414_v27  ;;  %v13744_v54 = vpop.eup %13743  ;;  %v5734_v56 = vld [vmem:[%s18272_s5 + $0x110] sm:$0xff]  ;;  %v18610_v5 = vmin.f32 %v5795_v60, 1.0 }
 0xae1   : > { %v5471_v17 = vpop.f32.mrf.mxu0  ;;  %v6245_v57 = vmul.f32 0.6931472, %v13744_v54 }
 0xae2   : > { %v6416_v63 = vrot.slane %v6346_v35, 4  ;;  %v5472_v46 = vadd.f32 %v18544_v19, %v5471_v17  ;;  %v5797_v17 = vmax.f32 %v5734_v56, 0.0 }
 0xae3   : > { %v13107_v34 = vpop.f32.mrf.mxu0 }
 0xae4   : > { %v6347_v10 = vadd.f32 %v6239_v25, %v5472_v46  ;;  %v18596_v41 = vsel %vm6404_vm6, %v6414_v27, %v6416_v63  ;;  %v18612_v25 = vmin.f32 %v5796_v49, 1.0 }
 0xae5   : > { %v5476_v43 = vpop.f32.mrf.mxu0 }
 0xae6   : > { %v6418_v58 = vrot.slane %v6347_v10, 4  ;;  %v5477_v38 = vadd.f32 %v18544_v19, %v5476_v43  ;;  %v5985_v43 = vsub.f32 1.0, %v18612_v25 }
 0xae7   : > { %v13110_v21 = vpop.f32.mrf.mxu0 }
 0xae8   : > { %v6348_v51 = vadd.f32 %v6241_v55, %v5477_v38  ;;  %v18602_v45 = vsel %vm6404_vm6, %v6416_v63, %v6418_v58  ;;  %v5735_v63 = vld [vmem:[%s18272_s5 + $0x118] sm:$0xff]  ;;  %v5984_v55 = vsub.f32 1.0, %v18610_v5  ;;  %v18625_v38 = vmin.f32 %v5797_v17, 1.0  ;;  %v5736_v21 = vld [vmem:[%s18272_s5 + $0x120] sm:$0xff] }
 0xae9   : > { %v5481_v4 = vpop.f32.mrf.mxu0  ;;  %v6048_v54 = vmax.f32 %v5985_v43, 1e-05  ;;  %v5739_v43 = vld [vmem:[%s18272_s5 + $0x138] sm:$0xff] }
 0xaea   : > { %v6420_v14 = vrot.slane %v6348_v51, 4  ;;  %v5482_v37 = vadd.f32 %v18544_v19, %v5481_v4 }
 0xaeb   : > { %v13113_v61 = vpop.f32.mrf.mxu0 }
 0xaec   : > { %v6349_v50 = vadd.f32 %v6243_v36, %v5482_v37  ;;  %v18607_v13 = vsel %vm6404_vm6, %v6418_v58, %v6420_v14  ;;  %v5798_v58 = vmax.f32 %v5735_v63, 0.0  ;;  %v6047_v36 = vmax.f32 %v5984_v55, 1e-05  ;;  %v5737_v61 = vld [vmem:[%s18272_s5 + $0x128] sm:$0xff] }
 0xaed   : > { %v5486_v8 = vpop.f32.mrf.mxu0  ;;  %v5986_v37 = vsub.f32 1.0, %v18625_v38  ;;  %v5800_v56 = vmax.f32 %v5737_v61, 0.0  ;;  %v5740_v61 = vld [vmem:[%s18272_s5 + $0x140] sm:$0xff] }
 0xaee   : > { %v6422_v27 = vrot.slane %v6349_v50, 4  ;;  %v5487_v62 = vadd.f32 %v18544_v19, %v5486_v8  ;;  %v18635_v4 = vmin.f32 %v5798_v58, 1.0  ;;  %13745 = vrcp.f32 %v6047_v36 }
 0xaef   : > { %v13116_v35 = vpop.f32.mrf.mxu0  ;;  %13747 = vrcp.f32 %v6048_v54  ;;  %v6049_v8 = vmax.f32 %v5986_v37, 1e-05  ;;  %v18648_v55 = vmin.f32 %v5800_v56, 1.0  ;;  %v5922_v56 = vmax.f32 %v18612_v25, 1e-05 }
 0xaf0   : > { %v18614_v59 = vadd.f32 %v6245_v57, %v5487_v62  ;;  %v18620_v34 = vsel %vm6404_vm6, %v6420_v14, %v6422_v27  ;;  %v5799_v14 = vmax.f32 %v5736_v21, 0.0  ;;  %v5987_v50 = vsub.f32 1.0, %v18635_v4  ;;  %v5738_v62 = vld [vmem:[%s18272_s5 + $0x130] sm:$0xff] }
 0xaf1   : > { %v18617_v46 = vpop.f32.mrf.mxu0  ;;  %13749 = vrcp.f32 %v6049_v8  ;;  %v5989_v54 = vsub.f32 1.0, %v18648_v55  ;;  %v5924_v0 = vmax.f32 %v18635_v4, 1e-05 }
 0xaf2   : > { %21922 = vst [vmem:[#allocation53_spill] sm:$0xff] %v18617_v46  ;;  %v21580_v10 = vrot.slane %v18614_v59, 4  ;;  %v18642_v57 = vmin.f32 %v5799_v14, 1.0  ;;  %v6050_v17 = vmax.f32 %v5987_v50, 1e-05 }
 0xaf3   : > { %v13119_v48 = vpop.f32.mrf.mxu0 }
 0xaf4   : > { %v18631_v39 = vsel %vm6404_vm6, %v6422_v27, %v21580_v10  ;;  %v5988_v63 = vsub.f32 1.0, %v18642_v57  ;;  %v5801_v48 = vmax.f32 %v5738_v62, 0.0  ;;  %13751 = vrcp.f32 %v6050_v17 }
 0xaf5   : > { %v18633_v51 = vpop.f32.mrf.mxu0  ;;  %v6052_v17 = vmax.f32 %v5989_v54, 1e-05 }
 0xaf6   : > { %21923 = vst [vmem:[#allocation54_spill] sm:$0xff] %v18633_v51  ;;  %v6051_v36 = vmax.f32 %v5988_v63, 1e-05  ;;  %v18654_v14 = vmin.f32 %v5801_v48, 1.0  ;;  %v5741_v48 = vld [vmem:[%s18272_s5 + $0x148] sm:$0xff] }
 0xaf7   : > { %v13122_v18 = vpop.f32.mrf.mxu0 }
 0xaf8   : > { %v5802_v18 = vmax.f32 %v5739_v43, 0.0  ;;  %13753 = vrcp.f32 %v6051_v36  ;;  %v5990_v63 = vsub.f32 1.0, %v18654_v14  ;;  %v5803_v43 = vmax.f32 %v5740_v61, 0.0 }
 0xaf9   : > { %v18638_v60 = vpop.f32.mrf.mxu0  ;;  %13755 = vrcp.f32 %v6052_v17 }
 0xafa   : > { %21924 = vst [vmem:[#allocation55_spill] sm:$0xff] %v18638_v60  ;;  %v18661_v62 = vmin.f32 %v5802_v18, 1.0  ;;  %v6053_v25 = vmax.f32 %v5990_v63, 1e-05  ;;  %v18669_v36 = vmin.f32 %v5803_v43, 1.0  ;;  %v5804_v18 = vmax.f32 %v5741_v48, 0.0 }
 0xafb   : > { %v13125_v49 = vpop.f32.mrf.mxu0  ;;  %v13746_v50 = vpop.eup %13745  ;;  %v5925_v43 = vmax.f32 %v18642_v57, 1e-05 }
 0xafc   : > { %v5921_v49 = vmax.f32 %v18610_v5, 1e-05  ;;  %v5923_v5 = vmax.f32 %v18625_v38, 1e-05  ;;  %v5992_v38 = vsub.f32 1.0, %v18669_v36 }
 0xafd   : > { %v18644_v27 = vpop.f32.mrf.mxu0 }
 0xafe   : > { %21925 = vst [vmem:[#allocation56_spill] sm:$0xff] %v18644_v27  ;;  %v6143_v10 = vmul.f32 %v13746_v50, %v5921_v49 }
 0xaff   : > { %v13128_v35 = vpop.f32.mrf.mxu0 }
 0xb00   : > { %v13748_v35 = vpop.eup %13747  ;;  %13757 = vlog2.f32 %v6143_v10 }
 0xb01   : > { %v18651_v58 = vpop.f32.mrf.mxu0  ;;  %v6145_v40 = vmul.f32 %v13748_v35, %v5922_v56  ;;  %v13750_v15 = vpop.eup %13749  ;;  %v18675_v56 = vmin.f32 %v5804_v18, 1.0 }
 0xb02   : > { %21926 = vst [vmem:[#allocation57_spill] sm:$0xff] %v18651_v58  ;;  %v6147_v50 = vmul.f32 %v13750_v15, %v5923_v5 }
 0xb03   : > { %v13131_v21 = vpop.f32.mrf.mxu0  ;;  %13759 = vlog2.f32 %v6145_v40  ;;  %v6055_v40 = vmax.f32 %v5992_v38, 1e-05  ;;  %v5993_v4 = vsub.f32 1.0, %v18675_v56  ;;  %v5927_v38 = vmax.f32 %v18654_v14, 1e-05  ;;  %v7138_v14 = vld [vmem:[%s21343_s18 + $0x60] sm:$0xff] }
 0xb04   : > { %13761 = vrcp.f32 %v6053_v25 }
 0xb05   : > { %v18656_v37 = vpop.f32.mrf.mxu0  ;;  %v6056_v25 = vmax.f32 %v5993_v4, 1e-05 }
 0xb07   : > { %v13134_v8 = vpop.f32.mrf.mxu0 }
 0xb08   : > { %v5991_v8 = vsub.f32 1.0, %v18661_v62 }
 0xb09   : > { %v18664_v21 = vpop.f32.mrf.mxu0 }
 0xb0a   : > { %v6054_v49 = vmax.f32 %v5991_v8, 1e-05  ;;  %v5926_v8 = vmax.f32 %v18648_v55, 1e-05 }
 0xb0b   : > { %v13137_v28 = vpop.f32.mrf.mxu0 }
 0xb0c   : > { %v13752_v28 = vpop.eup %13751  ;;  %13763 = vrcp.f32 %v6054_v49 }
 0xb0d   : > { %v18671_v54 = vpop.f32.mrf.mxu0  ;;  %v6149_v63 = vmul.f32 %v13752_v28, %v5924_v0  ;;  %v13754_v10 = vpop.eup %13753  ;;  %13765 = vlog2.f32 %v6147_v50  ;;  %v7141_v0 = vld [vmem:[%s21343_s18 + $0x78] sm:$0xff]  ;;  %v7140_v28 = vld [vmem:[%s21343_s18 + $0x70] sm:$0xff] }
 0xb0e   : > { %v6151_v5 = vmul.f32 %v13754_v10, %v5925_v43  ;;  %v13756_v18 = vpop.eup %13755  ;;  %13344 = vmatpush3.msra.mxu1 %v7141_v0  ;;  %v7139_v43 = vld [vmem:[%s21343_s18 + $0x68] sm:$0xff] }
 0xb0f   : > { %v13140_v61 = vpop.f32.mrf.mxu0  ;;  %13767 = vlog2.f32 %v6149_v63  ;;  %v13758_v57 = vpop.eup %13757  ;;  %13345 = vmatprep.subr.mxu1 %v21662_v1  ;;  %v6153_v50 = vmul.f32 %v13756_v18, %v5926_v8 }
 0xb10   : > { %13769 = vrcp.f32 %v6055_v40  ;;  %v13760_v55 = vpop.eup %13759  ;;  %13346 = vmatpush3.msra.mxu1 %v7140_v28  ;;  %v6269_v40 = vmul.f32 0.6931472, %v13758_v57  ;;  %v7137_v57 = vld [vmem:[%s21343_s18 + $0x58] sm:$0xff] }
 0xb11   : > { %v18677_v35 = vpop.f32.mrf.mxu0  ;;  %13771 = vlog2.f32 %v6151_v5  ;;  %13347 = vmatprep.subr.mxu1 %v21662_v1  ;;  %v6271_v8 = vmul.f32 0.6931472, %v13760_v55  ;;  %v7136_v55 = vld [vmem:[%s21343_s18 + $0x50] sm:$0xff] }
 0xb12   : > { %13773 = vrcp.f32 %v6056_v25  ;;  %13348 = vmatpush3.msra.mxu1 %v7139_v43  ;;  %v5929_v43 = vmax.f32 %v18669_v36, 1e-05  ;;  %v7134_v36 = vld [vmem:[%s21343_s18 + $0x40] sm:$0xff] }
 0xb13   : > { %v13143_v17 = vpop.f32.mrf.mxu0  ;;  %13349 = vmatprep.subr.mxu1 %v21662_v1  ;;  %13775 = vlog2.f32 %v6153_v50 }
 0xb14   : > { %v13762_v17 = vpop.eup %13761  ;;  %13350 = vmatpush3.msra.mxu1 %v7138_v14 }
 0xb15   : > { %v18681_v48 = vpop.f32.mrf.mxu0  ;;  %v6155_v25 = vmul.f32 %v13762_v17, %v5927_v38  ;;  %13351 = vmatprep.subr.mxu1 %v21662_v1 }
 0xb16   : > { %13352 = vmatpush3.msra.mxu1 %v7137_v57 }
 0xb17   : > { %v13146_v15 = vpop.f32.mrf.mxu0  ;;  %13353 = vmatprep.subr.mxu1 %v21662_v1  ;;  %13777 = vlog2.f32 %v6155_v25 }
 0xb18   : > { %v5928_v15 = vmax.f32 %v18661_v62, 1e-05  ;;  %13354 = vmatpush3.msra.mxu1 %v7136_v55 }
 0xb19   : > { %v18684_v61 = vpop.f32.mrf.mxu0  ;;  %v13764_v5 = vpop.eup %13763  ;;  %13355 = vmatprep.subr.mxu1 %v21662_v1 }
 0xb1a   : > { %v13766_v18 = vpop.eup %13765 }
 0xb1b   : > { %v13149_v49 = vpop.f32.mrf.mxu0  ;;  %v6273_v17 = vmul.f32 0.6931472, %v13766_v18 }
 0xb1c   : > { %v13768_v50 = vpop.eup %13767 }
 0xb1d   : > { %v5546_v63 = vpop.f32.mrf.mxu0  ;;  %v6275_v18 = vmul.f32 0.6931472, %v13768_v50 }
 0xb1e   : > { %v5547_v10 = vadd.f32 %v18544_v19, %v5546_v63  ;;  %v6157_v63 = vmul.f32 %v13764_v5, %v5928_v15 }
 0xb1f   : > { %v13152_v4 = vpop.f32.mrf.mxu0 }
 0xb20   : > { %v18708_v62 = vadd.f32 %v6269_v40, %v5547_v10  ;;  %v13770_v10 = vpop.eup %13769  ;;  %v7135_v4 = vld [vmem:[%s21343_s18 + $0x48] sm:$0xff]  ;;  %13779 = vlog2.f32 %v6157_v63  ;;  %v7133_v63 = vld [vmem:[%s21343_s18 + $0x38] sm:$0xff] }
 0xb21   : > { %v5551_v0 = vpop.f32.mrf.mxu0  ;;  %13356 = vmatpush3.msra.mxu1 %v7135_v4  ;;  %v13772_v25 = vpop.eup %13771  ;;  %v6159_v57 = vmul.f32 %v13770_v10, %v5929_v43  ;;  %v7132_v10 = vld [vmem:[%s21343_s18 + $0x30] sm:$0xff] }
 0xb22   : > { %21927 = vst [vmem:[#allocation58_spill] sm:$0xff] %v18708_v62  ;;  %v5552_v49 = vadd.f32 %v18544_v19, %v5551_v0  ;;  %v21581_v15 = vrot.slane %v18708_v62, 4  ;;  %13357 = vmatprep.subr.mxu1 %v21662_v1  ;;  %v13774_v55 = vpop.eup %13773 }
 0xb23   : > { %v13155_v28 = vpop.f32.mrf.mxu0  ;;  %13358 = vmatpush3.msra.mxu1 %v7134_v36  ;;  %13781 = vlog2.f32 %v6159_v57 }
 0xb24   : > { %v6363_v38 = vadd.f32 %v6271_v8, %v5552_v49  ;;  %v5930_v49 = vmax.f32 %v18675_v56, 1e-05  ;;  %13359 = vmatprep.subr.mxu1 %v21662_v1  ;;  %v6277_v56 = vmul.f32 0.6931472, %v13772_v25  ;;  %v7131_v25 = vld [vmem:[%s21343_s18 + $0x28] sm:$0xff] }
 0xb25   : > { %v5556_v40 = vpop.f32.mrf.mxu0  ;;  %13360 = vmatpush3.msra.mxu1 %v7133_v63 }
 0xb26   : > { %v6516_v14 = vrot.slane %v6363_v38, 4  ;;  %v5557_v5 = vadd.f32 %v18544_v19, %v5556_v40  ;;  %13361 = vmatprep.subr.mxu1 %v21662_v1  ;;  %v6161_v4 = vmul.f32 %v13774_v55, %v5930_v49 }
 0xb27   : > { %v13158_v8 = vpop.f32.mrf.mxu0  ;;  %13362 = vmatpush3.msra.mxu1 %v7132_v10 }
 0xb28   : > { %v6364_v0 = vadd.f32 %v6273_v17, %v5557_v5  ;;  %v18730_v28 = vsel %vm6404_vm6, %v21581_v15, %v6516_v14  ;;  %v13776_v8 = vpop.eup %13775  ;;  %13363 = vmatprep.subr.mxu1 %v21662_v1  ;;  %13783 = vlog2.f32 %v6161_v4 }
 0xb29   : > { %21928 = vst [vmem:[#allocation59_spill] sm:$0xff] %v18730_v28  ;;  %v5561_v50 = vpop.f32.mrf.mxu0  ;;  %13364 = vmatpush3.msra.mxu1 %v7131_v25  ;;  %v6279_v57 = vmul.f32 0.6931472, %v13776_v8  ;;  %v13778_v55 = vpop.eup %13777 }
 0xb2a   : > { %v6518_v38 = vrot.slane %v6364_v0, 4  ;;  %v5562_v17 = vadd.f32 %v18544_v19, %v5561_v50  ;;  %13365 = vmatprep.subr.mxu1 %v21662_v1  ;;  %v6281_v25 = vmul.f32 0.6931472, %v13778_v55 }
 0xb2b   : > { %v13161_v43 = vpop.f32.mrf.mxu0 }
 0xb2c   : > { %v6365_v40 = vadd.f32 %v6275_v18, %v5562_v17  ;;  %v18742_v5 = vsel %vm6404_vm6, %v6516_v14, %v6518_v38  ;;  %v7130_v14 = vld [vmem:[%s21343_s18 + $0x20] sm:$0xff]  ;;  %v7129_v43 = vld [vmem:[%s21343_s18 + $0x18] sm:$0xff] }
 0xb2d   : > { %21929 = vst [vmem:[#allocation61_spill] sm:$0xff] %v18742_v5  ;;  %v5566_v36 = vpop.f32.mrf.mxu0  ;;  %13366 = vmatpush3.msra.mxu1 %v7130_v14  ;;  %v13780_v4 = vpop.eup %13779  ;;  %v7126_v14 = vld [vmem:[%s21343_s18] sm:$0xff] }
 0xb2e   : > { %v6520_v0 = vrot.slane %v6365_v40, 4  ;;  %v5567_v50 = vadd.f32 %v18544_v19, %v5566_v36  ;;  %13367 = vmatprep.subr.mxu1 %v21662_v1  ;;  %v6283_v55 = vmul.f32 0.6931472, %v13780_v4 }
 0xb2f   : > { %v13164_v63 = vpop.f32.mrf.mxu0  ;;  %13368 = vmatpush3.msra.mxu1 %v7129_v43 }
 0xb30   : > { %v6366_v18 = vadd.f32 %v6277_v56, %v5567_v50  ;;  %v18754_v49 = vsel %vm6404_vm6, %v6518_v38, %v6520_v0  ;;  %13369 = vmatprep.subr.mxu1 %v21662_v1  ;;  %v7128_v38 = vld [vmem:[%s21343_s18 + $0x10] sm:$0xff]  ;;  %v7127_v56 = vld [vmem:[%s21343_s18 + $0x8] sm:$0xff] }
 0xb31   : > { %21930 = vst [vmem:[#allocation63_spill] sm:$0xff] %v18754_v49  ;;  %v5571_v17 = vpop.f32.mrf.mxu0  ;;  %13370 = vmatpush3.msra.mxu1 %v7128_v38 }
 0xb32   : > { %v6522_v10 = vrot.slane %v6366_v18, 4  ;;  %v5572_v40 = vadd.f32 %v18544_v19, %v5571_v17  ;;  %13371 = vmatprep.subr.mxu1 %v21662_v1 }
 0xb33   : > { %v13167_v36 = vpop.f32.mrf.mxu0  ;;  %13372 = vmatpush3.msra.mxu1 %v7127_v56 }
 0xb34   : > { %v6367_v8 = vadd.f32 %v6279_v57, %v5572_v40  ;;  %v18769_v50 = vsel %vm6404_vm6, %v6520_v0, %v6522_v10  ;;  %13373 = vmatprep.subr.mxu1 %v21662_v1  ;;  %v13782_v40 = vpop.eup %13781 }
 0xb35   : > { %21931 = vst [vmem:[#allocation65_spill] sm:$0xff] %v18769_v50  ;;  %v5576_v63 = vpop.f32.mrf.mxu0  ;;  %13374 = vmatpush3.msra.mxu1 %v7126_v14  ;;  %v13784_v4 = vpop.eup %13783 }
 0xb36   : > { %v6524_v18 = vrot.slane %v6367_v8, 4  ;;  %v5577_v17 = vadd.f32 %v18544_v19, %v5576_v63  ;;  %13408 = vmatprep.subr.mxu1 %v21662_v1  ;;  %v5753_v63 = vld [vmem:[%s18272_s5 + $0x1a8] sm:$0xff] }
 0xb37   : > { %v13170_v43 = vpop.f32.mrf.mxu0  ;;  %v5816_v31 = vmax.f32 %v5753_v63, 0.0 }
 0xb38   : > { %v6368_v57 = vadd.f32 %v6281_v25, %v5577_v17  ;;  %v18778_v0 = vsel %vm6404_vm6, %v6522_v10, %v6524_v18  ;;  %v6285_v43 = vmul.f32 0.6931472, %v13782_v40  ;;  %v5755_v40 = vld [vmem:[%s18272_s5 + $0x1b8] sm:$0xff] }
 0xb39   : > { %v5581_v36 = vpop.f32.mrf.mxu0  ;;  %v18793_v28 = vmin.f32 %v5816_v31, 1.0 }
 0xb3a   : > { %v6526_v38 = vrot.slane %v6368_v57, 4  ;;  %v5582_v8 = vadd.f32 %v18544_v19, %v5581_v36  ;;  %v5817_v57 = vmax.f32 %v5754_v33, 0.0  ;;  %v6287_v36 = vmul.f32 0.6931472, %v13784_v4  ;;  %v5756_v33 = vld [vmem:[%s18272_s5 + $0x1c0] sm:$0xff] }
 0xb3b   : > { %v13173_v15 = vpop.f32.mrf.mxu0 }
 0xb3c   : > { %v6369_v56 = vadd.f32 %v6283_v55, %v5582_v8  ;;  %v18785_v25 = vsel %vm6404_vm6, %v6524_v18, %v6526_v38  ;;  %v18795_v46 = vmin.f32 %v5817_v57, 1.0 }
 0xb3d   : > { %v5586_v14 = vpop.f32.mrf.mxu0 }
 0xb3e   : > { %v6528_v10 = vrot.slane %v6369_v56, 4  ;;  %v5587_v17 = vadd.f32 %v18544_v19, %v5586_v14  ;;  %v6006_v31 = vsub.f32 1.0, %v18795_v46 }
 0xb3f   : > { %v13176_v26 = vpop.f32.mrf.mxu0 }
 0xb40   : > { %v6370_v62 = vadd.f32 %v6285_v43, %v5587_v17  ;;  %v18789_v15 = vsel %vm6404_vm6, %v6526_v38, %v6528_v10  ;;  %v5818_v26 = vmax.f32 %v5755_v40, 0.0  ;;  %v5819_v17 = vmax.f32 %v5756_v33, 0.0 }
 0xb41   : > { %v5591_v55 = vpop.f32.mrf.mxu0 }
 0xb42   : > { %v6530_v8 = vrot.slane %v6370_v62, 4  ;;  %v5592_v18 = vadd.f32 %v18544_v19, %v5591_v55  ;;  %v6005_v62 = vsub.f32 1.0, %v18793_v28  ;;  %v18808_v57 = vmin.f32 %v5818_v26, 1.0  ;;  %v5758_v26 = vld [vmem:[%s18272_s5 + $0x1d0] sm:$0xff] }
 0xb43   : > { %v13179_v56 = vpop.f32.mrf.mxu0  ;;  %v5821_v60 = vmax.f32 %v5758_v26, 0.0 }
 0xb44   : > { %v18797_v14 = vadd.f32 %v6287_v36, %v5592_v18  ;;  %v18801_v63 = vsel %vm6404_vm6, %v6528_v10, %v6530_v8  ;;  %v5757_v36 = vld [vmem:[%s18272_s5 + $0x1c8] sm:$0xff]  ;;  %v6068_v40 = vmax.f32 %v6005_v62, 1e-05  ;;  %v6069_v56 = vmax.f32 %v6006_v31, 1e-05  ;;  %v5759_v31 = vld [vmem:[%s18272_s5 + $0x1d8] sm:$0xff] }
 0xb45   : > { %v18803_v38 = vpop.f32.mrf.mxu0  ;;  %v6007_v7 = vsub.f32 1.0, %v18808_v57 }
 0xb46   : > { %21932 = vst [vmem:[#allocation67_spill] sm:$0xff] %v18803_v38  ;;  %v21583_v43 = vrot.slane %v18797_v14, 4  ;;  %v18818_v38 = vmin.f32 %v5819_v17, 1.0  ;;  %13785 = vrcp.f32 %v6068_v40  ;;  %v5822_v40 = vmax.f32 %v5759_v31, 0.0 }
 0xb47   : > { %v13182_v4 = vpop.f32.mrf.mxu0  ;;  %13787 = vrcp.f32 %v6069_v56  ;;  %v6070_v62 = vmax.f32 %v6007_v7, 1e-05  ;;  %v5943_v31 = vmax.f32 %v18795_v46, 1e-05 }
 0xb48   : > { %v18814_v55 = vsel %vm6404_vm6, %v6530_v8, %v21583_v43  ;;  %v5820_v4 = vmax.f32 %v5757_v36, 0.0  ;;  %v6008_v8 = vsub.f32 1.0, %v18818_v38  ;;  %v18837_v52 = vmin.f32 %v5822_v40, 1.0  ;;  %v5762_v40 = vld [vmem:[%s18272_s5 + $0x1f0] sm:$0xff] }
 0xb49   : > { %v18816_v10 = vpop.f32.mrf.mxu0  ;;  %13789 = vrcp.f32 %v6070_v62  ;;  %v5942_v62 = vmax.f32 %v18793_v28, 1e-05  ;;  %v5944_v28 = vmax.f32 %v18808_v57, 1e-05  ;;  %v5945_v29 = vmax.f32 %v18818_v38, 1e-05 }
 0xb4a   : > { %21933 = vst [vmem:[#allocation69_spill] sm:$0xff] %v18816_v10  ;;  %v18825_v43 = vmin.f32 %v5820_v4, 1.0  ;;  %v6071_v36 = vmax.f32 %v6008_v8, 1e-05  ;;  %v5761_v8 = vld [vmem:[%s18272_s5 + $0x1e8] sm:$0xff] }
 0xb4b   : > { %v13185_v18 = vpop.f32.mrf.mxu0 }
 0xb4c   : > { %v6009_v16 = vsub.f32 1.0, %v18825_v43  ;;  %13791 = vrcp.f32 %v6071_v36  ;;  %v6011_v36 = vsub.f32 1.0, %v18837_v52 }
 0xb4d   : > { %v18821_v33 = vpop.f32.mrf.mxu0 }
 0xb4e   : > { %21934 = vst [vmem:[#allocation71_spill] sm:$0xff] %v18821_v33  ;;  %v18831_v33 = vmin.f32 %v5821_v60, 1.0  ;;  %v6072_v4 = vmax.f32 %v6009_v16, 1e-05  ;;  %v6074_v46 = vmax.f32 %v6011_v36, 1e-05 }
 0xb4f   : > { %v13188_v49 = vpop.f32.mrf.mxu0 }
 0xb50   : > { %v5760_v49 = vld [vmem:[%s18272_s5 + $0x1e0] sm:$0xff]  ;;  %v6010_v26 = vsub.f32 1.0, %v18831_v33  ;;  %13793 = vrcp.f32 %v6072_v4 }
 0xb51   : > { %v18827_v18 = vpop.f32.mrf.mxu0  ;;  %v5823_v7 = vmax.f32 %v5760_v49, 0.0  ;;  %v5824_v49 = vmax.f32 %v5761_v8, 0.0 }
 0xb52   : > { %21935 = vst [vmem:[#allocation73_spill] sm:$0xff] %v18827_v18  ;;  %v6073_v16 = vmax.f32 %v6010_v26, 1e-05 }
 0xb53   : > { %v13191_v17 = vpop.f32.mrf.mxu0  ;;  %v13786_v60 = vpop.eup %13785  ;;  %v18852_v4 = vmin.f32 %v5824_v49, 1.0  ;;  %v5946_v49 = vmax.f32 %v18825_v43, 1e-05 }
 0xb54   : > { %v6185_v32 = vmul.f32 %v13786_v60, %v5942_v62  ;;  %13795 = vrcp.f32 %v6073_v16 }
 0xb55   : > { %v18834_v56 = vpop.f32.mrf.mxu0  ;;  %v6013_v57 = vsub.f32 1.0, %v18852_v4 }
 0xb56   : > { %21936 = vst [vmem:[#allocation75_spill] sm:$0xff] %v18834_v56  ;;  %v18844_v56 = vmin.f32 %v5823_v7, 1.0  ;;  %v5825_v7 = vmax.f32 %v5762_v40, 0.0  ;;  %13797 = vlog2.f32 %v6185_v32 }
 0xb57   : > { %v13194_v58 = vpop.f32.mrf.mxu0 }
 0xb58   : > { %v13788_v58 = vpop.eup %13787 }
 0xb59   : > { %v18839_v17 = vpop.f32.mrf.mxu0  ;;  %v6187_v5 = vmul.f32 %v13788_v58, %v5943_v31  ;;  %v13790_v51 = vpop.eup %13789  ;;  %v18858_v31 = vmin.f32 %v5825_v7, 1.0 }
 0xb5a   : > { %v6189_v60 = vmul.f32 %v13790_v51, %v5944_v28 }
 0xb5b   : > { %v13197_v2 = vpop.f32.mrf.mxu0  ;;  %13799 = vlog2.f32 %v6187_v5  ;;  %v6076_v5 = vmax.f32 %v6013_v57, 1e-05  ;;  %v6014_v38 = vsub.f32 1.0, %v18858_v31 }
 0xb5c   : > { %v6012_v2 = vsub.f32 1.0, %v18844_v56  ;;  %13801 = vrcp.f32 %v6074_v46 }
 0xb5d   : > { %v18847_v10 = vpop.f32.mrf.mxu0  ;;  %v6077_v46 = vmax.f32 %v6014_v38, 1e-05 }
 0xb5e   : > { %v6075_v62 = vmax.f32 %v6012_v2, 1e-05  ;;  %v5947_v2 = vmax.f32 %v18831_v33, 1e-05  ;;  %v5949_v33 = vmax.f32 %v18844_v56, 1e-05 }
 0xb5f   : > { %v13200_v20 = vpop.f32.mrf.mxu0 }
 0xb60   : > { %v13792_v20 = vpop.eup %13791  ;;  %13803 = vrcp.f32 %v6075_v62 }
 0xb61   : > { %v18854_v26 = vpop.f32.mrf.mxu0  ;;  %v6191_v36 = vmul.f32 %v13792_v20, %v5945_v29  ;;  %v13794_v32 = vpop.eup %13793  ;;  %13805 = vlog2.f32 %v6189_v60  ;;  %v5948_v60 = vmax.f32 %v18837_v52, 1e-05 }
 0xb62   : > { %v6193_v28 = vmul.f32 %v13794_v32, %v5946_v49  ;;  %v13796_v7 = vpop.eup %13795 }
 0xb63   : > { %v13203_v8 = vpop.f32.mrf.mxu0  ;;  %13807 = vlog2.f32 %v6191_v36  ;;  %v13798_v29 = vpop.eup %13797  ;;  %v6195_v20 = vmul.f32 %v13796_v7, %v5947_v2 }
 0xb64   : > { %13809 = vrcp.f32 %v6076_v5  ;;  %v6311_v49 = vmul.f32 0.6931472, %v13798_v29  ;;  %v5950_v29 = vmax.f32 %v18852_v4, 1e-05  ;;  %v5951_v4 = vmax.f32 %v18858_v31, 1e-05 }
 0xb65   : > { %v18860_v58 = vpop.f32.mrf.mxu0  ;;  %13811 = vlog2.f32 %v6193_v28 }
 0xb66   : > { %13813 = vrcp.f32 %v6077_v46 }
 0xb67   : > { %v13206_v16 = vpop.f32.mrf.mxu0  ;;  %13815 = vlog2.f32 %v6195_v20 }
 0xb68   : > { %v13800_v62 = vpop.eup %13799 }
 0xb69   : > { %v18864_v40 = vpop.f32.mrf.mxu0  ;;  %v13802_v57 = vpop.eup %13801  ;;  %v6313_v38 = vmul.f32 0.6931472, %v13800_v62 }
 0xb6b   : > { %v13209_v51 = vpop.f32.mrf.mxu0 }
 0xb6c   : > { %v6197_v51 = vmul.f32 %v13802_v57, %v5948_v60  ;;  %v18880_v60 = vld [vmem:[%s21340_s15] ss:$0 sm:$0xff] }
 0xb6d   : > { %v18867_v8 = vpop.f32.mrf.mxu0  ;;  %v13804_v5 = vpop.eup %13803 }
 0xb6e   : > { %v13806_v18 = vpop.eup %13805  ;;  %v6199_v46 = vmul.f32 %v13804_v5, %v5949_v33  ;;  %13817 = vlog2.f32 %v6197_v51 }
 0xb6f   : > { %v13212_v43 = vpop.f32.mrf.mxu0  ;;  %v6315_v50 = vmul.f32 0.6931472, %v13806_v18 }
 0xb70   : > { %v13808_v7 = vpop.eup %13807  ;;  %13819 = vlog2.f32 %v6199_v46 }
 0xb71   : > { %v5651_v16 = vpop.f32.mrf.mxu0 }
 0xb72   : > { %v5652_v36 = vadd.f32 %v18544_v19, %v5651_v16  ;;  %v13810_v16 = vpop.eup %13809 }
 0xb73   : > { %v13215_v32 = vpop.f32.mrf.mxu0 }
 0xb74   : > { %v18872_v28 = vadd.f32 %v6311_v49, %v5652_v36  ;;  %v6317_v36 = vmul.f32 0.6931472, %v13808_v7  ;;  %v13812_v49 = vpop.eup %13811  ;;  %v6201_v32 = vmul.f32 %v13810_v16, %v5950_v29 }
 0xb75   : > { %v5656_v43 = vpop.f32.mrf.mxu0 }
 0xb76   : > { %21937 = vst [vmem:[#allocation77_spill] sm:$0xff] %v18872_v28  ;;  %v5657_v2 = vadd.f32 %v18544_v19, %v5656_v43  ;;  %v21585_v62 = vrot.slane %v18872_v28, 4  ;;  %13821 = vlog2.f32 %v6201_v32 }
 0xb77   : > { %v13218_v52 = vpop.f32.mrf.mxu0 }
 0xb78   : > { %v6384_v24 = vadd.f32 %v6313_v38, %v5657_v2  ;;  %v6319_v2 = vmul.f32 0.6931472, %v13812_v49 }
 0xb79   : > { %v5661_v56 = vpop.f32.mrf.mxu0 }
 0xb7a   : > { %v6624_v20 = vrot.slane %v6384_v24, 4  ;;  %v5662_v19 = vadd.f32 %v18880_v60, %v5661_v56  ;;  %v13814_v24 = vpop.eup %13813 }
 0xb7b   : > { %v13221_v57 = vpop.f32.mrf.mxu0  ;;  %v6203_v46 = vmul.f32 %v13814_v24, %v5951_v4  ;;  %v13816_v7 = vpop.eup %13815 }
 0xb7c   : > { %v6385_v18 = vadd.f32 %v6315_v50, %v5662_v19  ;;  %v18887_v33 = vsel %vm6404_vm6, %v21585_v62, %v6624_v20  ;;  %v6321_v57 = vmul.f32 0.6931472, %v13816_v7 }
 0xb7d   : > { %21938 = vst [vmem:[#allocation79_spill] sm:$0xff] %v18887_v33  ;;  %v5666_v5 = vpop.f32.mrf.mxu0  ;;  %13823 = vlog2.f32 %v6203_v46 }
 0xb7e   : > { %v6626_v38 = vrot.slane %v6385_v18, 4  ;;  %v5667_v51 = vadd.f32 %v18880_v60, %v5666_v5  ;;  %v13818_v5 = vpop.eup %13817 }
 0xb7f   : > { %v13224_v43 = vpop.f32.mrf.mxu0 }
 0xb80   : > { %v6386_v52 = vadd.f32 %v6317_v36, %v5667_v51  ;;  %v18891_v50 = vsel %vm6404_vm6, %v6624_v20, %v6626_v38  ;;  %v13820_v20 = vpop.eup %13819  ;;  %v6323_v51 = vmul.f32 0.6931472, %v13818_v5 }
 0xb81   : > { %21939 = vst [vmem:[#allocation60_spill] sm:$0xff] %v18891_v50  ;;  %v5671_v31 = vpop.f32.mrf.mxu0 }
 0xb82   : > { %v6628_v29 = vrot.slane %v6386_v52, 4  ;;  %v5672_v16 = vadd.f32 %v18880_v60, %v5671_v31 }
 0xb83   : > { %v13227_v56 = vpop.f32.mrf.mxu0 }
 0xb84   : > { %v6387_v19 = vadd.f32 %v6319_v2, %v5672_v16  ;;  %v18895_v18 = vsel %vm6404_vm6, %v6626_v38, %v6628_v29  ;;  %v6325_v38 = vmul.f32 0.6931472, %v13820_v20  ;;  %v13822_v56 = vpop.eup %13821 }
 0xb85   : > { %21940 = vst [vmem:[#allocation62_spill] sm:$0xff] %v18895_v18  ;;  %v5676_v49 = vpop.f32.mrf.mxu0 }
 0xb86   : > { %v6630_v36 = vrot.slane %v6387_v19, 4  ;;  %v5677_v32 = vadd.f32 %v18880_v60, %v5676_v49 }
 0xb87   : > { %v13230_v4 = vpop.f32.mrf.mxu0 }
 0xb88   : > { %v6388_v24 = vadd.f32 %v6321_v57, %v5677_v32  ;;  %v18899_v43 = vsel %vm6404_vm6, %v6628_v29, %v6630_v36  ;;  %v6327_v32 = vmul.f32 0.6931472, %v13822_v56 }
 0xb89   : > { %21941 = vst [vmem:[#allocation64_spill] sm:$0xff] %v18899_v43  ;;  %v5681_v52 = vpop.f32.mrf.mxu0 }
 0xb8a   : > { %v6632_v31 = vrot.slane %v6388_v24, 4  ;;  %v5682_v2 = vadd.f32 %v18880_v60, %v5681_v52  ;;  %v13824_v24 = vpop.eup %13823 }
 0xb8b   : > { %v13233_v46 = vpop.f32.mrf.mxu0 }
 0xb8c   : > { %v6389_v7 = vadd.f32 %v6323_v51, %v5682_v2  ;;  %v18903_v16 = vsel %vm6404_vm6, %v6630_v36, %v6632_v31  ;;  %v6329_v36 = vmul.f32 0.6931472, %v13824_v24 }
 0xb8d   : > { %21942 = vst [vmem:[#allocation66_spill] sm:$0xff] %v18903_v16  ;;  %v5686_v19 = vpop.f32.mrf.mxu0 }
 0xb8e   : > { %v6634_v49 = vrot.slane %v6389_v7, 4  ;;  %v5687_v4 = vadd.f32 %v18880_v60, %v5686_v19 }
 0xb8f   : > { %v13236_v57 = vpop.f32.mrf.mxu0 }
 0xb90   : > { %v6390_v5 = vadd.f32 %v6325_v38, %v5687_v4  ;;  %v18907_v29 = vsel %vm6404_vm6, %v6632_v31, %v6634_v49 }
 0xb91   : > { %21943 = vst [vmem:[#allocation68_spill] sm:$0xff] %v18907_v29  ;;  %v5691_v62 = vpop.f32.mrf.mxu0 }
 0xb92   : > { %v6636_v52 = vrot.slane %v6390_v5, 4  ;;  %v5692_v51 = vadd.f32 %v18880_v60, %v5691_v62 }
 0xb93   : > { %v13239_v20 = vpop.f32.mrf.mxu0 }
 0xb94   : > { %v6391_v2 = vadd.f32 %v6327_v32, %v5692_v51  ;;  %v18911_v46 = vsel %vm6404_vm6, %v6634_v49, %v6636_v52 }
 0xb95   : > { %v5696_v7 = vpop.f32.mrf.mxu0 }
 0xb96   : > { %v6638_v18 = vrot.slane %v6391_v2, 4  ;;  %v5697_v19 = vadd.f32 %v18880_v60, %v5696_v7  ;;  %v7083_v2 = vlaneseq }
 0xb97   : > { %v13242_v38 = vpop.f32.mrf.mxu0 }
 0xb98   : > { %v18914_v56 = vadd.f32 %v6329_v36, %v5697_v19  ;;  %v18917_v4 = vsel %vm6404_vm6, %v6636_v52, %v6638_v18  ;;  %v18925_v7 = vshrl.u32 %v7083_v2, 7  ;;  %v14070_v2 = vld [vmem:[%s21868_s0 + $0x78] sm:$0xff] }
 0xb99   : > { %v7072_v31 = vpop.f32.mrf.mxu1  ;;  %21944 = vst [vmem:[#allocation70_spill] sm:$0xff] %v18917_v4 }
 0xb9a   : > { %v7076_v57 = vmul.f32 0.005952381, %v7072_v31  ;;  %v21586_v62 = vrot.slane %v18914_v56, 4  ;;  %v21588_v52 = vsub.s32 0, %v18925_v7  ;;  %v21587_v38 = vsub.s32 1, %v18925_v7 }
 0xb9b   : > { %v13342_v5 = vpop.f32.mrf.mxu1 }
 0xb9c   : > { %v7077_v32 = vmul.f32 %v7076_v57, %v7076_v57  ;;  %v18923_v49 = vsel %vm6404_vm6, %v6638_v18, %v21586_v62  ;;  %v18930_v19 = vrot.slane %v7076_v57, %v21588_v52 }
 0xb9e   : > { %v7079_v24 = vrot.slane %v7077_v32, 7  ;;  %v7087_v5 = vsub.f32 %v18413_v11, %v18930_v19 }
 0xba0   : > { %v7081_v51 = vsub.f32 %v7076_v57, %v7079_v24  ;;  %v7088_v24 = vsub.f32 %v18408_v12, %v18930_v19  ;;  %v7089_v57 = vsub.f32 %v18416_v3, %v18930_v19  ;;  %v14071_v12 = vld [vmem:[%s21868_s0 + $0x70] sm:$0xff]  ;;  %v7090_v3 = vsub.f32 %v18431_v42, %v18930_v19 }
 0xba1   : > { %v7091_v42 = vsub.f32 %v18444_v30, %v18930_v19  ;;  %v7092_v30 = vsub.f32 %v18459_v6, %v18930_v19  ;;  %v7093_v6 = vsub.f32 %v18469_v44, %v18930_v19  ;;  %v7094_v44 = vsub.f32 %v18483_v22, %v18930_v19 }
 0xba2   : > { %v7082_v20 = vmax.f32 %v7081_v51, 0.0  ;;  %v7095_v22 = vsub.f32 %v18493_v53, %v18930_v19  ;;  %v7096_v53 = vsub.f32 %v18508_v9, %v18930_v19  ;;  %v7097_v9 = vsub.f32 %v18526_v47, %v18930_v19 }
 0xba4   : > { %v7098_v36 = vadd.f32 1e-05, %v7082_v20 }
 0xba6   : > { %13825 = vrsqrt.f32 %v7098_v36 }
 0xbb3   : > { %v13826_v31 = vpop.eup %13825 }
 0xbb4   : > { %v18935_v18 = vrot.slane %v13826_v31, %v21587_v38  ;;  %v14072_v31 = vld [vmem:[%s21868_s0 + $0x68] sm:$0xff] }
 0xbb6   : > { %v7104_v32 = vmul.f32 %v18935_v18, %v7087_v5  ;;  %v7105_v20 = vmul.f32 %v18935_v18, %v7088_v24  ;;  %v7106_v36 = vmul.f32 %v18935_v18, %v7089_v57  ;;  %v14073_v24 = vld [vmem:[%s21868_s0 + $0x60] sm:$0xff]  ;;  %v7108_v57 = vmul.f32 %v18935_v18, %v7091_v42  ;;  %v14080_v42 = vld [vmem:[%s21868_s0 + $0x28] sm:$0xff] }
 0xbb8   : > { %v7115_v51 = vmax.f32 %v7104_v32, 0.0  ;;  %v7116_v11 = vmax.f32 %v7105_v20, 0.0  ;;  %v7117_v5 = vmax.f32 %v7106_v36, 0.0  ;;  %v7107_v32 = vmul.f32 %v18935_v18, %v7090_v3  ;;  %v14077_v3 = vld [vmem:[%s21868_s0 + $0x40] sm:$0xff] }
 0xbb9   : > { %v7119_v36 = vmax.f32 %v7108_v57, 0.0  ;;  %v14081_v57 = vld [vmem:[%s21868_s0 + $0x20] sm:$0xff] }
 0xbba   : > { %13376 = vmatmul.mubr.f32.vlgmr.msra.gmra.mxu1 %v7115_v51  ;;  %v14074_v51 = vld [vmem:[%s21868_s0 + $0x58] sm:$0xff]  ;;  %v7118_v20 = vmax.f32 %v7107_v32, 0.0  ;;  %v7110_v32 = vmul.f32 %v18935_v18, %v7093_v6  ;;  %v7113_v6 = vmul.f32 %v18935_v18, %v7096_v53 }
 0xbbb   : > { %13378 = vmatprep.mubr.msk.f32.mxu1 %vm14097_vm0, %v21662_v1  ;;  %13409 = vmatpush3.msra.mxu1 %v14070_v2  ;;  %v14075_v2 = vld [vmem:[%s21868_s0 + $0x50] sm:$0xff] }
 0xbbc   : > { %13410 = vmatprep.subr.mxu1 %v21662_v1 }
 0xbbd   : > { %13411 = vmatpush3.msra.mxu1 %v14071_v12  ;;  %v7109_v12 = vmul.f32 %v18935_v18, %v7092_v30 }
 0xbbe   : > { %13379 = vmatmul.mubr.f32.gmra.mxu1 %v7116_v11  ;;  %13412 = vmatprep.subr.mxu1 %v21662_v1  ;;  %v14076_v11 = vld [vmem:[%s21868_s0 + $0x48] sm:$0xff] }
 0xbbf   : > { %13381 = vmatprep.mubr.msk.f32.mxu1 %vm14097_vm0, %v21662_v1  ;;  %13413 = vmatpush3.msra.mxu1 %v14072_v31  ;;  %v14078_v31 = vld [vmem:[%s21868_s0 + $0x38] sm:$0xff] }
 0xbc0   : > { %13414 = vmatprep.subr.mxu1 %v21662_v1 }
 0xbc1   : > { %13415 = vmatpush3.msra.mxu1 %v14073_v24  ;;  %v14079_v24 = vld [vmem:[%s21868_s0 + $0x30] sm:$0xff] }
 0xbc2   : > { %13382 = vmatmul.mubr.f32.gmra.mxu1 %v7117_v5  ;;  %13416 = vmatprep.subr.mxu1 %v21662_v1  ;;  %v7120_v5 = vmax.f32 %v7109_v12, 0.0  ;;  %v14084_v12 = vld [vmem:[%s21868_s0 + $0x8] sm:$0xff] }
 0xbc3   : > { %13384 = vmatprep.mubr.msk.f32.mxu1 %vm14097_vm0, %v21662_v1  ;;  %13417 = vmatpush3.msra.mxu1 %v14074_v51  ;;  %v7121_v51 = vmax.f32 %v7110_v32, 0.0  ;;  %v7114_v32 = vmul.f32 %v18935_v18, %v7097_v9 }
 0xbc4   : > { %13418 = vmatprep.subr.mxu1 %v21662_v1 }
 0xbc5   : > { %13419 = vmatpush3.msra.mxu1 %v14075_v2  ;;  %v14082_v2 = vld [vmem:[%s21868_s0 + $0x18] sm:$0xff] }
 0xbc6   : > { %13385 = vmatmul.mubr.f32.gmra.mxu1 %v7118_v20  ;;  %13420 = vmatprep.subr.mxu1 %v21662_v1  ;;  %v7111_v20 = vmul.f32 %v18935_v18, %v7094_v44 }
 0xbc7   : > { %13387 = vmatprep.mubr.msk.f32.mxu1 %vm14097_vm0, %v21662_v1  ;;  %13421 = vmatpush3.msra.mxu1 %v14076_v11  ;;  %v7112_v11 = vmul.f32 %v18935_v18, %v7095_v22  ;;  %v10863_v18 = vld [vmem:[%s21344_s19] ss:$0 sm:$0xff] }
 0xbc8   : > { %13422 = vmatprep.subr.mxu1 %v21662_v1  ;;  %v7122_v30 = vmax.f32 %v7111_v20, 0.0 }
 0xbc9   : > { %13423 = vmatpush3.msra.mxu1 %v14077_v3  ;;  %v7123_v3 = vmax.f32 %v7112_v11, 0.0 }
 0xbca   : > { %13388 = vmatmul.mubr.f32.gmra.mxu1 %v7119_v36  ;;  %13424 = vmatprep.subr.mxu1 %v21662_v1  ;;  %v14083_v36 = vld [vmem:[%s21868_s0 + $0x10] sm:$0xff] }
 0xbcb   : > { %13390 = vmatprep.mubr.msk.f32.mxu1 %vm14097_vm0, %v21662_v1  ;;  %13425 = vmatpush3.msra.mxu1 %v14078_v31  ;;  %v14085_v31 = vld [vmem:[%s21868_s0] sm:$0xff] }
 0xbcc   : > { %13426 = vmatprep.subr.mxu1 %v21662_v1 }
 0xbcd   : > { %13427 = vmatpush3.msra.mxu1 %v14079_v24  ;;  %v7125_v24 = vmax.f32 %v7114_v32, 0.0 }
 0xbce   : > { %13391 = vmatmul.mubr.f32.gmra.mxu1 %v7120_v5  ;;  %13428 = vmatprep.subr.mxu1 %v21662_v1  ;;  %v7124_v5 = vmax.f32 %v7113_v6, 0.0 }
 0xbcf   : > { %13393 = vmatprep.mubr.msk.f32.mxu1 %vm14097_vm0, %v21662_v1  ;;  %13429 = vmatpush3.msra.mxu1 %v14080_v42 }
 0xbd0   : > { %13430 = vmatprep.subr.mxu1 %v21662_v1 }
 0xbd1   : > { %13431 = vmatpush3.msra.mxu1 %v14081_v57 }
 0xbd2   : > { %13394 = vmatmul.mubr.f32.gmra.mxu1 %v7121_v51  ;;  %13432 = vmatprep.subr.mxu1 %v21662_v1 }
 0xbd3   : > { %13396 = vmatprep.mubr.msk.f32.mxu1 %vm14097_vm0, %v21662_v1  ;;  %13433 = vmatpush3.msra.mxu1 %v14082_v2 }
 0xbd4   : > { %13434 = vmatprep.subr.mxu1 %v21662_v1 }
 0xbd5   : > { %13435 = vmatpush3.msra.mxu1 %v14083_v36 }
 0xbd6   : > { %13397 = vmatmul.mubr.f32.gmra.mxu1 %v7122_v30  ;;  %13436 = vmatprep.subr.mxu1 %v21662_v1 }
 0xbd7   : > { %13399 = vmatprep.mubr.msk.f32.mxu1 %vm14097_vm0, %v21662_v1  ;;  %13437 = vmatpush3.msra.mxu1 %v14084_v12 }
 0xbd8   : > { %13438 = vmatprep.subr.mxu1 %v21662_v1 }
 0xbd9   : > { %13439 = vmatpush3.msra.mxu1 %v14085_v31 }
 0xbda   : > { %13400 = vmatmul.mubr.f32.gmra.mxu1 %v7123_v3  ;;  %13443 = vmatprep.subr.mxu1 %v21662_v1 }
 0xbdb   : > { %13402 = vmatprep.mubr.msk.f32.mxu1 %vm14097_vm0, %v21662_v1 }
 0xbde   : > { %13403 = vmatmul.mubr.f32.gmra.mxu1 %v7124_v5 }
 0xbdf   : > { %13405 = vmatprep.mubr.msk.f32.mxu1 %vm14097_vm0, %v21662_v1 }
 0xbe2   : > { %13406 = vmatmul.mubr.f32.gmra.mxu1 %v7125_v24 }
 0xbe3   : > { %13440 = vmatprep.mubr.msk.f32.mxu1 %vm14097_vm0, %v21662_v1 }
 0xc7a   : > { %v7215_v44 = vpop.f32.mrf.mxu1 }
 0xc7b   : > { %v19061_v53 = vadd.f32 %v10863_v18, %v7215_v44 }
 0xc7c   : > { %v13377_v42 = vpop.f32.mrf.mxu1 }
 0xc7d   : > { %v7286_v5 = vmul.f32 %v19061_v53, %v19061_v53 }
 0xc7e   : > { %v7220_v47 = vpop.f32.mrf.mxu1 }
 0xc7f   : > { %v19059_v11 = vadd.f32 %v10863_v18, %v7220_v47 }
 0xc80   : > { %v13380_v19 = vpop.f32.mrf.mxu1 }
 0xc81   : > { %v7287_v6 = vmul.f32 %v19059_v11, %v19059_v11  ;;  %v7269_v32 = vadd.f32 %v19059_v11, %v19061_v53 }
 0xc82   : > { %v7225_v51 = vpop.f32.mrf.mxu1 }
 0xc83   : > { %v19063_v12 = vadd.f32 %v10863_v18, %v7225_v51  ;;  %v7297_v47 = vadd.f32 %v7287_v6, %v7286_v5 }
 0xc84   : > { %v13383_v20 = vpop.f32.mrf.mxu1 }
 0xc85   : > { %v7288_v24 = vmul.f32 %v19063_v12, %v19063_v12  ;;  %v7270_v19 = vadd.f32 %v7269_v32, %v19063_v12 }
 0xc86   : > { %v7230_v57 = vpop.f32.mrf.mxu1 }
 0xc87   : > { %v19067_v31 = vadd.f32 %v10863_v18, %v7230_v57 }
 0xc88   : > { %v13386_v22 = vpop.f32.mrf.mxu1 }
 0xc89   : > { %v7289_v51 = vmul.f32 %v19067_v31, %v19067_v31  ;;  %v7298_v22 = vadd.f32 %v7297_v47, %v7288_v24 }
 0xc8a   : > { %v7235_v2 = vpop.f32.mrf.mxu1 }
 0xc8b   : > { %v19075_v44 = vadd.f32 %v10863_v18, %v7235_v2  ;;  %v7299_v38 = vadd.f32 %v7298_v22, %v7289_v51 }
 0xc8c   : > { %v13389_v30 = vpop.f32.mrf.mxu1 }
 0xc8d   : > { %v7271_v30 = vadd.f32 %v7270_v19, %v19067_v31 }
 0xc8e   : > { %v7240_v36 = vpop.f32.mrf.mxu1 }
 0xc8f   : > { %v19080_v20 = vadd.f32 %v10863_v18, %v7240_v36  ;;  %v7272_v6 = vadd.f32 %v7271_v30, %v19075_v44 }
 0xc90   : > { %v13392_v3 = vpop.f32.mrf.mxu1 }
 0xc91   : > { %v7290_v3 = vmul.f32 %v19075_v44, %v19075_v44  ;;  %v7291_v5 = vmul.f32 %v19080_v20, %v19080_v20  ;;  %v7273_v24 = vadd.f32 %v7272_v6, %v19080_v20 }
 0xc92   : > { %v7245_v9 = vpop.f32.mrf.mxu1 }
 0xc93   : > { %v19085_v62 = vadd.f32 %v10863_v18, %v7245_v9 }
 0xc94   : > { %v13395_v42 = vpop.f32.mrf.mxu1 }
 0xc95   : > { %v7300_v42 = vadd.f32 %v7299_v38, %v7290_v3  ;;  %v7292_v47 = vmul.f32 %v19085_v62, %v19085_v62  ;;  %v7274_v51 = vadd.f32 %v7273_v24, %v19085_v62 }
 0xc96   : > { %v7250_v57 = vpop.f32.mrf.mxu1 }
 0xc97   : > { %v19090_v32 = vadd.f32 %v10863_v18, %v7250_v57  ;;  %v7301_v52 = vadd.f32 %v7300_v42, %v7291_v5 }
 0xc98   : > { %v13398_v2 = vpop.f32.mrf.mxu1 }
 0xc99   : > { %v7293_v22 = vmul.f32 %v19090_v32, %v19090_v32  ;;  %v7302_v57 = vadd.f32 %v7301_v52, %v7292_v47  ;;  %v7275_v38 = vadd.f32 %v7274_v51, %v19090_v32 }
 0xc9a   : > { %v7255_v36 = vpop.f32.mrf.mxu1 }
 0xc9b   : > { %v19095_v19 = vadd.f32 %v10863_v18, %v7255_v36  ;;  %v7303_v16 = vadd.f32 %v7302_v57, %v7293_v22 }
 0xc9c   : > { %v13401_v9 = vpop.f32.mrf.mxu1 }
 0xc9d   : > { %v7294_v3 = vmul.f32 %v19095_v19, %v19095_v19  ;;  %v7276_v36 = vadd.f32 %v7275_v38, %v19095_v19 }
 0xc9e   : > { %v7260_v30 = vpop.f32.mrf.mxu1 }
 0xc9f   : > { %v19100_v2 = vadd.f32 %v10863_v18, %v7260_v30  ;;  %v7304_v9 = vadd.f32 %v7303_v16, %v7294_v3 }
 0xca0   : > { %v13404_v6 = vpop.f32.mrf.mxu1 }
 0xca1   : > { %v7295_v5 = vmul.f32 %v19100_v2, %v19100_v2  ;;  %v7277_v30 = vadd.f32 %v7276_v36, %v19100_v2 }
 0xca2   : > { %v7265_v42 = vpop.f32.mrf.mxu1 }
 0xca3   : > { %v19108_v24 = vadd.f32 %v10863_v18, %v7265_v42  ;;  %v7305_v51 = vadd.f32 %v7304_v9, %v7295_v5  ;;  %v7450_v5 = vld [vmem:[%s21345_s20 + $0x78] sm:$0xff]  ;;  %v7443_v9 = vld [vmem:[%s21345_s20 + $0x40] sm:$0xff] }
 0xca4   : > { %v13407_v4 = vpop.f32.mrf.mxu1 }
 0xca5   : > { %v7278_v52 = vsel %vm6404_vm6, %v19108_v24, 0.0  ;;  %v7296_v47 = vmul.f32 %v19108_v24, %v19108_v24 }
 0xca6   : > { %v7279_v22 = vadd.f32 %v7278_v52, %v7277_v30  ;;  %v7442_v30 = vld [vmem:[%s21345_s20 + $0x38] sm:$0xff]  ;;  %v7441_v52 = vld [vmem:[%s21345_s20 + $0x30] sm:$0xff] }
 0xca7   : > { %v7306_v57 = vsel %vm6404_vm6, %v7296_v47, 0.0  ;;  %v7440_v47 = vld [vmem:[%s21345_s20 + $0x28] sm:$0xff] }
 0xca8   : > { %v7280_v38 = vrot.slane %v7279_v22, 4  ;;  %v7307_v6 = vadd.f32 %v7306_v57, %v7305_v51  ;;  %v7439_v51 = vld [vmem:[%s21345_s20 + $0x20] sm:$0xff]  ;;  %v7437_v57 = vld [vmem:[%s21345_s20 + $0x10] sm:$0xff] }
 0xcaa   : > { %v7281_v28 = vadd.f32 %v7280_v38, %v7279_v22  ;;  %v7308_v33 = vrot.slane %v7307_v6, 4  ;;  %v7438_v22 = vld [vmem:[%s21345_s20 + $0x18] sm:$0xff]  ;;  %v7436_v38 = vld [vmem:[%s21345_s20 + $0x8] sm:$0xff] }
 0xcac   : > { %v7282_v18 = vrot.slane %v7281_v28, 2  ;;  %v7309_v42 = vadd.f32 %v7308_v33, %v7307_v6  ;;  %v7447_v33 = vld [vmem:[%s21345_s20 + $0x60] sm:$0xff] }
 0xcad   : > { %v7435_v6 = vld [vmem:[%s21345_s20] sm:$0xff] }
 0xcae   : > { %v7283_v16 = vadd.f32 %v7282_v18, %v7281_v28  ;;  %v7310_v3 = vrot.slane %v7309_v42, 2  ;;  %v7449_v28 = vld [vmem:[%s21345_s20 + $0x70] sm:$0xff] }
 0xcb0   : > { %v7284_v36 = vrot.slane %v7283_v16, 1  ;;  %v7311_v4 = vadd.f32 %v7310_v3, %v7309_v42 }
 0xcb2   : > { %v7312_v50 = vrot.slane %v7311_v4, 1  ;;  %v7285_v43 = vadd.f32 %v7284_v36, %v7283_v16 }
 0xcb4   : > { %v7313_v27 = vadd.f32 %v7312_v50, %v7311_v4  ;;  %v7446_v50 = vld [vmem:[%s21345_s20 + $0x58] sm:$0xff] }
 0xcb6   : > { %v7314_v29 = vsel %vm7004_vm7, %v7285_v43, %v7313_v27  ;;  %v7448_v27 = vld [vmem:[%s21345_s20 + $0x68] sm:$0xff]  ;;  %v7445_v43 = vld [vmem:[%s21345_s20 + $0x50] sm:$0xff] }
 0xcb7   : > { %13441 = vmatmul.mubr.f32.vlgmr.msra.gmra.mxu1 %v7314_v29  ;;  %v7444_v29 = vld [vmem:[%s21345_s20 + $0x48] sm:$0xff] }
 0xcb8   : > { %13475 = vmatprep.mubr.msk.f32.mxu1 %vm14097_vm0, %v21662_v1  ;;  %13444 = vmatpush3.msra.mxu1 %v7450_v5 }
 0xcb9   : > { %13445 = vmatprep.subr.mxu1 %v21662_v1 }
 0xcba   : > { %13446 = vmatpush3.msra.mxu1 %v7449_v28 }
 0xcbb   : > { %13447 = vmatprep.subr.mxu1 %v21662_v1 }
 0xcbc   : > { %13448 = vmatpush3.msra.mxu1 %v7448_v27  ;;  %v21945_v27 = vsub.s32 0, %v18925_v7 }
 0xcbd   : > { %13449 = vmatprep.subr.mxu1 %v21662_v1 }
 0xcbe   : > { %13450 = vmatpush3.msra.mxu1 %v7447_v33 }
 0xcbf   : > { %13451 = vmatprep.subr.mxu1 %v21662_v1 }
 0xcc0   : > { %13452 = vmatpush3.msra.mxu1 %v7446_v50 }
 0xcc1   : > { %13453 = vmatprep.subr.mxu1 %v21662_v1 }
 0xcc2   : > { %13454 = vmatpush3.msra.mxu1 %v7445_v43  ;;  %v21946_v43 = vsub.s32 1, %v18925_v7 }
 0xcc3   : > { %13455 = vmatprep.subr.mxu1 %v21662_v1 }
 0xcc4   : > { %13456 = vmatpush3.msra.mxu1 %v7444_v29 }
 0xcc5   : > { %13457 = vmatprep.subr.mxu1 %v21662_v1 }
 0xcc6   : > { %13458 = vmatpush3.msra.mxu1 %v7443_v9 }
 0xcc7   : > { %13459 = vmatprep.subr.mxu1 %v21662_v1 }
 0xcc8   : > { %13460 = vmatpush3.msra.mxu1 %v7442_v30 }
 0xcc9   : > { %13461 = vmatprep.subr.mxu1 %v21662_v1 }
 0xcca   : > { %13462 = vmatpush3.msra.mxu1 %v7441_v52 }
 0xccb   : > { %13463 = vmatprep.subr.mxu1 %v21662_v1 }
 0xccc   : > { %13464 = vmatpush3.msra.mxu1 %v7440_v47 }
 0xccd   : > { %13465 = vmatprep.subr.mxu1 %v21662_v1 }
 0xcce   : > { %13466 = vmatpush3.msra.mxu1 %v7439_v51 }
 0xccf   : > { %13467 = vmatprep.subr.mxu1 %v21662_v1 }
 0xcd0   : > { %13468 = vmatpush3.msra.mxu1 %v7438_v22 }
 0xcd1   : > { %13469 = vmatprep.subr.mxu1 %v21662_v1 }
 0xcd2   : > { %13470 = vmatpush3.msra.mxu1 %v7437_v57 }
 0xcd3   : > { %13471 = vmatprep.subr.mxu1 %v21662_v1 }
 0xcd4   : > { %13472 = vmatpush3.msra.mxu1 %v7436_v38 }
 0xcd5   : > { %13473 = vmatprep.subr.mxu1 %v21662_v1 }
 0xcd6   : > { %13474 = vmatpush3.msra.mxu1 %v7435_v6 }
 0xcd7   : > { %13508 = vmatprep.subr.mxu1 %v21662_v1 }
 0xd77   : > { %v7381_v18 = vpop.f32.mrf.mxu1 }
 0xd78   : > { %v7385_v42 = vmul.f32 0.005952381, %v7381_v18 }
 0xd79   : > { %v13442_v16 = vpop.f32.mrf.mxu1 }
 0xd7a   : > { %v7386_v3 = vmul.f32 %v7385_v42, %v7385_v42  ;;  %v7395_v33 = vrot.slane %v7385_v42, %v21945_v27 }
 0xd7c   : > { %v7388_v36 = vrot.slane %v7386_v3, 7  ;;  %v7396_v9 = vsub.f32 %v19061_v53, %v7395_v33  ;;  %v7397_v52 = vsub.f32 %v19059_v11, %v7395_v33  ;;  %v7398_v22 = vsub.f32 %v19063_v12, %v7395_v33 }
 0xd7d   : > { %v7399_v6 = vsub.f32 %v19067_v31, %v7395_v33  ;;  %v7400_v11 = vsub.f32 %v19075_v44, %v7395_v33  ;;  %v7402_v3 = vsub.f32 %v19085_v62, %v7395_v33 }
 0xd7e   : > { %v7390_v4 = vsub.f32 %v7385_v42, %v7388_v36  ;;  %v7401_v42 = vsub.f32 %v19080_v20, %v7395_v33 }
 0xd80   : > { %v7391_v5 = vmax.f32 %v7390_v4, 0.0  ;;  %v7403_v4 = vsub.f32 %v19090_v32, %v7395_v33 }
 0xd82   : > { %v7407_v28 = vadd.f32 1e-05, %v7391_v5 }
 0xd84   : > { %13827 = vrsqrt.f32 %v7407_v28  ;;  %v7404_v28 = vsub.f32 %v19095_v19, %v7395_v33 }
 0xd91   : > { %v13828_v50 = vpop.eup %13827 }
 0xd92   : > { %v7412_v29 = vrot.slane %v13828_v50, %v21946_v43  ;;  %v7405_v50 = vsub.f32 %v19100_v2, %v7395_v33  ;;  %v5731_v2 = vld [vmem:[%s18272_s5 + $0xf8] sm:$0xff] }
 0xd94   : > { %v7413_v30 = vmul.f32 %v7412_v29, %v7396_v9  ;;  %v7414_v51 = vmul.f32 %v7412_v29, %v7397_v52  ;;  %v7415_v38 = vmul.f32 %v7412_v29, %v7398_v22  ;;  %v7416_v53 = vmul.f32 %v7412_v29, %v7399_v6 }
 0xd95   : > { %v7417_v18 = vmul.f32 %v7412_v29, %v7400_v11  ;;  %v7418_v16 = vmul.f32 %v7412_v29, %v7401_v42  ;;  %v7419_v36 = vmul.f32 %v7412_v29, %v7402_v3  ;;  %v7420_v5 = vmul.f32 %v7412_v29, %v7403_v4 }
 0xd96   : > { %v7424_v47 = vmax.f32 %v7413_v30, 0.0  ;;  %v7425_v57 = vmax.f32 %v7414_v51, 0.0  ;;  %v7426_v7 = vmax.f32 %v7415_v38, 0.0  ;;  %v7427_v12 = vmax.f32 %v7416_v53, 0.0 }
 0xd97   : > { %v7428_v31 = vmax.f32 %v7417_v18, 0.0  ;;  %v7429_v44 = vmax.f32 %v7418_v16, 0.0  ;;  %v7430_v20 = vmax.f32 %v7419_v36, 0.0  ;;  %v7431_v62 = vmax.f32 %v7420_v5, 0.0 }
 0xd98   : > { %13476 = vmatmul.mubr.f32.vlgmr.msra.gmra.mxu1 %v7424_v47  ;;  %v7421_v27 = vmul.f32 %v7412_v29, %v7404_v28  ;;  %v7422_v43 = vmul.f32 %v7412_v29, %v7405_v50  ;;  %v7406_v9 = vsub.f32 %v19108_v24, %v7395_v33  ;;  %v5794_v47 = vmax.f32 %v5731_v2, 0.0  ;;  %v19224_v24 = vld [vmem:[%s21346_s21] ss:$0 sm:$0xff] }
 0xd99   : > { %13478 = vmatprep.mubr.msk.f32.mxu1 %vm14097_vm0, %v21662_v1 }
 0xd9a   : > { %v7432_v32 = vmax.f32 %v7421_v27, 0.0  ;;  %v7433_v19 = vmax.f32 %v7422_v43, 0.0  ;;  %v7423_v30 = vmul.f32 %v7412_v29, %v7406_v9  ;;  %v5857_v51 = vmin.f32 %v5794_v47, 1.0 }
 0xd9c   : > { %13479 = vmatmul.mubr.f32.gmra.mxu1 %v7425_v57  ;;  %v7434_v52 = vmax.f32 %v7423_v30, 0.0  ;;  %v5983_v29 = vsub.f32 1.0, %v5857_v51  ;;  %v5730_v57 = vld [vmem:[%s18272_s5 + $0xf0] sm:$0xff]  ;;  %v5920_v30 = vmax.f32 %v5857_v51, 1e-05 }
 0xd9d   : > { %13481 = vmatprep.mubr.msk.f32.mxu1 %vm14097_vm0, %v21662_v1 }
 0xd9e   : > { %v6046_v53 = vmax.f32 %v5983_v29, 1e-05 }
 0xda0   : > { %13482 = vmatmul.mubr.f32.gmra.mxu1 %v7426_v7  ;;  %v5793_v7 = vmax.f32 %v5730_v57, 0.0  ;;  %13829 = vrcp.f32 %v6046_v53 }
 0xda1   : > { %13484 = vmatprep.mubr.msk.f32.mxu1 %vm14097_vm0, %v21662_v1 }
 0xda4   : > { %13485 = vmatmul.mubr.f32.gmra.mxu1 %v7427_v12  ;;  %v5752_v12 = vld [vmem:[%s18272_s5 + $0x1a0] sm:$0xff] }
 0xda5   : > { %13487 = vmatprep.mubr.msk.f32.mxu1 %vm14097_vm0, %v21662_v1  ;;  %v5815_v16 = vmax.f32 %v5752_v12, 0.0 }
 0xda8   : > { %13488 = vmatmul.mubr.f32.gmra.mxu1 %v7428_v31  ;;  %v5856_v31 = vmin.f32 %v5793_v7, 1.0 }
 0xda9   : > { %13490 = vmatprep.mubr.msk.f32.mxu1 %vm14097_vm0, %v21662_v1 }
 0xdaa   : > { %v5982_v4 = vsub.f32 1.0, %v5856_v31 }
 0xdac   : > { %13491 = vmatmul.mubr.f32.gmra.mxu1 %v7429_v44  ;;  %v6045_v27 = vmax.f32 %v5982_v4, 1e-05 }
 0xdad   : > { %13493 = vmatprep.mubr.msk.f32.mxu1 %vm14097_vm0, %v21662_v1  ;;  %v13830_v47 = vpop.eup %13829 }
 0xdae   : > { %13831 = vrcp.f32 %v6045_v27 }
 0xdb0   : > { %13494 = vmatmul.mubr.f32.gmra.mxu1 %v7430_v20  ;;  %v5878_v20 = vmin.f32 %v5815_v16, 1.0 }
 0xdb1   : > { %13496 = vmatprep.mubr.msk.f32.mxu1 %vm14097_vm0, %v21662_v1 }
 0xdb2   : > { %v6004_v50 = vsub.f32 1.0, %v5878_v20 }
 0xdb4   : > { %13497 = vmatmul.mubr.f32.gmra.mxu1 %v7431_v62 }
 0xdb5   : > { %13499 = vmatprep.mubr.msk.f32.mxu1 %vm14097_vm0, %v21662_v1 }
 0xdb8   : > { %13500 = vmatmul.mubr.f32.gmra.mxu1 %v7432_v32 }
 0xdb9   : > { %13502 = vmatprep.mubr.msk.f32.mxu1 %vm14097_vm0, %v21662_v1 }
 0xdbb   : > { %v13832_v27 = vpop.eup %13831 }
 0xdbc   : > { %13503 = vmatmul.mubr.f32.gmra.mxu1 %v7433_v19  ;;  %v5729_v19 = vld [vmem:[%s18272_s5 + $0xe8] sm:$0xff] }
 0xdbd   : > { %13505 = vmatprep.mubr.msk.f32.mxu1 %vm14097_vm0, %v21662_v1  ;;  %v5792_v29 = vmax.f32 %v5729_v19, 0.0 }
 0xdbf   : > { %v5855_v51 = vmin.f32 %v5792_v29, 1.0 }
 0xdc0   : > { %13506 = vmatmul.mubr.f32.gmra.mxu1 %v7434_v52  ;;  %v6067_v52 = vmax.f32 %v6004_v50, 1e-05 }
 0xdc1   : > { %13530 = vmatprep.mubr.msk.f32.mxu1 %vm14097_vm0, %v21662_v1 }
 0xdc2   : > { %13833 = vrcp.f32 %v6067_v52  ;;  %v5941_v52 = vmax.f32 %v5878_v20, 1e-05  ;;  %v5542_v20 = vadd.f32 %v18880_v60, %v18684_v61  ;;  %v5918_v61 = vmax.f32 %v5855_v51, 1e-05 }
 0xe58   : > { %v7524_v33 = vpop.f32.mrf.mxu1 }
 0xe59   : > { %v19227_v22 = vadd.f32 %v19224_v24, %v7524_v33 }
 0xe5a   : > { %v13477_v38 = vpop.f32.mrf.mxu1 }
 0xe5b   : > { %7589 = vrot.lane.b32.xlu1 %v19227_v22, %s14098_s30  ;;  %v6141_v38 = vmul.f32 %v13830_v47, %v5920_v30 }
 0xe5c   : > { %v7529_v6 = vpop.f32.mrf.mxu1 }
 0xe5d   : > { %v19233_v11 = vadd.f32 %v19224_v24, %v7529_v6  ;;  %v5751_v6 = vld [vmem:[%s18272_s5 + $0x198] sm:$0xff]  ;;  %13835 = vlog2.f32 %v6141_v38 }
 0xe5e   : > { %v13480_v18 = vpop.f32.mrf.mxu1  ;;  %v5814_v12 = vmax.f32 %v5751_v6, 0.0 }
 0xe5f   : > { %7591 = vrot.lane.b32.xlu0 %v19233_v11, %s14098_s30 }
 0xe60   : > { %v7534_v42 = vpop.f32.mrf.mxu1 }
 0xe61   : > { %v19239_v3 = vadd.f32 %v19224_v24, %v7534_v42 }
 0xe62   : > { %v13483_v44 = vpop.f32.mrf.mxu1 }
 0xe63   : > { %7593 = vrot.lane.b32.xlu1 %v19239_v3, %s14098_s30  ;;  %v5981_v44 = vsub.f32 1.0, %v5855_v51  ;;  %v5727_v51 = vld [vmem:[%s18272_s5 + $0xd8] sm:$0xff] }
 0xe64   : > { %v7539_v36 = vpop.f32.mrf.mxu1 }
 0xe65   : > { %v19244_v5 = vadd.f32 %v19224_v24, %v7539_v36  ;;  %v19267_v36 = vmin.f32 %v5814_v12, 1.0 }
 0xe66   : > { %v13486_v28 = vpop.f32.mrf.mxu1 }
 0xe67   : > { %7595 = vrot.lane.b32.xlu0 %v19244_v5, %s14098_s30  ;;  %v5919_v28 = vmax.f32 %v5856_v31, 1e-05 }
 0xe68   : > { %v7544_v62 = vpop.f32.mrf.mxu1 }
 0xe69   : > { %v19249_v32 = vadd.f32 %v19224_v24, %v7544_v62  ;;  %v6139_v30 = vmul.f32 %v13832_v27, %v5919_v28 }
 0xe6a   : > { %v13489_v43 = vpop.f32.mrf.mxu1 }
 0xe6b   : > { %7597 = vrot.lane.b32.xlu1 %v19249_v32, %s14098_s30  ;;  %v6044_v43 = vmax.f32 %v5981_v44, 1e-05 }
 0xe6c   : > { %v7549_v9 = vpop.f32.mrf.mxu1 }
 0xe6d   : > { %v19255_v2 = vadd.f32 %v19224_v24, %v7549_v9  ;;  %v6003_v9 = vsub.f32 1.0, %v19267_v36  ;;  %13837 = vrcp.f32 %v6044_v43 }
 0xe6e   : > { %v13492_v33 = vpop.f32.mrf.mxu1  ;;  %13839 = vlog2.f32 %v6139_v30 }
 0xe6f   : > { %7599 = vrot.lane.b32.xlu0 %v19255_v2, %s14098_s30  ;;  %v13834_v33 = vpop.eup %13833  ;;  %v6066_v31 = vmax.f32 %v6003_v9, 1e-05 }
 0xe70   : > { %v7554_v57 = vpop.f32.mrf.mxu1  ;;  %v6183_v6 = vmul.f32 %v13834_v33, %v5941_v52  ;;  %v13836_v12 = vpop.eup %13835  ;;  %v5537_v33 = vadd.f32 %v18880_v60, %v18681_v48  ;;  %v5749_v48 = vld [vmem:[%s18272_s5 + $0x188] sm:$0xff] }
 0xe71   : > { %v19261_v7 = vadd.f32 %v19224_v24, %v7554_v57  ;;  %v5728_v57 = vld [vmem:[%s18272_s5 + $0xe0] sm:$0xff]  ;;  %13841 = vrcp.f32 %v6066_v31  ;;  %v6267_v44 = vmul.f32 0.6931472, %v13836_v12 }
 0xe72   : > { %v13495_v53 = vpop.f32.mrf.mxu1  ;;  %13843 = vlog2.f32 %v6183_v6 }
 0xe73   : > { %7601 = vrot.lane.b32.xlu1 %v19261_v7, %s14098_s30 }
 0xe74   : > { %v7559_v18 = vpop.f32.mrf.mxu1 }
 0xe75   : > { %v7560_v42 = vadd.f32 %v19224_v24, %v7559_v18 }
 0xe76   : > { %v13498_v16 = vpop.f32.mrf.mxu1 }
 0xe77   : > { %7603 = vrot.lane.b32.xlu0 %v7560_v42, %s14098_s30  ;;  %v5791_v16 = vmax.f32 %v5728_v57, 0.0  ;;  %v5940_v57 = vmax.f32 %v19267_v36, 1e-05  ;;  %v5647_v36 = vadd.f32 %v18880_v60, %v18867_v8 }
 0xe78   : > { %v7564_v4 = vpop.f32.mrf.mxu1 }
 0xe79   : > { %v7565_v62 = vadd.f32 %v19224_v24, %v7564_v4  ;;  %v5750_v4 = vld [vmem:[%s18272_s5 + $0x190] sm:$0xff]  ;;  %v19282_v28 = vmin.f32 %v5791_v16, 1.0 }
 0xe7a   : > { %v13501_v50 = vpop.f32.mrf.mxu1  ;;  %v5813_v27 = vmax.f32 %v5750_v4, 0.0 }
 0xe7b   : > { %7605 = vrot.lane.b32.xlu1 %v7565_v62, %s14098_s30  ;;  %v19289_v50 = vadd.f32 %v6267_v44, %v5542_v20  ;;  %v5980_v43 = vsub.f32 1.0, %v19282_v28 }
 0xe7c   : > { %v7569_v19 = vpop.f32.mrf.mxu1  ;;  %v19295_v9 = vmin.f32 %v5813_v27, 1.0 }
 0xe7d   : > { %v7570_v47 = vadd.f32 %v19224_v24, %v7569_v19  ;;  %v6043_v30 = vmax.f32 %v5980_v43, 1e-05 }
 0xe7e   : > { %v13504_v29 = vpop.f32.mrf.mxu1 }
 0xe7f   : > { %7607 = vrot.lane.b32.xlu0 %v7570_v47, %s14098_s30  ;;  %13845 = vrcp.f32 %v6043_v30  ;;  %v5748_v30 = vld [vmem:[%s18272_s5 + $0x180] sm:$0xff] }
 0xe80   : > { %v7574_v38 = vpop.f32.mrf.mxu1 }
 0xe81   : > { %v7575_v53 = vadd.f32 %v19224_v24, %v7574_v38  ;;  %v21947_v24 = vrot.slane %v18614_v59, 4  ;;  %v13838_v59 = vpop.eup %13837 }
 0xe82   : > { %v13507_v18 = vpop.f32.mrf.mxu1  ;;  %v13840_v19 = vpop.eup %13839  ;;  %v6137_v52 = vmul.f32 %v13838_v59, %v5918_v61  ;;  %v21949_v59 = vrot.slane %v18914_v56, 4 }
 0xe83   : > { %7609 = vrot.lane.b32.xlu1 %v7575_v53, %s14098_s30  ;;  %13509 = vmatpush3.xpose.msk.msra.mxu1 %vm834_vm1, %v7575_v53  ;;  %s14100_s30 = smov 4   ;;  %v6265_v29 = vmul.f32 0.6931472, %v13840_v19 }
 0xe84   : > { %13510 = vmatprep.subr.mxu1 %v21662_v1  ;;  %13847 = vlog2.f32 %v6137_v52 }
 0xe85   : > { %v6360_v6 = vadd.f32 %v6265_v29, %v5537_v33 }
 0xe87   : > { %13511 = vmatpush3.xpose.msk.msra.mxu1 %vm834_vm1, %v7570_v47  ;;  %6446 = vrot.lane.b32.xlu1 %v21947_v24, %s14099_s2  ;;  %v13842_v47 = vpop.eup %13841 }
 0xe88   : > { %13512 = vmatprep.subr.mxu1 %v21662_v1  ;;  %v13844_v31 = vpop.eup %13843  ;;  %v6181_v53 = vmul.f32 %v13842_v47, %v5940_v57 }
 0xe89   : > { %v6309_v12 = vmul.f32 0.6931472, %v13844_v31 }
 0xe8b   : > { %13513 = vmatpush3.xpose.msk.msra.mxu1 %vm834_vm1, %v7565_v62  ;;  %6490 = vrot.lane.b32.xlu1 %v19289_v50, %s14100_s30  ;;  %v6002_v62 = vsub.f32 1.0, %v19295_v9  ;;  %v19320_v18 = vadd.f32 %v6309_v12, %v5647_v36 }
 0xe8c   : > { %13514 = vmatprep.subr.mxu1 %v21662_v1  ;;  %v13846_v16 = vpop.eup %13845 }
 0xe8d   : > { %v6065_v38 = vmax.f32 %v6002_v62, 1e-05 }
 0xe8f   : > { %13515 = vmatpush3.xpose.msk.msra.mxu1 %vm834_vm1, %v7560_v42  ;;  %6444 = vrot.lane.b32.xlu1 %v18631_v39, %s14099_s2  ;;  %v21948_v39 = vrot.slane %v18797_v14, 4  ;;  %v5790_v42 = vmax.f32 %v5727_v51, 0.0  ;;  %13849 = vrcp.f32 %v6065_v38 }
 0xe90   : > { %13516 = vmatprep.subr.mxu1 %v21662_v1  ;;  %13851 = vlog2.f32 %v6181_v53  ;;  %v5747_v53 = vld [vmem:[%s18272_s5 + $0x178] sm:$0xff] }
 0xe91   : > { %v5853_v14 = vmin.f32 %v5790_v42, 1.0  ;;  %v13848_v20 = vpop.eup %13847  ;;  %v5810_v12 = vmax.f32 %v5747_v53, 0.0 }
 0xe92   : > { %v6263_v43 = vmul.f32 0.6931472, %v13848_v20 }
 0xe93   : > { %13517 = vmatpush3.xpose.msk.msra.mxu1 %vm834_vm1, %v19261_v7  ;;  %6554 = vrot.lane.b32.xlu1 %v21948_v39, %s14101_s27  ;;  %v5812_v7 = vmax.f32 %v5749_v48, 0.0  ;;  %v5979_v60 = vsub.f32 1.0, %v5853_v14  ;;  %v5916_v33 = vmax.f32 %v5853_v14, 1e-05 }
 0xe94   : > { %13518 = vmatprep.subr.mxu1 %v21662_v1 }
 0xe95   : > { %v19326_v8 = vmin.f32 %v5812_v7, 1.0  ;;  %v6042_v44 = vmax.f32 %v5979_v60, 1e-05 }
 0xe97   : > { %13519 = vmatpush3.xpose.msk.msra.mxu1 %vm834_vm1, %v19255_v2  ;;  %6488 = vrot.lane.b32.xlu1 %v6360_v6, %s14100_s30  ;;  %v5917_v2 = vmax.f32 %v19282_v28, 1e-05  ;;  %v5726_v28 = vld [vmem:[%s18272_s5 + $0xd0] sm:$0xff]  ;;  %13853 = vrcp.f32 %v6042_v44  ;;  %v5938_v42 = vmax.f32 %v19326_v8, 1e-05 }
 0xe98   : > { %13520 = vmatprep.subr.mxu1 %v21662_v1 }
 0xe99   : > { %v6135_v4 = vmul.f32 %v13846_v16, %v5917_v2 }
 0xe9b   : > { %13521 = vmatpush3.xpose.msk.msra.mxu1 %vm834_vm1, %v19249_v32  ;;  %6598 = vrot.lane.b32.xlu1 %v19320_v18, %s14102_s29  ;;  %v6001_v32 = vsub.f32 1.0, %v19326_v8  ;;  %13855 = vlog2.f32 %v6135_v4  ;;  %v19377_v8 = vmin.f32 %v5810_v12, 1.0 }
 0xe9c   : > { %13522 = vmatprep.subr.mxu1 %v21662_v1 }
 0xe9d   : > { %v6064_v24 = vmax.f32 %v6001_v32, 1e-05 }
 0xe9f   : > { %13523 = vmatpush3.xpose.msk.msra.mxu1 %vm834_vm1, %v19244_v5  ;;  %6442 = vrot.lane.b32.xlu1 %v18620_v34, %s14099_s2  ;;  %v13850_v34 = vpop.eup %13849  ;;  %v19345_v5 = vld [vmem:[%s21340_s15] ss:$0 sm:$0xff]  ;;  %13857 = vrcp.f32 %v6064_v24 }
 0xea0   : > { %13524 = vmatprep.subr.mxu1 %v21662_v1  ;;  %v5532_v27 = vadd.f32 %v19345_v5, %v18677_v35  ;;  %v13852_v61 = vpop.eup %13851  ;;  %v5527_v6 = vadd.f32 %v19345_v5, %v18671_v54  ;;  %v5724_v54 = vld [vmem:[%s18272_s5 + $0xc0] sm:$0xff]  ;;  %v5522_v24 = vadd.f32 %v19345_v5, %v18664_v21  ;;  %v5627_v12 = vadd.f32 %v19345_v5, %v18847_v10  ;;  %v5707_v10 = vld [vmem:[%s18272_s5 + $0x38] sm:$0xff] }
 0xea1   : > { %v6307_v52 = vmul.f32 0.6931472, %v13852_v61  ;;  %v5787_v32 = vmax.f32 %v5724_v54, 0.0 }
 0xea2   : > { %v6359_v19 = vadd.f32 %v6263_v43, %v5532_v27 }
 0xea3   : > { %13525 = vmatpush3.xpose.msk.msra.mxu1 %vm834_vm1, %v19239_v3  ;;  %6552 = vrot.lane.b32.xlu1 %v18814_v55, %s14101_s27  ;;  %v5939_v3 = vmax.f32 %v19295_v9, 1e-05  ;;  %v5789_v55 = vmax.f32 %v5726_v28, 0.0  ;;  %v5642_v9 = vadd.f32 %v19345_v5, %v18864_v40 }
 0xea4   : > { %13526 = vmatprep.subr.mxu1 %v21662_v1  ;;  %v13854_v29 = vpop.eup %13853 }
 0xea5   : > { %v6179_v35 = vmul.f32 %v13850_v34, %v5939_v3  ;;  %v5852_v62 = vmin.f32 %v5789_v55, 1.0  ;;  %v6381_v56 = vadd.f32 %v6307_v52, %v5642_v9  ;;  %v6133_v39 = vmul.f32 %v13854_v29, %v5916_v33  ;;  %v5745_v55 = vld [vmem:[%s18272_s5 + $0x168] sm:$0xff] }
 0xea7   : > { %13527 = vmatpush3.xpose.msk.msra.mxu1 %vm834_vm1, %v19233_v11  ;;  %6662 = vrot.lane.b32.xlu1 %v21949_v59, %s14103_s23  ;;  %v5811_v11 = vmax.f32 %v5748_v30, 0.0  ;;  %13859 = vlog2.f32 %v6179_v35  ;;  %v5978_v47 = vsub.f32 1.0, %v5852_v62  ;;  %v5915_v2 = vmax.f32 %v5852_v62, 1e-05  ;;  %v5722_v62 = vld [vmem:[%s18272_s5 + $0xb0] sm:$0xff] }
 0xea8   : > { %13528 = vmatprep.subr.mxu1 %v21662_v1  ;;  %v13856_v57 = vpop.eup %13855  ;;  %v5632_v59 = vadd.f32 %v19345_v5, %v18854_v26  ;;  %v5708_v26 = vld [vmem:[%s18272_s5 + $0x40] sm:$0xff] }
 0xea9   : > { %v5874_v51 = vmin.f32 %v5811_v11, 1.0  ;;  %v6041_v40 = vmax.f32 %v5978_v47, 1e-05  ;;  %v6261_v48 = vmul.f32 0.6931472, %v13856_v57 }
 0xeab   : > { %13529 = vmatpush3.xpose.msk.msra.mxu1 %vm834_vm1, %v19227_v22  ;;  %6486 = vrot.lane.b32.xlu1 %v6359_v19, %s14100_s30  ;;  %v6000_v22 = vsub.f32 1.0, %v5874_v51  ;;  %13861 = vrcp.f32 %v6041_v40  ;;  %v6358_v7 = vadd.f32 %v6261_v48, %v5527_v6  ;;  %v5937_v27 = vmax.f32 %v5874_v51, 1e-05 }
 0xeac   : > { %13618 = vmatprep.subr.mxu1 %v21662_v1  ;;  %v13858_v31 = vpop.eup %13857  ;;  %13863 = vlog2.f32 %v6133_v39  ;;  %v5785_v51 = vmax.f32 %v5722_v62, 0.0  ;;  %v5936_v40 = vmax.f32 %v19377_v8, 1e-05  ;;  %v5517_v39 = vadd.f32 %v19345_v5, %v18656_v37 }
 0xead   : > { %v6063_v38 = vmax.f32 %v6000_v22, 1e-05  ;;  %v6177_v36 = vmul.f32 %v13858_v31, %v5938_v42 }
 0xeaf   : > { %6596 = vrot.lane.b32.xlu1 %v6381_v56, %s14102_s29  ;;  %13865 = vrcp.f32 %v6063_v38  ;;  %v5771_v56 = vmax.f32 %v5708_v26, 0.0 }
 0xeb0   : > { %13867 = vlog2.f32 %v6177_v36 }
 0xeb1   : > { %v19414_v22 = vmin.f32 %v5771_v56, 1.0 }
 0xeb3   : > { %6440 = vrot.lane.b32.xlu1 %v18607_v13, %s14099_s2  ;;  %v5960_v53 = vsub.f32 1.0, %v19414_v22 }
 0xeb4   : > { %v13860_v13 = vpop.eup %13859 }
 0xeb5   : > { %v6305_v14 = vmul.f32 0.6931472, %v13860_v13  ;;  %v5743_v13 = vld [vmem:[%s18272_s5 + $0x158] sm:$0xff] }
 0xeb6   : > { %v5806_v54 = vmax.f32 %v5743_v13, 0.0  ;;  %v21955_v13 = vld [vmem:[#allocation64_spill] sm:$0xff] }
 0xeb7   : > { %6550 = vrot.lane.b32.xlu1 %v18801_v63, %s14101_s27  ;;  %v5637_v63 = vadd.f32 %v19345_v5, %v18860_v58  ;;  %v19384_v58 = vmin.f32 %v5787_v32, 1.0 }
 0xeb8   : > { %v13862_v16 = vpop.eup %13861  ;;  %v5869_v32 = vmin.f32 %v5806_v54, 1.0 }
 0xeb9   : > { %v6380_v60 = vadd.f32 %v6305_v14, %v5637_v63  ;;  %v13864_v20 = vpop.eup %13863  ;;  %v6131_v44 = vmul.f32 %v13862_v16, %v5915_v2  ;;  %v5976_v3 = vsub.f32 1.0, %v19384_v58  ;;  %v5913_v36 = vmax.f32 %v19384_v58, 1e-05 }
 0xeba   : > { %v6259_v34 = vmul.f32 0.6931472, %v13864_v20  ;;  %v5770_v20 = vmax.f32 %v5707_v10, 0.0 }
 0xebb   : > { %6660 = vrot.lane.b32.xlu1 %v18923_v49, %s14103_s23  ;;  %v5999_v49 = vsub.f32 1.0, %v19377_v8  ;;  %13869 = vlog2.f32 %v6131_v44  ;;  %v6039_v30 = vmax.f32 %v5976_v3, 1e-05  ;;  %v5995_v44 = vsub.f32 1.0, %v5869_v32 }
 0xebc   : > { %v13866_v28 = vpop.eup %13865  ;;  %v6357_v61 = vadd.f32 %v6259_v34, %v5522_v24 }
 0xebd   : > { %v6062_v4 = vmax.f32 %v5999_v49, 1e-05  ;;  %v13868_v43 = vpop.eup %13867 }
 0xebe   : > { %v6303_v19 = vmul.f32 0.6931472, %v13868_v43  ;;  %v6058_v43 = vmax.f32 %v5995_v44, 1e-05 }
 0xebf   : > { %6484 = vrot.lane.b32.xlu1 %v6358_v7, %s14100_s30  ;;  %13871 = vrcp.f32 %v6062_v4  ;;  %v5709_v4 = vld [vmem:[%s18272_s5 + $0x48] sm:$0xff] }
 0xec0   : > { %v6379_v35 = vadd.f32 %v6303_v19, %v5632_v59  ;;  %v21950_v19 = vld [vmem:[#allocation68_spill] sm:$0xff] }
 0xec3   : > { %6594 = vrot.lane.b32.xlu1 %v6380_v60, %s14102_s29 }
 0xec7   : > { %6438 = vrot.lane.b32.xlu1 %v18602_v45, %s14099_s2  ;;  %v6175_v45 = vmul.f32 %v13866_v28, %v5937_v27  ;;  %v5833_v27 = vmin.f32 %v5770_v20, 1.0 }
 0xec8   : > { %v13870_v47 = vpop.eup %13869 }
 0xec9   : > { %13873 = vlog2.f32 %v6175_v45  ;;  %v6257_v42 = vmul.f32 0.6931472, %v13870_v47  ;;  %v5959_v59 = vsub.f32 1.0, %v5833_v27  ;;  %v21951_v47 = vld [vmem:[#allocation56_spill] sm:$0xff] }
 0xeca   : > { %13875 = vrcp.f32 %v6039_v30 }
 0xecb   : > { %6548 = vrot.lane.b32.xlu1 %v18789_v15, %s14101_s27  ;;  %v5808_v15 = vmax.f32 %v5745_v55, 0.0  ;;  %v6356_v37 = vadd.f32 %v6257_v42, %v5517_v39  ;;  %v5932_v39 = vmax.f32 %v5869_v32, 1e-05 }
 0xecc   : > { %v13872_v29 = vpop.eup %13871 }
 0xecd   : > { %v7590_v21 = vpop.permute.xlu1 %7589  ;;  %v19403_v52 = vmin.f32 %v5808_v15, 1.0  ;;  %v6173_v38 = vmul.f32 %v13872_v29, %v5936_v40  ;;  %v21952_v40 = vld [vmem:[#allocation65_spill] sm:$0xff] }
 0xece   : > { %13531 = vmatmul.mubr.msk.f32.vlgmr.msra.gmra.mxu1 %vm834_vm1, %v7590_v21  ;;  %v5897_v21 = vmax.f32 %v19414_v22, 1e-05 }
 0xecf   : > { %6482 = vrot.lane.b32.xlu1 %v6357_v61, %s14100_s30  ;;  %13533 = vmatprep.mubr.msk.f32.mxu1 %vm14097_vm0, %v21662_v1  ;;  %v5997_v33 = vsub.f32 1.0, %v19403_v52  ;;  %v5934_v28 = vmax.f32 %v19403_v52, 1e-05  ;;  %v5622_v61 = vadd.f32 %v19345_v5, %v18839_v17  ;;  %v6022_v52 = vmax.f32 %v5959_v59, 1e-05  ;;  %v21960_v59 = vld [vmem:[#allocation49_spill] sm:$0xff] }
 0xed1   : > { %v7592_v9 = vpop.permute.xlu0 %7591  ;;  %v6060_v31 = vmax.f32 %v5997_v33, 1e-05 }
 0xed2   : > { %13534 = vmatmul.mubr.msk.f32.gmra.mxu1 %vm834_vm1, %v7592_v9 }
 0xed3   : > { %6592 = vrot.lane.b32.xlu1 %v6379_v35, %s14102_s29  ;;  %13536 = vmatprep.mubr.msk.f32.mxu1 %vm14097_vm0, %v21662_v1  ;;  %13877 = vrcp.f32 %v6060_v31 }
 0xed4   : > { %13879 = vlog2.f32 %v6173_v38 }
 0xed5   : > { %v7594_v11 = vpop.permute.xlu1 %7593 }
 0xed6   : > { %13537 = vmatmul.mubr.msk.f32.gmra.mxu1 %vm834_vm1, %v7594_v11  ;;  %v13874_v48 = vpop.eup %13873 }
 0xed7   : > { %6436 = vrot.lane.b32.xlu1 %v18596_v41, %s14099_s2  ;;  %13539 = vmatprep.mubr.msk.f32.mxu1 %vm14097_vm0, %v21662_v1  ;;  %v19420_v41 = vmin.f32 %v5785_v51, 1.0  ;;  %v6301_v7 = vmul.f32 0.6931472, %v13874_v48  ;;  %v13876_v14 = vpop.eup %13875  ;;  %v5507_v51 = vadd.f32 %v19345_v5, %v21951_v47 }
 0xed8   : > { %v6127_v60 = vmul.f32 %v13876_v14, %v5913_v36 }
 0xed9   : > { %v7596_v57 = vpop.permute.xlu0 %7595  ;;  %v6378_v2 = vadd.f32 %v6301_v7, %v5627_v12  ;;  %v5911_v35 = vmax.f32 %v19420_v41, 1e-05  ;;  %v5896_v7 = vmax.f32 %v5833_v27, 1e-05 }
 0xeda   : > { %13540 = vmatmul.mubr.msk.f32.gmra.mxu1 %vm834_vm1, %v7596_v57 }
 0xedb   : > { %6546 = vrot.lane.b32.xlu1 %v18785_v25, %s14101_s27  ;;  %13542 = vmatprep.mubr.msk.f32.mxu1 %vm14097_vm0, %v21662_v1  ;;  %v5974_v25 = vsub.f32 1.0, %v19420_v41 }
 0xedd   : > { %v7598_v6 = vpop.permute.xlu1 %7597  ;;  %v6037_v8 = vmax.f32 %v5974_v25, 1e-05 }
 0xede   : > { %13543 = vmatmul.mubr.msk.f32.gmra.mxu1 %vm834_vm1, %v7598_v6  ;;  %v21953_v6 = vld [vmem:[#allocation51_spill] sm:$0xff] }
 0xedf   : > { %6656 = vrot.lane.b32.xlu1 %v18911_v46, %s14103_s23  ;;  %13545 = vmatprep.mubr.msk.f32.mxu1 %vm14097_vm0, %v21662_v1  ;;  %v6023_v46 = vmax.f32 %v5960_v53, 1e-05  ;;  %v21954_v53 = vld [vmem:[#allocation73_spill] sm:$0xff] }
 0xee0   : > { %v13878_v58 = vpop.eup %13877  ;;  %v5612_v25 = vadd.f32 %v19345_v5, %v21954_v53 }
 0xee1   : > { %v7600_v63 = vpop.permute.xlu0 %7599  ;;  %13881 = vrcp.f32 %v6023_v46  ;;  %v13880_v34 = vpop.eup %13879  ;;  %v6169_v3 = vmul.f32 %v13878_v58, %v5934_v28 }
 0xee2   : > { %13546 = vmatmul.mubr.msk.f32.gmra.mxu1 %vm834_vm1, %v7600_v63  ;;  %13883 = vrcp.f32 %v6037_v8  ;;  %v6299_v55 = vmul.f32 0.6931472, %v13880_v34 }
 0xee3   : > { %6480 = vrot.lane.b32.xlu1 %v6356_v37, %s14100_s30  ;;  %13548 = vmatprep.mubr.msk.f32.mxu1 %vm14097_vm0, %v21662_v1  ;;  %13885 = vlog2.f32 %v6127_v60  ;;  %v21956_v60 = vld [vmem:[#allocation46_spill] sm:$0xff] }
 0xee4   : > { %13887 = vrcp.f32 %v6058_v43  ;;  %v6377_v17 = vadd.f32 %v6299_v55, %v5622_v61  ;;  %v21959_v61 = vld [vmem:[#allocation48_spill] sm:$0xff] }
 0xee5   : > { %v7602_v16 = vpop.permute.xlu1 %7601  ;;  %13889 = vlog2.f32 %v6169_v3 }
 0xee6   : > { %13549 = vmatmul.mubr.msk.f32.gmra.mxu1 %vm834_vm1, %v7602_v16  ;;  %13891 = vrcp.f32 %v6022_v52 }
 0xee7   : > { %6590 = vrot.lane.b32.xlu1 %v6378_v2, %s14102_s29  ;;  %13551 = vmatprep.mubr.msk.f32.mxu1 %vm14097_vm0, %v21662_v1  ;;  %v5427_v2 = vadd.f32 %v19345_v5, %v21956_v60 }
 0xee9   : > { %v7604_v49 = vpop.permute.xlu0 %7603 }
 0xeea   : > { %13552 = vmatmul.mubr.msk.f32.gmra.mxu1 %vm834_vm1, %v7604_v49  ;;  %v21957_v49 = vld [vmem:[#allocation54_spill] sm:$0xff] }
 0xeeb   : > { %6434 = vrot.lane.b32.xlu1 %v18592_v23, %s14099_s2  ;;  %13554 = vmatprep.mubr.msk.f32.mxu1 %vm14097_vm0, %v21662_v1  ;;  %v5772_v23 = vmax.f32 %v5709_v4, 0.0  ;;  %v5497_v20 = vadd.f32 %v19345_v5, %v21957_v49  ;;  %v21958_v4 = vld [vmem:[#allocation61_spill] sm:$0xff] }
 0xeed   : > { %v7606_v24 = vpop.permute.xlu1 %7605  ;;  %v5835_v15 = vmin.f32 %v5772_v23, 1.0 }
 0xeee   : > { %13555 = vmatmul.mubr.msk.f32.gmra.mxu1 %vm834_vm1, %v7606_v24 }
 0xeef   : > { %6544 = vrot.lane.b32.xlu1 %v18778_v0, %s14101_s27  ;;  %13557 = vmatprep.mubr.msk.f32.mxu1 %vm14097_vm0, %v21662_v1  ;;  %v13882_v0 = vpop.eup %13881  ;;  %v5961_v11 = vsub.f32 1.0, %v5835_v15  ;;  %v5898_v10 = vmax.f32 %v5835_v15, 1e-05 }
 0xef0   : > { %v13884_v30 = vpop.eup %13883  ;;  %v6095_v62 = vmul.f32 %v13882_v0, %v5897_v21  ;;  %v21961_v0 = vld [vmem:[#allocation69_spill] sm:$0xff] }
 0xef1   : > { %v7608_v45 = vpop.permute.xlu0 %7607  ;;  %v13886_v26 = vpop.eup %13885  ;;  %v6123_v56 = vmul.f32 %v13884_v30, %v5911_v35  ;;  %v6024_v57 = vmax.f32 %v5961_v11, 1e-05  ;;  %v5602_v21 = vadd.f32 %v19345_v5, %v21961_v0 }
 0xef2   : > { %13558 = vmatmul.mubr.msk.f32.gmra.mxu1 %vm834_vm1, %v7608_v45  ;;  %v6253_v33 = vmul.f32 0.6931472, %v13886_v26  ;;  %13893 = vlog2.f32 %v6095_v62  ;;  %v13888_v31 = vpop.eup %13887 }
 0xef3   : > { %6654 = vrot.lane.b32.xlu1 %v21950_v19, %s14103_s23  ;;  %13560 = vmatprep.mubr.msk.f32.mxu1 %vm14097_vm0, %v21662_v1  ;;  %13895 = vlog2.f32 %v6123_v56  ;;  %v13890_v38 = vpop.eup %13889  ;;  %v6165_v48 = vmul.f32 %v13888_v31, %v5932_v39  ;;  %v21963_v56 = vld [vmem:[#allocation45_spill] sm:$0xff]  ;;  %v6621_v39 = vrot.slane %v19320_v18, 4 }
 0xef4   : > { %v6354_v22 = vadd.f32 %v6253_v33, %v5507_v51  ;;  %13897 = vrcp.f32 %v6024_v57  ;;  %v6295_v36 = vmul.f32 0.6931472, %v13890_v38  ;;  %v13892_v12 = vpop.eup %13891  ;;  %v5422_v47 = vadd.f32 %v19345_v5, %v21963_v56 }
 0xef5   : > { %v7610_v9 = vpop.permute.xlu1 %7609  ;;  %13899 = vlog2.f32 %v6165_v48  ;;  %v6093_v54 = vmul.f32 %v13892_v12, %v5896_v7  ;;  %v21966_v48 = vld [vmem:[#allocation77_spill] sm:$0xff] }
 0xef6   : > { %13561 = vmatmul.mubr.msk.f32.gmra.mxu1 %vm834_vm1, %v7610_v9  ;;  %v6375_v14 = vadd.f32 %v6295_v36, %v5612_v25  ;;  %v21962_v9 = vld [vmem:[#allocation60_spill] sm:$0xff]  ;;  %v21967_v53 = vrot.slane %v21966_v48, 4 }
 0xef7   : > { %6588 = vrot.lane.b32.xlu1 %v6377_v17, %s14102_s29  ;;  %13640 = vmatprep.mubr.msk.f32.mxu1 %vm14097_vm0, %v21662_v1  ;;  %13901 = vlog2.f32 %v6093_v54 }
 0xef8   : > { %v6623_v25 = vsel %vm6404_vm6, %v6621_v39, %v21967_v53 }
 0xef9   : > { %v6447_v29 = vpop.permute.xlu1 %6446 }
 0xefa   : > { %v6686_v55 = vsel %vm6675_vm8, %v21959_v61, %v6447_v29 }
 0xefb   : > { %6542 = vrot.lane.b32.xlu1 %v21952_v40, %s14101_s27  ;;  %v21964_v40 = vld [vmem:[#allocation79_spill] sm:$0xff] }
 0xefd   : > { %v6491_v41 = vpop.permute.xlu1 %6490 }
 0xefe   : > { %v6698_v45 = vsel %vm6687_vm9, %v6686_v55, %v6491_v41 }
 0xeff   : > { %6476 = vrot.lane.b32.xlu1 %v6354_v22, %s14100_s30  ;;  %v13894_v63 = vpop.eup %13893  ;;  %v21965_v22 = vld [vmem:[#allocation47_spill] sm:$0xff] }
 0xf00   : > { %v13896_v8 = vpop.eup %13895  ;;  %v6221_v16 = vmul.f32 0.6931472, %v13894_v63  ;;  %v5432_v41 = vadd.f32 %v19345_v5, %v21965_v22 }
 0xf01   : > { %v19474_v42 = vpop.permute.xlu1 %6444  ;;  %v13898_v32 = vpop.eup %13897  ;;  %v6249_v44 = vmul.f32 0.6931472, %v13896_v8 }
 0xf02   : > { %v6338_v28 = vadd.f32 %v6221_v16, %v5427_v2  ;;  %v6097_v24 = vmul.f32 %v13898_v32, %v5898_v10  ;;  %v13900_v3 = vpop.eup %13899 }
 0xf03   : > { %6430 = vrot.lane.b32.xlu1 %v21953_v6, %s14099_s2  ;;  %v6352_v34 = vadd.f32 %v6249_v44, %v5497_v20  ;;  %v6291_v15 = vmul.f32 0.6931472, %v13900_v3 }
 0xf04   : > { %13903 = vlog2.f32 %v6097_v24  ;;  %v13902_v26 = vpop.eup %13901 }
 0xf05   : > { %v6555_v37 = vpop.permute.xlu1 %6554  ;;  %v6373_v52 = vadd.f32 %v6291_v15, %v5602_v21  ;;  %v6219_v51 = vmul.f32 0.6931472, %v13902_v26 }
 0xf06   : > { %v6709_v19 = vsel %vm1986_vm5, %v6698_v45, %v6555_v37 }
 0xf07   : > { %6650 = vrot.lane.b32.xlu1 %v21955_v13, %s14103_s23  ;;  %v6337_v57 = vadd.f32 %v6219_v51, %v5422_v47  ;;  %v5744_v51 = vld [vmem:[%s18272_s5 + $0x160] sm:$0xff] }
 0xf09   : > { %v6489_v46 = vpop.permute.xlu1 %6488 }
 0xf0b   : > { %6584 = vrot.lane.b32.xlu1 %v6375_v14, %s14102_s29 }
 0xf0d   : > { %v6599_v58 = vpop.permute.xlu1 %6598 }
 0xf0e   : > { %v6721_v30 = vsel %vm6710_vm10, %v6709_v19, %v6599_v58 }
 0xf0f   : > { %6538 = vrot.lane.b32.xlu1 %v21958_v4, %s14101_s27 }
 0xf11   : > { %v6443_v27 = vpop.permute.xlu1 %6442  ;;  %v13904_v33 = vpop.eup %13903 }
 0xf12   : > { %v6684_v23 = vsel %vm6675_vm8, %v6338_v28, %v6443_v27  ;;  %v6223_v31 = vmul.f32 0.6931472, %v13904_v33  ;;  %v5725_v28 = vld [vmem:[%s18272_s5 + $0xc8] sm:$0xff] }
 0xf13   : > { %6472 = vrot.lane.b32.xlu1 %v6352_v34, %s14100_s30  ;;  %v5788_v34 = vmax.f32 %v5725_v28, 0.0 }
 0xf14   : > { %v6339_v36 = vadd.f32 %v6223_v31, %v5432_v41  ;;  %v5721_v41 = vld [vmem:[%s18272_s5 + $0xa8] sm:$0xff] }
 0xf15   : > { %v6553_v43 = vpop.permute.xlu1 %6552  ;;  %v5784_v31 = vmax.f32 %v5721_v41, 0.0 }
 0xf16   : > { %v6685_v13 = vsel %vm6675_vm8, %v6339_v36, %v19474_v42 }
 0xf17   : > { %6426 = vrot.lane.b32.xlu1 %v21960_v59, %s14099_s2  ;;  %v6697_v18 = vsel %vm6687_vm9, %v6685_v13, %v6489_v46  ;;  %v5746_v59 = vld [vmem:[%s18272_s5 + $0x170] sm:$0xff]  ;;  %v5847_v53 = vmin.f32 %v5784_v31, 1.0 }
 0xf18   : > { %v6708_v7 = vsel %vm1986_vm5, %v6697_v18, %v6553_v43  ;;  %v5851_v43 = vmin.f32 %v5788_v34, 1.0  ;;  %v5809_v21 = vmax.f32 %v5746_v59, 0.0 }
 0xf19   : > { %v6663_v35 = vpop.permute.xlu1 %6662  ;;  %v5973_v13 = vsub.f32 1.0, %v5847_v53 }
 0xf1a   : > { %v19501_v17 = vsel %vm6722_vm11, %v6721_v30, %v6663_v35  ;;  %v5977_v55 = vsub.f32 1.0, %v5851_v43  ;;  %v5723_v35 = vld [vmem:[%s18272_s5 + $0xb8] sm:$0xff]  ;;  %v5914_v47 = vmax.f32 %v5851_v43, 1e-05 }
 0xf1b   : > { %13619 = vmatpush3.msk.msra.mxu1 %vm6404_vm6, %v19501_v17  ;;  %6646 = vrot.lane.b32.xlu1 %v21962_v9, %s14103_s23  ;;  %v5872_v9 = vmin.f32 %v5809_v21, 1.0  ;;  %v5786_v26 = vmax.f32 %v5723_v35, 0.0  ;;  %v21973_v21 = vld [vmem:[#allocation55_spill] sm:$0xff] }
 0xf1c   : > { %13620 = vmatprep.subr.mxu1 %v21662_v1  ;;  %v6040_v0 = vmax.f32 %v5977_v55, 1e-05 }
 0xf1d   : > { %v6487_v62 = vpop.permute.xlu1 %6486 }
 0xf1e   : > { %v6696_v11 = vsel %vm6687_vm9, %v6684_v23, %v6487_v62  ;;  %13905 = vrcp.f32 %v6040_v0  ;;  %v5849_v62 = vmin.f32 %v5786_v26, 1.0 }
 0xf1f   : > { %6580 = vrot.lane.b32.xlu1 %v6373_v52, %s14102_s29  ;;  %v5998_v52 = vsub.f32 1.0, %v5872_v9 }
 0xf20   : > { %v5975_v56 = vsub.f32 1.0, %v5849_v62 }
 0xf21   : > { %v6597_v29 = vpop.permute.xlu1 %6596 }
 0xf22   : > { %v6720_v63 = vsel %vm6710_vm10, %v6708_v7, %v6597_v29  ;;  %v6038_v29 = vmax.f32 %v5975_v56, 1e-05  ;;  %v5912_v7 = vmax.f32 %v5849_v62, 1e-05 }
 0xf23   : > { %6644 = vrot.lane.b32.xlu1 %v21964_v40, %s14103_s23  ;;  %v5807_v40 = vmax.f32 %v5744_v51, 0.0  ;;  %v21975_v51 = vld [vmem:[#allocation50_spill] sm:$0xff] }
 0xf25   : > { %v6441_v38 = vpop.permute.xlu1 %6440  ;;  %v5870_v22 = vmin.f32 %v5807_v40, 1.0 }
 0xf26   : > { %v19518_v6 = vsel %vm6675_vm8, %v6337_v57, %v6441_v38  ;;  %v5935_v38 = vmax.f32 %v5872_v9, 1e-05  ;;  %v21974_v9 = vld [vmem:[#allocation63_spill] sm:$0xff] }
 0xf27   : > { %6642 = vrot.lane.b32.xlu1 %v6623_v25, %s14103_s23  ;;  %v5996_v39 = vsub.f32 1.0, %v5870_v22 }
 0xf29   : > { %v6551_v37 = vpop.permute.xlu1 %6550  ;;  %v6059_v25 = vmax.f32 %v5996_v39, 1e-05 }
 0xf2a   : > { %v19527_v12 = vsel %vm1986_vm5, %v6696_v11, %v6551_v37  ;;  %v6061_v11 = vmax.f32 %v5998_v52, 1e-05  ;;  %v5742_v37 = vld [vmem:[%s18272_s5 + $0x150] sm:$0xff] }
 0xf2b   : > { %v13906_v33 = vpop.eup %13905 }
 0xf2c   : > { %13907 = vrcp.f32 %v6061_v11  ;;  %v6129_v57 = vmul.f32 %v13906_v33, %v5914_v47  ;;  %v21976_v33 = vld [vmem:[#allocation71_spill] sm:$0xff] }
 0xf2d   : > { %v6661_v14 = vpop.permute.xlu1 %6660  ;;  %13909 = vrcp.f32 %v6038_v29  ;;  %v5607_v29 = vadd.f32 %v19345_v5, %v21976_v33 }
 0xf2e   : > { %v19533_v8 = vsel %vm6722_vm11, %v6720_v63, %v6661_v14  ;;  %13911 = vlog2.f32 %v6129_v57  ;;  %v5805_v63 = vmax.f32 %v5742_v37, 0.0 }
 0xf2f   : > { %13621 = vmatpush3.msra.mxu1 %v19533_v8  ;;  %13913 = vrcp.f32 %v6059_v25  ;;  %v21979_v25 = vld [vmem:[#allocation59_spill] sm:$0xff] }
 0xf30   : > { %13622 = vmatprep.subr.mxu1 %v21662_v1 }
 0xf39   : > { %v13908_v48 = vpop.eup %13907 }
 0xf3a   : > { %v6171_v36 = vmul.f32 %v13908_v48, %v5935_v38  ;;  %v13910_v18 = vpop.eup %13909  ;;  %v21978_v38 = vld [vmem:[#allocation53_spill] sm:$0xff] }
 0xf3b   : > { %v13912_v14 = vpop.eup %13911  ;;  %v5492_v48 = vadd.f32 %v19345_v5, %v21978_v38 }
 0xf3c   : > { %13915 = vlog2.f32 %v6171_v36 }
 0xf8e   : > { %v19537_v54 = vpop.f32.mrf.mxu1 }
 0xf8f   : > { %7775 = vxpose.xlu0.b32.start [1/11] (short) (narrow) %v19537_v54, 88 }
 0xf90   : > { %v13532_v42 = vpop.f32.mrf.mxu1 }
 0xf91   : > { %v6125_v42 = vmul.f32 %v13910_v18, %v5912_v7  ;;  %v6513_v7 = vrot.slane %v19289_v50, 4 }
 0xf92   : > { %v19540_v60 = vpop.f32.mrf.mxu1 }
 0xf93   : > { %7776 = vxpose.xlu0.b32.cont [2/11] (short) (narrow) %v19540_v60, 88 }
 0xf94   : > { %v13535_v46 = vpop.f32.mrf.mxu1 }
 0xf96   : > { %v7731_v2 = vpop.f32.mrf.mxu1 }
 0xf97   : > { %7777 = vxpose.xlu0.b32.cont [3/11] (short) (narrow) %v7731_v2, 88 }
 0xf98   : > { %v13538_v16 = vpop.f32.mrf.mxu1 }
 0xf99   : > { %v5868_v16 = vmin.f32 %v5805_v63, 1.0  ;;  %v21980_v63 = vld [vmem:[#allocation67_spill] sm:$0xff] }
 0xf9a   : > { %v7736_v10 = vpop.f32.mrf.mxu1 }
 0xf9b   : > { %7778 = vxpose.xlu0.b32.cont [4/11] (short) (narrow) %v7736_v10, 88  ;;  %v5931_v52 = vmax.f32 %v5868_v16, 1e-05 }
 0xf9c   : > { %v13541_v32 = vpop.f32.mrf.mxu1 }
 0xf9e   : > { %v7741_v49 = vpop.f32.mrf.mxu1 }
 0xf9f   : > { %7779 = vxpose.xlu0.b32.cont [5/11] (short) (narrow) %v7741_v49, 88 }
 0xfa0   : > { %v13544_v20 = vpop.f32.mrf.mxu1 }
 0xfa1   : > { %v13914_v20 = vpop.eup %13913 }
 0xfa2   : > { %v7746_v44 = vpop.f32.mrf.mxu1  ;;  %v13916_v28 = vpop.eup %13915 }
 0xfa3   : > { %7780 = vxpose.xlu0.b32.cont [6/11] (short) (narrow) %v7746_v44, 88  ;;  %v6297_v43 = vmul.f32 0.6931472, %v13916_v28 }
 0xfa4   : > { %v13547_v58 = vpop.f32.mrf.mxu1 }
 0xfa5   : > { %v5933_v58 = vmax.f32 %v5870_v22, 1e-05  ;;  %v21977_v22 = vld [vmem:[#allocation62_spill] sm:$0xff] }
 0xfa6   : > { %v7751_v4 = vpop.f32.mrf.mxu1 }
 0xfa7   : > { %7781 = vxpose.xlu0.b32.cont [7/11] (short) (narrow) %v7751_v4, 88  ;;  %v6167_v34 = vmul.f32 %v13914_v20, %v5933_v58 }
 0xfa8   : > { %v13550_v24 = vpop.f32.mrf.mxu1 }
 0xfa9   : > { %v21970_v24 = vld [vmem:[#allocation52_spill] sm:$0xff] }
 0xfaa   : > { %v7756_v27 = vpop.f32.mrf.mxu1 }
 0xfab   : > { %7782 = vxpose.xlu0.b32.cont [8/11] (short) (narrow) %v7756_v27, 88 }
 0xfac   : > { %v13553_v23 = vpop.f32.mrf.mxu1 }
 0xfae   : > { %v7761_v3 = vpop.f32.mrf.mxu1 }
 0xfaf   : > { %7783 = vxpose.xlu0.b32.cont [9/11] (short) (narrow) %v7761_v3, 88 }
 0xfb0   : > { %v13556_v61 = vpop.f32.mrf.mxu1 }
 0xfb1   : > { %v21972_v61 = vld [vmem:[#allocation66_spill] sm:$0xff] }
 0xfb2   : > { %v7766_v45 = vpop.f32.mrf.mxu1 }
 0xfb3   : > { %7784 = vxpose.xlu0.b32.cont [10/11] (short) (narrow) %v7766_v45, 88 }
 0xfb4   : > { %v13559_v19 = vpop.f32.mrf.mxu1 }
 0xfb6   : > { %v7771_v15 = vpop.f32.mrf.mxu1 }
 0xfb7   : > { %7785 = vxpose.xlu0.b32.end [11/11] (short) (narrow) %v7771_v15, 88  ;;  %13564 = vmatpush3.msk.msra.mxu0 %vm6404_vm6, %v7771_v15  ;;  %v5502_v15 = vadd.f32 %v19345_v5, %v21973_v21 }
 0xfb8   : > { %v13562_v30 = vpop.f32.mrf.mxu1  ;;  %13565 = vmatprep.subr.mxu0 %v21662_v1 }
 0xfb9   : > { %13566 = vmatpush3.msra.mxu0 %v7766_v45  ;;  %v5910_v45 = vmax.f32 %v5847_v53, 1e-05 }
 0xfba   : > { %13567 = vmatprep.subr.mxu0 %v21662_v1 }
 0xfbb   : > { %13568 = vmatpush3.msra.mxu0 %v7761_v3 }
 0xfbc   : > { %13569 = vmatprep.subr.mxu0 %v21662_v1 }
 0xfbd   : > { %13570 = vmatpush3.msra.mxu0 %v7756_v27  ;;  %v21971_v27 = vld [vmem:[#allocation75_spill] sm:$0xff] }
 0xfbe   : > { %13571 = vmatprep.subr.mxu0 %v21662_v1  ;;  %v5617_v23 = vadd.f32 %v19345_v5, %v21971_v27  ;;  %v5704_v27 = vld [vmem:[%s18272_s5 + $0x20] sm:$0xff] }
 0xfbf   : > { %13572 = vmatpush3.msra.mxu0 %v7751_v4  ;;  %v19567_v4 = vpop.permute.xlu1 %6484 }
 0xfc0   : > { %13573 = vmatprep.subr.mxu0 %v21662_v1  ;;  %v6376_v59 = vadd.f32 %v6297_v43, %v5617_v23 }
 0xfc1   : > { %13574 = vmatpush3.msra.mxu0 %v7746_v44 }
 0xfc2   : > { %13575 = vmatprep.subr.mxu0 %v21662_v1 }
 0xfc3   : > { %13576 = vmatpush3.msra.mxu0 %v7741_v49  ;;  %v5994_v49 = vsub.f32 1.0, %v5868_v16  ;;  %v19573_v3 = vpop.permute.xlu1 %6594 }
 0xfc4   : > { %13577 = vmatprep.subr.mxu0 %v21662_v1 }
 0xfc5   : > { %13578 = vmatpush3.msra.mxu0 %v7736_v10  ;;  %v21969_v10 = vld [vmem:[#allocation70_spill] sm:$0xff]  ;;  %v6057_v44 = vmax.f32 %v5994_v49, 1e-05 }
 0xfc6   : > { %13579 = vmatprep.subr.mxu0 %v21662_v1 }
 0xfc7   : > { %13580 = vmatpush3.msra.mxu0 %v7731_v2  ;;  %v6255_v2 = vmul.f32 0.6931472, %v13912_v14  ;;  %v19580_v35 = vpop.permute.xlu1 %6438  ;;  %v5597_v14 = vadd.f32 %v19345_v5, %v21980_v63 }
 0xfc8   : > { %13581 = vmatprep.subr.mxu0 %v21662_v1 }
 0xfc9   : > { %13582 = vmatpush3.msra.mxu0 %v19540_v60  ;;  %v21968_v60 = vld [vmem:[#allocation57_spill] sm:$0xff] }
 0xfca   : > { %13583 = vmatprep.subr.mxu0 %v21662_v1  ;;  %v5512_v46 = vadd.f32 %v19345_v5, %v21968_v60  ;;  %v21981_v60 = vld [vmem:[#allocation58_spill] sm:$0xff]  ;;  %v5706_v5 = vld [vmem:[%s18272_s5 + $0x30] sm:$0xff] }
 0xfcb   : > { %13584 = vmatpush3.msra.mxu0 %v19537_v54  ;;  %v6036_v54 = vmax.f32 %v5973_v13, 1e-05  ;;  %v19584_v11 = vpop.permute.xlu1 %6548  ;;  %v5769_v20 = vmax.f32 %v5706_v5, 0.0 }
 0xfcc   : > { %v6355_v32 = vadd.f32 %v6255_v2, %v5512_v46  ;;  %v21982_v46 = vrot.slane %v21981_v60, 4 }
 0xfcd   : > { %13917 = vrcp.f32 %v6036_v54  ;;  %v5832_v28 = vmin.f32 %v5769_v20, 1.0 }
 0xfce   : > { %13919 = vlog2.f32 %v6125_v42  ;;  %v6515_v2 = vsel %vm6404_vm6, %v6513_v7, %v21982_v46 }
 0xfcf   : > { %13921 = vrcp.f32 %v6057_v44  ;;  %v19591_v57 = vpop.permute.xlu1 %6482  ;;  %v5958_v43 = vsub.f32 1.0, %v5832_v28 }
 0xfd0   : > { %13923 = vlog2.f32 %v6167_v34 }
 0xfd3   : > { %v19595_v39 = vpop.permute.xlu1 %6592 }
 0xfd7   : > { %v19602_v37 = vpop.permute.xlu1 %6436 }
 0xfda   : > { %v13918_v55 = vpop.eup %13917 }
 0xfdb   : > { %v13920_v19 = vpop.eup %13919  ;;  %v6121_v0 = vmul.f32 %v13918_v55, %v5910_v45  ;;  %v19614_v16 = vpop.permute.xlu1 %6546  ;;  %v5767_v45 = vmax.f32 %v5704_v27, 0.0 }
 0xfdc   : > { %v6251_v30 = vmul.f32 0.6931472, %v13920_v19  ;;  %v13922_v62 = vpop.eup %13921  ;;  %v6021_v19 = vmax.f32 %v5958_v43, 1e-05 }
 0xfdd   : > { %13925 = vlog2.f32 %v6121_v0  ;;  %v6163_v56 = vmul.f32 %v13922_v62, %v5931_v52  ;;  %v13924_v47 = vpop.eup %13923  ;;  %v5830_v21 = vmin.f32 %v5767_v45, 1.0  ;;  %v5703_v52 = vld [vmem:[%s18272_s5 + $0x18] sm:$0xff]  ;;  %v19680_v45 = vld [vmem:[%s21340_s15] ss:$0 sm:$0xff] }
 0xfde   : > { %v6353_v26 = vadd.f32 %v6251_v30, %v5502_v15  ;;  %v6293_v40 = vmul.f32 0.6931472, %v13924_v47 }
 0xfdf   : > { %13927 = vlog2.f32 %v6163_v56  ;;  %v5893_v60 = vmax.f32 %v5830_v21, 1e-05 }
 0xfe0   : > { %6658 = vrot.lane.b32.xlu0 %v21969_v10, %s14103_s23  ;;  %v6374_v41 = vadd.f32 %v6293_v40, %v5607_v29  ;;  %13929 = vrcp.f32 %v6021_v19  ;;  %v5702_v40 = vld [vmem:[%s18272_s5 + $0x10] sm:$0xff] }
 0xfe4   : > { %6478 = vrot.lane.b32.xlu0 %v6355_v32, %s14100_s30  ;;  %v19625_v32 = vpop.permute.xlu1 %6656 }
 0xfe8   : > { %6432 = vrot.lane.b32.xlu0 %v21970_v24, %s14099_s2  ;;  %v19630_v58 = vpop.permute.xlu1 %6480  ;;  %v5705_v24 = vld [vmem:[%s18272_s5 + $0x28] sm:$0xff] }
 0xfe9   : > { %v5768_v23 = vmax.f32 %v5705_v24, 0.0 }
 0xfea   : > { %v13926_v31 = vpop.eup %13925 }
 0xfeb   : > { %v6247_v53 = vmul.f32 0.6931472, %v13926_v31  ;;  %v5895_v31 = vmax.f32 %v5832_v28, 1e-05  ;;  %v5700_v28 = vld [vmem:[%s18272_s5] sm:$0xff] }
 0xfec   : > { %6652 = vrot.lane.b32.xlu0 %v21972_v61, %s14103_s23  ;;  %v13928_v13 = vpop.eup %13927  ;;  %v19640_v61 = vpop.permute.xlu1 %6590  ;;  %v5763_v27 = vmax.f32 %v5700_v28, 0.0 }
 0xfed   : > { %v6351_v36 = vadd.f32 %v6247_v53, %v5492_v48  ;;  %v6289_v54 = vmul.f32 0.6931472, %v13928_v13  ;;  %v13930_v38 = vpop.eup %13929  ;;  %v5765_v48 = vmax.f32 %v5702_v40, 0.0 }
 0xfef   : > { %v6372_v50 = vadd.f32 %v6289_v54, %v5597_v14 }
 0xff0   : > { %6586 = vrot.lane.b32.xlu0 %v6376_v59, %s14102_s29  ;;  %v5831_v59 = vmin.f32 %v5768_v23, 1.0  ;;  %v19645_v15 = vpop.permute.xlu1 %6434 }
 0xff2   : > { %v5957_v30 = vsub.f32 1.0, %v5831_v59  ;;  %v5894_v14 = vmax.f32 %v5831_v59, 1e-05  ;;  %v21983_v59 = vld [vmem:[#allocation44_spill] sm:$0xff] }
 0xff3   : > { %v5417_v19 = vadd.f32 %v19680_v45, %v21983_v59 }
 0xff4   : > { %6540 = vrot.lane.b32.xlu0 %v21974_v9, %s14101_s27  ;;  %v6020_v62 = vmax.f32 %v5957_v30, 1e-05  ;;  %v19654_v56 = vpop.permute.xlu1 %6544 }
 0xff6   : > { %13931 = vrcp.f32 %v6020_v62  ;;  %v6695_v62 = vsel %vm6687_vm9, %v19518_v6, %v19567_v4 }
 0xff7   : > { %v6706_v40 = vsel %vm1986_vm5, %v6695_v62, %v19584_v11 }
 0xff8   : > { %6474 = vrot.lane.b32.xlu0 %v6353_v26, %s14100_s30  ;;  %v5956_v26 = vsub.f32 1.0, %v5830_v21  ;;  %v19684_v21 = vmin.f32 %v5763_v27, 1.0 }
 0xffa   : > { %v6019_v33 = vmax.f32 %v5956_v26, 1e-05 }
 0xffc   : > { %6428 = vrot.lane.b32.xlu0 %v21975_v51, %s14099_s2  ;;  %v5766_v51 = vmax.f32 %v5703_v52, 0.0  ;;  %13933 = vrcp.f32 %v6019_v33  ;;  %v5952_v52 = vsub.f32 1.0, %v19684_v21 }
0x1000   : > { %6648 = vrot.lane.b32.xlu0 %v21977_v22, %s14103_s23  ;;  %v5829_v22 = vmin.f32 %v5766_v51, 1.0 }
0x1002   : > { %v5955_v53 = vsub.f32 1.0, %v5829_v22  ;;  %v5892_v23 = vmax.f32 %v5829_v22, 1e-05 }
0x1003   : > { %v13932_v54 = vpop.eup %13931 }
0x1004   : > { %6582 = vrot.lane.b32.xlu0 %v6374_v41, %s14102_s29  ;;  %v19660_v41 = vpop.permute.xlu1 %6654  ;;  %v6018_v7 = vmax.f32 %v5955_v53, 1e-05 }
0x1008   : > { %6536 = vrot.lane.b32.xlu0 %v21979_v25, %s14101_s27  ;;  %v6091_v25 = vmul.f32 %v13930_v38, %v5895_v31  ;;  %v19665_v13 = vpop.permute.xlu1 %6588 }
0x100a   : > { %13935 = vlog2.f32 %v6091_v25 }
0x100b   : > { %v7791_v18 = vpop.trf.xlu0  ;;  %13937 = vrcp.f32 %v6018_v7 }
0x100c   : > { %13586 = vmatmul.mubr.msk.f32.vlgmr.msra.gmra.mxu0 %vm7807_vm12, %v7791_v18  ;;  %6470 = vrot.lane.b32.xlu0 %v6351_v36, %s14100_s30  ;;  %v5701_v36 = vld [vmem:[%s18272_s5 + $0x8] sm:$0xff]  ;;  %v5828_v18 = vmin.f32 %v5765_v48, 1.0  ;;  %v19667_v46 = vpop.permute.xlu1 %6542  ;;  %s21991_s5 = sld [smem:[#allocation108_spill]] }
0x100d   : > { %13588 = vmatprep.mubr.msk.f32.mxu0 %vm14097_vm0, %v21662_v1  ;;  %v5764_v63 = vmax.f32 %v5701_v36, 0.0 }
0x100e   : > { %v5891_v38 = vmax.f32 %v5828_v18, 1e-05 }
0x100f   : > { %v7792_v42 = vpop.trf.xlu0 }
0x1010   : > { %13589 = vmatmul.mubr.msk.f32.gmra.mxu0 %vm7807_vm12, %v7792_v42  ;;  %6534 = vrot.lane.b32.xlu0 %v6515_v2, %s14101_s27  ;;  %v5954_v42 = vsub.f32 1.0, %v5828_v18  ;;  %v13934_v2 = vpop.eup %13933  ;;  %v21985_v18 = vld [vmem:[#allocation42_spill] sm:$0xff] }
0x1011   : > { %13591 = vmatprep.mubr.msk.f32.mxu0 %vm14097_vm0, %v21662_v1 }
0x1012   : > { %v6017_v5 = vmax.f32 %v5954_v42, 1e-05 }
0x1013   : > { %v7793_v10 = vpop.trf.xlu0 }
0x1014   : > { %13592 = vmatmul.mubr.msk.f32.gmra.mxu0 %vm7807_vm12, %v7793_v10  ;;  %6578 = vrot.lane.b32.xlu0 %v6372_v50, %s14102_s29  ;;  %v19669_v50 = vmin.f32 %v5764_v63, 1.0  ;;  %v6089_v10 = vmul.f32 %v13932_v54, %v5894_v14  ;;  %s21990_s29 = sld [smem:[#allocation107_spill]] }
0x1015   : > { %13594 = vmatprep.mubr.msk.f32.mxu0 %vm14097_vm0, %v21662_v1 }
0x1016   : > { %v5953_v20 = vsub.f32 1.0, %v19669_v50  ;;  %13939 = vlog2.f32 %v6089_v10  ;;  %v5890_v14 = vmax.f32 %v19669_v50, 1e-05 }
0x1017   : > { %v7794_v49 = vpop.trf.xlu0  ;;  %13941 = vrcp.f32 %v6017_v5 }
0x1018   : > { %13595 = vmatmul.mubr.msk.f32.gmra.mxu0 %vm7807_vm12, %v7794_v49  ;;  %v6087_v49 = vmul.f32 %v13934_v2, %v5893_v60  ;;  %v6016_v24 = vmax.f32 %v5953_v20, 1e-05 }
0x1019   : > { %13597 = vmatprep.mubr.msk.f32.mxu0 %vm14097_vm0, %v21662_v1 }
0x101a   : > { %13943 = vlog2.f32 %v6087_v49  ;;  %s19867_s1 = scalar_lea.vmem %s21990_s29, %s13674_s24  ;;  %s21590_s24 = smov 12  }
0x101b   : > { %v7795_v44 = vpop.trf.xlu0  ;;  %13945 = vrcp.f32 %v6016_v24 }
0x101c   : > { %13598 = vmatmul.mubr.msk.f32.gmra.mxu0 %vm7807_vm12, %v7795_v44  ;;  %v19672_v44 = vpop.permute.xlu1 %6476 }
0x101d   : > { %13600 = vmatprep.mubr.msk.f32.mxu0 %vm14097_vm0, %v21662_v1 }
0x101f   : > { %v7796_v34 = vpop.trf.xlu0 }
0x1020   : > { %13601 = vmatmul.mubr.msk.f32.gmra.mxu0 %vm7807_vm12, %v7796_v34  ;;  %v13936_v34 = vpop.eup %13935  ;;  %v19675_v43 = vpop.permute.xlu1 %6430 }
0x1021   : > { %13603 = vmatprep.mubr.msk.f32.mxu0 %vm14097_vm0, %v21662_v1 }
0x1023   : > { %v7797_v55 = vpop.trf.xlu0 }
0x1024   : > { %13604 = vmatmul.mubr.msk.f32.gmra.mxu0 %vm7807_vm12, %v7797_v55  ;;  %v13938_v55 = vpop.eup %13937  ;;  %v6651_v51 = vpop.permute.xlu1 %6650 }
0x1025   : > { %13606 = vmatprep.mubr.msk.f32.mxu0 %vm14097_vm0, %v21662_v1  ;;  %v6085_v30 = vmul.f32 %v13938_v55, %v5892_v23  ;;  %v13940_v26 = vpop.eup %13939  ;;  %v21986_v23 = vld [vmem:[#allocation41_spill] sm:$0xff] }
0x1026   : > { %v13942_v31 = vpop.eup %13941  ;;  %v6215_v48 = vmul.f32 0.6931472, %v13940_v26  ;;  %v5402_v55 = vadd.f32 %v19680_v45, %v21986_v23  ;;  %v7964_v23 = vld [vmem:[%s21333_s8] sm:$0xff] }
0x1027   : > { %v7798_v0 = vpop.trf.xlu0  ;;  %13947 = vlog2.f32 %v6085_v30  ;;  %v13944_v4 = vpop.eup %13943 }
0x1028   : > { %13607 = vmatmul.mubr.msk.f32.gmra.mxu0 %vm7807_vm12, %v7798_v0  ;;  %v6217_v0 = vmul.f32 0.6931472, %v13936_v34  ;;  %v6213_v7 = vmul.f32 0.6931472, %v13944_v4  ;;  %v6585_v63 = vpop.permute.xlu1 %6584  ;;  %v13946_v54 = vpop.eup %13945  ;;  %v21988_v4 = vld [vmem:[#allocation39_spill] sm:$0xff] }
0x1029   : > { %13609 = vmatprep.mubr.msk.f32.mxu0 %vm14097_vm0, %v21662_v1  ;;  %v6081_v10 = vmul.f32 %v13946_v54, %v5890_v14 }
0x102b   : > { %v7799_v9 = vpop.trf.xlu0 }
0x102c   : > { %13610 = vmatmul.mubr.msk.f32.gmra.mxu0 %vm7807_vm12, %v7799_v9  ;;  %v6336_v9 = vadd.f32 %v6217_v0, %v5417_v19  ;;  %v6539_v20 = vpop.permute.xlu1 %6538  ;;  %v5889_v19 = vmax.f32 %v19684_v21, 1e-05 }
0x102d   : > { %13612 = vmatprep.mubr.msk.f32.mxu0 %vm14097_vm0, %v21662_v1 }
0x102f   : > { %v7800_v47 = vpop.trf.xlu0 }
0x1030   : > { %13613 = vmatmul.mubr.msk.f32.gmra.mxu0 %vm7807_vm12, %v7800_v47  ;;  %v6719_v47 = vsel %vm6710_vm10, %v19527_v12, %v19573_v3  ;;  %v6718_v12 = vsel %vm6710_vm10, %v6706_v40, %v19595_v39  ;;  %v21984_v3 = vld [vmem:[#allocation43_spill] sm:$0xff] }
0x1031   : > { %13615 = vmatprep.mubr.msk.f32.mxu0 %vm14097_vm0, %v21662_v1  ;;  %v19711_v53 = vsel %vm6722_vm11, %v6718_v12, %v19625_v32  ;;  %v5407_v32 = vadd.f32 %v19680_v45, %v21985_v18 }
0x1033   : > { %v7801_v29 = vpop.trf.xlu0  ;;  %v6334_v60 = vadd.f32 %v6213_v7, %v5407_v32 }
0x1034   : > { %13616 = vmatmul.mubr.msk.f32.gmra.mxu0 %vm7807_vm12, %v7801_v29  ;;  %v6682_v29 = vsel %vm6675_vm8, %v6336_v9, %v19580_v35  ;;  %v5412_v35 = vadd.f32 %v19680_v45, %v21984_v3  ;;  %v5392_v3 = vadd.f32 %v19680_v45, %v21988_v4 }
0x1035   : > { %8945 = vmatprep.mubr.f32.mxu0 %v21662_v1  ;;  %v6694_v6 = vsel %vm6687_vm9, %v6682_v29, %v19591_v57  ;;  %v6015_v57 = vmax.f32 %v5952_v52, 1e-05  ;;  %v6680_v50 = vsel %vm6675_vm8, %v6334_v60, %v19645_v15 }
0x1036   : > { %v6705_v11 = vsel %vm1986_vm5, %v6694_v6, %v19614_v16  ;;  %v6083_v16 = vmul.f32 %v13942_v31, %v5891_v38 }
0x1037   : > { %v6717_v39 = vsel %vm6710_vm10, %v6705_v11, %v19640_v61  ;;  %v6335_v61 = vadd.f32 %v6215_v48, %v5412_v35  ;;  %13949 = vrcp.f32 %v6015_v57 }
0x1038   : > { %v19719_v36 = vsel %vm6722_vm11, %v6717_v39, %v19660_v41  ;;  %13951 = vlog2.f32 %v6083_v16 }
0x1039   : > { %v6681_v41 = vsel %vm6675_vm8, %v6335_v61, %v19602_v37  ;;  %13953 = vlog2.f32 %v6081_v10  ;;  %v21989_v10 = vld [vmem:[#allocation38_spill] sm:$0xff] }
0x103a   : > { %v6693_v2 = vsel %vm6687_vm9, %v6681_v41, %v19630_v58  ;;  %v13948_v58 = vpop.eup %13947 }
0x103b   : > { %v6704_v5 = vsel %vm1986_vm5, %v6693_v2, %v19654_v56  ;;  %v6211_v59 = vmul.f32 0.6931472, %v13948_v58 }
0x103c   : > { %v6716_v49 = vsel %vm6710_vm10, %v6704_v5, %v19665_v13  ;;  %v6473_v13 = vpop.permute.xlu1 %6472  ;;  %v5387_v5 = vadd.f32 %v19680_v45, %v21989_v10  ;;  %v7974_v10 = vld [vmem:[%s21333_s8 + $0x50] sm:$0xf] }
0x1040   : > { %v6427_v52 = vpop.permute.xlu1 %6426 }
0x1044   : > { %v13950_v30 = vpop.eup %13949  ;;  %v6647_v12 = vpop.permute.xlu1 %6646 }
0x1045   : > { %v13952_v9 = vpop.eup %13951  ;;  %v6079_v26 = vmul.f32 %v13950_v30, %v5889_v19 }
0x1046   : > { %v6209_v29 = vmul.f32 0.6931472, %v13952_v9  ;;  %v13954_v40 = vpop.eup %13953 }
0x1047   : > { %13955 = vlog2.f32 %v6079_v26  ;;  %v6207_v35 = vmul.f32 0.6931472, %v13954_v40  ;;  %v7966_v26 = vld [vmem:[%s21333_s8 + $0x10] sm:$0xff] }
0x1048   : > { %v6581_v16 = vpop.permute.xlu1 %6580 }
0x104c   : > { %v6645_v41 = vpop.permute.xlu1 %6644 }
0x1052   : > { %v6659_v33 = vpop.permute.xlu0 %6658 }
0x1053   : > { %v19698_v22 = vsel %vm6722_vm11, %v6719_v47, %v6659_v33 }
0x1054   : > { %13623 = vmatpush3.msra.mxu1 %v19698_v22  ;;  %v13956_v54 = vpop.eup %13955 }
0x1055   : > { %13624 = vmatprep.subr.mxu1 %v21662_v1 }
0x1056   : > { %v6479_v25 = vpop.permute.xlu0 %6478  ;;  %13625 = vmatpush3.msra.mxu1 %v19711_v53 }
0x1057   : > { %13626 = vmatprep.subr.mxu1 %v21662_v1  ;;  %v6692_v24 = vsel %vm6687_vm9, %v6680_v50, %v6479_v25  ;;  %v6205_v50 = vmul.f32 0.6931472, %v13956_v54  ;;  %v7973_v54 = vld [vmem:[%s21333_s8 + $0x48] sm:$0xff] }
0x1058   : > { %13627 = vmatpush3.msra.mxu1 %v19719_v36  ;;  %v6703_v15 = vsel %vm1986_vm5, %v6692_v24, %v19667_v46  ;;  %v6333_v46 = vadd.f32 %v6211_v59, %v5402_v55 }
0x1059   : > { %13628 = vmatprep.subr.mxu1 %v21662_v1 }
0x105a   : > { %v6433_v42 = vpop.permute.xlu0 %6432 }
0x105b   : > { %v6679_v47 = vsel %vm6675_vm8, %v6333_v46, %v6433_v42 }
0x105c   : > { %v6691_v21 = vsel %vm6687_vm9, %v6679_v47, %v19672_v44  ;;  %v6331_v44 = vadd.f32 %v6207_v35, %v5392_v3 }
0x105e   : > { %v6653_v28 = vpop.permute.xlu0 %6652 }
0x105f   : > { %v19739_v37 = vsel %vm6722_vm11, %v6716_v49, %v6653_v28 }
0x1060   : > { %13629 = vmatpush3.msra.mxu1 %v19739_v37 }
0x1061   : > { %13630 = vmatprep.subr.mxu1 %v21662_v1 }
0x1062   : > { %v6587_v56 = vpop.permute.xlu0 %6586 }
0x1063   : > { %v6715_v34 = vsel %vm6710_vm10, %v6703_v15, %v6587_v56 }
0x1064   : > { %v19747_v27 = vsel %vm6722_vm11, %v6715_v34, %v6651_v51  ;;  %v21987_v51 = vld [vmem:[#allocation40_spill] sm:$0xff]  ;;  %v6643_v34 = vpop.permute.xlu1 %6642 }
0x1065   : > { %13631 = vmatpush3.msra.mxu1 %v19747_v27  ;;  %v5397_v33 = vadd.f32 %v19680_v45, %v21987_v51  ;;  %v7967_v51 = vld [vmem:[%s21333_s8 + $0x18] sm:$0xff] }
0x1066   : > { %v6541_v0 = vpop.permute.xlu0 %6540  ;;  %13632 = vmatprep.subr.mxu1 %v21662_v1 }
0x1067   : > { %v6702_v38 = vsel %vm1986_vm5, %v6691_v21, %v6541_v0  ;;  %v6332_v6 = vadd.f32 %v6209_v29, %v5397_v33  ;;  %v7965_v0 = vld [vmem:[%s21333_s8 + $0x8] sm:$0xff]  ;;  %v7968_v21 = vld [vmem:[%s21333_s8 + $0x20] sm:$0xff] }
0x1068   : > { %v6714_v57 = vsel %vm6710_vm10, %v6702_v38, %v6585_v63 }
0x1069   : > { %v6678_v48 = vsel %vm6675_vm8, %v6332_v6, %v19675_v43 }
0x106a   : > { %v6475_v62 = vpop.permute.xlu0 %6474 }
0x106b   : > { %v6690_v39 = vsel %vm6687_vm9, %v6678_v48, %v6475_v62  ;;  %v7970_v48 = vld [vmem:[%s21333_s8 + $0x30] sm:$0xff] }
0x106c   : > { %v6701_v32 = vsel %vm1986_vm5, %v6690_v39, %v6539_v20  ;;  %v6330_v20 = vadd.f32 %v6205_v50, %v5387_v5 }
0x106e   : > { %v6429_v31 = vpop.permute.xlu0 %6428  ;;  %v6676_v24 = vsel %vm6675_vm8, %v6330_v20, %v6427_v52 }
0x106f   : > { %v6677_v7 = vsel %vm6675_vm8, %v6331_v44, %v6429_v31  ;;  %v7971_v44 = vld [vmem:[%s21333_s8 + $0x38] sm:$0xff] }
0x1070   : > { %v6689_v61 = vsel %vm6687_vm9, %v6677_v7, %v6473_v13  ;;  %v7972_v7 = vld [vmem:[%s21333_s8 + $0x40] sm:$0xff] }
0x1072   : > { %v6649_v11 = vpop.permute.xlu0 %6648 }
0x1073   : > { %v19767_v25 = vsel %vm6722_vm11, %v6714_v57, %v6649_v11 }
0x1074   : > { %13633 = vmatpush3.msra.mxu1 %v19767_v25 }
0x1075   : > { %13634 = vmatprep.subr.mxu1 %v21662_v1 }
0x1076   : > { %v6583_v18 = vpop.permute.xlu0 %6582 }
0x1077   : > { %v6713_v43 = vsel %vm6710_vm10, %v6701_v32, %v6583_v18 }
0x1078   : > { %v19775_v63 = vsel %vm6722_vm11, %v6713_v43, %v6647_v12  ;;  %v7969_v12 = vld [vmem:[%s21333_s8 + $0x28] sm:$0xff] }
0x1079   : > { %13635 = vmatpush3.msra.mxu1 %v19775_v63 }
0x107a   : > { %v6537_v14 = vpop.permute.xlu0 %6536  ;;  %13636 = vmatprep.subr.mxu1 %v21662_v1 }
0x107b   : > { %v6700_v42 = vsel %vm1986_vm5, %v6689_v61, %v6537_v14 }
0x107c   : > { %v6712_v60 = vsel %vm6710_vm10, %v6700_v42, %v6581_v16 }
0x107d   : > { %v19783_v2 = vsel %vm6722_vm11, %v6712_v60, %v6645_v41 }
0x107e   : > { %v6471_v49 = vpop.permute.xlu0 %6470  ;;  %13637 = vmatpush3.msra.mxu1 %v19783_v2 }
0x107f   : > { %13638 = vmatprep.subr.mxu1 %v21662_v1  ;;  %v6688_v58 = vsel %vm6687_vm9, %v6676_v24, %v6471_v49 }
0x1082   : > { %v6535_v28 = vpop.permute.xlu0 %6534 }
0x1083   : > { %v6699_v56 = vsel %vm1986_vm5, %v6688_v58, %v6535_v28 }
0x1086   : > { %v6579_v15 = vpop.permute.xlu0 %6578 }
0x1087   : > { %v6711_v13 = vsel %vm6710_vm10, %v6699_v56, %v6579_v15 }
0x1088   : > { %v19794_v45 = vsel %vm6722_vm11, %v6711_v13, %v6643_v34 }
0x1089   : > { %13639 = vmatpush3.msra.mxu1 %v19794_v45 }
0x10cc   : > { %v7910_v55 = vpop.f32.mrf.mxu0 }
0x10cd   : > { %v7975_v59 = vmul.f32 %v7964_v23, %v7910_v55 }
0x10ce   : > { %v13587_v19 = vpop.f32.mrf.mxu0 }
0x10cf   : > { %13641 = vmatmul.mubr.msk.f32.vlgmr.msra.gmra.mxu1 %vm7807_vm12, %v7975_v59 }
0x10d0   : > { %v7915_v30 = vpop.f32.mrf.mxu0  ;;  %13643 = vmatprep.mubr.msk.f32.mxu1 %vm14097_vm0, %v21662_v1 }
0x10d1   : > { %v7976_v9 = vmul.f32 %v7965_v0, %v7915_v30 }
0x10d2   : > { %v13590_v46 = vpop.f32.mrf.mxu0 }
0x10d3   : > { %13644 = vmatmul.mubr.msk.f32.gmra.mxu1 %vm7807_vm12, %v7976_v9 }
0x10d4   : > { %v7920_v52 = vpop.f32.mrf.mxu0  ;;  %13646 = vmatprep.mubr.msk.f32.mxu1 %vm14097_vm0, %v21662_v1 }
0x10d5   : > { %v7977_v62 = vmul.f32 %v7966_v26, %v7920_v52 }
0x10d6   : > { %v13593_v47 = vpop.f32.mrf.mxu0 }
0x10d7   : > { %13647 = vmatmul.mubr.msk.f32.gmra.mxu1 %vm7807_vm12, %v7977_v62 }
0x10d8   : > { %v7925_v33 = vpop.f32.mrf.mxu0  ;;  %13649 = vmatprep.mubr.msk.f32.mxu1 %vm14097_vm0, %v21662_v1 }
0x10d9   : > { %v7978_v29 = vmul.f32 %v7967_v51, %v7925_v33 }
0x10da   : > { %v13596_v40 = vpop.f32.mrf.mxu0 }
0x10db   : > { %13650 = vmatmul.mubr.msk.f32.gmra.mxu1 %vm7807_vm12, %v7978_v29 }
0x10dc   : > { %v7930_v31 = vpop.f32.mrf.mxu0  ;;  %13652 = vmatprep.mubr.msk.f32.mxu1 %vm14097_vm0, %v21662_v1 }
0x10dd   : > { %v7979_v38 = vmul.f32 %v7968_v21, %v7930_v31 }
0x10de   : > { %v13599_v6 = vpop.f32.mrf.mxu0 }
0x10df   : > { %13653 = vmatmul.mubr.msk.f32.gmra.mxu1 %vm7807_vm12, %v7979_v38 }
0x10e0   : > { %v7935_v4 = vpop.f32.mrf.mxu0  ;;  %13655 = vmatprep.mubr.msk.f32.mxu1 %vm14097_vm0, %v21662_v1 }
0x10e1   : > { %v7980_v3 = vmul.f32 %v7969_v12, %v7935_v4 }
0x10e2   : > { %v13602_v35 = vpop.f32.mrf.mxu0 }
0x10e3   : > { %13656 = vmatmul.mubr.msk.f32.gmra.mxu1 %vm7807_vm12, %v7980_v3 }
0x10e4   : > { %v7940_v11 = vpop.f32.mrf.mxu0  ;;  %13658 = vmatprep.mubr.msk.f32.mxu1 %vm14097_vm0, %v21662_v1 }
0x10e5   : > { %v7981_v57 = vmul.f32 %v7970_v48, %v7940_v11 }
0x10e6   : > { %v13605_v39 = vpop.f32.mrf.mxu0 }
0x10e7   : > { %13659 = vmatmul.mubr.msk.f32.gmra.mxu1 %vm7807_vm12, %v7981_v57  ;;  %v19870_v57 = vld [vmem:[%s19867_s1] sm:$0xff] }
0x10e8   : > { %v7945_v16 = vpop.f32.mrf.mxu0  ;;  %13661 = vmatprep.mubr.msk.f32.mxu1 %vm14097_vm0, %v21662_v1 }
0x10e9   : > { %v7982_v18 = vmul.f32 %v7971_v44, %v7945_v16 }
0x10ea   : > { %v13608_v32 = vpop.f32.mrf.mxu0 }
0x10eb   : > { %13662 = vmatmul.mubr.msk.f32.gmra.mxu1 %vm7807_vm12, %v7982_v18 }
0x10ec   : > { %v7950_v43 = vpop.f32.mrf.mxu0  ;;  %13664 = vmatprep.mubr.msk.f32.mxu1 %vm14097_vm0, %v21662_v1 }
0x10ed   : > { %v7983_v14 = vmul.f32 %v7972_v7, %v7950_v43  ;;  %v19876_v7 = vld [vmem:[%s21334_s9] ss:$0 sm:$0xff] }
0x10ee   : > { %v13611_v61 = vpop.f32.mrf.mxu0 }
0x10ef   : > { %13665 = vmatmul.mubr.msk.f32.gmra.mxu1 %vm7807_vm12, %v7983_v14 }
0x10f0   : > { %v7955_v42 = vpop.f32.mrf.mxu0  ;;  %13667 = vmatprep.mubr.msk.f32.mxu1 %vm14097_vm0, %v21662_v1 }
0x10f1   : > { %v7984_v41 = vmul.f32 %v7973_v54, %v7955_v42  ;;  %v19880_v54 = vld [vmem:[%s19867_s1 + $0x8] sm:$0xff] }
0x10f2   : > { %v13614_v60 = vpop.f32.mrf.mxu0 }
0x10f3   : > { %13668 = vmatmul.mubr.msk.f32.gmra.mxu1 %vm7807_vm12, %v7984_v41 }
0x10f4   : > { %v7960_v5 = vpop.f32.mrf.mxu0  ;;  %13670 = vmatprep.mubr.msk.f32.mxu1 %vm14097_vm0, %v21662_v1 }
0x10f5   : > { %v7985_v50 = vmul.f32 %v7974_v10, %v7960_v5 }
0x10f6   : > { %v13617_v49 = vpop.f32.mrf.mxu0 }
0x10f7   : > { %13671 = vmatmul.mubr.msk.f32.gmra.mxu1 %vm7807_vm12, %v7985_v50 }
0x10f8   : > { %9028 = vmatprep.mubr.f32.mxu1 %v21662_v1 }
0x118f   : > { %v8088_v20 = vpop.f32.mrf.mxu1 }
0x1190   : > { %v10923_v28 = vmul.f32 -1.442695, %v8088_v20 }
0x1191   : > { %v13642_v24 = vpop.f32.mrf.mxu1 }
0x1192   : > { %13957 = vpow2.f32 %v10923_v28  ;;  %v19886_v28 = vld [vmem:[%s19867_s1 + $0x10] sm:$0xff] }
0x1193   : > { %v8093_v58 = vpop.f32.mrf.mxu1 }
0x1194   : > { %v10924_v56 = vmul.f32 -1.442695, %v8093_v58 }
0x1195   : > { %v13645_v15 = vpop.f32.mrf.mxu1 }
0x1196   : > { %13959 = vpow2.f32 %v10924_v56 }
0x1197   : > { %v8098_v34 = vpop.f32.mrf.mxu1 }
0x1198   : > { %v10925_v13 = vmul.f32 -1.442695, %v8098_v34 }
0x1199   : > { %v13648_v23 = vpop.f32.mrf.mxu1 }
0x119a   : > { %13961 = vpow2.f32 %v10925_v13 }
0x119b   : > { %v8103_v55 = vpop.f32.mrf.mxu1 }
0x119c   : > { %v10926_v59 = vmul.f32 -1.442695, %v8103_v55  ;;  %v19892_v55 = vld [vmem:[%s19867_s1 + $0x18] sm:$0xff] }
0x119d   : > { %v13651_v19 = vpop.f32.mrf.mxu1 }
0x119e   : > { %13963 = vpow2.f32 %v10926_v59 }
0x119f   : > { %v13958_v0 = vpop.eup %13957  ;;  %v8108_v30 = vpop.f32.mrf.mxu1 }
0x11a0   : > { %v8281_v9 = vadd.f32 1.0, %v13958_v0  ;;  %v10927_v46 = vmul.f32 -1.442695, %v8108_v30 }
0x11a1   : > { %v13654_v26 = vpop.f32.mrf.mxu1 }
0x11a2   : > { %13965 = vrcp.f32 %v8281_v9 }
0x11a3   : > { %v13960_v52 = vpop.eup %13959  ;;  %13967 = vpow2.f32 %v10927_v46  ;;  %v8113_v62 = vpop.f32.mrf.mxu1 }
0x11a4   : > { %v8282_v47 = vadd.f32 1.0, %v13960_v52  ;;  %v10928_v51 = vmul.f32 -1.442695, %v8113_v62  ;;  %v19899_v52 = vld [vmem:[%s19867_s1 + $0x20] sm:$0xff] }
0x11a5   : > { %v13657_v33 = vpop.f32.mrf.mxu1 }
0x11a6   : > { %13969 = vrcp.f32 %v8282_v47 }
0x11a7   : > { %v13962_v29 = vpop.eup %13961  ;;  %13971 = vpow2.f32 %v10928_v51  ;;  %v8118_v40 = vpop.f32.mrf.mxu1 }
0x11a8   : > { %v8283_v21 = vadd.f32 1.0, %v13962_v29  ;;  %v10929_v31 = vmul.f32 -1.442695, %v8118_v40  ;;  %v19904_v40 = vld [vmem:[%s19867_s1 + $0x28] sm:$0xff] }
0x11a9   : > { %v13660_v38 = vpop.f32.mrf.mxu1 }
0x11aa   : > { %13973 = vrcp.f32 %v8283_v21 }
0x11ab   : > { %v13964_v6 = vpop.eup %13963  ;;  %13975 = vpow2.f32 %v10929_v31  ;;  %v8123_v12 = vpop.f32.mrf.mxu1 }
0x11ac   : > { %v8284_v4 = vadd.f32 1.0, %v13964_v6  ;;  %v10930_v3 = vmul.f32 -1.442695, %v8123_v12 }
0x11ad   : > { %v13663_v35 = vpop.f32.mrf.mxu1 }
0x11ae   : > { %13977 = vrcp.f32 %v8284_v4  ;;  %v19910_v4 = vld [vmem:[%s19867_s1 + $0x30] sm:$0xff] }
0x11af   : > { %v13966_v48 = vpop.eup %13965  ;;  %13979 = vpow2.f32 %v10930_v3  ;;  %v8128_v11 = vpop.f32.mrf.mxu1 }
0x11b0   : > { %v13968_v39 = vpop.eup %13967  ;;  %v10931_v44 = vmul.f32 -1.442695, %v8128_v11  ;;  %v8314_v16 = vsub.f32 %v19870_v57, %v13966_v48  ;;  %v19916_v11 = vld [vmem:[%s19867_s1 + $0x38] sm:$0xff] }
0x11b1   : > { %v8285_v18 = vadd.f32 1.0, %v13968_v39  ;;  %v13666_v32 = vpop.f32.mrf.mxu1 }
0x11b2   : > { %13981 = vpow2.f32 %v10931_v44  ;;  %v8325_v43 = vmul.f32 %v19876_v7, %v8314_v16 }
0x11b3   : > { %v13970_v14 = vpop.eup %13969  ;;  %13983 = vrcp.f32 %v8285_v18  ;;  %v8133_v61 = vpop.f32.mrf.mxu1  ;;  %v19922_v18 = vld [vmem:[%s19867_s1 + $0x40] sm:$0xff] }
0x11b4   : > { %v13972_v42 = vpop.eup %13971  ;;  %v10932_v41 = vmul.f32 -1.442695, %v8133_v61  ;;  %8347 = vrot.lane.b32.xlu0 %v8325_v43, %s21590_s24  ;;  %v8315_v60 = vsub.f32 %v19880_v54, %v13970_v14  ;;  %v19927_v43 = vld [vmem:[%s19867_s1 + $0x48] sm:$0xff]  ;;  %v8715_v61 = vld [vmem:[%s21991_s5 + $0xa18] sm:$0xf] }
0x11b5   : > { %v8286_v10 = vadd.f32 1.0, %v13972_v42  ;;  %v13669_v5 = vpop.f32.mrf.mxu1  ;;  %v8713_v14 = vld [vmem:[%s21991_s5 + $0xa08] sm:$0xf]  ;;  %v8712_v42 = vld [vmem:[%s21991_s5 + $0xa00] sm:$0xf]  ;;  %10939 = vmatprep.subr.msk.mxu1 %vm6404_vm6, %v8715_v61 }
0x11b6   : > { %13985 = vpow2.f32 %v10932_v41  ;;  %v8326_v50 = vmul.f32 %v19876_v7, %v8315_v60  ;;  %10934 = vmatprep.subr.msk.mxu0 %vm6404_vm6, %v8713_v14  ;;  %v8714_v60 = vld [vmem:[%s21991_s5 + $0xa10] sm:$0xf]  ;;  %v8683_v5 = vld [vmem:[%s21991_s5 + $0x918] sm:$0xff]  ;;  %v8456_v61 = vld [vmem:[%s21991_s5 + $0x200] sm:$0xff] }
0x11b7   : > { %v13974_v49 = vpop.eup %13973  ;;  %13987 = vrcp.f32 %v8286_v10  ;;  %v8138_v20 = vpop.f32.mrf.mxu1  ;;  %v8681_v10 = vld [vmem:[%s21991_s5 + $0x908] sm:$0xff]  ;;  %10935 = vmatpush1.msk.msra.mxu0 %vm6404_vm6, %v8712_v42  ;;  %10940 = vmatpush1.msk.msra.mxu1 %vm6404_vm6, %v8714_v60  ;;  %v8459_v14 = vld [vmem:[%s21991_s5 + $0x218] sm:$0xff]  ;;  %v8458_v42 = vld [vmem:[%s21991_s5 + $0x210] sm:$0xff] }
0x11b8   : > { %v13976_v24 = vpop.eup %13975  ;;  %v10933_v58 = vmul.f32 -1.442695, %v8138_v20  ;;  %8349 = vrot.lane.b32.xlu1 %v8326_v50, %s21590_s24  ;;  %v8316_v56 = vsub.f32 %v19886_v28, %v13974_v49  ;;  %v8680_v49 = vld [vmem:[%s21991_s5 + $0x900] sm:$0xff]  ;;  %v8682_v20 = vld [vmem:[%s21991_s5 + $0x910] sm:$0xff]  ;;  %8893 = vmatprep.subr.mxu0 %v8681_v10  ;;  %v8427_v60 = vld [vmem:[%s21991_s5 + $0x118] sm:$0xff] }
0x11b9   : > { %v8287_v15 = vadd.f32 1.0, %v13976_v24  ;;  %v13672_v34 = vpop.f32.mrf.mxu1  ;;  %v8649_v24 = vld [vmem:[%s21991_s5 + $0x808] sm:$0xff]  ;;  %8976 = vmatprep.subr.mxu1 %v8683_v5  ;;  %8894 = vmatpush1.msra.mxu0 %v8680_v49  ;;  %v8424_v10 = vld [vmem:[%s21991_s5 + $0x100] sm:$0xff]  ;;  %v8426_v5 = vld [vmem:[%s21991_s5 + $0x110] sm:$0xff] }
0x11ba   : > { %13989 = vpow2.f32 %v10933_v58  ;;  %v8327_v13 = vmul.f32 %v19876_v7, %v8316_v56  ;;  %v8651_v56 = vld [vmem:[%s21991_s5 + $0x818] sm:$0xff]  ;;  %v8650_v34 = vld [vmem:[%s21991_s5 + $0x810] sm:$0xff]  ;;  %8977 = vmatpush1.msra.mxu1 %v8682_v20  ;;  %8895 = vmatprep.subr.mxu0 %v8649_v24  ;;  %v8392_v20 = vld [vmem:[%s21991_s5] sm:$0xff] }
0x11bb   : > { %v13978_v23 = vpop.eup %13977  ;;  %13991 = vrcp.f32 %v8287_v15  ;;  %v8648_v15 = vld [vmem:[%s21991_s5 + $0x800] sm:$0xff]  ;;  %8978 = vmatprep.subr.mxu1 %v8651_v56  ;;  %v8395_v49 = vld [vmem:[%s21991_s5 + $0x18] sm:$0xff]  ;;  %v8394_v24 = vld [vmem:[%s21991_s5 + $0x10] sm:$0xff] }
0x11bc   : > { %v13980_v59 = vpop.eup %13979  ;;  %8351 = vrot.lane.b32.xlu0 %v8327_v13, %s21590_s24  ;;  %v8317_v19 = vsub.f32 %v19892_v55, %v13978_v23  ;;  %v8617_v23 = vld [vmem:[%s21991_s5 + $0x708] sm:$0xff]  ;;  %8896 = vmatpush1.msra.mxu0 %v8648_v15  ;;  %v8719_v56 = vld [vmem:[%s21991_s5 + $0xa38] sm:$0xf]  ;;  %v10911_v15 = vmul.f32 -1.442695, %v19794_v45 }
0x11bd   : > { %v8288_v0 = vadd.f32 1.0, %v13980_v59  ;;  %v8619_v59 = vld [vmem:[%s21991_s5 + $0x718] sm:$0xff]  ;;  %8979 = vmatpush1.msra.mxu1 %v8650_v34  ;;  %8897 = vmatprep.subr.mxu0 %v8617_v23  ;;  %v10912_v34 = vmul.f32 -1.442695, %v19783_v2  ;;  %v10914_v23 = vmul.f32 -1.442695, %v19767_v25 }
0x11be   : > { %v8328_v30 = vmul.f32 %v19876_v7, %v8317_v19  ;;  %8980 = vmatprep.subr.mxu1 %v8619_v59  ;;  %v10917_v2 = vmul.f32 -1.442695, %v19719_v36  ;;  %v10918_v25 = vmul.f32 -1.442695, %v19711_v53 }
0x11bf   : > { %v13982_v9 = vpop.eup %13981  ;;  %13993 = vrcp.f32 %v8288_v0  ;;  %v19980_v0 = vld [vmem:[%s19867_s1 + $0x50] sm:$0xf] }
0x11c0   : > { %v13984_v46 = vpop.eup %13983  ;;  %v8289_v26 = vadd.f32 1.0, %v13982_v9  ;;  %8353 = vrot.lane.b32.xlu1 %v8328_v30, %s21590_s24  ;;  %v8616_v30 = vld [vmem:[%s21991_s5 + $0x700] sm:$0xff]  ;;  %v8618_v9 = vld [vmem:[%s21991_s5 + $0x710] sm:$0xff] }
0x11c1   : > { %v8318_v62 = vsub.f32 %v19899_v52, %v13984_v46  ;;  %8898 = vmatpush1.msra.mxu0 %v8616_v30  ;;  %8981 = vmatpush1.msra.mxu1 %v8618_v9 }
0x11c2   : > { %13995 = vrcp.f32 %v8289_v26  ;;  %v8585_v26 = vld [vmem:[%s21991_s5 + $0x608] sm:$0xff] }
0x11c3   : > { %v13986_v47 = vpop.eup %13985  ;;  %v8329_v51 = vmul.f32 %v19876_v7, %v8318_v62  ;;  %v8587_v62 = vld [vmem:[%s21991_s5 + $0x618] sm:$0xff]  ;;  %8899 = vmatprep.subr.mxu0 %v8585_v26 }
0x11c4   : > { %v13988_v33 = vpop.eup %13987  ;;  %v8290_v29 = vadd.f32 1.0, %v13986_v47  ;;  %v8584_v47 = vld [vmem:[%s21991_s5 + $0x600] sm:$0xff]  ;;  %8982 = vmatprep.subr.mxu1 %v8587_v62 }
0x11c5   : > { %8355 = vrot.lane.b32.xlu0 %v8329_v51, %s21590_s24  ;;  %v8319_v21 = vsub.f32 %v19904_v40, %v13988_v33  ;;  %v8586_v33 = vld [vmem:[%s21991_s5 + $0x610] sm:$0xff]  ;;  %8900 = vmatpush1.msra.mxu0 %v8584_v47  ;;  %v10919_v47 = vmul.f32 -1.442695, %v19698_v22 }
0x11c6   : > { %13997 = vrcp.f32 %v8290_v29  ;;  %v8553_v29 = vld [vmem:[%s21991_s5 + $0x508] sm:$0xff]  ;;  %8983 = vmatpush1.msra.mxu1 %v8586_v33 }
0x11c7   : > { %v13990_v31 = vpop.eup %13989  ;;  %v8330_v38 = vmul.f32 %v19876_v7, %v8319_v21  ;;  %v8555_v21 = vld [vmem:[%s21991_s5 + $0x518] sm:$0xff]  ;;  %8901 = vmatprep.subr.mxu0 %v8553_v29 }
0x11c8   : > { %v13992_v6 = vpop.eup %13991  ;;  %v8291_v12 = vadd.f32 1.0, %v13990_v31  ;;  %v8552_v31 = vld [vmem:[%s21991_s5 + $0x500] sm:$0xff]  ;;  %8984 = vmatprep.subr.mxu1 %v8555_v21  ;;  %v10921_v21 = vmul.f32 -1.442695, %v19501_v17 }
0x11c9   : > { %8357 = vrot.lane.b32.xlu1 %v8330_v38, %s21590_s24  ;;  %v8320_v3 = vsub.f32 %v19910_v4, %v13992_v6  ;;  %v8554_v38 = vld [vmem:[%s21991_s5 + $0x510] sm:$0xff]  ;;  %v8521_v6 = vld [vmem:[%s21991_s5 + $0x408] sm:$0xff]  ;;  %8902 = vmatpush1.msra.mxu0 %v8552_v31 }
0x11ca   : > { %13999 = vrcp.f32 %v8291_v12  ;;  %v8523_v12 = vld [vmem:[%s21991_s5 + $0x418] sm:$0xff]  ;;  %8985 = vmatpush1.msra.mxu1 %v8554_v38  ;;  %8903 = vmatprep.subr.mxu0 %v8521_v6 }
0x11cb   : > { %v8331_v35 = vmul.f32 %v19876_v7, %v8320_v3  ;;  %v8520_v3 = vld [vmem:[%s21991_s5 + $0x400] sm:$0xff]  ;;  %8986 = vmatprep.subr.mxu1 %v8523_v12  ;;  %14001 = vpow2.f32 %v10911_v15 }
0x11cc   : > { %v13994_v48 = vpop.eup %13993  ;;  %8904 = vmatpush1.msra.mxu0 %v8520_v3  ;;  %14003 = vpow2.f32 %v10912_v34 }
0x11cd   : > { %8359 = vrot.lane.b32.xlu0 %v8331_v35, %s21590_s24  ;;  %v8321_v39 = vsub.f32 %v19916_v11, %v13994_v48  ;;  %v8522_v35 = vld [vmem:[%s21991_s5 + $0x410] sm:$0xff]  ;;  %v8489_v48 = vld [vmem:[%s21991_s5 + $0x308] sm:$0xff] }
0x11ce   : > { %8987 = vmatpush1.msra.mxu1 %v8522_v35  ;;  %8905 = vmatprep.subr.mxu0 %v8489_v48 }
0x11cf   : > { %v13996_v44 = vpop.eup %13995  ;;  %v8332_v16 = vmul.f32 %v19876_v7, %v8321_v39  ;;  %v8491_v39 = vld [vmem:[%s21991_s5 + $0x318] sm:$0xff] }
0x11d0   : > { %v8322_v32 = vsub.f32 %v19922_v18, %v13996_v44  ;;  %v8488_v44 = vld [vmem:[%s21991_s5 + $0x300] sm:$0xff]  ;;  %8988 = vmatprep.subr.mxu1 %v8491_v39 }
0x11d1   : > { %8361 = vrot.lane.b32.xlu1 %v8332_v16, %s21590_s24  ;;  %v8490_v16 = vld [vmem:[%s21991_s5 + $0x310] sm:$0xff]  ;;  %8906 = vmatpush1.msra.mxu0 %v8488_v44  ;;  %s13675_s24 = smul.u32 768, %s21994_s28 }
0x11d2   : > { %v8333_v41 = vmul.f32 %v19876_v7, %v8322_v32  ;;  %v8457_v32 = vld [vmem:[%s21991_s5 + $0x208] sm:$0xff]  ;;  %8989 = vmatpush1.msra.mxu1 %v8490_v16 }
0x11d3   : > { %v13998_v50 = vpop.eup %13997  ;;  %8907 = vmatprep.subr.mxu0 %v8457_v32  ;;  %8990 = vmatprep.subr.mxu1 %v8459_v14  ;;  %s21200_s2 = scalar_lea.vmem %s21347_s22, %s13675_s24 }
0x11d4   : > { %8363 = vrot.lane.b32.xlu0 %v8333_v41, %s21992_s6  ;;  %v8323_v58 = vsub.f32 %v19927_v43, %v13998_v50  ;;  %v8425_v41 = vld [vmem:[%s21991_s5 + $0x108] sm:$0xff]  ;;  %8908 = vmatpush1.msra.mxu0 %v8456_v61 }
0x11d5   : > { %v8393_v50 = vld [vmem:[%s21991_s5 + $0x8] sm:$0xff]  ;;  %8991 = vmatpush1.msra.mxu1 %v8458_v42  ;;  %8909 = vmatprep.subr.mxu0 %v8425_v41 }
0x11d6   : > { %v8334_v13 = vmul.f32 %v19876_v7, %v8323_v58  ;;  %8992 = vmatprep.subr.mxu1 %v8427_v60  ;;  %8910 = vmatpush1.msra.mxu0 %v8424_v10  ;;  %v8717_v58 = vld [vmem:[%s21991_s5 + $0xa28] sm:$0xf] }
0x11d7   : > { %v14000_v19 = vpop.eup %13999  ;;  %8993 = vmatpush1.msra.mxu1 %v8426_v5  ;;  %8911 = vmatprep.subr.mxu0 %v8393_v50 }
0x11d8   : > { %8365 = vrot.lane.b32.xlu1 %v8334_v13, %s21992_s6  ;;  %v8324_v46 = vsub.f32 %v19980_v0, %v14000_v19  ;;  %8994 = vmatprep.subr.mxu1 %v8395_v49  ;;  %v10913_v13 = vmul.f32 -1.442695, %v19775_v63  ;;  %v14002_v59 = vpop.eup %14001  ;;  %v10915_v19 = vmul.f32 -1.442695, %v19747_v27 }
0x11d9   : > { %8912 = vmatpush1.msra.mxu0 %v8392_v20  ;;  %8995 = vmatpush1.msra.mxu1 %v8394_v24  ;;  %v8187_v30 = vadd.f32 1.0, %v14002_v59  ;;  %v14004_v9 = vpop.eup %14003 }
0x11da   : > { %v8335_v51 = vmul.f32 %v19876_v7, %v8324_v46  ;;  %10944 = vmatprep.subr.msk.mxu0 %vm6404_vm6, %v8717_v58  ;;  %10949 = vmatprep.subr.msk.mxu1 %vm6404_vm6, %v8719_v56  ;;  %14005 = vpow2.f32 %v10913_v13  ;;  %v10916_v46 = vmul.f32 -1.442695, %v19739_v37  ;;  %v8188_v26 = vadd.f32 1.0, %v14004_v9 }
0x11db   : > { %14007 = vpow2.f32 %v10914_v23  ;;  %v10920_v37 = vmul.f32 -1.442695, %v19533_v8 }
0x11dc   : > { %8367 = vrot.lane.b32.xlu0 %v8335_v51, %s21992_s6  ;;  %14009 = vpow2.f32 %v10915_v19 }
0x11dd   : > { %14011 = vrcp.f32 %v8187_v30 }
0x11de   : > { %14013 = vpow2.f32 %v10916_v46 }
0x11df   : > { %14015 = vrcp.f32 %v8188_v26 }
0x11e0   : > { %14017 = vpow2.f32 %v10917_v2 }
0x11e7   : > { %v14006_v45 = vpop.eup %14005 }
0x11e8   : > { %v8189_v63 = vadd.f32 1.0, %v14006_v45  ;;  %v14008_v62 = vpop.eup %14007 }
0x11e9   : > { %v8190_v27 = vadd.f32 1.0, %v14008_v62  ;;  %v14010_v51 = vpop.eup %14009 }
0x11ea   : > { %14019 = vrcp.f32 %v8189_v63  ;;  %v14012_v33 = vpop.eup %14011  ;;  %v8191_v29 = vadd.f32 1.0, %v14010_v51 }
0x11eb   : > { %14021 = vpow2.f32 %v10918_v25  ;;  %v14014_v36 = vpop.eup %14013  ;;  %v8220_v31 = vsub.f32 %v19870_v57, %v14012_v33 }
0x11ec   : > { %14023 = vpow2.f32 %v10919_v47  ;;  %v14016_v53 = vpop.eup %14015  ;;  %v8192_v38 = vadd.f32 1.0, %v14014_v36 }
0x11ed   : > { %14025 = vrcp.f32 %v8190_v27  ;;  %v14018_v22 = vpop.eup %14017  ;;  %v8237_v6 = vmul.f32 %v19876_v7, %v8220_v31  ;;  %v8221_v12 = vsub.f32 %v19880_v54, %v14016_v53 }
0x11ee   : > { %14027 = vpow2.f32 %v10920_v37  ;;  %v8193_v3 = vadd.f32 1.0, %v14018_v22 }
0x11ef   : > { %14029 = vrcp.f32 %v8191_v29  ;;  %v8238_v57 = vmul.f32 %v19876_v7, %v8221_v12  ;;  %v8718_v12 = vld [vmem:[%s21991_s5 + $0xa30] sm:$0xf] }
0x11f0   : > { %14031 = vpow2.f32 %v10921_v21 }
0x11f1   : > { %14033 = vrcp.f32 %v8192_v38 }
0x11f2   : > { %14035 = vrcp.f32 %v8193_v3  ;;  %v8684_v3 = vld [vmem:[%s21991_s5 + $0x920] sm:$0xff] }
0x11f7   : > { %v14020_v8 = vpop.eup %14019 }
0x11f8   : > { %v14022_v48 = vpop.eup %14021  ;;  %v8222_v44 = vsub.f32 %v19886_v28, %v14020_v8 }
0x11f9   : > { %v14024_v39 = vpop.eup %14023  ;;  %v8194_v32 = vadd.f32 1.0, %v14022_v48  ;;  %v8653_v48 = vld [vmem:[%s21991_s5 + $0x828] sm:$0xff] }
0x11fa   : > { %v14026_v16 = vpop.eup %14025  ;;  %v8195_v54 = vadd.f32 1.0, %v14024_v39  ;;  %v8239_v42 = vmul.f32 %v19876_v7, %v8222_v44  ;;  %v8652_v39 = vld [vmem:[%s21991_s5 + $0x820] sm:$0xff]  ;;  %v8621_v44 = vld [vmem:[%s21991_s5 + $0x728] sm:$0xff] }
0x11fb   : > { %v8223_v41 = vsub.f32 %v19892_v55, %v14026_v16  ;;  %v14028_v60 = vpop.eup %14027  ;;  %14037 = vrcp.f32 %v8194_v32  ;;  %v8623_v16 = vld [vmem:[%s21991_s5 + $0x738] sm:$0xff]  ;;  %v8620_v32 = vld [vmem:[%s21991_s5 + $0x720] sm:$0xff] }
0x11fc   : > { %v14030_v5 = vpop.eup %14029  ;;  %v8196_v28 = vadd.f32 1.0, %v14028_v60  ;;  %14039 = vrcp.f32 %v8195_v54  ;;  %v8591_v54 = vld [vmem:[%s21991_s5 + $0x638] sm:$0xff]  ;;  %v8557_v60 = vld [vmem:[%s21991_s5 + $0x528] sm:$0xff] }
0x11fd   : > { %v8240_v49 = vmul.f32 %v19876_v7, %v8223_v41  ;;  %v14032_v20 = vpop.eup %14031  ;;  %v8224_v58 = vsub.f32 %v19899_v52, %v14030_v5  ;;  %v8590_v41 = vld [vmem:[%s21991_s5 + $0x630] sm:$0xff]  ;;  %v8556_v5 = vld [vmem:[%s21991_s5 + $0x520] sm:$0xff] }
0x11fe   : > { %v14034_v56 = vpop.eup %14033  ;;  %v8197_v55 = vadd.f32 1.0, %v14032_v20  ;;  %14041 = vrcp.f32 %v8196_v28  ;;  %v8525_v28 = vld [vmem:[%s21991_s5 + $0x428] sm:$0xff]  ;;  %v8524_v20 = vld [vmem:[%s21991_s5 + $0x420] sm:$0xff] }
0x11ff   : > { %v8241_v34 = vmul.f32 %v19876_v7, %v8224_v58  ;;  %v8225_v13 = vsub.f32 %v19904_v40, %v14034_v56  ;;  %v14036_v23 = vpop.eup %14035  ;;  %v8493_v58 = vld [vmem:[%s21991_s5 + $0x328] sm:$0xff]  ;;  %v8495_v56 = vld [vmem:[%s21991_s5 + $0x338] sm:$0xff] }
0x1200   : > { %14043 = vrcp.f32 %v8197_v55  ;;  %v8226_v52 = vsub.f32 %v19910_v4, %v14036_v23  ;;  %v8492_v55 = vld [vmem:[%s21991_s5 + $0x320] sm:$0xff]  ;;  %v8463_v23 = vld [vmem:[%s21991_s5 + $0x238] sm:$0xff] }
0x1201   : > { %v8242_v30 = vmul.f32 %v19876_v7, %v8225_v13  ;;  %v8461_v13 = vld [vmem:[%s21991_s5 + $0x228] sm:$0xff] }
0x1202   : > { %v8243_v2 = vmul.f32 %v19876_v7, %v8226_v52  ;;  %v8431_v52 = vld [vmem:[%s21991_s5 + $0x138] sm:$0xff] }
0x1208   : > { %v14038_v9 = vpop.eup %14037 }
0x1209   : > { %v14040_v45 = vpop.eup %14039  ;;  %v8227_v40 = vsub.f32 %v19916_v11, %v14038_v9 }
0x120a   : > { %v8228_v25 = vsub.f32 %v19922_v18, %v14040_v45  ;;  %v8397_v45 = vld [vmem:[%s21991_s5 + $0x28] sm:$0xff] }
0x120b   : > { %v14042_v47 = vpop.eup %14041  ;;  %v8244_v27 = vmul.f32 %v19876_v7, %v8227_v40  ;;  %v8396_v40 = vld [vmem:[%s21991_s5 + $0x20] sm:$0xff] }
0x120c   : > { %v8245_v37 = vmul.f32 %v19876_v7, %v8228_v25  ;;  %v8229_v33 = vsub.f32 %v19927_v43, %v14042_v47  ;;  %v8716_v43 = vld [vmem:[%s21991_s5 + $0xa20] sm:$0xf]  ;;  %v8723_v25 = vld [vmem:[%s21991_s5 + $0xa58] sm:$0xf] }
0x120d   : > { %v14044_v29 = vpop.eup %14043  ;;  %v8720_v47 = vld [vmem:[%s21991_s5 + $0xa40] sm:$0xf] }
0x120e   : > { %v8246_v21 = vmul.f32 %v19876_v7, %v8229_v33  ;;  %v8230_v18 = vsub.f32 %v19980_v0, %v14044_v29  ;;  %v8685_v0 = vld [vmem:[%s21991_s5 + $0x928] sm:$0xff]  ;;  %v8690_v33 = vld [vmem:[%s21991_s5 + $0x950] sm:$0xff] }
0x120f   : > { %v8657_v29 = vld [vmem:[%s21991_s5 + $0x848] sm:$0xff] }
0x1210   : > { %v8247_v38 = vmul.f32 %v19876_v7, %v8230_v18  ;;  %v8687_v7 = vld [vmem:[%s21991_s5 + $0x938] sm:$0xff]  ;;  %v8625_v18 = vld [vmem:[%s21991_s5 + $0x748] sm:$0xff] }
0x1226   : > { %v8348_v35 = vpop.permute.xlu0 %8347 }
0x1227   : > { %v8381_v17 = vsel %vm8380_vm13, %v8237_v6, %v8348_v35  ;;  %v8686_v35 = vld [vmem:[%s21991_s5 + $0x930] sm:$0xff] }
0x1228   : > { %8744 = vxpose.xlu1.b32.start [1/11] (short) (narrow) %v8381_v17, 24  ;;  %v8655_v17 = vld [vmem:[%s21991_s5 + $0x838] sm:$0xff] }
0x122a   : > { %v8350_v14 = vpop.permute.xlu1 %8349 }
0x122b   : > { %v8382_v61 = vsel %vm8380_vm13, %v8238_v57, %v8350_v14  ;;  %v8654_v57 = vld [vmem:[%s21991_s5 + $0x830] sm:$0xff] }
0x122c   : > { %8745 = vxpose.xlu1.b32.cont [2/11] (short) (narrow) %v8382_v61, 24  ;;  %v8622_v14 = vld [vmem:[%s21991_s5 + $0x730] sm:$0xff]  ;;  %v8589_v61 = vld [vmem:[%s21991_s5 + $0x628] sm:$0xff] }
0x122e   : > { %v8352_v10 = vpop.permute.xlu0 %8351 }
0x122f   : > { %v8383_v50 = vsel %vm8380_vm13, %v8239_v42, %v8352_v10  ;;  %v8588_v42 = vld [vmem:[%s21991_s5 + $0x620] sm:$0xff]  ;;  %v8559_v10 = vld [vmem:[%s21991_s5 + $0x538] sm:$0xff] }
0x1230   : > { %8746 = vxpose.xlu1.b32.cont [3/11] (short) (narrow) %v8383_v50, 24  ;;  %v8558_v50 = vld [vmem:[%s21991_s5 + $0x530] sm:$0xff] }
0x1232   : > { %v8354_v24 = vpop.permute.xlu1 %8353 }
0x1233   : > { %v8384_v15 = vsel %vm8380_vm13, %v8240_v49, %v8354_v24  ;;  %v8527_v49 = vld [vmem:[%s21991_s5 + $0x438] sm:$0xff]  ;;  %v8526_v24 = vld [vmem:[%s21991_s5 + $0x430] sm:$0xff] }
0x1234   : > { %8747 = vxpose.xlu1.b32.cont [4/11] (short) (narrow) %v8384_v15, 24 }
0x1237   : > { %v8356_v59 = vpop.permute.xlu0 %8355 }
0x1238   : > { %v8385_v19 = vsel %vm8380_vm13, %v8241_v34, %v8356_v59  ;;  %v8494_v34 = vld [vmem:[%s21991_s5 + $0x330] sm:$0xff]  ;;  %v8460_v59 = vld [vmem:[%s21991_s5 + $0x220] sm:$0xff] }
0x1239   : > { %8748 = vxpose.xlu1.b32.cont [5/11] (short) (narrow) %v8385_v19, 24  ;;  %v8462_v19 = vld [vmem:[%s21991_s5 + $0x230] sm:$0xff] }
0x123b   : > { %v8358_v46 = vpop.permute.xlu1 %8357 }
0x123c   : > { %v8386_v26 = vsel %vm8380_vm13, %v8242_v30, %v8358_v46  ;;  %v8429_v30 = vld [vmem:[%s21991_s5 + $0x128] sm:$0xff]  ;;  %v8428_v46 = vld [vmem:[%s21991_s5 + $0x120] sm:$0xff] }
0x123d   : > { %8749 = vxpose.xlu1.b32.cont [6/11] (short) (narrow) %v8386_v26, 24  ;;  %v8430_v26 = vld [vmem:[%s21991_s5 + $0x130] sm:$0xff] }
0x123f   : > { %v8360_v63 = vpop.permute.xlu0 %8359 }
0x1240   : > { %v8387_v62 = vsel %vm8380_vm13, %v8243_v2, %v8360_v63  ;;  %v8399_v2 = vld [vmem:[%s21991_s5 + $0x38] sm:$0xff]  ;;  %v8398_v63 = vld [vmem:[%s21991_s5 + $0x30] sm:$0xff] }
0x1241   : > { %8750 = vxpose.xlu1.b32.cont [7/11] (short) (narrow) %v8387_v62, 24  ;;  %v8721_v62 = vld [vmem:[%s21991_s5 + $0xa48] sm:$0xf] }
0x1243   : > { %v8362_v4 = vpop.permute.xlu1 %8361 }
0x1244   : > { %v8388_v51 = vsel %vm8380_vm13, %v8244_v27, %v8362_v4  ;;  %v8722_v27 = vld [vmem:[%s21991_s5 + $0xa50] sm:$0xf]  ;;  %v8689_v4 = vld [vmem:[%s21991_s5 + $0x948] sm:$0xff] }
0x1245   : > { %8751 = vxpose.xlu1.b32.cont [8/11] (short) (narrow) %v8388_v51, 24  ;;  %v8691_v51 = vld [vmem:[%s21991_s5 + $0x958] sm:$0xff] }
0x1246   : > { %v8364_v36 = vpop.permute.xlu0 %8363 }
0x1247   : > { %v8389_v11 = vsel %vm8380_vm13, %v8245_v37, %v8364_v36  ;;  %v8688_v37 = vld [vmem:[%s21991_s5 + $0x940] sm:$0xff]  ;;  %v8659_v36 = vld [vmem:[%s21991_s5 + $0x858] sm:$0xff] }
0x1249   : > { %8752 = vxpose.xlu1.b32.cont [9/11] (short) (narrow) %v8389_v11, 24  ;;  %v8656_v11 = vld [vmem:[%s21991_s5 + $0x840] sm:$0xff] }
0x124a   : > { %v8366_v31 = vpop.permute.xlu1 %8365 }
0x124b   : > { %v8390_v53 = vsel %vm8380_vm13, %v8246_v21, %v8366_v31  ;;  %v8658_v21 = vld [vmem:[%s21991_s5 + $0x850] sm:$0xff]  ;;  %v8627_v31 = vld [vmem:[%s21991_s5 + $0x758] sm:$0xff] }
0x124d   : > { %8753 = vxpose.xlu1.b32.cont [10/11] (short) (narrow) %v8390_v53, 24  ;;  %v8624_v53 = vld [vmem:[%s21991_s5 + $0x740] sm:$0xff] }
0x124e   : > { %v8368_v22 = vpop.permute.xlu0 %8367 }
0x124f   : > { %v8391_v6 = vsel %vm8380_vm13, %v8247_v38, %v8368_v22  ;;  %v8626_v38 = vld [vmem:[%s21991_s5 + $0x750] sm:$0xff]  ;;  %v8593_v22 = vld [vmem:[%s21991_s5 + $0x648] sm:$0xff] }
0x1251   : > { %8754 = vxpose.xlu1.b32.end [11/11] (short) (narrow) %v8391_v6, 24  ;;  %v8595_v6 = vld [vmem:[%s21991_s5 + $0x658] sm:$0xff] }
0x12a5   : > { %v20134_v8 = vpop.trf.xlu1 }
0x12a6   : > { %10936 = vmatmul.mubr.msk.f32.vlgmr.msra.gmra.mxu0 %vm7807_vm12, %v20134_v8  ;;  %10941 = vmatmul.mubr.msk.f32.vlgmr.msra.gmra.mxu1 %vm7807_vm12, %v20134_v8 }
0x12a7   : > { %10945 = vmatpush1.msk.msra.mxu0 %vm6404_vm6, %v8716_v43  ;;  %10950 = vmatpush1.msk.msra.mxu1 %vm6404_vm6, %v8718_v12  ;;  %v8592_v43 = vld [vmem:[%s21991_s5 + $0x640] sm:$0xff]  ;;  %v8594_v12 = vld [vmem:[%s21991_s5 + $0x650] sm:$0xff] }
0x12a8   : > { %9059 = vmatprep.subr.mxu0 %v8685_v0  ;;  %9142 = vmatprep.subr.mxu1 %v8687_v7  ;;  %v8561_v0 = vld [vmem:[%s21991_s5 + $0x548] sm:$0xff]  ;;  %v8563_v7 = vld [vmem:[%s21991_s5 + $0x558] sm:$0xff] }
0x12a9   : > { %9060 = vmatpush1.msra.mxu0 %v8684_v3  ;;  %9143 = vmatpush1.msra.mxu1 %v8686_v35  ;;  %v20220_v15 = vpop.trf.xlu1  ;;  %v8560_v3 = vld [vmem:[%s21991_s5 + $0x540] sm:$0xff]  ;;  %v8562_v35 = vld [vmem:[%s21991_s5 + $0x550] sm:$0xff] }
0x12aa   : > { %9061 = vmatprep.subr.mxu0 %v8653_v48  ;;  %9144 = vmatprep.subr.mxu1 %v8655_v17  ;;  %v8529_v48 = vld [vmem:[%s21991_s5 + $0x448] sm:$0xff]  ;;  %v8531_v17 = vld [vmem:[%s21991_s5 + $0x458] sm:$0xff] }
0x12ab   : > { %9062 = vmatpush1.msra.mxu0 %v8652_v39  ;;  %9145 = vmatpush1.msra.mxu1 %v8654_v57  ;;  %v8528_v39 = vld [vmem:[%s21991_s5 + $0x440] sm:$0xff]  ;;  %v8530_v57 = vld [vmem:[%s21991_s5 + $0x450] sm:$0xff] }
0x12ac   : > { %9063 = vmatprep.subr.mxu0 %v8621_v44  ;;  %9146 = vmatprep.subr.mxu1 %v8623_v16  ;;  %v8497_v44 = vld [vmem:[%s21991_s5 + $0x348] sm:$0xff]  ;;  %v8499_v16 = vld [vmem:[%s21991_s5 + $0x358] sm:$0xff] }
0x12ad   : > { %9064 = vmatpush1.msra.mxu0 %v8620_v32  ;;  %9147 = vmatpush1.msra.mxu1 %v8622_v14  ;;  %v20252_v9 = vpop.trf.xlu1  ;;  %v8496_v32 = vld [vmem:[%s21991_s5 + $0x340] sm:$0xff]  ;;  %v8498_v14 = vld [vmem:[%s21991_s5 + $0x350] sm:$0xff] }
0x12ae   : > { %9065 = vmatprep.subr.mxu0 %v8589_v61  ;;  %9148 = vmatprep.subr.mxu1 %v8591_v54  ;;  %v8465_v61 = vld [vmem:[%s21991_s5 + $0x248] sm:$0xff]  ;;  %v8467_v54 = vld [vmem:[%s21991_s5 + $0x258] sm:$0xff] }
0x12af   : > { %9066 = vmatpush1.msra.mxu0 %v8588_v42  ;;  %9149 = vmatpush1.msra.mxu1 %v8590_v41  ;;  %v8464_v42 = vld [vmem:[%s21991_s5 + $0x240] sm:$0xff]  ;;  %v8466_v41 = vld [vmem:[%s21991_s5 + $0x250] sm:$0xff] }
0x12b0   : > { %9067 = vmatprep.subr.mxu0 %v8557_v60  ;;  %9150 = vmatprep.subr.mxu1 %v8559_v10  ;;  %v8433_v60 = vld [vmem:[%s21991_s5 + $0x148] sm:$0xff]  ;;  %v8435_v10 = vld [vmem:[%s21991_s5 + $0x158] sm:$0xff] }
0x12b1   : > { %9068 = vmatpush1.msra.mxu0 %v8556_v5  ;;  %9151 = vmatpush1.msra.mxu1 %v8558_v50  ;;  %v8432_v5 = vld [vmem:[%s21991_s5 + $0x140] sm:$0xff]  ;;  %v8434_v50 = vld [vmem:[%s21991_s5 + $0x150] sm:$0xff] }
0x12b2   : > { %9069 = vmatprep.subr.mxu0 %v8525_v28  ;;  %9152 = vmatprep.subr.mxu1 %v8527_v49  ;;  %v8401_v28 = vld [vmem:[%s21991_s5 + $0x48] sm:$0xff]  ;;  %v8403_v49 = vld [vmem:[%s21991_s5 + $0x58] sm:$0xff] }
0x12b3   : > { %9070 = vmatpush1.msra.mxu0 %v8524_v20  ;;  %9153 = vmatpush1.msra.mxu1 %v8526_v24  ;;  %v8400_v20 = vld [vmem:[%s21991_s5 + $0x40] sm:$0xff]  ;;  %v8402_v24 = vld [vmem:[%s21991_s5 + $0x50] sm:$0xff] }
0x12b4   : > { %8951 = vmatprep.mubr.f32.mxu0 %v21662_v1  ;;  %9034 = vmatprep.mubr.f32.mxu1 %v21662_v1 }
0x12b5   : > { %9071 = vmatprep.subr.mxu0 %v8493_v58  ;;  %9154 = vmatprep.subr.mxu1 %v8495_v56  ;;  %v8725_v58 = vld [vmem:[%s21991_s5 + $0xa68] sm:$0xf]  ;;  %v8727_v56 = vld [vmem:[%s21991_s5 + $0xa78] sm:$0xf] }
0x12b6   : > { %10937 = vmatmul.mubr.msk.f32.gmra.mxu0 %vm7807_vm12, %v20220_v15  ;;  %10942 = vmatmul.mubr.msk.f32.gmra.mxu1 %vm7807_vm12, %v20220_v15 }
0x12b7   : > { %9072 = vmatpush1.msra.mxu0 %v8492_v55  ;;  %9155 = vmatpush1.msra.mxu1 %v8494_v34  ;;  %v8724_v55 = vld [vmem:[%s21991_s5 + $0xa60] sm:$0xf]  ;;  %v8726_v34 = vld [vmem:[%s21991_s5 + $0xa70] sm:$0xf] }
0x12b8   : > { %9073 = vmatprep.subr.mxu0 %v8461_v13  ;;  %9156 = vmatprep.subr.mxu1 %v8463_v23  ;;  %v8693_v13 = vld [vmem:[%s21991_s5 + $0x968] sm:$0xff]  ;;  %v8695_v23 = vld [vmem:[%s21991_s5 + $0x978] sm:$0xff] }
0x12b9   : > { %9074 = vmatpush1.msra.mxu0 %v8460_v59  ;;  %9157 = vmatpush1.msra.mxu1 %v8462_v19  ;;  %v8692_v59 = vld [vmem:[%s21991_s5 + $0x960] sm:$0xff]  ;;  %v8694_v19 = vld [vmem:[%s21991_s5 + $0x970] sm:$0xff] }
0x12ba   : > { %8957 = vmatprep.mubr.f32.mxu0 %v21662_v1  ;;  %9040 = vmatprep.mubr.f32.mxu1 %v21662_v1 }
0x12bb   : > { %9075 = vmatprep.subr.mxu0 %v8429_v30  ;;  %9158 = vmatprep.subr.mxu1 %v8431_v52  ;;  %v8661_v30 = vld [vmem:[%s21991_s5 + $0x868] sm:$0xff]  ;;  %v8663_v52 = vld [vmem:[%s21991_s5 + $0x878] sm:$0xff] }
0x12bc   : > { %10938 = vmatmul.mubr.msk.f32.gmra.mxu0 %vm7807_vm12, %v20252_v9  ;;  %10943 = vmatmul.mubr.msk.f32.gmra.mxu1 %vm7807_vm12, %v20252_v9 }
0x12bd   : > { %9076 = vmatpush1.msra.mxu0 %v8428_v46  ;;  %9159 = vmatpush1.msra.mxu1 %v8430_v26  ;;  %v8660_v46 = vld [vmem:[%s21991_s5 + $0x860] sm:$0xff]  ;;  %v8662_v26 = vld [vmem:[%s21991_s5 + $0x870] sm:$0xff] }
0x12be   : > { %9077 = vmatprep.subr.mxu0 %v8397_v45  ;;  %9160 = vmatprep.subr.mxu1 %v8399_v2  ;;  %v8629_v45 = vld [vmem:[%s21991_s5 + $0x768] sm:$0xff]  ;;  %v8631_v2 = vld [vmem:[%s21991_s5 + $0x778] sm:$0xff] }
0x12bf   : > { %9078 = vmatpush1.msra.mxu0 %v8396_v40  ;;  %9161 = vmatpush1.msra.mxu1 %v8398_v63  ;;  %v8628_v40 = vld [vmem:[%s21991_s5 + $0x760] sm:$0xff]  ;;  %v8630_v63 = vld [vmem:[%s21991_s5 + $0x770] sm:$0xff] }
0x12c0   : > { %9111 = vmatprep.mubr.f32.mxu0 %v21662_v1  ;;  %9194 = vmatprep.mubr.f32.mxu1 %v21662_v1 }
0x12c1   : > { %10954 = vmatprep.subr.msk.mxu0 %vm6404_vm6, %v8721_v62  ;;  %10959 = vmatprep.subr.msk.mxu1 %vm6404_vm6, %v8723_v25  ;;  %v8597_v62 = vld [vmem:[%s21991_s5 + $0x668] sm:$0xff]  ;;  %v8599_v25 = vld [vmem:[%s21991_s5 + $0x678] sm:$0xff] }
0x12c2   : > { %10946 = vmatmul.mubr.msk.f32.vlgmr.msra.gmra.mxu0 %vm7807_vm12, %v20134_v8  ;;  %10951 = vmatmul.mubr.msk.f32.vlgmr.msra.gmra.mxu1 %vm7807_vm12, %v20134_v8 }
0x12c3   : > { %10955 = vmatpush1.msk.msra.mxu0 %vm6404_vm6, %v8720_v47  ;;  %10960 = vmatpush1.msk.msra.mxu1 %vm6404_vm6, %v8722_v27  ;;  %v8596_v47 = vld [vmem:[%s21991_s5 + $0x660] sm:$0xff]  ;;  %v8598_v27 = vld [vmem:[%s21991_s5 + $0x670] sm:$0xff] }
0x12c4   : > { %9225 = vmatprep.subr.mxu0 %v8689_v4  ;;  %9308 = vmatprep.subr.mxu1 %v8691_v51  ;;  %v8565_v4 = vld [vmem:[%s21991_s5 + $0x568] sm:$0xff]  ;;  %v8567_v51 = vld [vmem:[%s21991_s5 + $0x578] sm:$0xff] }
0x12c5   : > { %9226 = vmatpush1.msra.mxu0 %v8688_v37  ;;  %9309 = vmatpush1.msra.mxu1 %v8690_v33  ;;  %v8564_v37 = vld [vmem:[%s21991_s5 + $0x560] sm:$0xff]  ;;  %v8566_v33 = vld [vmem:[%s21991_s5 + $0x570] sm:$0xff] }
0x12c6   : > { %9227 = vmatprep.subr.mxu0 %v8657_v29  ;;  %9310 = vmatprep.subr.mxu1 %v8659_v36  ;;  %v8533_v29 = vld [vmem:[%s21991_s5 + $0x468] sm:$0xff]  ;;  %v8535_v36 = vld [vmem:[%s21991_s5 + $0x478] sm:$0xff] }
0x12c7   : > { %9228 = vmatpush1.msra.mxu0 %v8656_v11  ;;  %9311 = vmatpush1.msra.mxu1 %v8658_v21  ;;  %v8532_v11 = vld [vmem:[%s21991_s5 + $0x460] sm:$0xff]  ;;  %v8534_v21 = vld [vmem:[%s21991_s5 + $0x470] sm:$0xff] }
0x12c8   : > { %9229 = vmatprep.subr.mxu0 %v8625_v18  ;;  %9312 = vmatprep.subr.mxu1 %v8627_v31  ;;  %v8501_v18 = vld [vmem:[%s21991_s5 + $0x368] sm:$0xff]  ;;  %v8503_v31 = vld [vmem:[%s21991_s5 + $0x378] sm:$0xff] }
0x12c9   : > { %9230 = vmatpush1.msra.mxu0 %v8624_v53  ;;  %9313 = vmatpush1.msra.mxu1 %v8626_v38  ;;  %v8500_v53 = vld [vmem:[%s21991_s5 + $0x360] sm:$0xff]  ;;  %v8502_v38 = vld [vmem:[%s21991_s5 + $0x370] sm:$0xff] }
0x12ca   : > { %9231 = vmatprep.subr.mxu0 %v8593_v22  ;;  %9314 = vmatprep.subr.mxu1 %v8595_v6  ;;  %v8469_v22 = vld [vmem:[%s21991_s5 + $0x268] sm:$0xff]  ;;  %v8471_v6 = vld [vmem:[%s21991_s5 + $0x278] sm:$0xff] }
0x12cb   : > { %9232 = vmatpush1.msra.mxu0 %v8592_v43  ;;  %9315 = vmatpush1.msra.mxu1 %v8594_v12  ;;  %v8468_v43 = vld [vmem:[%s21991_s5 + $0x260] sm:$0xff]  ;;  %v8470_v12 = vld [vmem:[%s21991_s5 + $0x270] sm:$0xff] }
0x12cc   : > { %9233 = vmatprep.subr.mxu0 %v8561_v0  ;;  %9316 = vmatprep.subr.mxu1 %v8563_v7  ;;  %v8437_v0 = vld [vmem:[%s21991_s5 + $0x168] sm:$0xff]  ;;  %v8439_v7 = vld [vmem:[%s21991_s5 + $0x178] sm:$0xff] }
0x12cd   : > { %9234 = vmatpush1.msra.mxu0 %v8560_v3  ;;  %9317 = vmatpush1.msra.mxu1 %v8562_v35  ;;  %v8436_v3 = vld [vmem:[%s21991_s5 + $0x160] sm:$0xff]  ;;  %v8438_v35 = vld [vmem:[%s21991_s5 + $0x170] sm:$0xff] }
0x12ce   : > { %9235 = vmatprep.subr.mxu0 %v8529_v48  ;;  %9318 = vmatprep.subr.mxu1 %v8531_v17  ;;  %v8405_v48 = vld [vmem:[%s21991_s5 + $0x68] sm:$0xff]  ;;  %v8407_v17 = vld [vmem:[%s21991_s5 + $0x78] sm:$0xff] }
0x12cf   : > { %9236 = vmatpush1.msra.mxu0 %v8528_v39  ;;  %9319 = vmatpush1.msra.mxu1 %v8530_v57  ;;  %v8404_v39 = vld [vmem:[%s21991_s5 + $0x60] sm:$0xff]  ;;  %v8406_v57 = vld [vmem:[%s21991_s5 + $0x70] sm:$0xff] }
0x12d0   : > { %9117 = vmatprep.mubr.f32.mxu0 %v21662_v1  ;;  %9200 = vmatprep.mubr.f32.mxu1 %v21662_v1 }
0x12d1   : > { %9237 = vmatprep.subr.mxu0 %v8497_v44  ;;  %9320 = vmatprep.subr.mxu1 %v8499_v16  ;;  %v8729_v44 = vld [vmem:[%s21991_s5 + $0xa88] sm:$0xf]  ;;  %v8731_v16 = vld [vmem:[%s21991_s5 + $0xa98] sm:$0xf] }
0x12d2   : > { %10947 = vmatmul.mubr.msk.f32.gmra.mxu0 %vm7807_vm12, %v20220_v15  ;;  %10952 = vmatmul.mubr.msk.f32.gmra.mxu1 %vm7807_vm12, %v20220_v15 }
0x12d3   : > { %9238 = vmatpush1.msra.mxu0 %v8496_v32  ;;  %9321 = vmatpush1.msra.mxu1 %v8498_v14  ;;  %v8728_v32 = vld [vmem:[%s21991_s5 + $0xa80] sm:$0xf]  ;;  %v8730_v14 = vld [vmem:[%s21991_s5 + $0xa90] sm:$0xf] }
0x12d4   : > { %9239 = vmatprep.subr.mxu0 %v8465_v61  ;;  %9322 = vmatprep.subr.mxu1 %v8467_v54  ;;  %v8697_v61 = vld [vmem:[%s21991_s5 + $0x988] sm:$0xff]  ;;  %v8699_v54 = vld [vmem:[%s21991_s5 + $0x998] sm:$0xff] }
0x12d5   : > { %9240 = vmatpush1.msra.mxu0 %v8464_v42  ;;  %9323 = vmatpush1.msra.mxu1 %v8466_v41  ;;  %v8696_v42 = vld [vmem:[%s21991_s5 + $0x980] sm:$0xff]  ;;  %v8698_v41 = vld [vmem:[%s21991_s5 + $0x990] sm:$0xff] }
0x12d6   : > { %9123 = vmatprep.mubr.f32.mxu0 %v21662_v1  ;;  %9206 = vmatprep.mubr.f32.mxu1 %v21662_v1 }
0x12d7   : > { %9241 = vmatprep.subr.mxu0 %v8433_v60  ;;  %9324 = vmatprep.subr.mxu1 %v8435_v10  ;;  %v8665_v60 = vld [vmem:[%s21991_s5 + $0x888] sm:$0xff]  ;;  %v8667_v10 = vld [vmem:[%s21991_s5 + $0x898] sm:$0xff] }
0x12d8   : > { %10948 = vmatmul.mubr.msk.f32.gmra.mxu0 %vm7807_vm12, %v20252_v9  ;;  %10953 = vmatmul.mubr.msk.f32.gmra.mxu1 %vm7807_vm12, %v20252_v9 }
0x12d9   : > { %9242 = vmatpush1.msra.mxu0 %v8432_v5  ;;  %9325 = vmatpush1.msra.mxu1 %v8434_v50  ;;  %v8664_v5 = vld [vmem:[%s21991_s5 + $0x880] sm:$0xff]  ;;  %v8666_v50 = vld [vmem:[%s21991_s5 + $0x890] sm:$0xff] }
0x12da   : > { %9243 = vmatprep.subr.mxu0 %v8401_v28  ;;  %9326 = vmatprep.subr.mxu1 %v8403_v49  ;;  %v8633_v28 = vld [vmem:[%s21991_s5 + $0x788] sm:$0xff]  ;;  %v8635_v49 = vld [vmem:[%s21991_s5 + $0x798] sm:$0xff] }
0x12db   : > { %9244 = vmatpush1.msra.mxu0 %v8400_v20  ;;  %9327 = vmatpush1.msra.mxu1 %v8402_v24  ;;  %v8632_v20 = vld [vmem:[%s21991_s5 + $0x780] sm:$0xff]  ;;  %v8634_v24 = vld [vmem:[%s21991_s5 + $0x790] sm:$0xff] }
0x12dc   : > { %9277 = vmatprep.mubr.f32.mxu0 %v21662_v1  ;;  %9360 = vmatprep.mubr.f32.mxu1 %v21662_v1 }
0x12dd   : > { %10964 = vmatprep.subr.msk.mxu0 %vm6404_vm6, %v8725_v58  ;;  %10969 = vmatprep.subr.msk.mxu1 %vm6404_vm6, %v8727_v56  ;;  %v8601_v58 = vld [vmem:[%s21991_s5 + $0x688] sm:$0xff]  ;;  %v8603_v56 = vld [vmem:[%s21991_s5 + $0x698] sm:$0xff] }
0x12de   : > { %10956 = vmatmul.mubr.msk.f32.vlgmr.msra.gmra.mxu0 %vm7807_vm12, %v20134_v8  ;;  %10961 = vmatmul.mubr.msk.f32.vlgmr.msra.gmra.mxu1 %vm7807_vm12, %v20134_v8 }
0x12df   : > { %10965 = vmatpush1.msk.msra.mxu0 %vm6404_vm6, %v8724_v55  ;;  %10970 = vmatpush1.msk.msra.mxu1 %vm6404_vm6, %v8726_v34  ;;  %v8600_v55 = vld [vmem:[%s21991_s5 + $0x680] sm:$0xff]  ;;  %v8602_v34 = vld [vmem:[%s21991_s5 + $0x690] sm:$0xff] }
0x12e0   : > { %9391 = vmatprep.subr.mxu0 %v8693_v13  ;;  %9474 = vmatprep.subr.mxu1 %v8695_v23  ;;  %v8569_v13 = vld [vmem:[%s21991_s5 + $0x588] sm:$0xff]  ;;  %v8571_v23 = vld [vmem:[%s21991_s5 + $0x598] sm:$0xff] }
0x12e1   : > { %9392 = vmatpush1.msra.mxu0 %v8692_v59  ;;  %9475 = vmatpush1.msra.mxu1 %v8694_v19  ;;  %v8568_v59 = vld [vmem:[%s21991_s5 + $0x580] sm:$0xff]  ;;  %v8570_v19 = vld [vmem:[%s21991_s5 + $0x590] sm:$0xff] }
0x12e2   : > { %9393 = vmatprep.subr.mxu0 %v8661_v30  ;;  %9476 = vmatprep.subr.mxu1 %v8663_v52  ;;  %v8537_v30 = vld [vmem:[%s21991_s5 + $0x488] sm:$0xff]  ;;  %v8539_v52 = vld [vmem:[%s21991_s5 + $0x498] sm:$0xff] }
0x12e3   : > { %9394 = vmatpush1.msra.mxu0 %v8660_v46  ;;  %9477 = vmatpush1.msra.mxu1 %v8662_v26  ;;  %v8536_v46 = vld [vmem:[%s21991_s5 + $0x480] sm:$0xff]  ;;  %v8538_v26 = vld [vmem:[%s21991_s5 + $0x490] sm:$0xff] }
0x12e4   : > { %9395 = vmatprep.subr.mxu0 %v8629_v45  ;;  %9478 = vmatprep.subr.mxu1 %v8631_v2  ;;  %v8505_v45 = vld [vmem:[%s21991_s5 + $0x388] sm:$0xff]  ;;  %v8507_v2 = vld [vmem:[%s21991_s5 + $0x398] sm:$0xff] }
0x12e5   : > { %9396 = vmatpush1.msra.mxu0 %v8628_v40  ;;  %9479 = vmatpush1.msra.mxu1 %v8630_v63  ;;  %v8504_v40 = vld [vmem:[%s21991_s5 + $0x380] sm:$0xff]  ;;  %v8506_v63 = vld [vmem:[%s21991_s5 + $0x390] sm:$0xff] }
0x12e6   : > { %9397 = vmatprep.subr.mxu0 %v8597_v62  ;;  %9480 = vmatprep.subr.mxu1 %v8599_v25  ;;  %v8473_v62 = vld [vmem:[%s21991_s5 + $0x288] sm:$0xff]  ;;  %v8475_v25 = vld [vmem:[%s21991_s5 + $0x298] sm:$0xff] }
0x12e7   : > { %9398 = vmatpush1.msra.mxu0 %v8596_v47  ;;  %9481 = vmatpush1.msra.mxu1 %v8598_v27  ;;  %v8472_v47 = vld [vmem:[%s21991_s5 + $0x280] sm:$0xff]  ;;  %v8474_v27 = vld [vmem:[%s21991_s5 + $0x290] sm:$0xff] }
0x12e8   : > { %9399 = vmatprep.subr.mxu0 %v8565_v4  ;;  %9482 = vmatprep.subr.mxu1 %v8567_v51  ;;  %v8441_v4 = vld [vmem:[%s21991_s5 + $0x188] sm:$0xff]  ;;  %v8443_v51 = vld [vmem:[%s21991_s5 + $0x198] sm:$0xff] }
0x12e9   : > { %9400 = vmatpush1.msra.mxu0 %v8564_v37  ;;  %9483 = vmatpush1.msra.mxu1 %v8566_v33  ;;  %v8440_v37 = vld [vmem:[%s21991_s5 + $0x180] sm:$0xff]  ;;  %v8442_v33 = vld [vmem:[%s21991_s5 + $0x190] sm:$0xff] }
0x12ea   : > { %9401 = vmatprep.subr.mxu0 %v8533_v29  ;;  %9484 = vmatprep.subr.mxu1 %v8535_v36  ;;  %v8409_v29 = vld [vmem:[%s21991_s5 + $0x88] sm:$0xff]  ;;  %v8411_v36 = vld [vmem:[%s21991_s5 + $0x98] sm:$0xff] }
0x12eb   : > { %9402 = vmatpush1.msra.mxu0 %v8532_v11  ;;  %9485 = vmatpush1.msra.mxu1 %v8534_v21  ;;  %v8408_v11 = vld [vmem:[%s21991_s5 + $0x80] sm:$0xff]  ;;  %v8410_v21 = vld [vmem:[%s21991_s5 + $0x90] sm:$0xff] }
0x12ec   : > { %9283 = vmatprep.mubr.f32.mxu0 %v21662_v1  ;;  %9366 = vmatprep.mubr.f32.mxu1 %v21662_v1 }
0x12ed   : > { %9403 = vmatprep.subr.mxu0 %v8501_v18  ;;  %9486 = vmatprep.subr.mxu1 %v8503_v31  ;;  %v8733_v18 = vld [vmem:[%s21991_s5 + $0xaa8] sm:$0xf]  ;;  %v8735_v31 = vld [vmem:[%s21991_s5 + $0xab8] sm:$0xf] }
0x12ee   : > { %10957 = vmatmul.mubr.msk.f32.gmra.mxu0 %vm7807_vm12, %v20220_v15  ;;  %10962 = vmatmul.mubr.msk.f32.gmra.mxu1 %vm7807_vm12, %v20220_v15 }
0x12ef   : > { %9404 = vmatpush1.msra.mxu0 %v8500_v53  ;;  %9487 = vmatpush1.msra.mxu1 %v8502_v38  ;;  %v8732_v53 = vld [vmem:[%s21991_s5 + $0xaa0] sm:$0xf]  ;;  %v8734_v38 = vld [vmem:[%s21991_s5 + $0xab0] sm:$0xf] }
0x12f0   : > { %9405 = vmatprep.subr.mxu0 %v8469_v22  ;;  %9488 = vmatprep.subr.mxu1 %v8471_v6  ;;  %v8701_v22 = vld [vmem:[%s21991_s5 + $0x9a8] sm:$0xff]  ;;  %v8703_v6 = vld [vmem:[%s21991_s5 + $0x9b8] sm:$0xff] }
0x12f1   : > { %9406 = vmatpush1.msra.mxu0 %v8468_v43  ;;  %9489 = vmatpush1.msra.mxu1 %v8470_v12  ;;  %v8700_v43 = vld [vmem:[%s21991_s5 + $0x9a0] sm:$0xff]  ;;  %v8702_v12 = vld [vmem:[%s21991_s5 + $0x9b0] sm:$0xff] }
0x12f2   : > { %9289 = vmatprep.mubr.f32.mxu0 %v21662_v1  ;;  %9372 = vmatprep.mubr.f32.mxu1 %v21662_v1 }
0x12f3   : > { %9407 = vmatprep.subr.mxu0 %v8437_v0  ;;  %9490 = vmatprep.subr.mxu1 %v8439_v7  ;;  %v8669_v0 = vld [vmem:[%s21991_s5 + $0x8a8] sm:$0xff]  ;;  %v8671_v7 = vld [vmem:[%s21991_s5 + $0x8b8] sm:$0xff] }
0x12f4   : > { %10958 = vmatmul.mubr.msk.f32.gmra.mxu0 %vm7807_vm12, %v20252_v9  ;;  %10963 = vmatmul.mubr.msk.f32.gmra.mxu1 %vm7807_vm12, %v20252_v9 }
0x12f5   : > { %9408 = vmatpush1.msra.mxu0 %v8436_v3  ;;  %9491 = vmatpush1.msra.mxu1 %v8438_v35  ;;  %v8668_v3 = vld [vmem:[%s21991_s5 + $0x8a0] sm:$0xff]  ;;  %v8670_v35 = vld [vmem:[%s21991_s5 + $0x8b0] sm:$0xff] }
0x12f6   : > { %9409 = vmatprep.subr.mxu0 %v8405_v48  ;;  %9492 = vmatprep.subr.mxu1 %v8407_v17  ;;  %v8637_v48 = vld [vmem:[%s21991_s5 + $0x7a8] sm:$0xff]  ;;  %v8639_v17 = vld [vmem:[%s21991_s5 + $0x7b8] sm:$0xff] }
0x12f7   : > { %9410 = vmatpush1.msra.mxu0 %v8404_v39  ;;  %9493 = vmatpush1.msra.mxu1 %v8406_v57  ;;  %v8636_v39 = vld [vmem:[%s21991_s5 + $0x7a0] sm:$0xff]  ;;  %v8638_v57 = vld [vmem:[%s21991_s5 + $0x7b0] sm:$0xff] }
0x12f8   : > { %9443 = vmatprep.mubr.f32.mxu0 %v21662_v1  ;;  %9526 = vmatprep.mubr.f32.mxu1 %v21662_v1 }
0x12f9   : > { %10974 = vmatprep.subr.msk.mxu0 %vm6404_vm6, %v8729_v44  ;;  %10979 = vmatprep.subr.msk.mxu1 %vm6404_vm6, %v8731_v16  ;;  %v8605_v44 = vld [vmem:[%s21991_s5 + $0x6a8] sm:$0xff]  ;;  %v8607_v16 = vld [vmem:[%s21991_s5 + $0x6b8] sm:$0xff] }
0x12fa   : > { %10966 = vmatmul.mubr.msk.f32.vlgmr.msra.gmra.mxu0 %vm7807_vm12, %v20134_v8  ;;  %10971 = vmatmul.mubr.msk.f32.vlgmr.msra.gmra.mxu1 %vm7807_vm12, %v20134_v8 }
0x12fb   : > { %10975 = vmatpush1.msk.msra.mxu0 %vm6404_vm6, %v8728_v32  ;;  %10980 = vmatpush1.msk.msra.mxu1 %vm6404_vm6, %v8730_v14  ;;  %v8604_v32 = vld [vmem:[%s21991_s5 + $0x6a0] sm:$0xff]  ;;  %v8606_v14 = vld [vmem:[%s21991_s5 + $0x6b0] sm:$0xff] }
0x12fc   : > { %9557 = vmatprep.subr.mxu0 %v8697_v61  ;;  %9640 = vmatprep.subr.mxu1 %v8699_v54  ;;  %v8573_v61 = vld [vmem:[%s21991_s5 + $0x5a8] sm:$0xff]  ;;  %v8575_v54 = vld [vmem:[%s21991_s5 + $0x5b8] sm:$0xff] }
0x12fd   : > { %9558 = vmatpush1.msra.mxu0 %v8696_v42  ;;  %9641 = vmatpush1.msra.mxu1 %v8698_v41  ;;  %v8572_v42 = vld [vmem:[%s21991_s5 + $0x5a0] sm:$0xff]  ;;  %v8574_v41 = vld [vmem:[%s21991_s5 + $0x5b0] sm:$0xff] }
0x12fe   : > { %9559 = vmatprep.subr.mxu0 %v8665_v60  ;;  %9642 = vmatprep.subr.mxu1 %v8667_v10  ;;  %v8541_v60 = vld [vmem:[%s21991_s5 + $0x4a8] sm:$0xff]  ;;  %v8543_v10 = vld [vmem:[%s21991_s5 + $0x4b8] sm:$0xff] }
0x12ff   : > { %9560 = vmatpush1.msra.mxu0 %v8664_v5  ;;  %9643 = vmatpush1.msra.mxu1 %v8666_v50  ;;  %v8540_v5 = vld [vmem:[%s21991_s5 + $0x4a0] sm:$0xff]  ;;  %v8542_v50 = vld [vmem:[%s21991_s5 + $0x4b0] sm:$0xff] }
0x1300   : > { %9561 = vmatprep.subr.mxu0 %v8633_v28  ;;  %9644 = vmatprep.subr.mxu1 %v8635_v49  ;;  %v8509_v28 = vld [vmem:[%s21991_s5 + $0x3a8] sm:$0xff]  ;;  %v8511_v49 = vld [vmem:[%s21991_s5 + $0x3b8] sm:$0xff] }
0x1301   : > { %9562 = vmatpush1.msra.mxu0 %v8632_v20  ;;  %9645 = vmatpush1.msra.mxu1 %v8634_v24  ;;  %v8508_v20 = vld [vmem:[%s21991_s5 + $0x3a0] sm:$0xff]  ;;  %v8510_v24 = vld [vmem:[%s21991_s5 + $0x3b0] sm:$0xff] }
0x1302   : > { %9563 = vmatprep.subr.mxu0 %v8601_v58  ;;  %9646 = vmatprep.subr.mxu1 %v8603_v56  ;;  %v8477_v58 = vld [vmem:[%s21991_s5 + $0x2a8] sm:$0xff]  ;;  %v8479_v56 = vld [vmem:[%s21991_s5 + $0x2b8] sm:$0xff] }
0x1303   : > { %9564 = vmatpush1.msra.mxu0 %v8600_v55  ;;  %9647 = vmatpush1.msra.mxu1 %v8602_v34  ;;  %v8476_v55 = vld [vmem:[%s21991_s5 + $0x2a0] sm:$0xff]  ;;  %v8478_v34 = vld [vmem:[%s21991_s5 + $0x2b0] sm:$0xff] }
0x1304   : > { %9565 = vmatprep.subr.mxu0 %v8569_v13  ;;  %9648 = vmatprep.subr.mxu1 %v8571_v23  ;;  %v8445_v13 = vld [vmem:[%s21991_s5 + $0x1a8] sm:$0xff]  ;;  %v8447_v23 = vld [vmem:[%s21991_s5 + $0x1b8] sm:$0xff] }
0x1305   : > { %9566 = vmatpush1.msra.mxu0 %v8568_v59  ;;  %9649 = vmatpush1.msra.mxu1 %v8570_v19  ;;  %v8444_v59 = vld [vmem:[%s21991_s5 + $0x1a0] sm:$0xff]  ;;  %v8446_v19 = vld [vmem:[%s21991_s5 + $0x1b0] sm:$0xff] }
0x1306   : > { %9567 = vmatprep.subr.mxu0 %v8537_v30  ;;  %9650 = vmatprep.subr.mxu1 %v8539_v52  ;;  %v8413_v30 = vld [vmem:[%s21991_s5 + $0xa8] sm:$0xff]  ;;  %v8415_v52 = vld [vmem:[%s21991_s5 + $0xb8] sm:$0xff] }
0x1307   : > { %9568 = vmatpush1.msra.mxu0 %v8536_v46  ;;  %9651 = vmatpush1.msra.mxu1 %v8538_v26  ;;  %v8412_v46 = vld [vmem:[%s21991_s5 + $0xa0] sm:$0xff]  ;;  %v8414_v26 = vld [vmem:[%s21991_s5 + $0xb0] sm:$0xff] }
0x1308   : > { %9449 = vmatprep.mubr.f32.mxu0 %v21662_v1  ;;  %9532 = vmatprep.mubr.f32.mxu1 %v21662_v1 }
0x1309   : > { %9569 = vmatprep.subr.mxu0 %v8505_v45  ;;  %9652 = vmatprep.subr.mxu1 %v8507_v2  ;;  %v8737_v45 = vld [vmem:[%s21991_s5 + $0xac8] sm:$0xf]  ;;  %v8739_v2 = vld [vmem:[%s21991_s5 + $0xad8] sm:$0xf] }
0x130a   : > { %10967 = vmatmul.mubr.msk.f32.gmra.mxu0 %vm7807_vm12, %v20220_v15  ;;  %10972 = vmatmul.mubr.msk.f32.gmra.mxu1 %vm7807_vm12, %v20220_v15 }
0x130b   : > { %9570 = vmatpush1.msra.mxu0 %v8504_v40  ;;  %9653 = vmatpush1.msra.mxu1 %v8506_v63  ;;  %v8736_v40 = vld [vmem:[%s21991_s5 + $0xac0] sm:$0xf]  ;;  %v8738_v63 = vld [vmem:[%s21991_s5 + $0xad0] sm:$0xf] }
0x130c   : > { %9571 = vmatprep.subr.mxu0 %v8473_v62  ;;  %9654 = vmatprep.subr.mxu1 %v8475_v25  ;;  %v8705_v62 = vld [vmem:[%s21991_s5 + $0x9c8] sm:$0xff]  ;;  %v8707_v25 = vld [vmem:[%s21991_s5 + $0x9d8] sm:$0xff] }
0x130d   : > { %9572 = vmatpush1.msra.mxu0 %v8472_v47  ;;  %9655 = vmatpush1.msra.mxu1 %v8474_v27  ;;  %v8704_v47 = vld [vmem:[%s21991_s5 + $0x9c0] sm:$0xff]  ;;  %v8706_v27 = vld [vmem:[%s21991_s5 + $0x9d0] sm:$0xff] }
0x130e   : > { %9455 = vmatprep.mubr.f32.mxu0 %v21662_v1  ;;  %9538 = vmatprep.mubr.f32.mxu1 %v21662_v1 }
0x130f   : > { %9573 = vmatprep.subr.mxu0 %v8441_v4  ;;  %9656 = vmatprep.subr.mxu1 %v8443_v51  ;;  %v8673_v4 = vld [vmem:[%s21991_s5 + $0x8c8] sm:$0xff]  ;;  %v8675_v51 = vld [vmem:[%s21991_s5 + $0x8d8] sm:$0xff] }
0x1310   : > { %10968 = vmatmul.mubr.msk.f32.gmra.mxu0 %vm7807_vm12, %v20252_v9  ;;  %10973 = vmatmul.mubr.msk.f32.gmra.mxu1 %vm7807_vm12, %v20252_v9 }
0x1311   : > { %9574 = vmatpush1.msra.mxu0 %v8440_v37  ;;  %9657 = vmatpush1.msra.mxu1 %v8442_v33  ;;  %v8672_v37 = vld [vmem:[%s21991_s5 + $0x8c0] sm:$0xff]  ;;  %v8674_v33 = vld [vmem:[%s21991_s5 + $0x8d0] sm:$0xff] }
0x1312   : > { %9575 = vmatprep.subr.mxu0 %v8409_v29  ;;  %9658 = vmatprep.subr.mxu1 %v8411_v36  ;;  %v8641_v29 = vld [vmem:[%s21991_s5 + $0x7c8] sm:$0xff]  ;;  %v8643_v36 = vld [vmem:[%s21991_s5 + $0x7d8] sm:$0xff] }
0x1313   : > { %9576 = vmatpush1.msra.mxu0 %v8408_v11  ;;  %9659 = vmatpush1.msra.mxu1 %v8410_v21  ;;  %v8640_v11 = vld [vmem:[%s21991_s5 + $0x7c0] sm:$0xff]  ;;  %v8642_v21 = vld [vmem:[%s21991_s5 + $0x7d0] sm:$0xff] }
0x1314   : > { %9609 = vmatprep.mubr.f32.mxu0 %v21662_v1  ;;  %9692 = vmatprep.mubr.f32.mxu1 %v21662_v1 }
0x1315   : > { %10984 = vmatprep.subr.msk.mxu0 %vm6404_vm6, %v8733_v18  ;;  %10989 = vmatprep.subr.msk.mxu1 %vm6404_vm6, %v8735_v31  ;;  %v8609_v18 = vld [vmem:[%s21991_s5 + $0x6c8] sm:$0xff]  ;;  %v8611_v31 = vld [vmem:[%s21991_s5 + $0x6d8] sm:$0xff] }
0x1316   : > { %10976 = vmatmul.mubr.msk.f32.vlgmr.msra.gmra.mxu0 %vm7807_vm12, %v20134_v8  ;;  %10981 = vmatmul.mubr.msk.f32.vlgmr.msra.gmra.mxu1 %vm7807_vm12, %v20134_v8 }
0x1317   : > { %10985 = vmatpush1.msk.msra.mxu0 %vm6404_vm6, %v8732_v53  ;;  %10990 = vmatpush1.msk.msra.mxu1 %vm6404_vm6, %v8734_v38  ;;  %v8608_v53 = vld [vmem:[%s21991_s5 + $0x6c0] sm:$0xff]  ;;  %v8610_v38 = vld [vmem:[%s21991_s5 + $0x6d0] sm:$0xff] }
0x1318   : > { %9723 = vmatprep.subr.mxu0 %v8701_v22  ;;  %9806 = vmatprep.subr.mxu1 %v8703_v6  ;;  %v8577_v22 = vld [vmem:[%s21991_s5 + $0x5c8] sm:$0xff]  ;;  %v8579_v6 = vld [vmem:[%s21991_s5 + $0x5d8] sm:$0xff] }
0x1319   : > { %9724 = vmatpush1.msra.mxu0 %v8700_v43  ;;  %9807 = vmatpush1.msra.mxu1 %v8702_v12  ;;  %v8576_v43 = vld [vmem:[%s21991_s5 + $0x5c0] sm:$0xff]  ;;  %v8578_v12 = vld [vmem:[%s21991_s5 + $0x5d0] sm:$0xff] }
0x131a   : > { %9725 = vmatprep.subr.mxu0 %v8669_v0  ;;  %9808 = vmatprep.subr.mxu1 %v8671_v7  ;;  %v8545_v0 = vld [vmem:[%s21991_s5 + $0x4c8] sm:$0xff]  ;;  %v8547_v7 = vld [vmem:[%s21991_s5 + $0x4d8] sm:$0xff] }
0x131b   : > { %9726 = vmatpush1.msra.mxu0 %v8668_v3  ;;  %9809 = vmatpush1.msra.mxu1 %v8670_v35  ;;  %v8544_v3 = vld [vmem:[%s21991_s5 + $0x4c0] sm:$0xff]  ;;  %v8546_v35 = vld [vmem:[%s21991_s5 + $0x4d0] sm:$0xff] }
0x131c   : > { %9727 = vmatprep.subr.mxu0 %v8637_v48  ;;  %9810 = vmatprep.subr.mxu1 %v8639_v17  ;;  %v8513_v48 = vld [vmem:[%s21991_s5 + $0x3c8] sm:$0xff]  ;;  %v8515_v17 = vld [vmem:[%s21991_s5 + $0x3d8] sm:$0xff] }
0x131d   : > { %9728 = vmatpush1.msra.mxu0 %v8636_v39  ;;  %9811 = vmatpush1.msra.mxu1 %v8638_v57  ;;  %v8512_v39 = vld [vmem:[%s21991_s5 + $0x3c0] sm:$0xff]  ;;  %v8514_v57 = vld [vmem:[%s21991_s5 + $0x3d0] sm:$0xff] }
0x131e   : > { %9729 = vmatprep.subr.mxu0 %v8605_v44  ;;  %9812 = vmatprep.subr.mxu1 %v8607_v16  ;;  %v8481_v44 = vld [vmem:[%s21991_s5 + $0x2c8] sm:$0xff]  ;;  %v8483_v16 = vld [vmem:[%s21991_s5 + $0x2d8] sm:$0xff] }
0x131f   : > { %9730 = vmatpush1.msra.mxu0 %v8604_v32  ;;  %9813 = vmatpush1.msra.mxu1 %v8606_v14  ;;  %v8480_v32 = vld [vmem:[%s21991_s5 + $0x2c0] sm:$0xff]  ;;  %v8482_v14 = vld [vmem:[%s21991_s5 + $0x2d0] sm:$0xff] }
0x1320   : > { %9731 = vmatprep.subr.mxu0 %v8573_v61  ;;  %9814 = vmatprep.subr.mxu1 %v8575_v54  ;;  %v8449_v61 = vld [vmem:[%s21991_s5 + $0x1c8] sm:$0xff]  ;;  %v8451_v54 = vld [vmem:[%s21991_s5 + $0x1d8] sm:$0xff] }
0x1321   : > { %9732 = vmatpush1.msra.mxu0 %v8572_v42  ;;  %9815 = vmatpush1.msra.mxu1 %v8574_v41  ;;  %v8448_v42 = vld [vmem:[%s21991_s5 + $0x1c0] sm:$0xff]  ;;  %v8450_v41 = vld [vmem:[%s21991_s5 + $0x1d0] sm:$0xff] }
0x1322   : > { %9733 = vmatprep.subr.mxu0 %v8541_v60  ;;  %9816 = vmatprep.subr.mxu1 %v8543_v10  ;;  %v8417_v60 = vld [vmem:[%s21991_s5 + $0xc8] sm:$0xff]  ;;  %v8419_v10 = vld [vmem:[%s21991_s5 + $0xd8] sm:$0xff] }
0x1323   : > { %9734 = vmatpush1.msra.mxu0 %v8540_v5  ;;  %9817 = vmatpush1.msra.mxu1 %v8542_v50  ;;  %v8416_v5 = vld [vmem:[%s21991_s5 + $0xc0] sm:$0xff]  ;;  %v8418_v50 = vld [vmem:[%s21991_s5 + $0xd0] sm:$0xff] }
0x1324   : > { %9615 = vmatprep.mubr.f32.mxu0 %v21662_v1  ;;  %9698 = vmatprep.mubr.f32.mxu1 %v21662_v1 }
0x1325   : > { %9735 = vmatprep.subr.mxu0 %v8509_v28  ;;  %9818 = vmatprep.subr.mxu1 %v8511_v49  ;;  %v8741_v28 = vld [vmem:[%s21991_s5 + $0xae8] sm:$0xf]  ;;  %v8743_v49 = vld [vmem:[%s21991_s5 + $0xaf8] sm:$0xf] }
0x1326   : > { %10977 = vmatmul.mubr.msk.f32.gmra.mxu0 %vm7807_vm12, %v20220_v15  ;;  %10982 = vmatmul.mubr.msk.f32.gmra.mxu1 %vm7807_vm12, %v20220_v15 }
0x1327   : > { %9736 = vmatpush1.msra.mxu0 %v8508_v20  ;;  %9819 = vmatpush1.msra.mxu1 %v8510_v24  ;;  %v8740_v20 = vld [vmem:[%s21991_s5 + $0xae0] sm:$0xf]  ;;  %v8742_v24 = vld [vmem:[%s21991_s5 + $0xaf0] sm:$0xf] }
0x1328   : > { %9737 = vmatprep.subr.mxu0 %v8477_v58  ;;  %9820 = vmatprep.subr.mxu1 %v8479_v56  ;;  %v8709_v58 = vld [vmem:[%s21991_s5 + $0x9e8] sm:$0xff]  ;;  %v8711_v56 = vld [vmem:[%s21991_s5 + $0x9f8] sm:$0xff] }
0x1329   : > { %9738 = vmatpush1.msra.mxu0 %v8476_v55  ;;  %9821 = vmatpush1.msra.mxu1 %v8478_v34  ;;  %v8708_v55 = vld [vmem:[%s21991_s5 + $0x9e0] sm:$0xff]  ;;  %v8710_v34 = vld [vmem:[%s21991_s5 + $0x9f0] sm:$0xff] }
0x132a   : > { %9621 = vmatprep.mubr.f32.mxu0 %v21662_v1  ;;  %9704 = vmatprep.mubr.f32.mxu1 %v21662_v1 }
0x132b   : > { %9739 = vmatprep.subr.mxu0 %v8445_v13  ;;  %9822 = vmatprep.subr.mxu1 %v8447_v23  ;;  %v8677_v13 = vld [vmem:[%s21991_s5 + $0x8e8] sm:$0xff]  ;;  %v8679_v23 = vld [vmem:[%s21991_s5 + $0x8f8] sm:$0xff] }
0x132c   : > { %10978 = vmatmul.mubr.msk.f32.gmra.mxu0 %vm7807_vm12, %v20252_v9  ;;  %10983 = vmatmul.mubr.msk.f32.gmra.mxu1 %vm7807_vm12, %v20252_v9 }
0x132d   : > { %9740 = vmatpush1.msra.mxu0 %v8444_v59  ;;  %9823 = vmatpush1.msra.mxu1 %v8446_v19  ;;  %v8676_v59 = vld [vmem:[%s21991_s5 + $0x8e0] sm:$0xff]  ;;  %v8678_v19 = vld [vmem:[%s21991_s5 + $0x8f0] sm:$0xff] }
0x132e   : > { %9741 = vmatprep.subr.mxu0 %v8413_v30  ;;  %9824 = vmatprep.subr.mxu1 %v8415_v52  ;;  %v8645_v30 = vld [vmem:[%s21991_s5 + $0x7e8] sm:$0xff]  ;;  %v8647_v52 = vld [vmem:[%s21991_s5 + $0x7f8] sm:$0xff] }
0x132f   : > { %9742 = vmatpush1.msra.mxu0 %v8412_v46  ;;  %9825 = vmatpush1.msra.mxu1 %v8414_v26  ;;  %v8644_v46 = vld [vmem:[%s21991_s5 + $0x7e0] sm:$0xff]  ;;  %v8646_v26 = vld [vmem:[%s21991_s5 + $0x7f0] sm:$0xff] }
0x1330   : > { %9775 = vmatprep.mubr.f32.mxu0 %v21662_v1  ;;  %9858 = vmatprep.mubr.f32.mxu1 %v21662_v1 }
0x1331   : > { %10994 = vmatprep.subr.msk.mxu0 %vm6404_vm6, %v8737_v45  ;;  %10999 = vmatprep.subr.msk.mxu1 %vm6404_vm6, %v8739_v2  ;;  %v8613_v45 = vld [vmem:[%s21991_s5 + $0x6e8] sm:$0xff]  ;;  %v8615_v2 = vld [vmem:[%s21991_s5 + $0x6f8] sm:$0xff] }
0x1332   : > { %10986 = vmatmul.mubr.msk.f32.vlgmr.msra.gmra.mxu0 %vm7807_vm12, %v20134_v8  ;;  %10991 = vmatmul.mubr.msk.f32.vlgmr.msra.gmra.mxu1 %vm7807_vm12, %v20134_v8 }
0x1333   : > { %10995 = vmatpush1.msk.msra.mxu0 %vm6404_vm6, %v8736_v40  ;;  %11000 = vmatpush1.msk.msra.mxu1 %vm6404_vm6, %v8738_v63  ;;  %v8612_v40 = vld [vmem:[%s21991_s5 + $0x6e0] sm:$0xff]  ;;  %v8614_v63 = vld [vmem:[%s21991_s5 + $0x6f0] sm:$0xff] }
0x1334   : > { %9889 = vmatprep.subr.mxu0 %v8705_v62  ;;  %9972 = vmatprep.subr.mxu1 %v8707_v25  ;;  %v8581_v62 = vld [vmem:[%s21991_s5 + $0x5e8] sm:$0xff]  ;;  %v8583_v25 = vld [vmem:[%s21991_s5 + $0x5f8] sm:$0xff] }
0x1335   : > { %9890 = vmatpush1.msra.mxu0 %v8704_v47  ;;  %9973 = vmatpush1.msra.mxu1 %v8706_v27  ;;  %v8580_v47 = vld [vmem:[%s21991_s5 + $0x5e0] sm:$0xff]  ;;  %v8582_v27 = vld [vmem:[%s21991_s5 + $0x5f0] sm:$0xff] }
0x1336   : > { %9891 = vmatprep.subr.mxu0 %v8673_v4  ;;  %9974 = vmatprep.subr.mxu1 %v8675_v51  ;;  %v8549_v4 = vld [vmem:[%s21991_s5 + $0x4e8] sm:$0xff]  ;;  %v8551_v51 = vld [vmem:[%s21991_s5 + $0x4f8] sm:$0xff] }
0x1337   : > { %9892 = vmatpush1.msra.mxu0 %v8672_v37  ;;  %9975 = vmatpush1.msra.mxu1 %v8674_v33  ;;  %v8548_v37 = vld [vmem:[%s21991_s5 + $0x4e0] sm:$0xff]  ;;  %v8550_v33 = vld [vmem:[%s21991_s5 + $0x4f0] sm:$0xff] }
0x1338   : > { %9893 = vmatprep.subr.mxu0 %v8641_v29  ;;  %9976 = vmatprep.subr.mxu1 %v8643_v36  ;;  %v8517_v29 = vld [vmem:[%s21991_s5 + $0x3e8] sm:$0xff]  ;;  %v8519_v36 = vld [vmem:[%s21991_s5 + $0x3f8] sm:$0xff] }
0x1339   : > { %9894 = vmatpush1.msra.mxu0 %v8640_v11  ;;  %9977 = vmatpush1.msra.mxu1 %v8642_v21  ;;  %v8516_v11 = vld [vmem:[%s21991_s5 + $0x3e0] sm:$0xff]  ;;  %v8518_v21 = vld [vmem:[%s21991_s5 + $0x3f0] sm:$0xff] }
0x133a   : > { %9895 = vmatprep.subr.mxu0 %v8609_v18  ;;  %9978 = vmatprep.subr.mxu1 %v8611_v31  ;;  %v8485_v18 = vld [vmem:[%s21991_s5 + $0x2e8] sm:$0xff]  ;;  %v8487_v31 = vld [vmem:[%s21991_s5 + $0x2f8] sm:$0xff] }
0x133b   : > { %9896 = vmatpush1.msra.mxu0 %v8608_v53  ;;  %9979 = vmatpush1.msra.mxu1 %v8610_v38  ;;  %v8484_v53 = vld [vmem:[%s21991_s5 + $0x2e0] sm:$0xff]  ;;  %v8486_v38 = vld [vmem:[%s21991_s5 + $0x2f0] sm:$0xff] }
0x133c   : > { %9897 = vmatprep.subr.mxu0 %v8577_v22  ;;  %9980 = vmatprep.subr.mxu1 %v8579_v6  ;;  %v8453_v22 = vld [vmem:[%s21991_s5 + $0x1e8] sm:$0xff]  ;;  %v8455_v6 = vld [vmem:[%s21991_s5 + $0x1f8] sm:$0xff] }
0x133d   : > { %9898 = vmatpush1.msra.mxu0 %v8576_v43  ;;  %9981 = vmatpush1.msra.mxu1 %v8578_v12  ;;  %v8452_v43 = vld [vmem:[%s21991_s5 + $0x1e0] sm:$0xff]  ;;  %v8454_v12 = vld [vmem:[%s21991_s5 + $0x1f0] sm:$0xff] }
0x133e   : > { %9899 = vmatprep.subr.mxu0 %v8545_v0  ;;  %9982 = vmatprep.subr.mxu1 %v8547_v7  ;;  %v8421_v0 = vld [vmem:[%s21991_s5 + $0xe8] sm:$0xff]  ;;  %v8423_v7 = vld [vmem:[%s21991_s5 + $0xf8] sm:$0xff] }
0x133f   : > { %9900 = vmatpush1.msra.mxu0 %v8544_v3  ;;  %9983 = vmatpush1.msra.mxu1 %v8546_v35  ;;  %v8420_v3 = vld [vmem:[%s21991_s5 + $0xe0] sm:$0xff]  ;;  %v8422_v35 = vld [vmem:[%s21991_s5 + $0xf0] sm:$0xff] }
0x1340   : > { %9781 = vmatprep.mubr.f32.mxu0 %v21662_v1  ;;  %9864 = vmatprep.mubr.f32.mxu1 %v21662_v1 }
0x1341   : > { %9901 = vmatprep.subr.mxu0 %v8513_v48  ;;  %9984 = vmatprep.subr.mxu1 %v8515_v17 }
0x1342   : > { %10987 = vmatmul.mubr.msk.f32.gmra.mxu0 %vm7807_vm12, %v20220_v15  ;;  %10992 = vmatmul.mubr.msk.f32.gmra.mxu1 %vm7807_vm12, %v20220_v15 }
0x1343   : > { %9902 = vmatpush1.msra.mxu0 %v8512_v39  ;;  %9985 = vmatpush1.msra.mxu1 %v8514_v57 }
0x1344   : > { %9903 = vmatprep.subr.mxu0 %v8481_v44  ;;  %9986 = vmatprep.subr.mxu1 %v8483_v16 }
0x1345   : > { %9904 = vmatpush1.msra.mxu0 %v8480_v32  ;;  %9987 = vmatpush1.msra.mxu1 %v8482_v14 }
0x1346   : > { %9787 = vmatprep.mubr.f32.mxu0 %v21662_v1  ;;  %9870 = vmatprep.mubr.f32.mxu1 %v21662_v1 }
0x1347   : > { %9905 = vmatprep.subr.mxu0 %v8449_v61  ;;  %9988 = vmatprep.subr.mxu1 %v8451_v54 }
0x1348   : > { %10988 = vmatmul.mubr.msk.f32.gmra.mxu0 %vm7807_vm12, %v20252_v9  ;;  %10993 = vmatmul.mubr.msk.f32.gmra.mxu1 %vm7807_vm12, %v20252_v9 }
0x1349   : > { %9906 = vmatpush1.msra.mxu0 %v8448_v42  ;;  %9989 = vmatpush1.msra.mxu1 %v8450_v41 }
0x134a   : > { %9907 = vmatprep.subr.mxu0 %v8417_v60  ;;  %9990 = vmatprep.subr.mxu1 %v8419_v10 }
0x134b   : > { %9908 = vmatpush1.msra.mxu0 %v8416_v5  ;;  %9991 = vmatpush1.msra.mxu1 %v8418_v50 }
0x134c   : > { %9941 = vmatprep.mubr.f32.mxu0 %v21662_v1  ;;  %10024 = vmatprep.mubr.f32.mxu1 %v21662_v1 }
0x134d   : > { %11004 = vmatprep.subr.msk.mxu0 %vm6404_vm6, %v8741_v28  ;;  %11009 = vmatprep.subr.msk.mxu1 %vm6404_vm6, %v8743_v49 }
0x134e   : > { %10996 = vmatmul.mubr.msk.f32.vlgmr.msra.gmra.mxu0 %vm7807_vm12, %v20134_v8  ;;  %11001 = vmatmul.mubr.msk.f32.vlgmr.msra.gmra.mxu1 %vm7807_vm12, %v20134_v8 }
0x134f   : > { %11005 = vmatpush1.msk.msra.mxu0 %vm6404_vm6, %v8740_v20  ;;  %11010 = vmatpush1.msk.msra.mxu1 %vm6404_vm6, %v8742_v24 }
0x1350   : > { %10055 = vmatprep.subr.mxu0 %v8709_v58  ;;  %10138 = vmatprep.subr.mxu1 %v8711_v56 }
0x1351   : > { %10056 = vmatpush1.msra.mxu0 %v8708_v55  ;;  %10139 = vmatpush1.msra.mxu1 %v8710_v34 }
0x1352   : > { %10057 = vmatprep.subr.mxu0 %v8677_v13  ;;  %10140 = vmatprep.subr.mxu1 %v8679_v23 }
0x1353   : > { %10058 = vmatpush1.msra.mxu0 %v8676_v59  ;;  %10141 = vmatpush1.msra.mxu1 %v8678_v19 }
0x1354   : > { %10059 = vmatprep.subr.mxu0 %v8645_v30  ;;  %10142 = vmatprep.subr.mxu1 %v8647_v52 }
0x1355   : > { %10060 = vmatpush1.msra.mxu0 %v8644_v46  ;;  %10143 = vmatpush1.msra.mxu1 %v8646_v26 }
0x1356   : > { %10061 = vmatprep.subr.mxu0 %v8613_v45  ;;  %10144 = vmatprep.subr.mxu1 %v8615_v2 }
0x1357   : > { %10062 = vmatpush1.msra.mxu0 %v8612_v40  ;;  %10145 = vmatpush1.msra.mxu1 %v8614_v63 }
0x1358   : > { %10063 = vmatprep.subr.mxu0 %v8581_v62  ;;  %10146 = vmatprep.subr.mxu1 %v8583_v25 }
0x1359   : > { %10064 = vmatpush1.msra.mxu0 %v8580_v47  ;;  %10147 = vmatpush1.msra.mxu1 %v8582_v27 }
0x135a   : > { %10065 = vmatprep.subr.mxu0 %v8549_v4  ;;  %10148 = vmatprep.subr.mxu1 %v8551_v51 }
0x135b   : > { %9947 = vmatprep.mubr.f32.mxu0 %v21662_v1  ;;  %10030 = vmatprep.mubr.f32.mxu1 %v21662_v1 }
0x135c   : > { %10066 = vmatpush1.msra.mxu0 %v8548_v37  ;;  %10149 = vmatpush1.msra.mxu1 %v8550_v33 }
0x135d   : > { %10997 = vmatmul.mubr.msk.f32.gmra.mxu0 %vm7807_vm12, %v20220_v15  ;;  %11002 = vmatmul.mubr.msk.f32.gmra.mxu1 %vm7807_vm12, %v20220_v15 }
0x135e   : > { %10067 = vmatprep.subr.mxu0 %v8517_v29  ;;  %10150 = vmatprep.subr.mxu1 %v8519_v36 }
0x135f   : > { %10068 = vmatpush1.msra.mxu0 %v8516_v11  ;;  %10151 = vmatpush1.msra.mxu1 %v8518_v21 }
0x1360   : > { %10069 = vmatprep.subr.mxu0 %v8485_v18  ;;  %10152 = vmatprep.subr.mxu1 %v8487_v31 }
0x1361   : > { %9953 = vmatprep.mubr.f32.mxu0 %v21662_v1  ;;  %10036 = vmatprep.mubr.f32.mxu1 %v21662_v1 }
0x1362   : > { %10070 = vmatpush1.msra.mxu0 %v8484_v53  ;;  %10153 = vmatpush1.msra.mxu1 %v8486_v38 }
0x1363   : > { %10998 = vmatmul.mubr.msk.f32.gmra.mxu0 %vm7807_vm12, %v20252_v9  ;;  %11003 = vmatmul.mubr.msk.f32.gmra.mxu1 %vm7807_vm12, %v20252_v9 }
0x1364   : > { %10071 = vmatprep.subr.mxu0 %v8453_v22  ;;  %10154 = vmatprep.subr.mxu1 %v8455_v6 }
0x1365   : > { %10072 = vmatpush1.msra.mxu0 %v8452_v43  ;;  %10155 = vmatpush1.msra.mxu1 %v8454_v12 }
0x1366   : > { %10073 = vmatprep.subr.mxu0 %v8421_v0  ;;  %10156 = vmatprep.subr.mxu1 %v8423_v7  ;;  %v8947_v48 = vpop.f32.mrf.mxu0  ;;  %v9030_v17 = vpop.f32.mrf.mxu1 }
0x1367   : > { %10074 = vmatpush1.msra.mxu0 %v8420_v3  ;;  %10107 = vmatprep.mubr.f32.mxu0 %v21662_v1  ;;  %10209 = vst [vmem:[%s21200_s2] sm:$0xff] %v8947_v48  ;;  %10211 = vst [vmem:[%s21200_s2 + $0x10] sm:$0xff] %v9030_v17 }
0x1368   : > { %10157 = vmatpush1.msra.mxu1 %v8422_v35  ;;  %10190 = vmatprep.mubr.f32.mxu1 %v21662_v1  ;;  %v8949_v39 = vpop.f32.mrf.mxu0  ;;  %v9032_v57 = vpop.f32.mrf.mxu1 }
0x1369   : > { %11006 = vmatmul.mubr.msk.f32.vlgmr.msra.gmra.mxu0 %vm7807_vm12, %v20134_v8  ;;  %11011 = vmatmul.mubr.msk.f32.vlgmr.msra.gmra.mxu1 %vm7807_vm12, %v20134_v8  ;;  %10210 = vst [vmem:[%s21200_s2 + $0x8] sm:$0xff] %v8949_v39  ;;  %10212 = vst [vmem:[%s21200_s2 + $0x18] sm:$0xff] %v9032_v57 }
0x136a   : > { %10113 = vmatprep.mubr.f32.mxu0 %v21662_v1  ;;  %10196 = vmatprep.mubr.f32.mxu1 %v21662_v1 }
0x136d   : > { %11007 = vmatmul.mubr.msk.f32.gmra.mxu0 %vm7807_vm12, %v20220_v15  ;;  %11012 = vmatmul.mubr.msk.f32.gmra.mxu1 %vm7807_vm12, %v20220_v15 }
0x136e   : > { %10119 = vmatprep.mubr.f32.mxu0 %v21662_v1  ;;  %10202 = vmatprep.mubr.f32.mxu1 %v21662_v1 }
0x1371   : > { %11008 = vmatmul.mubr.msk.f32.gmra.mxu0 %vm7807_vm12, %v20252_v9  ;;  %11013 = vmatmul.mubr.msk.f32.gmra.mxu1 %vm7807_vm12, %v20252_v9 }
0x1376   : > { %v8953_v8 = vpop.f32.mrf.mxu0  ;;  %v9036_v44 = vpop.f32.mrf.mxu1 }
0x1377   : > { %10241 = vst [vmem:[%s21200_s2 + $0x100] sm:$0xff] %v8953_v8  ;;  %10243 = vst [vmem:[%s21200_s2 + $0x110] sm:$0xff] %v9036_v44 }
0x1378   : > { %v8955_v15 = vpop.f32.mrf.mxu0  ;;  %v9038_v16 = vpop.f32.mrf.mxu1 }
0x1379   : > { %10242 = vst [vmem:[%s21200_s2 + $0x108] sm:$0xff] %v8955_v15  ;;  %10244 = vst [vmem:[%s21200_s2 + $0x118] sm:$0xff] %v9038_v16 }
0x137c   : > { %v8959_v1 = vpop.f32.mrf.mxu0  ;;  %v9042_v32 = vpop.f32.mrf.mxu1 }
0x137d   : > { %10273 = vst [vmem:[%s21200_s2 + $0x200] sm:$0xff] %v8959_v1  ;;  %10275 = vst [vmem:[%s21200_s2 + $0x210] sm:$0xff] %v9042_v32 }
0x137e   : > { %v8961_v9 = vpop.f32.mrf.mxu0  ;;  %v9044_v14 = vpop.f32.mrf.mxu1 }
0x137f   : > { %10274 = vst [vmem:[%s21200_s2 + $0x208] sm:$0xff] %v8961_v9  ;;  %10276 = vst [vmem:[%s21200_s2 + $0x218] sm:$0xff] %v9044_v14 }
0x1382   : > { %v9113_v61 = vpop.f32.mrf.mxu0  ;;  %v9196_v54 = vpop.f32.mrf.mxu1 }
0x1383   : > { %10213 = vst [vmem:[%s21200_s2 + $0x20] sm:$0xff] %v9113_v61  ;;  %10215 = vst [vmem:[%s21200_s2 + $0x30] sm:$0xff] %v9196_v54 }
0x1384   : > { %v9115_v42 = vpop.f32.mrf.mxu0  ;;  %v9198_v41 = vpop.f32.mrf.mxu1 }
0x1385   : > { %10214 = vst [vmem:[%s21200_s2 + $0x28] sm:$0xff] %v9115_v42  ;;  %10216 = vst [vmem:[%s21200_s2 + $0x38] sm:$0xff] %v9198_v41 }
0x1392   : > { %v9119_v60 = vpop.f32.mrf.mxu0  ;;  %v9202_v10 = vpop.f32.mrf.mxu1 }
0x1393   : > { %10245 = vst [vmem:[%s21200_s2 + $0x120] sm:$0xff] %v9119_v60  ;;  %10247 = vst [vmem:[%s21200_s2 + $0x130] sm:$0xff] %v9202_v10 }
0x1394   : > { %v9121_v5 = vpop.f32.mrf.mxu0  ;;  %v9204_v50 = vpop.f32.mrf.mxu1 }
0x1395   : > { %10246 = vst [vmem:[%s21200_s2 + $0x128] sm:$0xff] %v9121_v5  ;;  %10248 = vst [vmem:[%s21200_s2 + $0x138] sm:$0xff] %v9204_v50 }
0x1398   : > { %v9125_v28 = vpop.f32.mrf.mxu0  ;;  %v9208_v49 = vpop.f32.mrf.mxu1 }
0x1399   : > { %10277 = vst [vmem:[%s21200_s2 + $0x220] sm:$0xff] %v9125_v28  ;;  %10279 = vst [vmem:[%s21200_s2 + $0x230] sm:$0xff] %v9208_v49 }
0x139a   : > { %v9127_v20 = vpop.f32.mrf.mxu0  ;;  %v9210_v24 = vpop.f32.mrf.mxu1 }
0x139b   : > { %10278 = vst [vmem:[%s21200_s2 + $0x228] sm:$0xff] %v9127_v20  ;;  %10280 = vst [vmem:[%s21200_s2 + $0x238] sm:$0xff] %v9210_v24 }
0x139e   : > { %v9279_v58 = vpop.f32.mrf.mxu0  ;;  %v9362_v56 = vpop.f32.mrf.mxu1 }
0x139f   : > { %10217 = vst [vmem:[%s21200_s2 + $0x40] sm:$0xff] %v9279_v58  ;;  %10219 = vst [vmem:[%s21200_s2 + $0x50] sm:$0xff] %v9362_v56 }
0x13a0   : > { %v9281_v55 = vpop.f32.mrf.mxu0  ;;  %v9364_v34 = vpop.f32.mrf.mxu1 }
0x13a1   : > { %10218 = vst [vmem:[%s21200_s2 + $0x48] sm:$0xff] %v9281_v55  ;;  %10220 = vst [vmem:[%s21200_s2 + $0x58] sm:$0xff] %v9364_v34 }
0x13ae   : > { %v9285_v13 = vpop.f32.mrf.mxu0  ;;  %v9368_v23 = vpop.f32.mrf.mxu1 }
0x13af   : > { %10249 = vst [vmem:[%s21200_s2 + $0x140] sm:$0xff] %v9285_v13  ;;  %10251 = vst [vmem:[%s21200_s2 + $0x150] sm:$0xff] %v9368_v23 }
0x13b0   : > { %v9287_v59 = vpop.f32.mrf.mxu0  ;;  %v9370_v19 = vpop.f32.mrf.mxu1 }
0x13b1   : > { %10250 = vst [vmem:[%s21200_s2 + $0x148] sm:$0xff] %v9287_v59  ;;  %10252 = vst [vmem:[%s21200_s2 + $0x158] sm:$0xff] %v9370_v19 }
0x13b4   : > { %v9291_v30 = vpop.f32.mrf.mxu0  ;;  %v9374_v52 = vpop.f32.mrf.mxu1 }
0x13b5   : > { %10281 = vst [vmem:[%s21200_s2 + $0x240] sm:$0xff] %v9291_v30  ;;  %10283 = vst [vmem:[%s21200_s2 + $0x250] sm:$0xff] %v9374_v52 }
0x13b6   : > { %v9293_v46 = vpop.f32.mrf.mxu0  ;;  %v9376_v26 = vpop.f32.mrf.mxu1 }
0x13b7   : > { %10282 = vst [vmem:[%s21200_s2 + $0x248] sm:$0xff] %v9293_v46  ;;  %10284 = vst [vmem:[%s21200_s2 + $0x258] sm:$0xff] %v9376_v26 }
0x13ba   : > { %v9445_v45 = vpop.f32.mrf.mxu0  ;;  %v9528_v2 = vpop.f32.mrf.mxu1 }
0x13bb   : > { %10221 = vst [vmem:[%s21200_s2 + $0x60] sm:$0xff] %v9445_v45  ;;  %10223 = vst [vmem:[%s21200_s2 + $0x70] sm:$0xff] %v9528_v2 }
0x13bc   : > { %v9447_v40 = vpop.f32.mrf.mxu0  ;;  %v9530_v63 = vpop.f32.mrf.mxu1 }
0x13bd   : > { %10222 = vst [vmem:[%s21200_s2 + $0x68] sm:$0xff] %v9447_v40  ;;  %10224 = vst [vmem:[%s21200_s2 + $0x78] sm:$0xff] %v9530_v63 }
0x13ca   : > { %v9451_v62 = vpop.f32.mrf.mxu0  ;;  %v9534_v25 = vpop.f32.mrf.mxu1 }
0x13cb   : > { %10253 = vst [vmem:[%s21200_s2 + $0x160] sm:$0xff] %v9451_v62  ;;  %10255 = vst [vmem:[%s21200_s2 + $0x170] sm:$0xff] %v9534_v25 }
0x13cc   : > { %v9453_v47 = vpop.f32.mrf.mxu0  ;;  %v9536_v27 = vpop.f32.mrf.mxu1 }
0x13cd   : > { %10254 = vst [vmem:[%s21200_s2 + $0x168] sm:$0xff] %v9453_v47  ;;  %10256 = vst [vmem:[%s21200_s2 + $0x178] sm:$0xff] %v9536_v27 }
0x13d0   : > { %v9457_v4 = vpop.f32.mrf.mxu0  ;;  %v9540_v51 = vpop.f32.mrf.mxu1 }
0x13d1   : > { %10285 = vst [vmem:[%s21200_s2 + $0x260] sm:$0xff] %v9457_v4  ;;  %10287 = vst [vmem:[%s21200_s2 + $0x270] sm:$0xff] %v9540_v51 }
0x13d2   : > { %v9459_v37 = vpop.f32.mrf.mxu0  ;;  %v9542_v33 = vpop.f32.mrf.mxu1 }
0x13d3   : > { %10286 = vst [vmem:[%s21200_s2 + $0x268] sm:$0xff] %v9459_v37  ;;  %10288 = vst [vmem:[%s21200_s2 + $0x278] sm:$0xff] %v9542_v33 }
0x13d6   : > { %v9611_v29 = vpop.f32.mrf.mxu0  ;;  %v9694_v36 = vpop.f32.mrf.mxu1 }
0x13d7   : > { %10225 = vst [vmem:[%s21200_s2 + $0x80] sm:$0xff] %v9611_v29  ;;  %10227 = vst [vmem:[%s21200_s2 + $0x90] sm:$0xff] %v9694_v36 }
0x13d8   : > { %v9613_v11 = vpop.f32.mrf.mxu0  ;;  %v9696_v21 = vpop.f32.mrf.mxu1 }
0x13d9   : > { %10226 = vst [vmem:[%s21200_s2 + $0x88] sm:$0xff] %v9613_v11  ;;  %10228 = vst [vmem:[%s21200_s2 + $0x98] sm:$0xff] %v9696_v21 }
0x13e6   : > { %v9617_v18 = vpop.f32.mrf.mxu0  ;;  %v9700_v31 = vpop.f32.mrf.mxu1 }
0x13e7   : > { %10257 = vst [vmem:[%s21200_s2 + $0x180] sm:$0xff] %v9617_v18  ;;  %10259 = vst [vmem:[%s21200_s2 + $0x190] sm:$0xff] %v9700_v31 }
0x13e8   : > { %v9619_v53 = vpop.f32.mrf.mxu0  ;;  %v9702_v38 = vpop.f32.mrf.mxu1 }
0x13e9   : > { %10258 = vst [vmem:[%s21200_s2 + $0x188] sm:$0xff] %v9619_v53  ;;  %10260 = vst [vmem:[%s21200_s2 + $0x198] sm:$0xff] %v9702_v38 }
0x13ec   : > { %v9623_v22 = vpop.f32.mrf.mxu0  ;;  %v9706_v6 = vpop.f32.mrf.mxu1 }
0x13ed   : > { %10289 = vst [vmem:[%s21200_s2 + $0x280] sm:$0xff] %v9623_v22  ;;  %10291 = vst [vmem:[%s21200_s2 + $0x290] sm:$0xff] %v9706_v6 }
0x13ee   : > { %v9625_v43 = vpop.f32.mrf.mxu0  ;;  %v9708_v12 = vpop.f32.mrf.mxu1 }
0x13ef   : > { %10290 = vst [vmem:[%s21200_s2 + $0x288] sm:$0xff] %v9625_v43  ;;  %10292 = vst [vmem:[%s21200_s2 + $0x298] sm:$0xff] %v9708_v12 }
0x13f2   : > { %v9777_v0 = vpop.f32.mrf.mxu0  ;;  %v9860_v7 = vpop.f32.mrf.mxu1 }
0x13f3   : > { %10229 = vst [vmem:[%s21200_s2 + $0xa0] sm:$0xff] %v9777_v0  ;;  %10231 = vst [vmem:[%s21200_s2 + $0xb0] sm:$0xff] %v9860_v7 }
0x13f4   : > { %v9779_v3 = vpop.f32.mrf.mxu0  ;;  %v9862_v35 = vpop.f32.mrf.mxu1 }
0x13f5   : > { %10230 = vst [vmem:[%s21200_s2 + $0xa8] sm:$0xff] %v9779_v3  ;;  %10232 = vst [vmem:[%s21200_s2 + $0xb8] sm:$0xff] %v9862_v35 }
0x1402   : > { %v9783_v48 = vpop.f32.mrf.mxu0  ;;  %v9866_v17 = vpop.f32.mrf.mxu1 }
0x1403   : > { %10261 = vst [vmem:[%s21200_s2 + $0x1a0] sm:$0xff] %v9783_v48  ;;  %10263 = vst [vmem:[%s21200_s2 + $0x1b0] sm:$0xff] %v9866_v17 }
0x1404   : > { %v9785_v39 = vpop.f32.mrf.mxu0  ;;  %v9868_v57 = vpop.f32.mrf.mxu1 }
0x1405   : > { %10262 = vst [vmem:[%s21200_s2 + $0x1a8] sm:$0xff] %v9785_v39  ;;  %10264 = vst [vmem:[%s21200_s2 + $0x1b8] sm:$0xff] %v9868_v57 }
0x1408   : > { %v9789_v8 = vpop.f32.mrf.mxu0  ;;  %v9872_v44 = vpop.f32.mrf.mxu1 }
0x1409   : > { %10293 = vst [vmem:[%s21200_s2 + $0x2a0] sm:$0xff] %v9789_v8  ;;  %10295 = vst [vmem:[%s21200_s2 + $0x2b0] sm:$0xff] %v9872_v44 }
0x140a   : > { %v9791_v15 = vpop.f32.mrf.mxu0  ;;  %v9874_v16 = vpop.f32.mrf.mxu1 }
0x140b   : > { %10294 = vst [vmem:[%s21200_s2 + $0x2a8] sm:$0xff] %v9791_v15  ;;  %10296 = vst [vmem:[%s21200_s2 + $0x2b8] sm:$0xff] %v9874_v16 }
0x140e   : > { %v9943_v1 = vpop.f32.mrf.mxu0  ;;  %v10026_v32 = vpop.f32.mrf.mxu1 }
0x140f   : > { %10233 = vst [vmem:[%s21200_s2 + $0xc0] sm:$0xff] %v9943_v1  ;;  %10235 = vst [vmem:[%s21200_s2 + $0xd0] sm:$0xff] %v10026_v32 }
0x1410   : > { %v9945_v9 = vpop.f32.mrf.mxu0  ;;  %v10028_v14 = vpop.f32.mrf.mxu1 }
0x1411   : > { %10234 = vst [vmem:[%s21200_s2 + $0xc8] sm:$0xff] %v9945_v9  ;;  %10236 = vst [vmem:[%s21200_s2 + $0xd8] sm:$0xff] %v10028_v14 }
0x141d   : > { %v9949_v61 = vpop.f32.mrf.mxu0  ;;  %v10032_v54 = vpop.f32.mrf.mxu1 }
0x141e   : > { %10265 = vst [vmem:[%s21200_s2 + $0x1c0] sm:$0xff] %v9949_v61  ;;  %10267 = vst [vmem:[%s21200_s2 + $0x1d0] sm:$0xff] %v10032_v54 }
0x141f   : > { %v9951_v42 = vpop.f32.mrf.mxu0  ;;  %v10034_v41 = vpop.f32.mrf.mxu1 }
0x1420   : > { %10266 = vst [vmem:[%s21200_s2 + $0x1c8] sm:$0xff] %v9951_v42  ;;  %10268 = vst [vmem:[%s21200_s2 + $0x1d8] sm:$0xff] %v10034_v41 }
0x1423   : > { %v9955_v60 = vpop.f32.mrf.mxu0  ;;  %v10038_v10 = vpop.f32.mrf.mxu1 }
0x1424   : > { %10297 = vst [vmem:[%s21200_s2 + $0x2c0] sm:$0xff] %v9955_v60  ;;  %10299 = vst [vmem:[%s21200_s2 + $0x2d0] sm:$0xff] %v10038_v10 }
0x1425   : > { %v9957_v5 = vpop.f32.mrf.mxu0  ;;  %v10040_v50 = vpop.f32.mrf.mxu1 }
0x1426   : > { %10298 = vst [vmem:[%s21200_s2 + $0x2c8] sm:$0xff] %v9957_v5  ;;  %10300 = vst [vmem:[%s21200_s2 + $0x2d8] sm:$0xff] %v10040_v50 }
0x1429   : > { %v10109_v28 = vpop.f32.mrf.mxu0  ;;  %v10192_v49 = vpop.f32.mrf.mxu1 }
0x142a   : > { %10237 = vst [vmem:[%s21200_s2 + $0xe0] sm:$0xff] %v10109_v28  ;;  %10239 = vst [vmem:[%s21200_s2 + $0xf0] sm:$0xff] %v10192_v49 }
0x142b   : > { %v10111_v20 = vpop.f32.mrf.mxu0  ;;  %v10194_v24 = vpop.f32.mrf.mxu1 }
0x142c   : > { %10238 = vst [vmem:[%s21200_s2 + $0xe8] sm:$0xff] %v10111_v20  ;;  %10240 = vst [vmem:[%s21200_s2 + $0xf8] sm:$0xff] %v10194_v24 }
0x142d   : > { %v10115_v58 = vpop.f32.mrf.mxu0  ;;  %v10198_v56 = vpop.f32.mrf.mxu1 }
0x142e   : > { %10269 = vst [vmem:[%s21200_s2 + $0x1e0] sm:$0xff] %v10115_v58  ;;  %10271 = vst [vmem:[%s21200_s2 + $0x1f0] sm:$0xff] %v10198_v56 }
0x142f   : > { %v10117_v55 = vpop.f32.mrf.mxu0  ;;  %v10200_v34 = vpop.f32.mrf.mxu1 }
0x1430   : > { %10270 = vst [vmem:[%s21200_s2 + $0x1e8] sm:$0xff] %v10117_v55  ;;  %10272 = vst [vmem:[%s21200_s2 + $0x1f8] sm:$0xff] %v10200_v34 }
0x1431   : > { %v10121_v13 = vpop.f32.mrf.mxu0  ;;  %v10204_v23 = vpop.f32.mrf.mxu1 }
0x1432   : > { %10301 = vst [vmem:[%s21200_s2 + $0x2e0] sm:$0xff] %v10121_v13  ;;  %10303 = vst [vmem:[%s21200_s2 + $0x2f0] sm:$0xff] %v10204_v23 }
0x1433   : > { %v10123_v59 = vpop.f32.mrf.mxu0  ;;  %v10206_v19 = vpop.f32.mrf.mxu1 }
0x1434   : > { %10302 = vst [vmem:[%s21200_s2 + $0x2e8] sm:$0xff] %v10123_v59  ;;  %10304 = vst [vmem:[%s21200_s2 + $0x2f8] sm:$0xff] %v10206_v19 }
0x1435 PF: > { %s32_s3 = sadd.s32 1, %s14094_s3  }
0x1436   : > { %p29_p4 = scmp.ge.s32.totalorder %s32_s3, 4  }
0x1438   :  { %31 = sbr.rel (!%p29_p4) target bundleno = 8 (0x8), region = 147 }

</bundles_post_ra>
